<compile_context>
chip_gen: v7x
topology: tpu7x:2x2x1
jax: 0.10.0
libtpu: 0.0.40
codegen_flags: <defaults>
</compile_context>

<pallas_src>
import functools

import jax
import jax.numpy as jnp
from jax.experimental import pallas as pl
from jax.experimental.pallas import tpu as pltpu


LANES = 128      # padded channel / feature width (lane-dense)
K1_PAD = 32      # conv1 patch length 25 -> padded to 32
C1, C2 = 10, 20  # real channel counts
F1 = 50          # fc1 width
KSIZE = 5


# ---------------------------------------------------------------------------
# The single fused Pallas kernel
# ---------------------------------------------------------------------------
def _lenet_kernel(p1_ref, w1_ref, b1_ref, w2_ref, b2_ref,
                  wf1_ref, bf1_ref, wf2_ref, bf2_ref,
                  out_ref, u_scr, *, batch):
    B = batch
    R = KSIZE * 12 * 8 * B   # conv1 rows per pool block (kh, w, ho, b) = 960 @ B=2
    M = 8 * 8 * B            # conv2 output rows (wo, ho, b)            = 128 @ B=2

    # ---- conv1: ONE im2col matmul over all four 2x2-pool members -----------
    # Patch rows are ordered (dy, dx | kh, w, ho, b); the 4 (dy,dx) blocks are
    # the four members of each pooling window -> pooling = max over 4 blocks.
    c1 = jnp.dot(p1_ref[...], w1_ref[...],
                 preferred_element_type=jnp.float32)             # (4R, 128) f32
    c1 = c1.reshape(4, R, LANES)
    c1 = jnp.maximum(jnp.maximum(c1[0], c1[1]),
                     jnp.maximum(c1[2], c1[3]))                   # pooled conv1
    h1 = jnp.maximum(c1 + b1_ref[...], 0.0).astype(jnp.bfloat16)  # (R, 128)

    # Scatter the 5 kh-unfold slices into the lane axis of u:
    #   u[w, ho*B+b, kh*128+ci] = relu(pool(conv1))[b, ho+kh, w, ci]
    # 128-aligned lane-slice stores only -> no relayout.
    h5 = h1.reshape(KSIZE, 12, 8 * B, LANES)
    for kh in range(KSIZE):
        u_scr[:, :, kh * LANES:(kh + 1) * LANES] = h5[kh]

    # ---- conv2: 5 matmuls; the kw window is a leading-dim slice of u -------
    # K = 5 kh-taps * 128 lanes = 640 (ci padded 10->128, zeros in the weights).
    acc = jnp.dot(u_scr[0:8].reshape(M, KSIZE * LANES), w2_ref[0],
                  preferred_element_type=jnp.float32)             # (M, 128) f32
    for kw in range(1, KSIZE):
        lhs = u_scr[kw:kw + 8].reshape(M, KSIZE * LANES)          # tile-preserving
        acc = acc + jnp.dot(lhs, w2_ref[kw],
                            preferred_element_type=jnp.float32)

    # ---- bias + 2x2 max-pool + ReLU (rows are (wo, ho, b)) -----------------
    c2 = (acc + b2_ref[...]).reshape(4, 2, 8, B, LANES)           # (wp,dx,ho,b,c)
    t = jnp.maximum(c2[:, 0], c2[:, 1])                           # pool over dx
    t = t.reshape(4, 4, 2, B, LANES)                              # (wp,hp,dy,b,c)
    h2 = jnp.maximum(jnp.maximum(t[:, :, 0], t[:, :, 1]), 0.0)    # (wp,hp,b,c)

    # ---- fc1: one K = 16*128 = 2048 matmul + ReLU ---------------------------
    # Lane-concatenate the 16 (hp,wp) position slices (pos-major, channel-minor
    # columns, matching the wf1 prepack).
    pieces = [h2[wp, hp] for hp in range(4) for wp in range(4)]   # 16 x (B, 128)
    lhs1 = jnp.concatenate(pieces, axis=-1).astype(jnp.bfloat16)  # (B, 2048)
    y1 = jnp.dot(lhs1, wf1_ref[...],
                 preferred_element_type=jnp.float32) + bf1_ref[...]
    y1 = jnp.maximum(y1, 0.0)                                     # (B, 128)

    # ---- fc2 ----------------------------------------------------------------
    out_ref[...] = jnp.dot(y1.astype(jnp.bfloat16), wf2_ref[...],
                           preferred_element_type=jnp.float32) + bf2_ref[...]


# ---------------------------------------------------------------------------
# Host-side glue: conv1 patch extraction + one-time weight prepack
# ---------------------------------------------------------------------------
def _build_conv1_patches(x):
    """x: (B,1,28,28) NCHW -> (4*5*12*8*B, 32) bf16 conv1 patch matrix.

    Row order (outer->inner): (dy, dx, kh2, w, ho, b); column k = kh*5 + kw.
    The kh2 axis is the conv2 H-tap unfold (3.3x duplication) so that the
    in-kernel conv2 window extraction needs no sublane-crossing slices.
    """
    B = x.shape[0]
    xs = x[:, 0]                                                   # (B,28,28)
    cols = [xs[:, kh:kh + 24, kw:kw + 24]
            for kh in range(KSIZE) for kw in range(KSIZE)]
    pat = jnp.stack(cols, axis=-1)                                 # (B,24,24,25)
    pat = pat.reshape(B, 12, 2, 12, 2, 25)                         # (b,hh,dy,w,dx,k)
    # kh2-unfold: for each conv2 H-tap kh2, pooled rows hh = kh2 + [0..8)
    pat = jnp.stack([pat[:, k:k + 8] for k in range(KSIZE)],
                    axis=1)                                        # (b,kh2,ho,dy,w,dx,k)
    pat = pat.transpose(3, 5, 1, 4, 2, 0, 6)                       # (dy,dx,kh2,w,ho,b,k)
    pat = jnp.pad(pat, [(0, 0)] * 6 + [(0, K1_PAD - 25)])
    return pat.reshape(4 * KSIZE * 12 * 8 * B, K1_PAD).astype(jnp.bfloat16)


def prepack_params(p, num_classes=10):
    """One-time: reshape/transpose/zero-pad to lane-dense bf16 layouts."""
    def padto(a, shape):
        return jnp.pad(a, [(0, s - d) for d, s in zip(a.shape, shape)])

    # conv1: (co,1,5,5) -> (k=kh*5+kw, co), pad to (32, 128)
    w1 = p["w1"].reshape(C1, 25).T
    # conv2: (co,ci,kh,kw) -> (kw, kh*128+ci, co), pad ci/co to 128 -> (5,640,128)
    w2 = jnp.transpose(p["w2"], (3, 2, 1, 0))                      # (kw,kh,ci,co)
    w2 = padto(w2, (KSIZE, KSIZE, LANES, LANES)).reshape(KSIZE, KSIZE * LANES, LANES)
    # fc1: (f, c*16+hp*4+wp) -> ((hp*4+wp)*128 + c, f) -> (2048, 128)
    wf1 = p["wf1"].reshape(F1, C2, 4, 4).transpose(2, 3, 1, 0)     # (hp,wp,c,f)
    wf1 = padto(wf1, (4, 4, LANES, LANES)).reshape(4 * 4 * LANES, LANES)
    # fc2: (nc, 50) -> (50, nc) -> (128, 128)
    wf2 = p["wf2"].T
    return {
        "w1": padto(w1, (K1_PAD, LANES)).astype(jnp.bfloat16),
        "b1": padto(p["b1"].reshape(1, C1), (1, LANES)).astype(jnp.float32),
        "w2": w2.astype(jnp.bfloat16),
        "b2": padto(p["b2"].reshape(1, C2), (1, LANES)).astype(jnp.float32),
        "wf1": wf1.astype(jnp.bfloat16),
        "bf1": padto(p["bf1"].reshape(1, F1), (1, LANES)).astype(jnp.float32),
        "wf2": padto(wf2, (LANES, LANES)).astype(jnp.bfloat16),
        "bf2": padto(p["bf2"].reshape(1, num_classes), (1, LANES)).astype(jnp.float32),
    }


@functools.partial(jax.jit, static_argnames=("num_classes",))
def net_forward(x, packed, num_classes=10):
    """x: (B,1,28,28) float32 NCHW -> logits (B, num_classes)."""
    B = x.shape[0]
    p1 = _build_conv1_patches(x)

    out = pl.pallas_call(
        functools.partial(_lenet_kernel, batch=B),
        out_shape=jax.ShapeDtypeStruct((B, LANES), jnp.float32),
        in_specs=[pl.BlockSpec(memory_space=pltpu.MemorySpace.VMEM)] * 9,
        out_specs=pl.BlockSpec(memory_space=pltpu.MemorySpace.VMEM),
        scratch_shapes=[
            # conv2 input: (w=12, (ho,b)=8B, (kh,ci)=5*128) bf16, fully written
            # by conv1 before conv2 reads it.
            pltpu.VMEM((12, 8 * B, KSIZE * LANES), jnp.bfloat16),
        ],
    )(p1, packed["w1"], packed["b1"], packed["w2"], packed["b2"],
      packed["wf1"], packed["bf1"], packed["wf2"], packed["bf2"])

    return out[:, :num_classes]


# ---------------------------------------------------------------------------
# Init + pure-JAX reference (sanity check only)
# ---------------------------------------------------------------------------
def init_params(key, num_classes=10):
    """Deterministic PyTorch-default-style (uniform +-1/sqrt(fan_in)) init."""
    def uni(k, shape, fan_in):
        bound = 1.0 / float(fan_in) ** 0.5
        return jax.random.uniform(k, shape, jnp.float32, -bound, bound)
    ks = jax.random.split(key, 8)
    return {
        "w1": uni(ks[0], (10, 1, 5, 5), 1 * 5 * 5),
        "b1": uni(ks[1], (10,), 1 * 5 * 5),
        "w2": uni(ks[2], (20, 10, 5, 5), 10 * 5 * 5),
        "b2": uni(ks[3], (20,), 10 * 5 * 5),
        "wf1": uni(ks[4], (50, 320), 320),
        "bf1": uni(ks[5], (50,), 320),
        "wf2": uni(ks[6], (num_classes, 50), 50),
        "bf2": uni(ks[7], (num_classes,), 50),
    }


def ref_forward(x, p):
    def conv(h, w, b):
        y = jax.lax.conv_general_dilated(
            h, w, (1, 1), "VALID",
            dimension_numbers=("NCHW", "OIHW", "NCHW"),
            precision=jax.lax.Precision.HIGHEST)
        return y + b[None, :, None, None]

    def pool(h):
        B, C, H, W = h.shape
        return jnp.max(h.reshape(B, C, H // 2, 2, W // 2, 2), axis=(3, 5))

    h = jax.nn.relu(pool(conv(x, p["w1"], p["b1"])))
    h = jax.nn.relu(pool(conv(h, p["w2"], p["b2"])))
    h = h.reshape(x.shape[0], 320)
    h = jax.nn.relu(h @ p["wf1"].T + p["bf1"])
    return h @ p["wf2"].T + p["bf2"]


if __name__ == "__main__":
    key = jax.random.PRNGKey(0)
    k_param, k_x = jax.random.split(key)
    params = init_params(k_param, num_classes=10)
    packed = prepack_params(params, num_classes=10)
    x = jax.random.normal(k_x, (2, 1, 28, 28), dtype=jnp.float32)  # NCHW, like MNIST

    out = jax.block_until_ready(net_forward(x, packed, num_classes=10))
    assert out.shape == (2, 10) and out.dtype == jnp.float32

    ref = jax.block_until_ready(ref_forward(x, params))
    assert jnp.allclose(out, ref, atol=5e-2, rtol=5e-2), "mismatch vs JAX reference"

    print("KERNEL_OK")
</pallas_src>

<mosaic_0001>
module attributes {stable_mosaic.version = 11 : i64} {
  func.func @_lenet_kernel(%arg0: memref<3840x32xbf16, #tpu.memory_space<vmem>>, %arg1: memref<32x128xbf16, #tpu.memory_space<vmem>>, %arg2: memref<1x128xf32, #tpu.memory_space<vmem>>, %arg3: memref<5x640x128xbf16, #tpu.memory_space<vmem>>, %arg4: memref<1x128xf32, #tpu.memory_space<vmem>>, %arg5: memref<2048x128xbf16, #tpu.memory_space<vmem>>, %arg6: memref<1x128xf32, #tpu.memory_space<vmem>>, %arg7: memref<128x128xbf16, #tpu.memory_space<vmem>>, %arg8: memref<1x128xf32, #tpu.memory_space<vmem>>, %arg9: memref<2x128xf32, #tpu.memory_space<vmem>>, %arg10: memref<12x16x640xbf16, #tpu.memory_space<vmem>>) attributes {dimension_semantics = [], scalar_prefetch = 0 : i64, scratch_operands = 1 : i64, tpu.core_type = #tpu.core_type<tc>} {
    %c0 = arith.constant 0 : index
    %c0_0 = arith.constant 0 : index
    %0 = vector.load %arg0[%c0, %c0_0] : memref<3840x32xbf16, #tpu.memory_space<vmem>>, vector<3840x32xbf16>
    %c0_1 = arith.constant 0 : index
    %c0_2 = arith.constant 0 : index
    %1 = vector.load %arg1[%c0_1, %c0_2] : memref<32x128xbf16, #tpu.memory_space<vmem>>, vector<32x128xbf16>
    %cst = arith.constant dense<0.000000e+00> : vector<3840x128xf32>
    %2 = tpu.matmul %0, %1, %cst {dimension_numbers = #tpu.dot_dimension_numbers<[1], [0], [0], [1], [0, 0, 1, 1], [], []>} : vector<3840x32xbf16>, vector<32x128xbf16>, vector<3840x128xf32> -> vector<3840x128xf32>
    %3 = vector.shape_cast %2 : vector<3840x128xf32> to vector<4x960x128xf32>
    %4 = vector.extract_strided_slice %3 {offsets = [0, 0, 0], sizes = [1, 960, 128], strides = [1, 1, 1]} : vector<4x960x128xf32> to vector<1x960x128xf32>
    %5 = vector.shape_cast %4 : vector<1x960x128xf32> to vector<960x128xf32>
    %6 = vector.extract_strided_slice %3 {offsets = [1, 0, 0], sizes = [1, 960, 128], strides = [1, 1, 1]} : vector<4x960x128xf32> to vector<1x960x128xf32>
    %7 = vector.shape_cast %6 : vector<1x960x128xf32> to vector<960x128xf32>
    %8 = arith.maximumf %5, %7 : vector<960x128xf32>
    %9 = vector.extract_strided_slice %3 {offsets = [2, 0, 0], sizes = [1, 960, 128], strides = [1, 1, 1]} : vector<4x960x128xf32> to vector<1x960x128xf32>
    %10 = vector.shape_cast %9 : vector<1x960x128xf32> to vector<960x128xf32>
    %11 = vector.extract_strided_slice %3 {offsets = [3, 0, 0], sizes = [1, 960, 128], strides = [1, 1, 1]} : vector<4x960x128xf32> to vector<1x960x128xf32>
    %12 = vector.shape_cast %11 : vector<1x960x128xf32> to vector<960x128xf32>
    %13 = arith.maximumf %10, %12 : vector<960x128xf32>
    %14 = arith.maximumf %8, %13 : vector<960x128xf32>
    %c0_3 = arith.constant 0 : index
    %c0_4 = arith.constant 0 : index
    %15 = vector.load %arg2[%c0_3, %c0_4] : memref<1x128xf32, #tpu.memory_space<vmem>>, vector<1x128xf32>
    %16 = vector.broadcast %15 : vector<1x128xf32> to vector<960x128xf32>
    %17 = arith.addf %14, %16 : vector<960x128xf32>
    %cst_5 = arith.constant 0.000000e+00 : f32
    %18 = vector.broadcast %cst_5 : f32 to vector<960x128xf32>
    %19 = arith.maximumf %17, %18 : vector<960x128xf32>
    %20 = arith.truncf %19 : vector<960x128xf32> to vector<960x128xbf16>
    %21 = vector.shape_cast %20 : vector<960x128xbf16> to vector<5x12x16x128xbf16>
    %22 = vector.extract_strided_slice %21 {offsets = [0, 0, 0, 0], sizes = [1, 12, 16, 128], strides = [1, 1, 1, 1]} : vector<5x12x16x128xbf16> to vector<1x12x16x128xbf16>
    %23 = vector.shape_cast %22 : vector<1x12x16x128xbf16> to vector<12x16x128xbf16>
    %c0_6 = arith.constant 0 : index
    %c0_7 = arith.constant 0 : index
    %c0_8 = arith.constant 0 : index
    %24 = vector.load %arg10[%c0_6, %c0_7, %c0_8] : memref<12x16x640xbf16, #tpu.memory_space<vmem>>, vector<12x16x128xbf16>
    tpu.vector_store %arg10[%c0_6, %c0_7, %c0_8], %23 {strides = array<i32>} : memref<12x16x640xbf16, #tpu.memory_space<vmem>>, vector<12x16x128xbf16>,
    %25 = vector.extract_strided_slice %21 {offsets = [1, 0, 0, 0], sizes = [1, 12, 16, 128], strides = [1, 1, 1, 1]} : vector<5x12x16x128xbf16> to vector<1x12x16x128xbf16>
    %26 = vector.shape_cast %25 : vector<1x12x16x128xbf16> to vector<12x16x128xbf16>
    %c0_9 = arith.constant 0 : index
    %c0_10 = arith.constant 0 : index
    %c128 = arith.constant 128 : index
    %27 = vector.load %arg10[%c0_9, %c0_10, %c128] : memref<12x16x640xbf16, #tpu.memory_space<vmem>>, vector<12x16x128xbf16>
    tpu.vector_store %arg10[%c0_9, %c0_10, %c128], %26 {strides = array<i32>} : memref<12x16x640xbf16, #tpu.memory_space<vmem>>, vector<12x16x128xbf16>,
    %28 = vector.extract_strided_slice %21 {offsets = [2, 0, 0, 0], sizes = [1, 12, 16, 128], strides = [1, 1, 1, 1]} : vector<5x12x16x128xbf16> to vector<1x12x16x128xbf16>
    %29 = vector.shape_cast %28 : vector<1x12x16x128xbf16> to vector<12x16x128xbf16>
    %c0_11 = arith.constant 0 : index
    %c0_12 = arith.constant 0 : index
    %c256 = arith.constant 256 : index
    %30 = vector.load %arg10[%c0_11, %c0_12, %c256] : memref<12x16x640xbf16, #tpu.memory_space<vmem>>, vector<12x16x128xbf16>
    tpu.vector_store %arg10[%c0_11, %c0_12, %c256], %29 {strides = array<i32>} : memref<12x16x640xbf16, #tpu.memory_space<vmem>>, vector<12x16x128xbf16>,
    %31 = vector.extract_strided_slice %21 {offsets = [3, 0, 0, 0], sizes = [1, 12, 16, 128], strides = [1, 1, 1, 1]} : vector<5x12x16x128xbf16> to vector<1x12x16x128xbf16>
    %32 = vector.shape_cast %31 : vector<1x12x16x128xbf16> to vector<12x16x128xbf16>
    %c0_13 = arith.constant 0 : index
    %c0_14 = arith.constant 0 : index
    %c384 = arith.constant 384 : index
    %33 = vector.load %arg10[%c0_13, %c0_14, %c384] : memref<12x16x640xbf16, #tpu.memory_space<vmem>>, vector<12x16x128xbf16>
    tpu.vector_store %arg10[%c0_13, %c0_14, %c384], %32 {strides = array<i32>} : memref<12x16x640xbf16, #tpu.memory_space<vmem>>, vector<12x16x128xbf16>,
    %34 = vector.extract_strided_slice %21 {offsets = [4, 0, 0, 0], sizes = [1, 12, 16, 128], strides = [1, 1, 1, 1]} : vector<5x12x16x128xbf16> to vector<1x12x16x128xbf16>
    %35 = vector.shape_cast %34 : vector<1x12x16x128xbf16> to vector<12x16x128xbf16>
    %c0_15 = arith.constant 0 : index
    %c0_16 = arith.constant 0 : index
    %c512 = arith.constant 512 : index
    %36 = vector.load %arg10[%c0_15, %c0_16, %c512] : memref<12x16x640xbf16, #tpu.memory_space<vmem>>, vector<12x16x128xbf16>
    tpu.vector_store %arg10[%c0_15, %c0_16, %c512], %35 {strides = array<i32>} : memref<12x16x640xbf16, #tpu.memory_space<vmem>>, vector<12x16x128xbf16>,
    %c0_17 = arith.constant 0 : index
    %c0_18 = arith.constant 0 : index
    %c0_19 = arith.constant 0 : index
    %37 = vector.load %arg10[%c0_17, %c0_18, %c0_19] : memref<12x16x640xbf16, #tpu.memory_space<vmem>>, vector<8x16x640xbf16>
    %38 = vector.shape_cast %37 : vector<8x16x640xbf16> to vector<128x640xbf16>
    %c0_20 = arith.constant 0 : index
    %c0_21 = arith.constant 0 : index
    %c0_22 = arith.constant 0 : index
    %39 = vector.load %arg3[%c0_20, %c0_21, %c0_22] : memref<5x640x128xbf16, #tpu.memory_space<vmem>>, vector<1x640x128xbf16>
    %40 = vector.shape_cast %39 : vector<1x640x128xbf16> to vector<640x128xbf16>
    %cst_23 = arith.constant dense<0.000000e+00> : vector<128x128xf32>
    %41 = tpu.matmul %38, %40, %cst_23 {dimension_numbers = #tpu.dot_dimension_numbers<[1], [0], [0], [1], [0, 0, 1, 1], [], []>} : vector<128x640xbf16>, vector<640x128xbf16>, vector<128x128xf32> -> vector<128x128xf32>
    %c1 = arith.constant 1 : index
    %c0_24 = arith.constant 0 : index
    %c0_25 = arith.constant 0 : index
    %42 = vector.load %arg10[%c1, %c0_24, %c0_25] : memref<12x16x640xbf16, #tpu.memory_space<vmem>>, vector<8x16x640xbf16>
    %43 = vector.shape_cast %42 : vector<8x16x640xbf16> to vector<128x640xbf16>
    %c1_26 = arith.constant 1 : index
    %c0_27 = arith.constant 0 : index
    %c0_28 = arith.constant 0 : index
    %44 = vector.load %arg3[%c1_26, %c0_27, %c0_28] : memref<5x640x128xbf16, #tpu.memory_space<vmem>>, vector<1x640x128xbf16>
    %45 = vector.shape_cast %44 : vector<1x640x128xbf16> to vector<640x128xbf16>
    %cst_29 = arith.constant dense<0.000000e+00> : vector<128x128xf32>
    %46 = tpu.matmul %43, %45, %cst_29 {dimension_numbers = #tpu.dot_dimension_numbers<[1], [0], [0], [1], [0, 0, 1, 1], [], []>} : vector<128x640xbf16>, vector<640x128xbf16>, vector<128x128xf32> -> vector<128x128xf32>
    %47 = arith.addf %41, %46 : vector<128x128xf32>
    %c2 = arith.constant 2 : index
    %c0_30 = arith.constant 0 : index
    %c0_31 = arith.constant 0 : index
    %48 = vector.load %arg10[%c2, %c0_30, %c0_31] : memref<12x16x640xbf16, #tpu.memory_space<vmem>>, vector<8x16x640xbf16>
    %49 = vector.shape_cast %48 : vector<8x16x640xbf16> to vector<128x640xbf16>
    %c2_32 = arith.constant 2 : index
    %c0_33 = arith.constant 0 : index
    %c0_34 = arith.constant 0 : index
    %50 = vector.load %arg3[%c2_32, %c0_33, %c0_34] : memref<5x640x128xbf16, #tpu.memory_space<vmem>>, vector<1x640x128xbf16>
    %51 = vector.shape_cast %50 : vector<1x640x128xbf16> to vector<640x128xbf16>
    %cst_35 = arith.constant dense<0.000000e+00> : vector<128x128xf32>
    %52 = tpu.matmul %49, %51, %cst_35 {dimension_numbers = #tpu.dot_dimension_numbers<[1], [0], [0], [1], [0, 0, 1, 1], [], []>} : vector<128x640xbf16>, vector<640x128xbf16>, vector<128x128xf32> -> vector<128x128xf32>
    %53 = arith.addf %47, %52 : vector<128x128xf32>
    %c3 = arith.constant 3 : index
    %c0_36 = arith.constant 0 : index
    %c0_37 = arith.constant 0 : index
    %54 = vector.load %arg10[%c3, %c0_36, %c0_37] : memref<12x16x640xbf16, #tpu.memory_space<vmem>>, vector<8x16x640xbf16>
    %55 = vector.shape_cast %54 : vector<8x16x640xbf16> to vector<128x640xbf16>
    %c3_38 = arith.constant 3 : index
    %c0_39 = arith.constant 0 : index
    %c0_40 = arith.constant 0 : index
    %56 = vector.load %arg3[%c3_38, %c0_39, %c0_40] : memref<5x640x128xbf16, #tpu.memory_space<vmem>>, vector<1x640x128xbf16>
    %57 = vector.shape_cast %56 : vector<1x640x128xbf16> to vector<640x128xbf16>
    %cst_41 = arith.constant dense<0.000000e+00> : vector<128x128xf32>
    %58 = tpu.matmul %55, %57, %cst_41 {dimension_numbers = #tpu.dot_dimension_numbers<[1], [0], [0], [1], [0, 0, 1, 1], [], []>} : vector<128x640xbf16>, vector<640x128xbf16>, vector<128x128xf32> -> vector<128x128xf32>
    %59 = arith.addf %53, %58 : vector<128x128xf32>
    %c4 = arith.constant 4 : index
    %c0_42 = arith.constant 0 : index
    %c0_43 = arith.constant 0 : index
    %60 = vector.load %arg10[%c4, %c0_42, %c0_43] : memref<12x16x640xbf16, #tpu.memory_space<vmem>>, vector<8x16x640xbf16>
    %61 = vector.shape_cast %60 : vector<8x16x640xbf16> to vector<128x640xbf16>
    %c4_44 = arith.constant 4 : index
    %c0_45 = arith.constant 0 : index
    %c0_46 = arith.constant 0 : index
    %62 = vector.load %arg3[%c4_44, %c0_45, %c0_46] : memref<5x640x128xbf16, #tpu.memory_space<vmem>>, vector<1x640x128xbf16>
    %63 = vector.shape_cast %62 : vector<1x640x128xbf16> to vector<640x128xbf16>
    %cst_47 = arith.constant dense<0.000000e+00> : vector<128x128xf32>
    %64 = tpu.matmul %61, %63, %cst_47 {dimension_numbers = #tpu.dot_dimension_numbers<[1], [0], [0], [1], [0, 0, 1, 1], [], []>} : vector<128x640xbf16>, vector<640x128xbf16>, vector<128x128xf32> -> vector<128x128xf32>
    %65 = arith.addf %59, %64 : vector<128x128xf32>
    %c0_48 = arith.constant 0 : index
    %c0_49 = arith.constant 0 : index
    %66 = vector.load %arg4[%c0_48, %c0_49] : memref<1x128xf32, #tpu.memory_space<vmem>>, vector<1x128xf32>
    %67 = vector.broadcast %66 : vector<1x128xf32> to vector<128x128xf32>
    %68 = arith.addf %65, %67 : vector<128x128xf32>
    %69 = vector.shape_cast %68 : vector<128x128xf32> to vector<4x2x8x2x128xf32>
    %70 = vector.extract_strided_slice %69 {offsets = [0, 0, 0, 0, 0], sizes = [4, 1, 8, 2, 128], strides = [1, 1, 1, 1, 1]} : vector<4x2x8x2x128xf32> to vector<4x1x8x2x128xf32>
    %71 = vector.shape_cast %70 : vector<4x1x8x2x128xf32> to vector<4x8x2x128xf32>
    %72 = vector.extract_strided_slice %69 {offsets = [0, 1, 0, 0, 0], sizes = [4, 1, 8, 2, 128], strides = [1, 1, 1, 1, 1]} : vector<4x2x8x2x128xf32> to vector<4x1x8x2x128xf32>
    %73 = vector.shape_cast %72 : vector<4x1x8x2x128xf32> to vector<4x8x2x128xf32>
    %74 = arith.maximumf %71, %73 : vector<4x8x2x128xf32>
    %75 = vector.shape_cast %74 : vector<4x8x2x128xf32> to vector<4x4x2x2x128xf32>
    %76 = vector.extract_strided_slice %75 {offsets = [0, 0, 0, 0, 0], sizes = [4, 4, 1, 2, 128], strides = [1, 1, 1, 1, 1]} : vector<4x4x2x2x128xf32> to vector<4x4x1x2x128xf32>
    %77 = vector.shape_cast %76 : vector<4x4x1x2x128xf32> to vector<4x4x2x128xf32>
    %78 = vector.extract_strided_slice %75 {offsets = [0, 0, 1, 0, 0], sizes = [4, 4, 1, 2, 128], strides = [1, 1, 1, 1, 1]} : vector<4x4x2x2x128xf32> to vector<4x4x1x2x128xf32>
    %79 = vector.shape_cast %78 : vector<4x4x1x2x128xf32> to vector<4x4x2x128xf32>
    %80 = arith.maximumf %77, %79 : vector<4x4x2x128xf32>
    %cst_50 = arith.constant 0.000000e+00 : f32
    %81 = vector.broadcast %cst_50 : f32 to vector<4x4x2x128xf32>
    %82 = arith.maximumf %80, %81 : vector<4x4x2x128xf32>
    %83 = vector.extract_strided_slice %82 {offsets = [0, 0, 0, 0], sizes = [1, 1, 2, 128], strides = [1, 1, 1, 1]} : vector<4x4x2x128xf32> to vector<1x1x2x128xf32>
    %84 = vector.shape_cast %83 : vector<1x1x2x128xf32> to vector<2x128xf32>
    %85 = vector.extract_strided_slice %82 {offsets = [1, 0, 0, 0], sizes = [1, 1, 2, 128], strides = [1, 1, 1, 1]} : vector<4x4x2x128xf32> to vector<1x1x2x128xf32>
    %86 = vector.shape_cast %85 : vector<1x1x2x128xf32> to vector<2x128xf32>
    %87 = vector.extract_strided_slice %82 {offsets = [2, 0, 0, 0], sizes = [1, 1, 2, 128], strides = [1, 1, 1, 1]} : vector<4x4x2x128xf32> to vector<1x1x2x128xf32>
    %88 = vector.shape_cast %87 : vector<1x1x2x128xf32> to vector<2x128xf32>
    %89 = vector.extract_strided_slice %82 {offsets = [3, 0, 0, 0], sizes = [1, 1, 2, 128], strides = [1, 1, 1, 1]} : vector<4x4x2x128xf32> to vector<1x1x2x128xf32>
    %90 = vector.shape_cast %89 : vector<1x1x2x128xf32> to vector<2x128xf32>
    %91 = vector.extract_strided_slice %82 {offsets = [0, 1, 0, 0], sizes = [1, 1, 2, 128], strides = [1, 1, 1, 1]} : vector<4x4x2x128xf32> to vector<1x1x2x128xf32>
    %92 = vector.shape_cast %91 : vector<1x1x2x128xf32> to vector<2x128xf32>
    %93 = vector.extract_strided_slice %82 {offsets = [1, 1, 0, 0], sizes = [1, 1, 2, 128], strides = [1, 1, 1, 1]} : vector<4x4x2x128xf32> to vector<1x1x2x128xf32>
    %94 = vector.shape_cast %93 : vector<1x1x2x128xf32> to vector<2x128xf32>
    %95 = vector.extract_strided_slice %82 {offsets = [2, 1, 0, 0], sizes = [1, 1, 2, 128], strides = [1, 1, 1, 1]} : vector<4x4x2x128xf32> to vector<1x1x2x128xf32>
    %96 = vector.shape_cast %95 : vector<1x1x2x128xf32> to vector<2x128xf32>
    %97 = vector.extract_strided_slice %82 {offsets = [3, 1, 0, 0], sizes = [1, 1, 2, 128], strides = [1, 1, 1, 1]} : vector<4x4x2x128xf32> to vector<1x1x2x128xf32>
    %98 = vector.shape_cast %97 : vector<1x1x2x128xf32> to vector<2x128xf32>
    %99 = vector.extract_strided_slice %82 {offsets = [0, 2, 0, 0], sizes = [1, 1, 2, 128], strides = [1, 1, 1, 1]} : vector<4x4x2x128xf32> to vector<1x1x2x128xf32>
    %100 = vector.shape_cast %99 : vector<1x1x2x128xf32> to vector<2x128xf32>
    %101 = vector.extract_strided_slice %82 {offsets = [1, 2, 0, 0], sizes = [1, 1, 2, 128], strides = [1, 1, 1, 1]} : vector<4x4x2x128xf32> to vector<1x1x2x128xf32>
    %102 = vector.shape_cast %101 : vector<1x1x2x128xf32> to vector<2x128xf32>
    %103 = vector.extract_strided_slice %82 {offsets = [2, 2, 0, 0], sizes = [1, 1, 2, 128], strides = [1, 1, 1, 1]} : vector<4x4x2x128xf32> to vector<1x1x2x128xf32>
    %104 = vector.shape_cast %103 : vector<1x1x2x128xf32> to vector<2x128xf32>
    %105 = vector.extract_strided_slice %82 {offsets = [3, 2, 0, 0], sizes = [1, 1, 2, 128], strides = [1, 1, 1, 1]} : vector<4x4x2x128xf32> to vector<1x1x2x128xf32>
    %106 = vector.shape_cast %105 : vector<1x1x2x128xf32> to vector<2x128xf32>
    %107 = vector.extract_strided_slice %82 {offsets = [0, 3, 0, 0], sizes = [1, 1, 2, 128], strides = [1, 1, 1, 1]} : vector<4x4x2x128xf32> to vector<1x1x2x128xf32>
    %108 = vector.shape_cast %107 : vector<1x1x2x128xf32> to vector<2x128xf32>
    %109 = vector.extract_strided_slice %82 {offsets = [1, 3, 0, 0], sizes = [1, 1, 2, 128], strides = [1, 1, 1, 1]} : vector<4x4x2x128xf32> to vector<1x1x2x128xf32>
    %110 = vector.shape_cast %109 : vector<1x1x2x128xf32> to vector<2x128xf32>
    %111 = vector.extract_strided_slice %82 {offsets = [2, 3, 0, 0], sizes = [1, 1, 2, 128], strides = [1, 1, 1, 1]} : vector<4x4x2x128xf32> to vector<1x1x2x128xf32>
    %112 = vector.shape_cast %111 : vector<1x1x2x128xf32> to vector<2x128xf32>
    %113 = vector.extract_strided_slice %82 {offsets = [3, 3, 0, 0], sizes = [1, 1, 2, 128], strides = [1, 1, 1, 1]} : vector<4x4x2x128xf32> to vector<1x1x2x128xf32>
    %114 = vector.shape_cast %113 : vector<1x1x2x128xf32> to vector<2x128xf32>
    %115 = tpu.concatenate %84, %86, %88, %90, %92, %94, %96, %98, %100, %102, %104, %106, %108, %110, %112, %114 in 1 : vector<2x128xf32>, vector<2x128xf32>, vector<2x128xf32>, vector<2x128xf32>, vector<2x128xf32>, vector<2x128xf32>, vector<2x128xf32>, vector<2x128xf32>, vector<2x128xf32>, vector<2x128xf32>, vector<2x128xf32>, vector<2x128xf32>, vector<2x128xf32>, vector<2x128xf32>, vector<2x128xf32>, vector<2x128xf32> -> vector<2x2048xf32>
    %116 = arith.truncf %115 : vector<2x2048xf32> to vector<2x2048xbf16>
    %c0_51 = arith.constant 0 : index
    %c0_52 = arith.constant 0 : index
    %117 = vector.load %arg5[%c0_51, %c0_52] : memref<2048x128xbf16, #tpu.memory_space<vmem>>, vector<2048x128xbf16>
    %cst_53 = arith.constant dense<0.000000e+00> : vector<2x128xf32>
    %118 = tpu.matmul %116, %117, %cst_53 {dimension_numbers = #tpu.dot_dimension_numbers<[1], [0], [0], [1], [0, 0, 1, 1], [], []>} : vector<2x2048xbf16>, vector<2048x128xbf16>, vector<2x128xf32> -> vector<2x128xf32>
    %c0_54 = arith.constant 0 : index
    %c0_55 = arith.constant 0 : index
    %119 = vector.load %arg6[%c0_54, %c0_55] : memref<1x128xf32, #tpu.memory_space<vmem>>, vector<1x128xf32>
    %120 = vector.broadcast %119 : vector<1x128xf32> to vector<2x128xf32>
    %121 = arith.addf %118, %120 : vector<2x128xf32>
    %cst_56 = arith.constant 0.000000e+00 : f32
    %122 = vector.broadcast %cst_56 : f32 to vector<2x128xf32>
    %123 = arith.maximumf %121, %122 : vector<2x128xf32>
    %124 = arith.truncf %123 : vector<2x128xf32> to vector<2x128xbf16>
    %c0_57 = arith.constant 0 : index
    %c0_58 = arith.constant 0 : index
    %125 = vector.load %arg7[%c0_57, %c0_58] : memref<128x128xbf16, #tpu.memory_space<vmem>>, vector<128x128xbf16>
    %cst_59 = arith.constant dense<0.000000e+00> : vector<2x128xf32>
    %126 = tpu.matmul %124, %125, %cst_59 {dimension_numbers = #tpu.dot_dimension_numbers<[1], [0], [0], [1], [0, 0, 1, 1], [], []>} : vector<2x128xbf16>, vector<128x128xbf16>, vector<2x128xf32> -> vector<2x128xf32>
    %c0_60 = arith.constant 0 : index
    %c0_61 = arith.constant 0 : index
    %127 = vector.load %arg8[%c0_60, %c0_61] : memref<1x128xf32, #tpu.memory_space<vmem>>, vector<1x128xf32>
    %128 = vector.broadcast %127 : vector<1x128xf32> to vector<2x128xf32>
    %129 = arith.addf %126, %128 : vector<2x128xf32>
    %c0_62 = arith.constant 0 : index
    %c0_63 = arith.constant 0 : index
    %130 = vector.load %arg9[%c0_62, %c0_63] : memref<2x128xf32, #tpu.memory_space<vmem>>, vector<2x128xf32>
    tpu.vector_store %arg9[%c0_62, %c0_63], %129 {strides = array<i32>} : memref<2x128xf32, #tpu.memory_space<vmem>>, vector<2x128xf32>,
    return
  }
}

</mosaic_0001>

<bundles_post_ra>
// kernel: net_forward.1
= control target key start
LH: loop header
LB: loop body
LE: loop exit
PB: predicated region body
PF: predicated region fallthrough
CT: control target
= control target key end

     0   :  { %vm1730_vm0 = vcmask 261120   ;;  %s18653_s0 = inlined_call_operand.vmem [shape: bf16[3840,32], index: 0, kind: input, shape index: {}]   ;;  %s18654_s1 = inlined_call_operand.vmem [shape: bf16[32,128], index: 1, kind: input, shape index: {}]   ;;  %s18655_s2 = inlined_call_operand.vmem [shape: f32[1,128], index: 2, kind: input, shape index: {}]   ;;  %s18656_s3 = inlined_call_operand.vmem [shape: bf16[5,640,128], index: 3, kind: input, shape index: {}]   ;;  %s18657_s4 = inlined_call_operand.vmem [shape: f32[1,128], index: 4, kind: input, shape index: {}]   ;;  %s18658_s5 = inlined_call_operand.vmem [shape: bf16[2048,128], index: 5, kind: input, shape index: {}]   ;;  %s18659_s6 = inlined_call_operand.vmem [shape: f32[1,128], index: 6, kind: input, shape index: {}]   ;;  %s18660_s7 = inlined_call_operand.vmem [shape: bf16[128,128], index: 7, kind: input, shape index: {}]   ;;  %s18661_s8 = inlined_call_operand.vmem [shape: f32[1,128], index: 8, kind: input, shape index: {}]   ;;  %s18662_s9 = inlined_call_operand.hbm [shape: f32[2,128], index: 9, kind: output, shape index: {}]  }
   0x1   :  { %v13493_v0 = vld [vmem:[%s18654_s1] sm:$0xff]   ;;  %v13494_v1 = vld [vmem:[%s18654_s1 + $0x8] sm:$0xff]   ;;  %v13497_v4 = vld [vmem:[%s18653_s0 + $0x10] sm:$0xff]  }
   0x2   :  { %12665 = vmatprep.subr.bf16.mxu0 %v13493_v0  ;;  %v13495_v2 = vld [vmem:[%s18653_s0] sm:$0xff]   ;;  %v13496_v3 = vld [vmem:[%s18653_s0 + $0x8] sm:$0xff]   ;;  %v13498_v5 = vld [vmem:[%s18653_s0 + $0x18] sm:$0xff]  }
   0x3   :  { %12666 = vmatpush3.bf16.msra.mxu0 %v13493_v0  ;;  %12669 = vmatprep.mubr.msk.bf16.mxu0 %vm1730_vm0, %v13495_v2  ;;  %v13499_v6 = vld [vmem:[%s18653_s0 + $0x20] sm:$0xff]   ;;  %v13500_v7 = vld [vmem:[%s18653_s0 + $0x28] sm:$0xff]   ;;  %v13501_v8 = vld [vmem:[%s18653_s0 + $0x30] sm:$0xff]  }
   0x4   :  { %12667 = vmatprep.subr.bf16.mxu0 %v13494_v1  ;;  %v13502_v9 = vld [vmem:[%s18653_s0 + $0x38] sm:$0xff]   ;;  %v13503_v10 = vld [vmem:[%s18653_s0 + $0x40] sm:$0xff]   ;;  %v13504_v11 = vld [vmem:[%s18653_s0 + $0x48] sm:$0xff]  }
   0x5   :  { %v13505_v12 = vld [vmem:[%s18653_s0 + $0x50] sm:$0xff]   ;;  %v13506_v13 = vld [vmem:[%s18653_s0 + $0x58] sm:$0xff]   ;;  %v13507_v14 = vld [vmem:[%s18653_s0 + $0x60] sm:$0xff]  }
   0x6   :  { %v13508_v15 = vld [vmem:[%s18653_s0 + $0x68] sm:$0xff]   ;;  %v13509_v16 = vld [vmem:[%s18653_s0 + $0x70] sm:$0xff]   ;;  %v13510_v17 = vld [vmem:[%s18653_s0 + $0x78] sm:$0xff]  }
   0x7   :  { %12668 = vmatpush3.bf16.msra.mxu0 %v13494_v1  ;;  %v13511_v18 = vld [vmem:[%s18653_s0 + $0x80] sm:$0xff]   ;;  %v13512_v19 = vld [vmem:[%s18653_s0 + $0x88] sm:$0xff]   ;;  %v13513_v20 = vld [vmem:[%s18653_s0 + $0x90] sm:$0xff]  }
   0x8   :  { %v13514_v21 = vld [vmem:[%s18653_s0 + $0x98] sm:$0xff]   ;;  %v13515_v22 = vld [vmem:[%s18653_s0 + $0xa0] sm:$0xff]   ;;  %v13516_v23 = vld [vmem:[%s18653_s0 + $0xa8] sm:$0xff]  }
   0x9   :  { %v13517_v24 = vld [vmem:[%s18653_s0 + $0xb0] sm:$0xff]   ;;  %v13518_v25 = vld [vmem:[%s18653_s0 + $0xb8] sm:$0xff]   ;;  %v13519_v26 = vld [vmem:[%s18653_s0 + $0xc0] sm:$0xff]  }
   0xa   :  { %12670 = vmatmul.mubr.msk.bf16.vlgmr.msra.gmra.mrb[0].mxu0 %vm1730_vm0, %v13496_v3  ;;  %v13520_v27 = vld [vmem:[%s18653_s0 + $0xc8] sm:$0xff]   ;;  %v13521_v28 = vld [vmem:[%s18653_s0 + $0xd0] sm:$0xff]   ;;  %v13522_v29 = vld [vmem:[%s18653_s0 + $0xd8] sm:$0xff]  }
   0xb   :  { %12673 = vmatprep.mubr.msk.bf16.mxu0 %vm1730_vm0, %v13497_v4  ;;  %v13523_v30 = vld [vmem:[%s18653_s0 + $0xe0] sm:$0xff]   ;;  %v13524_v31 = vld [vmem:[%s18653_s0 + $0xe8] sm:$0xff]   ;;  %v13525_v32 = vld [vmem:[%s18653_s0 + $0xf0] sm:$0xff]  }
   0xc   :  { %v13526_v33 = vld [vmem:[%s18653_s0 + $0xf8] sm:$0xff]   ;;  %v13527_v34 = vld [vmem:[%s18653_s0 + $0x100] sm:$0xff]   ;;  %v13528_v35 = vld [vmem:[%s18653_s0 + $0x108] sm:$0xff]  }
   0xd   :  { %v13529_v36 = vld [vmem:[%s18653_s0 + $0x110] sm:$0xff]   ;;  %v13530_v37 = vld [vmem:[%s18653_s0 + $0x118] sm:$0xff]   ;;  %v13531_v38 = vld [vmem:[%s18653_s0 + $0x120] sm:$0xff]  }
   0xe   :  { %v13532_v39 = vld [vmem:[%s18653_s0 + $0x128] sm:$0xff]   ;;  %v13533_v40 = vld [vmem:[%s18653_s0 + $0x130] sm:$0xff]   ;;  %v13534_v41 = vld [vmem:[%s18653_s0 + $0x138] sm:$0xff]  }
   0xf   :  { %v13535_v42 = vld [vmem:[%s18653_s0 + $0x140] sm:$0xff]   ;;  %v13536_v43 = vld [vmem:[%s18653_s0 + $0x148] sm:$0xff]   ;;  %v13537_v44 = vld [vmem:[%s18653_s0 + $0x150] sm:$0xff]  }
  0x10   :  { %v13538_v45 = vld [vmem:[%s18653_s0 + $0x158] sm:$0xff]   ;;  %v13539_v46 = vld [vmem:[%s18653_s0 + $0x160] sm:$0xff]   ;;  %v13540_v47 = vld [vmem:[%s18653_s0 + $0x168] sm:$0xff]  }
  0x11   :  { %v13541_v48 = vld [vmem:[%s18653_s0 + $0x170] sm:$0xff]   ;;  %v13542_v49 = vld [vmem:[%s18653_s0 + $0x178] sm:$0xff]   ;;  %v13543_v50 = vld [vmem:[%s18653_s0 + $0x180] sm:$0xff]  }
  0x12   :  { %12674 = vmatmul.mubr.msk.bf16.gmra.mrb[4].mxu0 %vm1730_vm0, %v13498_v5  ;;  %v13544_v51 = vld [vmem:[%s18653_s0 + $0x188] sm:$0xff]   ;;  %v13545_v52 = vld [vmem:[%s18653_s0 + $0x190] sm:$0xff]   ;;  %v13546_v53 = vld [vmem:[%s18653_s0 + $0x198] sm:$0xff]  }
  0x13   :  { %12677 = vmatprep.mubr.msk.bf16.mxu0 %vm1730_vm0, %v13499_v6  ;;  %v13547_v54 = vld [vmem:[%s18653_s0 + $0x1a0] sm:$0xff]   ;;  %v13548_v55 = vld [vmem:[%s18653_s0 + $0x1a8] sm:$0xff]   ;;  %v13549_v56 = vld [vmem:[%s18653_s0 + $0x1b0] sm:$0xff]  }
  0x14   :  { %v13550_v59 = vld [vmem:[%s18653_s0 + $0x1b8] sm:$0xff]   ;;  %v13551_v61 = vld [vmem:[%s18653_s0 + $0x1c0] sm:$0xff]   ;;  %v13552_v1 = vld [vmem:[%s18653_s0 + $0x1c8] sm:$0xff]  }
  0x15   :  { %v13553_v3 = vld [vmem:[%s18653_s0 + $0x1d0] sm:$0xff]  }
  0x1a   :  { %12678 = vmatmul.mubr.msk.bf16.gmra.mrb[8].mxu0 %vm1730_vm0, %v13500_v7  ;;  %v13554_v7 = vld [vmem:[%s18653_s0 + $0x1d8] sm:$0xff]  }
  0x1b   :  { %12681 = vmatprep.mubr.msk.bf16.mxu0 %vm1730_vm0, %v13501_v8 }
  0x22   :  { %12682 = vmatmul.mubr.msk.bf16.gmra.mrb[12].mxu0 %vm1730_vm0, %v13502_v9  ;;  %v13555_v9 = vld [vmem:[%s18653_s0 + $0x1e0] sm:$0xff]  }
  0x23   :  { %12685 = vmatprep.mubr.msk.bf16.mxu0 %vm1730_vm0, %v13503_v10 }
  0x2a   :  { %12686 = vmatmul.mubr.msk.bf16.gmra.mrb[16].mxu0 %vm1730_vm0, %v13504_v11 }
  0x2b   :  { %12689 = vmatprep.mubr.msk.bf16.mxu0 %vm1730_vm0, %v13505_v12 }
  0x32   :  { %12690 = vmatmul.mubr.msk.bf16.gmra.mrb[20].mxu0 %vm1730_vm0, %v13506_v13  ;;  %v13556_v13 = vld [vmem:[%s18653_s0 + $0x1e8] sm:$0xff]  }
  0x33   :  { %12693 = vmatprep.mubr.msk.bf16.mxu0 %vm1730_vm0, %v13507_v14 }
  0x3a   :  { %12694 = vmatmul.mubr.msk.bf16.gmra.mrb[24].mxu0 %vm1730_vm0, %v13508_v15  ;;  %v13557_v15 = vld [vmem:[%s18653_s0 + $0x1f0] sm:$0xff]  }
  0x3b   :  { %12697 = vmatprep.mubr.msk.bf16.mxu0 %vm1730_vm0, %v13509_v16 }
  0x42   :  { %12698 = vmatmul.mubr.msk.bf16.gmra.mrb[28].mxu0 %vm1730_vm0, %v13510_v17 }
  0x43   :  { %12701 = vmatprep.mubr.msk.bf16.mxu0 %vm1730_vm0, %v13511_v18 }
  0x4a   :  { %12702 = vmatmul.mubr.msk.bf16.gmra.mrb[32].mxu0 %vm1730_vm0, %v13512_v19  ;;  %v13558_v19 = vld [vmem:[%s18653_s0 + $0x1f8] sm:$0xff]  }
  0x4b   :  { %12705 = vmatprep.mubr.msk.bf16.mxu0 %vm1730_vm0, %v13513_v20 }
  0x52   :  { %12706 = vmatmul.mubr.msk.bf16.gmra.mrb[36].mxu0 %vm1730_vm0, %v13514_v21  ;;  %v13559_v21 = vld [vmem:[%s18653_s0 + $0x200] sm:$0xff]  }
  0x53   :  { %12709 = vmatprep.mubr.msk.bf16.mxu0 %vm1730_vm0, %v13515_v22 }
  0x5a   :  { %12710 = vmatmul.mubr.msk.bf16.gmra.mrb[40].mxu0 %vm1730_vm0, %v13516_v23 }
  0x5b   :  { %12713 = vmatprep.mubr.msk.bf16.mxu0 %vm1730_vm0, %v13517_v24 }
  0x62   :  { %12714 = vmatmul.mubr.msk.bf16.gmra.mrb[44].mxu0 %vm1730_vm0, %v13518_v25  ;;  %v13560_v25 = vld [vmem:[%s18653_s0 + $0x208] sm:$0xff]  }
  0x63   :  { %12717 = vmatprep.mubr.msk.bf16.mxu0 %vm1730_vm0, %v13519_v26 }
  0x6a   :  { %12718 = vmatmul.mubr.msk.bf16.gmra.mrb[48].mxu0 %vm1730_vm0, %v13520_v27  ;;  %v13561_v27 = vld [vmem:[%s18653_s0 + $0x210] sm:$0xff]  }
  0x6b   :  { %12721 = vmatprep.mubr.msk.bf16.mxu0 %vm1730_vm0, %v13521_v28 }
  0x72   :  { %12722 = vmatmul.mubr.msk.bf16.gmra.mrb[52].mxu0 %vm1730_vm0, %v13522_v29 }
  0x73   :  { %12725 = vmatprep.mubr.msk.bf16.mxu0 %vm1730_vm0, %v13523_v30 }
  0x7a   :  { %12726 = vmatmul.mubr.msk.bf16.gmra.mrb[56].mxu0 %vm1730_vm0, %v13524_v31  ;;  %v13562_v31 = vld [vmem:[%s18653_s0 + $0x218] sm:$0xff]  }
  0x7b   :  { %12729 = vmatprep.mubr.msk.bf16.mxu0 %vm1730_vm0, %v13525_v32 }
  0x82   :  { %12730 = vmatmul.mubr.msk.bf16.gmra.mrb[60].mxu0 %vm1730_vm0, %v13526_v33  ;;  %v13563_v33 = vld [vmem:[%s18653_s0 + $0x220] sm:$0xff]  }
  0x83   :  { %12733 = vmatprep.mubr.msk.bf16.mxu0 %vm1730_vm0, %v13527_v34 }
  0x8a   :  { %12734 = vmatmul.mubr.msk.bf16.gmra.mrb[64].mxu0 %vm1730_vm0, %v13528_v35 }
  0x8b   :  { %12737 = vmatprep.mubr.msk.bf16.mxu0 %vm1730_vm0, %v13529_v36 }
  0x92   :  { %12738 = vmatmul.mubr.msk.bf16.gmra.mrb[68].mxu0 %vm1730_vm0, %v13530_v37  ;;  %v13564_v37 = vld [vmem:[%s18653_s0 + $0x228] sm:$0xff]  }
  0x93   :  { %12741 = vmatprep.mubr.msk.bf16.mxu0 %vm1730_vm0, %v13531_v38 }
  0x9a   :  { %12742 = vmatmul.mubr.msk.bf16.gmra.mrb[72].mxu0 %vm1730_vm0, %v13532_v39  ;;  %v13565_v39 = vld [vmem:[%s18653_s0 + $0x230] sm:$0xff]  }
  0x9b   :  { %12745 = vmatprep.mubr.msk.bf16.mxu0 %vm1730_vm0, %v13533_v40 }
  0xa2   :  { %12746 = vmatmul.mubr.msk.bf16.gmra.mrb[76].mxu0 %vm1730_vm0, %v13534_v41 }
  0xa3   :  { %12749 = vmatprep.mubr.msk.bf16.mxu0 %vm1730_vm0, %v13535_v42 }
  0xaa   :  { %12750 = vmatmul.mubr.msk.bf16.gmra.mrb[80].mxu0 %vm1730_vm0, %v13536_v43  ;;  %v13566_v43 = vld [vmem:[%s18653_s0 + $0x238] sm:$0xff]  }
  0xab   :  { %12753 = vmatprep.mubr.msk.bf16.mxu0 %vm1730_vm0, %v13537_v44 }
  0xb2   :  { %12754 = vmatmul.mubr.msk.bf16.gmra.mrb[84].mxu0 %vm1730_vm0, %v13538_v45  ;;  %v13567_v45 = vld [vmem:[%s18653_s0 + $0x240] sm:$0xff]  }
  0xb3   :  { %12757 = vmatprep.mubr.msk.bf16.mxu0 %vm1730_vm0, %v13539_v46 }
  0xba   :  { %12758 = vmatmul.mubr.msk.bf16.gmra.mrb[88].mxu0 %vm1730_vm0, %v13540_v47 }
  0xbb   :  { %12761 = vmatprep.mubr.msk.bf16.mxu0 %vm1730_vm0, %v13541_v48 }
  0xc2   :  { %12762 = vmatmul.mubr.msk.bf16.gmra.mrb[92].mxu0 %vm1730_vm0, %v13542_v49  ;;  %v13568_v49 = vld [vmem:[%s18653_s0 + $0x248] sm:$0xff]  }
  0xc3   :  { %12765 = vmatprep.mubr.msk.bf16.mxu0 %vm1730_vm0, %v13543_v50 }
  0xca   :  { %12766 = vmatmul.mubr.msk.bf16.gmra.mrb[96].mxu0 %vm1730_vm0, %v13544_v51  ;;  %v13569_v51 = vld [vmem:[%s18653_s0 + $0x250] sm:$0xff]  }
  0xcb   :  { %12769 = vmatprep.mubr.msk.bf16.mxu0 %vm1730_vm0, %v13545_v52 }
  0xd2   :  { %12770 = vmatmul.mubr.msk.bf16.gmra.mrb[100].mxu0 %vm1730_vm0, %v13546_v53 }
  0xd3   :  { %12773 = vmatprep.mubr.msk.bf16.mxu0 %vm1730_vm0, %v13547_v54 }
  0xda   :  { %12774 = vmatmul.mubr.msk.bf16.gmra.mrb[104].mxu0 %vm1730_vm0, %v13548_v55  ;;  %v13570_v55 = vld [vmem:[%s18653_s0 + $0x258] sm:$0xff]  }
  0xdb   :  { %12777 = vmatprep.mubr.msk.bf16.mxu0 %vm1730_vm0, %v13549_v56 }
  0xdd   :  { %v14376_v57 = vpop.f32.mrb[0].mxu0 }
  0xde   :  { %v14378_v58 = vpop.f32.mrb[1].mxu0 }
  0xdf   :  { %v14383_v60 = vpop.f32.mrb[2].mxu0 }
  0xe0   :  { %18916 = vst [vmem:[#allocation6_spill] sm:$0xff] %v14383_v60  ;;  %v14388_v62 = vpop.f32.mrb[3].mxu0 }
  0xe2   :  { %12778 = vmatmul.mubr.msk.bf16.gmra.mrb[108].mxu0 %vm1730_vm0, %v13550_v59  ;;  %v13571_v59 = vld [vmem:[%s18653_s0 + $0x260] sm:$0xff]  }
  0xe3   :  { %12781 = vmatprep.mubr.msk.bf16.mxu0 %vm1730_vm0, %v13551_v61 }
  0xe5   :  { %v14392_v63 = vpop.f32.mrb[4].mxu0 }
  0xe6   :  { %v14394_v0 = vpop.f32.mrb[5].mxu0 }
  0xe7   :  { %v14399_v2 = vpop.f32.mrb[6].mxu0 }
  0xe8   :  { %18917 = vst [vmem:[#allocation7_spill] sm:$0xff] %v14399_v2  ;;  %v14404_v4 = vpop.f32.mrb[7].mxu0 }
  0xea   :  { %12782 = vmatmul.mubr.msk.bf16.gmra.mrb[112].mxu0 %vm1730_vm0, %v13552_v1 }
  0xeb   :  { %12785 = vmatprep.mubr.msk.bf16.mxu0 %vm1730_vm0, %v13553_v3 }
  0xed   :  { %v14408_v5 = vpop.f32.mrb[8].mxu0 }
  0xee   :  { %v14410_v6 = vpop.f32.mrb[9].mxu0 }
  0xef   :  { %v14415_v8 = vpop.f32.mrb[10].mxu0 }
  0xf0   :  { %18918 = vst [vmem:[#allocation8_spill] sm:$0xff] %v14415_v8  ;;  %v14420_v10 = vpop.f32.mrb[11].mxu0 }
  0xf2   :  { %12786 = vmatmul.mubr.msk.bf16.gmra.mrb[116].mxu0 %vm1730_vm0, %v13554_v7  ;;  %v13572_v7 = vld [vmem:[%s18653_s0 + $0x268] sm:$0xff]  }
  0xf3   :  { %12789 = vmatprep.mubr.msk.bf16.mxu0 %vm1730_vm0, %v13555_v9 }
  0xf5   :  { %v14424_v11 = vpop.f32.mrb[12].mxu0 }
  0xf6   :  { %v14426_v12 = vpop.f32.mrb[13].mxu0 }
  0xf7   :  { %v14431_v14 = vpop.f32.mrb[14].mxu0 }
  0xf8   :  { %18919 = vst [vmem:[#allocation9_spill] sm:$0xff] %v14431_v14  ;;  %v14436_v16 = vpop.f32.mrb[15].mxu0 }
  0xfa   :  { %12790 = vmatmul.mubr.msk.bf16.gmra.mrb[120].mxu0 %vm1730_vm0, %v13556_v13  ;;  %v13573_v13 = vld [vmem:[%s18653_s0 + $0x270] sm:$0xff]  }
  0xfb   :  { %12793 = vmatprep.mubr.msk.bf16.mxu0 %vm1730_vm0, %v13557_v15 }
  0xfd   :  { %v14440_v17 = vpop.f32.mrb[16].mxu0 }
  0xfe   :  { %v14442_v18 = vpop.f32.mrb[17].mxu0 }
  0xff   :  { %v14447_v20 = vpop.f32.mrb[18].mxu0 }
 0x100   :  { %18920 = vst [vmem:[#allocation10_spill] sm:$0xff] %v14447_v20  ;;  %v14452_v22 = vpop.f32.mrb[19].mxu0 }
 0x102   :  { %12794 = vmatmul.mubr.msk.bf16.gmra.mrb[124].mxu0 %vm1730_vm0, %v13558_v19 }
 0x103   :  { %12797 = vmatprep.mubr.msk.bf16.mxu0 %vm1730_vm0, %v13559_v21 }
 0x105   :  { %v14456_v23 = vpop.f32.mrb[20].mxu0 }
 0x106   :  { %v14458_v24 = vpop.f32.mrb[21].mxu0 }
 0x107   :  { %v14463_v26 = vpop.f32.mrb[22].mxu0 }
 0x108   :  { %18921 = vst [vmem:[#allocation11_spill] sm:$0xff] %v14463_v26  ;;  %v14468_v28 = vpop.f32.mrb[23].mxu0 }
 0x109   :  { %18922 = vst [vmem:[#allocation12_spill] sm:$0xff] %v14468_v28 }
 0x10a   :  { %12798 = vmatmul.mubr.msk.bf16.gmra.mrb[128].mxu0 %vm1730_vm0, %v13560_v25  ;;  %v13574_v25 = vld [vmem:[%s18653_s0 + $0x278] sm:$0xff]  }
 0x10b   :  { %12801 = vmatprep.mubr.msk.bf16.mxu0 %vm1730_vm0, %v13561_v27 }
 0x10d   :  { %v14472_v29 = vpop.f32.mrb[24].mxu0 }
 0x10e   :  { %18923 = vst [vmem:[#allocation13_spill] sm:$0xff] %v14472_v29  ;;  %v14474_v30 = vpop.f32.mrb[25].mxu0 }
 0x10f   :  { %18924 = vst [vmem:[#allocation14_spill] sm:$0xff] %v14474_v30  ;;  %v14479_v32 = vpop.f32.mrb[26].mxu0 }
 0x110   :  { %18925 = vst [vmem:[#allocation15_spill] sm:$0xff] %v14479_v32  ;;  %v14484_v34 = vpop.f32.mrb[27].mxu0 }
 0x111   :  { %18926 = vst [vmem:[#allocation16_spill] sm:$0xff] %v14484_v34 }
 0x112   :  { %12802 = vmatmul.mubr.msk.bf16.gmra.mrb[132].mxu0 %vm1730_vm0, %v13562_v31  ;;  %v13575_v31 = vld [vmem:[%s18653_s0 + $0x280] sm:$0xff]  }
 0x113   :  { %12805 = vmatprep.mubr.msk.bf16.mxu0 %vm1730_vm0, %v13563_v33 }
 0x115   :  { %v14488_v35 = vpop.f32.mrb[28].mxu0 }
 0x116   :  { %18927 = vst [vmem:[#allocation17_spill] sm:$0xff] %v14488_v35  ;;  %v14490_v36 = vpop.f32.mrb[29].mxu0 }
 0x117   :  { %18928 = vst [vmem:[#allocation18_spill] sm:$0xff] %v14490_v36  ;;  %v14495_v38 = vpop.f32.mrb[30].mxu0 }
 0x118   :  { %18929 = vst [vmem:[#allocation19_spill] sm:$0xff] %v14495_v38  ;;  %v14500_v40 = vpop.f32.mrb[31].mxu0 }
 0x119   :  { %18930 = vst [vmem:[#allocation20_spill] sm:$0xff] %v14500_v40 }
 0x11a   :  { %12806 = vmatmul.mubr.msk.bf16.gmra.mrb[136].mxu0 %vm1730_vm0, %v13564_v37 }
 0x11b   :  { %12809 = vmatprep.mubr.msk.bf16.mxu0 %vm1730_vm0, %v13565_v39 }
 0x11d   :  { %v14504_v41 = vpop.f32.mrb[32].mxu0 }
 0x11e   :  { %18931 = vst [vmem:[#allocation21_spill] sm:$0xff] %v14504_v41  ;;  %v14506_v42 = vpop.f32.mrb[33].mxu0 }
 0x11f   :  { %18932 = vst [vmem:[#allocation22_spill] sm:$0xff] %v14506_v42  ;;  %v14511_v44 = vpop.f32.mrb[34].mxu0 }
 0x120   :  { %18933 = vst [vmem:[#allocation23_spill] sm:$0xff] %v14511_v44  ;;  %v14516_v46 = vpop.f32.mrb[35].mxu0 }
 0x121   :  { %18934 = vst [vmem:[#allocation24_spill] sm:$0xff] %v14516_v46 }
 0x122   :  { %12810 = vmatmul.mubr.msk.bf16.gmra.mrb[140].mxu0 %vm1730_vm0, %v13566_v43  ;;  %v13576_v43 = vld [vmem:[%s18653_s0 + $0x288] sm:$0xff]  }
 0x123   :  { %12813 = vmatprep.mubr.msk.bf16.mxu0 %vm1730_vm0, %v13567_v45 }
 0x125   :  { %v14520_v47 = vpop.f32.mrb[36].mxu0 }
 0x126   :  { %18935 = vst [vmem:[#allocation25_spill] sm:$0xff] %v14520_v47  ;;  %v14522_v48 = vpop.f32.mrb[37].mxu0 }
 0x127   :  { %18936 = vst [vmem:[#allocation26_spill] sm:$0xff] %v14522_v48  ;;  %v14527_v50 = vpop.f32.mrb[38].mxu0 }
 0x128   :  { %18937 = vst [vmem:[#allocation27_spill] sm:$0xff] %v14527_v50  ;;  %v14532_v52 = vpop.f32.mrb[39].mxu0 }
 0x129   :  { %18938 = vst [vmem:[#allocation28_spill] sm:$0xff] %v14532_v52 }
 0x12a   :  { %12814 = vmatmul.mubr.msk.bf16.gmra.mrb[144].mxu0 %vm1730_vm0, %v13568_v49  ;;  %v13577_v49 = vld [vmem:[%s18653_s0 + $0x290] sm:$0xff]  }
 0x12b   :  { %12817 = vmatprep.mubr.msk.bf16.mxu0 %vm1730_vm0, %v13569_v51 }
 0x12d   :  { %v14536_v53 = vpop.f32.mrb[40].mxu0 }
 0x12e   :  { %18939 = vst [vmem:[#allocation29_spill] sm:$0xff] %v14536_v53  ;;  %v14538_v54 = vpop.f32.mrb[41].mxu0 }
 0x12f   :  { %18940 = vst [vmem:[#allocation30_spill] sm:$0xff] %v14538_v54  ;;  %v14543_v56 = vpop.f32.mrb[42].mxu0 }
 0x130   :  { %18941 = vst [vmem:[#allocation31_spill] sm:$0xff] %v14543_v56  ;;  %v14548_v61 = vpop.f32.mrb[43].mxu0 }
 0x131   :  { %18942 = vst [vmem:[#allocation32_spill] sm:$0xff] %v14548_v61 }
 0x132   :  { %12818 = vmatmul.mubr.msk.bf16.gmra.mrb[148].mxu0 %vm1730_vm0, %v13570_v55 }
 0x133   :  { %12821 = vmatprep.mubr.msk.bf16.mxu0 %vm1730_vm0, %v13571_v59 }
 0x135   :  { %v14552_v1 = vpop.f32.mrb[44].mxu0 }
 0x136   :  { %18943 = vst [vmem:[#allocation33_spill] sm:$0xff] %v14552_v1  ;;  %v14554_v3 = vpop.f32.mrb[45].mxu0 }
 0x137   :  { %18944 = vst [vmem:[#allocation34_spill] sm:$0xff] %v14554_v3  ;;  %v14559_v9 = vpop.f32.mrb[46].mxu0 }
 0x138   :  { %18945 = vst [vmem:[#allocation35_spill] sm:$0xff] %v14559_v9  ;;  %v14564_v15 = vpop.f32.mrb[47].mxu0 }
 0x139   :  { %18946 = vst [vmem:[#allocation36_spill] sm:$0xff] %v14564_v15 }
 0x13a   :  { %12822 = vmatmul.mubr.msk.bf16.gmra.mrb[152].mxu0 %vm1730_vm0, %v13572_v7  ;;  %v13578_v7 = vld [vmem:[%s18653_s0 + $0x298] sm:$0xff]  }
 0x13b   :  { %12825 = vmatprep.mubr.msk.bf16.mxu0 %vm1730_vm0, %v13573_v13 }
 0x13d   :  { %v14568_v19 = vpop.f32.mrb[48].mxu0 }
 0x13e   :  { %18947 = vst [vmem:[#allocation37_spill] sm:$0xff] %v14568_v19  ;;  %v14570_v21 = vpop.f32.mrb[49].mxu0 }
 0x13f   :  { %18948 = vst [vmem:[#allocation38_spill] sm:$0xff] %v14570_v21  ;;  %v14575_v27 = vpop.f32.mrb[50].mxu0 }
 0x140   :  { %18949 = vst [vmem:[#allocation39_spill] sm:$0xff] %v14575_v27  ;;  %v14580_v33 = vpop.f32.mrb[51].mxu0 }
 0x141   :  { %18950 = vst [vmem:[#allocation40_spill] sm:$0xff] %v14580_v33 }
 0x142   :  { %12826 = vmatmul.mubr.msk.bf16.gmra.mrb[156].mxu0 %vm1730_vm0, %v13574_v25  ;;  %v13579_v25 = vld [vmem:[%s18653_s0 + $0x2a0] sm:$0xff]  }
 0x143   :  { %12829 = vmatprep.mubr.msk.bf16.mxu0 %vm1730_vm0, %v13575_v31 }
 0x145   :  { %v14584_v37 = vpop.f32.mrb[52].mxu0 }
 0x146   :  { %18951 = vst [vmem:[#allocation41_spill] sm:$0xff] %v14584_v37  ;;  %v14586_v39 = vpop.f32.mrb[53].mxu0 }
 0x147   :  { %18952 = vst [vmem:[#allocation42_spill] sm:$0xff] %v14586_v39  ;;  %v14591_v45 = vpop.f32.mrb[54].mxu0 }
 0x148   :  { %18953 = vst [vmem:[#allocation43_spill] sm:$0xff] %v14591_v45  ;;  %v14596_v51 = vpop.f32.mrb[55].mxu0 }
 0x149   :  { %18954 = vst [vmem:[#allocation44_spill] sm:$0xff] %v14596_v51 }
 0x14a   :  { %12830 = vmatmul.mubr.msk.bf16.gmra.mrb[160].mxu0 %vm1730_vm0, %v13576_v43 }
 0x14b   :  { %12833 = vmatprep.mubr.msk.bf16.mxu0 %vm1730_vm0, %v13577_v49 }
 0x14d   :  { %v14600_v55 = vpop.f32.mrb[56].mxu0 }
 0x14e   :  { %18955 = vst [vmem:[#allocation45_spill] sm:$0xff] %v14600_v55  ;;  %v14602_v59 = vpop.f32.mrb[57].mxu0 }
 0x14f   :  { %18956 = vst [vmem:[#allocation46_spill] sm:$0xff] %v14602_v59  ;;  %v14607_v13 = vpop.f32.mrb[58].mxu0  ;;  %v13580_v59 = vld [vmem:[%s18653_s0 + $0x2a8] sm:$0xff]  }
 0x150   :  { %18957 = vst [vmem:[#allocation47_spill] sm:$0xff] %v14607_v13  ;;  %v14612_v31 = vpop.f32.mrb[59].mxu0  ;;  %v13581_v13 = vld [vmem:[%s18653_s0 + $0x2b0] sm:$0xff]  }
 0x151   :  { %18958 = vst [vmem:[#allocation48_spill] sm:$0xff] %v14612_v31 }
 0x152   :  { %12834 = vmatmul.mubr.msk.bf16.gmra.mrb[164].mxu0 %vm1730_vm0, %v13578_v7 }
 0x153   :  { %12837 = vmatprep.mubr.msk.bf16.mxu0 %vm1730_vm0, %v13579_v25 }
 0x155   :  { %v14616_v43 = vpop.f32.mrb[60].mxu0 }
 0x156   :  { %18959 = vst [vmem:[#allocation49_spill] sm:$0xff] %v14616_v43  ;;  %v14618_v49 = vpop.f32.mrb[61].mxu0 }
 0x157   :  { %18960 = vst [vmem:[#allocation50_spill] sm:$0xff] %v14618_v49  ;;  %v14623_v55 = vpop.f32.mrb[62].mxu0  ;;  %v13582_v49 = vld [vmem:[%s18653_s0 + $0x2b8] sm:$0xff]  }
 0x158   :  { %18961 = vst [vmem:[#allocation51_spill] sm:$0xff] %v14623_v55  ;;  %v14628_v51 = vpop.f32.mrb[63].mxu0  ;;  %v13583_v55 = vld [vmem:[%s18653_s0 + $0x2c0] sm:$0xff]  }
 0x159   :  { %18962 = vst [vmem:[#allocation52_spill] sm:$0xff] %v14628_v51 }
 0x15a   :  { %12838 = vmatmul.mubr.msk.bf16.gmra.mrb[168].mxu0 %vm1730_vm0, %v13580_v59 }
 0x15b   :  { %12841 = vmatprep.mubr.msk.bf16.mxu0 %vm1730_vm0, %v13581_v13 }
 0x15d   :  { %v14632_v7 = vpop.f32.mrb[64].mxu0 }
 0x15e   :  { %18963 = vst [vmem:[#allocation53_spill] sm:$0xff] %v14632_v7  ;;  %v14634_v25 = vpop.f32.mrb[65].mxu0 }
 0x15f   :  { %18964 = vst [vmem:[#allocation54_spill] sm:$0xff] %v14634_v25  ;;  %v14639_v43 = vpop.f32.mrb[66].mxu0  ;;  %v13584_v25 = vld [vmem:[%s18653_s0 + $0x2c8] sm:$0xff]  }
 0x160   :  { %18965 = vst [vmem:[#allocation55_spill] sm:$0xff] %v14639_v43  ;;  %v14644_v31 = vpop.f32.mrb[67].mxu0  ;;  %v13585_v43 = vld [vmem:[%s18653_s0 + $0x2d0] sm:$0xff]  }
 0x161   :  { %18966 = vst [vmem:[#allocation56_spill] sm:$0xff] %v14644_v31 }
 0x162   :  { %12842 = vmatmul.mubr.msk.bf16.gmra.mrb[172].mxu0 %vm1730_vm0, %v13582_v49 }
 0x163   :  { %12845 = vmatprep.mubr.msk.bf16.mxu0 %vm1730_vm0, %v13583_v55 }
 0x165   :  { %v14648_v59 = vpop.f32.mrb[68].mxu0 }
 0x166   :  { %18967 = vst [vmem:[#allocation57_spill] sm:$0xff] %v14648_v59  ;;  %v14650_v13 = vpop.f32.mrb[69].mxu0 }
 0x167   :  { %18968 = vst [vmem:[#allocation58_spill] sm:$0xff] %v14650_v13  ;;  %v14655_v7 = vpop.f32.mrb[70].mxu0  ;;  %v13586_v13 = vld [vmem:[%s18653_s0 + $0x2d8] sm:$0xff]  }
 0x168   :  { %18969 = vst [vmem:[#allocation59_spill] sm:$0xff] %v14655_v7  ;;  %v14660_v51 = vpop.f32.mrb[71].mxu0  ;;  %v13587_v7 = vld [vmem:[%s18653_s0 + $0x2e0] sm:$0xff]  }
 0x169   :  { %18970 = vst [vmem:[#allocation60_spill] sm:$0xff] %v14660_v51 }
 0x16a   :  { %12846 = vmatmul.mubr.msk.bf16.gmra.mrb[176].mxu0 %vm1730_vm0, %v13584_v25 }
 0x16b   :  { %12849 = vmatprep.mubr.msk.bf16.mxu0 %vm1730_vm0, %v13585_v43 }
 0x16d   :  { %v14664_v55 = vpop.f32.mrb[72].mxu0 }
 0x16e   :  { %18971 = vst [vmem:[#allocation61_spill] sm:$0xff] %v14664_v55  ;;  %v14666_v49 = vpop.f32.mrb[73].mxu0 }
 0x16f   :  { %18972 = vst [vmem:[#allocation62_spill] sm:$0xff] %v14666_v49  ;;  %v14671_v59 = vpop.f32.mrb[74].mxu0  ;;  %v13588_v49 = vld [vmem:[%s18653_s0 + $0x2e8] sm:$0xff]  }
 0x170   :  { %18973 = vst [vmem:[#allocation63_spill] sm:$0xff] %v14671_v59  ;;  %v14676_v31 = vpop.f32.mrb[75].mxu0  ;;  %v13589_v59 = vld [vmem:[%s18653_s0 + $0x2f0] sm:$0xff]  }
 0x171   :  { %18974 = vst [vmem:[#allocation64_spill] sm:$0xff] %v14676_v31 }
 0x172   :  { %12850 = vmatmul.mubr.msk.bf16.gmra.mrb[180].mxu0 %vm1730_vm0, %v13586_v13 }
 0x173   :  { %12853 = vmatprep.mubr.msk.bf16.mxu0 %vm1730_vm0, %v13587_v7 }
 0x175   :  { %v14680_v43 = vpop.f32.mrb[76].mxu0 }
 0x176   :  { %18975 = vst [vmem:[#allocation65_spill] sm:$0xff] %v14680_v43  ;;  %v14682_v25 = vpop.f32.mrb[77].mxu0 }
 0x177   :  { %18976 = vst [vmem:[#allocation66_spill] sm:$0xff] %v14682_v25  ;;  %v14687_v55 = vpop.f32.mrb[78].mxu0  ;;  %v13590_v25 = vld [vmem:[%s18653_s0 + $0x2f8] sm:$0xff]  }
 0x178   :  { %18977 = vst [vmem:[#allocation67_spill] sm:$0xff] %v14687_v55  ;;  %v14692_v51 = vpop.f32.mrb[79].mxu0  ;;  %v13591_v55 = vld [vmem:[%s18653_s0 + $0x300] sm:$0xff]  }
 0x179   :  { %18978 = vst [vmem:[#allocation68_spill] sm:$0xff] %v14692_v51 }
 0x17a   :  { %12854 = vmatmul.mubr.msk.bf16.gmra.mrb[184].mxu0 %vm1730_vm0, %v13588_v49 }
 0x17b   :  { %12857 = vmatprep.mubr.msk.bf16.mxu0 %vm1730_vm0, %v13589_v59 }
 0x17d   :  { %v14696_v7 = vpop.f32.mrb[80].mxu0 }
 0x17e   :  { %18979 = vst [vmem:[#allocation69_spill] sm:$0xff] %v14696_v7  ;;  %v14698_v13 = vpop.f32.mrb[81].mxu0 }
 0x17f   :  { %18980 = vst [vmem:[#allocation70_spill] sm:$0xff] %v14698_v13  ;;  %v14703_v43 = vpop.f32.mrb[82].mxu0  ;;  %v13592_v13 = vld [vmem:[%s18653_s0 + $0x308] sm:$0xff]  }
 0x180   :  { %18981 = vst [vmem:[#allocation71_spill] sm:$0xff] %v14703_v43  ;;  %v14708_v31 = vpop.f32.mrb[83].mxu0  ;;  %v13593_v43 = vld [vmem:[%s18653_s0 + $0x310] sm:$0xff]  }
 0x181   :  { %18982 = vst [vmem:[#allocation72_spill] sm:$0xff] %v14708_v31 }
 0x182   :  { %12858 = vmatmul.mubr.msk.bf16.gmra.mrb[188].mxu0 %vm1730_vm0, %v13590_v25 }
 0x183   :  { %12861 = vmatprep.mubr.msk.bf16.mxu0 %vm1730_vm0, %v13591_v55 }
 0x185   :  { %v14712_v59 = vpop.f32.mrb[84].mxu0 }
 0x186   :  { %18983 = vst [vmem:[#allocation73_spill] sm:$0xff] %v14712_v59  ;;  %v14714_v49 = vpop.f32.mrb[85].mxu0 }
 0x187   :  { %18984 = vst [vmem:[#allocation74_spill] sm:$0xff] %v14714_v49  ;;  %v14719_v7 = vpop.f32.mrb[86].mxu0  ;;  %v13594_v49 = vld [vmem:[%s18653_s0 + $0x318] sm:$0xff]  }
 0x188   :  { %18985 = vst [vmem:[#allocation75_spill] sm:$0xff] %v14719_v7  ;;  %v14724_v51 = vpop.f32.mrb[87].mxu0  ;;  %v13595_v7 = vld [vmem:[%s18653_s0 + $0x320] sm:$0xff]  }
 0x189   :  { %18986 = vst [vmem:[#allocation76_spill] sm:$0xff] %v14724_v51 }
 0x18a   :  { %12862 = vmatmul.mubr.msk.bf16.gmra.mrb[192].mxu0 %vm1730_vm0, %v13592_v13 }
 0x18b   :  { %12865 = vmatprep.mubr.msk.bf16.mxu0 %vm1730_vm0, %v13593_v43 }
 0x18d   :  { %v14728_v55 = vpop.f32.mrb[88].mxu0 }
 0x18e   :  { %18987 = vst [vmem:[#allocation77_spill] sm:$0xff] %v14728_v55  ;;  %v14730_v25 = vpop.f32.mrb[89].mxu0 }
 0x18f   :  { %18988 = vst [vmem:[#allocation78_spill] sm:$0xff] %v14730_v25  ;;  %v14735_v59 = vpop.f32.mrb[90].mxu0  ;;  %v13596_v25 = vld [vmem:[%s18653_s0 + $0x328] sm:$0xff]  }
 0x190   :  { %18989 = vst [vmem:[#allocation79_spill] sm:$0xff] %v14735_v59  ;;  %v14740_v31 = vpop.f32.mrb[91].mxu0  ;;  %v13597_v59 = vld [vmem:[%s18653_s0 + $0x330] sm:$0xff]  }
 0x191   :  { %18990 = vst [vmem:[#allocation80_spill] sm:$0xff] %v14740_v31 }
 0x192   :  { %12866 = vmatmul.mubr.msk.bf16.gmra.mrb[196].mxu0 %vm1730_vm0, %v13594_v49 }
 0x193   :  { %12869 = vmatprep.mubr.msk.bf16.mxu0 %vm1730_vm0, %v13595_v7 }
 0x195   :  { %v14744_v43 = vpop.f32.mrb[92].mxu0 }
 0x196   :  { %18991 = vst [vmem:[#allocation81_spill] sm:$0xff] %v14744_v43  ;;  %v14746_v13 = vpop.f32.mrb[93].mxu0 }
 0x197   :  { %18992 = vst [vmem:[#allocation82_spill] sm:$0xff] %v14746_v13  ;;  %v14751_v55 = vpop.f32.mrb[94].mxu0  ;;  %v13598_v13 = vld [vmem:[%s18653_s0 + $0x338] sm:$0xff]  }
 0x198   :  { %18993 = vst [vmem:[#allocation83_spill] sm:$0xff] %v14751_v55  ;;  %v14756_v51 = vpop.f32.mrb[95].mxu0  ;;  %v13599_v55 = vld [vmem:[%s18653_s0 + $0x340] sm:$0xff]  }
 0x199   :  { %18994 = vst [vmem:[#allocation84_spill] sm:$0xff] %v14756_v51 }
 0x19a   :  { %12870 = vmatmul.mubr.msk.bf16.gmra.mrb[200].mxu0 %vm1730_vm0, %v13596_v25 }
 0x19b   :  { %12873 = vmatprep.mubr.msk.bf16.mxu0 %vm1730_vm0, %v13597_v59 }
 0x19d   :  { %v14760_v7 = vpop.f32.mrb[96].mxu0 }
 0x19e   :  { %18995 = vst [vmem:[#allocation85_spill] sm:$0xff] %v14760_v7  ;;  %v14762_v49 = vpop.f32.mrb[97].mxu0 }
 0x19f   :  { %18996 = vst [vmem:[#allocation86_spill] sm:$0xff] %v14762_v49  ;;  %v14767_v43 = vpop.f32.mrb[98].mxu0  ;;  %v13600_v49 = vld [vmem:[%s18653_s0 + $0x348] sm:$0xff]  }
 0x1a0   :  { %18997 = vst [vmem:[#allocation87_spill] sm:$0xff] %v14767_v43  ;;  %v14772_v31 = vpop.f32.mrb[99].mxu0  ;;  %v13601_v43 = vld [vmem:[%s18653_s0 + $0x350] sm:$0xff]  }
 0x1a1   :  { %18998 = vst [vmem:[#allocation88_spill] sm:$0xff] %v14772_v31 }
 0x1a2   :  { %12874 = vmatmul.mubr.msk.bf16.gmra.mrb[204].mxu0 %vm1730_vm0, %v13598_v13 }
 0x1a3   :  { %12877 = vmatprep.mubr.msk.bf16.mxu0 %vm1730_vm0, %v13599_v55 }
 0x1a5   :  { %v14776_v59 = vpop.f32.mrb[100].mxu0 }
 0x1a6   :  { %18999 = vst [vmem:[#allocation89_spill] sm:$0xff] %v14776_v59  ;;  %v14778_v25 = vpop.f32.mrb[101].mxu0 }
 0x1a7   :  { %19000 = vst [vmem:[#allocation90_spill] sm:$0xff] %v14778_v25  ;;  %v14783_v7 = vpop.f32.mrb[102].mxu0  ;;  %v13602_v25 = vld [vmem:[%s18653_s0 + $0x358] sm:$0xff]  }
 0x1a8   :  { %19001 = vst [vmem:[#allocation91_spill] sm:$0xff] %v14783_v7  ;;  %v14788_v51 = vpop.f32.mrb[103].mxu0  ;;  %v13603_v7 = vld [vmem:[%s18653_s0 + $0x360] sm:$0xff]  }
 0x1a9   :  { %19002 = vst [vmem:[#allocation92_spill] sm:$0xff] %v14788_v51 }
 0x1aa   :  { %12878 = vmatmul.mubr.msk.bf16.gmra.mrb[208].mxu0 %vm1730_vm0, %v13600_v49 }
 0x1ab   :  { %12881 = vmatprep.mubr.msk.bf16.mxu0 %vm1730_vm0, %v13601_v43 }
 0x1ad   :  { %v14792_v55 = vpop.f32.mrb[104].mxu0 }
 0x1ae   :  { %19003 = vst [vmem:[#allocation93_spill] sm:$0xff] %v14792_v55  ;;  %v14794_v13 = vpop.f32.mrb[105].mxu0 }
 0x1af   :  { %19004 = vst [vmem:[#allocation94_spill] sm:$0xff] %v14794_v13  ;;  %v14799_v59 = vpop.f32.mrb[106].mxu0  ;;  %v13604_v13 = vld [vmem:[%s18653_s0 + $0x368] sm:$0xff]  }
 0x1b0   :  { %19005 = vst [vmem:[#allocation95_spill] sm:$0xff] %v14799_v59  ;;  %v14804_v31 = vpop.f32.mrb[107].mxu0  ;;  %v13605_v59 = vld [vmem:[%s18653_s0 + $0x370] sm:$0xff]  }
 0x1b1   :  { %19006 = vst [vmem:[#allocation96_spill] sm:$0xff] %v14804_v31 }
 0x1b2   :  { %12882 = vmatmul.mubr.msk.bf16.gmra.mrb[212].mxu0 %vm1730_vm0, %v13602_v25 }
 0x1b3   :  { %12885 = vmatprep.mubr.msk.bf16.mxu0 %vm1730_vm0, %v13603_v7 }
 0x1b5   :  { %v14808_v43 = vpop.f32.mrb[108].mxu0 }
 0x1b6   :  { %19007 = vst [vmem:[#allocation97_spill] sm:$0xff] %v14808_v43  ;;  %v14810_v49 = vpop.f32.mrb[109].mxu0 }
 0x1b7   :  { %19008 = vst [vmem:[#allocation98_spill] sm:$0xff] %v14810_v49  ;;  %v14815_v55 = vpop.f32.mrb[110].mxu0  ;;  %v13606_v49 = vld [vmem:[%s18653_s0 + $0x378] sm:$0xff]  }
 0x1b8   :  { %19009 = vst [vmem:[#allocation99_spill] sm:$0xff] %v14815_v55  ;;  %v14820_v51 = vpop.f32.mrb[111].mxu0  ;;  %v13607_v55 = vld [vmem:[%s18653_s0 + $0x380] sm:$0xff]  }
 0x1b9   :  { %19010 = vst [vmem:[#allocation100_spill] sm:$0xff] %v14820_v51 }
 0x1ba   :  { %12886 = vmatmul.mubr.msk.bf16.gmra.mrb[216].mxu0 %vm1730_vm0, %v13604_v13 }
 0x1bb   :  { %12889 = vmatprep.mubr.msk.bf16.mxu0 %vm1730_vm0, %v13605_v59 }
 0x1bd   :  { %v14824_v7 = vpop.f32.mrb[112].mxu0 }
 0x1be   :  { %19011 = vst [vmem:[#allocation101_spill] sm:$0xff] %v14824_v7  ;;  %v14826_v25 = vpop.f32.mrb[113].mxu0 }
 0x1bf   :  { %19012 = vst [vmem:[#allocation102_spill] sm:$0xff] %v14826_v25  ;;  %v14831_v43 = vpop.f32.mrb[114].mxu0 }
 0x1c0   :  { %19013 = vst [vmem:[#allocation103_spill] sm:$0xff] %v14831_v43  ;;  %v14836_v31 = vpop.f32.mrb[115].mxu0 }
 0x1c1   :  { %19014 = vst [vmem:[#allocation104_spill] sm:$0xff] %v14836_v31 }
 0x1c2   :  { %12890 = vmatmul.mubr.msk.bf16.gmra.mrb[220].mxu0 %vm1730_vm0, %v13606_v49 }
 0x1c3   :  { %12893 = vmatprep.mubr.msk.bf16.mxu0 %vm1730_vm0, %v13607_v55 }
 0x1c5   :  { %v14840_v59 = vpop.f32.mrb[116].mxu0 }
 0x1c6   :  { %19015 = vst [vmem:[#allocation105_spill] sm:$0xff] %v14840_v59 }
 0x1c7   :  { %14 = vsyncpa [#allocation4], 0  ;;  %v14842_v13 = vpop.f32.mrb[117].mxu0  ;;  %v13608_v25 = vld [vmem:[%s18653_s0 + $0x388] sm:$0xff]   ;;  %v13609_v7 = vld [vmem:[%s18653_s0 + $0x390] sm:$0xff]   ;;  %vm14098_vm1 = vmmov 0  }
 0x1c8   :  { %19016 = vst [vmem:[#allocation106_spill] sm:$0xff] %v14842_v13  ;;  %v14847_v43 = vpop.f32.mrb[118].mxu0  ;;  %v13675_v21 = vld [vmem:[%s18653_s0 + $0x5a0] sm:$0xff]   ;;  %v13677_v3 = vld [vmem:[%s18653_s0 + $0x5b0] sm:$0xff]   ;;  %s14099_s23 = smov [#allocation3]  }
 0x1c9   :  { %19017 = vst [vmem:[#allocation107_spill] sm:$0xff] %v14847_v43  ;;  %v14852_v31 = vpop.f32.mrb[119].mxu0  ;;  %v13610_v43 = vld [vmem:[%s18653_s0 + $0x398] sm:$0xff]   ;;  %v13679_v54 = vld [vmem:[%s18653_s0 + $0x5c0] sm:$0xff]   ;;  %v13681_v48 = vld [vmem:[%s18653_s0 + $0x5d0] sm:$0xff]   ;;  %s10368_s24 = sshll.u32 %s14099_s23, 4  ;;  %s10369_s24 = int_to_ptr.vmem [resolvable:$true] %s10368_s24 }
 0x1ca   :  { %19018 = vst [vmem:[#allocation108_spill] sm:$0xff] %v14852_v31  ;;  %12894 = vmatmul.mubr.msk.bf16.gmra.mrb[224].mxu0 %vm1730_vm0, %v13608_v25  ;;  %v13612_v25 = vld [vmem:[%s18653_s0 + $0x3a8] sm:$0xff]   ;;  %v13683_v42 = vld [vmem:[%s18653_s0 + $0x5e0] sm:$0xff]   ;;  %v13685_v36 = vld [vmem:[%s18653_s0 + $0x5f0] sm:$0xff]   ;;  %s14072_s25 = scalar_lea.vmem %s10369_s24, 32  ;;  %p14077_p1 = scmp.lt.s32.totalorder %s10369_s24, %s10369_s24 }
 0x1cb   :  { %12897 = vmatprep.mubr.msk.bf16.mxu0 %vm1730_vm0, %v13609_v7  ;;  %v13611_v7 = vld [vmem:[%s18653_s0 + $0x3a0] sm:$0xff]   ;;  %p14073_p0 = scmp.ne.s32.totalorder %s10369_s24, %s14072_s25  ;;  %p14078_p2 = scmp.lt.s32.totalorder %s14072_s25, %s14072_s25 }
 0x1cd   :  { %v14856_v55 = vpop.f32.mrb[120].mxu0  ;;  %p14079_p3 = por %p14078_p2, %p14077_p1 }
 0x1ce   :  { %19019 = vst [vmem:[#allocation109_spill] sm:$0xff] %v14856_v55  ;;  %v14860_v13 = vpop.f32.mrb[121].mxu0 }
 0x1cf   :  { %19020 = vst [vmem:[#allocation110_spill] sm:$0xff] %v14860_v13  ;;  %v14867_v51 = vpop.f32.mrb[122].mxu0  ;;  %p14080_p4 = pnand %p14079_p3, %p14073_p0 }
 0x1d0   :  { %19021 = vst [vmem:[#allocation111_spill] sm:$0xff] %v14867_v51  ;;  %v14874_v31 = vpop.f32.mrb[123].mxu0 }
 0x1d2   :  { %12898 = vmatmul.mubr.msk.bf16.gmra.mrb[228].mxu0 %vm1730_vm0, %v13610_v43  ;;  %v13613_v43 = vld [vmem:[%s18653_s0 + $0x3b0] sm:$0xff]  }
 0x1d3   :  { %12901 = vmatprep.mubr.msk.bf16.mxu0 %vm1730_vm0, %v13611_v7  ;;  %v13614_v7 = vld [vmem:[%s18653_s0 + $0x3b8] sm:$0xff]  }
 0x1d5   :  { %v14880_v55 = vpop.f32.mrb[124].mxu0 }
 0x1d6   :  { %19022 = vst [vmem:[#allocation112_spill] sm:$0xff] %v14880_v55  ;;  %v14884_v13 = vpop.f32.mrb[125].mxu0  ;;  %v19297_v30 = vld [vmem:[#allocation110_spill] sm:$0xff] }
 0x1d7   :  { %19023 = vst [vmem:[#allocation113_spill] sm:$0xff] %v14884_v13  ;;  %v14891_v60 = vpop.f32.mrb[126].mxu0 }
 0x1d8   :  { %19024 = vst [vmem:[#allocation114_spill] sm:$0xff] %v14891_v60  ;;  %v14898_v49 = vpop.f32.mrb[127].mxu0 }
 0x1da   :  { %12902 = vmatmul.mubr.msk.bf16.gmra.mrb[232].mxu0 %vm1730_vm0, %v13612_v25  ;;  %v13615_v25 = vld [vmem:[%s18653_s0 + $0x3c0] sm:$0xff]  }
 0x1db   :  { %12905 = vmatprep.mubr.msk.bf16.mxu0 %vm1730_vm0, %v13613_v43  ;;  %v13616_v43 = vld [vmem:[%s18653_s0 + $0x3c8] sm:$0xff]  }
 0x1dd   :  { %v14904_v55 = vpop.f32.mrb[128].mxu0 }
 0x1de   :  { %19025 = vst [vmem:[#allocation115_spill] sm:$0xff] %v14904_v55  ;;  %v14908_v13 = vpop.f32.mrb[129].mxu0 }
 0x1df   :  { %19026 = vst [vmem:[#allocation116_spill] sm:$0xff] %v14908_v13  ;;  %v14915_v2 = vpop.f32.mrb[130].mxu0 }
 0x1e0   :  { %19027 = vst [vmem:[#allocation117_spill] sm:$0xff] %v14915_v2  ;;  %v14922_v59 = vpop.f32.mrb[131].mxu0 }
 0x1e2   :  { %12906 = vmatmul.mubr.msk.bf16.gmra.mrb[236].mxu0 %vm1730_vm0, %v13614_v7  ;;  %v13617_v7 = vld [vmem:[%s18653_s0 + $0x3d0] sm:$0xff]  }
 0x1e3   :  { %12909 = vmatprep.mubr.msk.bf16.mxu0 %vm1730_vm0, %v13615_v25  ;;  %v13618_v25 = vld [vmem:[%s18653_s0 + $0x3d8] sm:$0xff]  }
 0x1e5   :  { %v14928_v55 = vpop.f32.mrb[132].mxu0 }
 0x1e6   :  { %19028 = vst [vmem:[#allocation118_spill] sm:$0xff] %v14928_v55  ;;  %v14932_v13 = vpop.f32.mrb[133].mxu0 }
 0x1e7   :  { %19029 = vst [vmem:[#allocation119_spill] sm:$0xff] %v14932_v13  ;;  %v14939_v8 = vpop.f32.mrb[134].mxu0 }
 0x1e8   :  { %19030 = vst [vmem:[#allocation120_spill] sm:$0xff] %v14939_v8  ;;  %v14946_v51 = vpop.f32.mrb[135].mxu0 }
 0x1ea   :  { %12910 = vmatmul.mubr.msk.bf16.gmra.mrb[240].mxu0 %vm1730_vm0, %v13616_v43  ;;  %v13619_v43 = vld [vmem:[%s18653_s0 + $0x3e0] sm:$0xff]  }
 0x1eb   :  { %12913 = vmatprep.mubr.msk.bf16.mxu0 %vm1730_vm0, %v13617_v7  ;;  %v13620_v7 = vld [vmem:[%s18653_s0 + $0x3e8] sm:$0xff]  }
 0x1ed   :  { %v14952_v55 = vpop.f32.mrb[136].mxu0 }
 0x1ee   :  { %19031 = vst [vmem:[#allocation121_spill] sm:$0xff] %v14952_v55  ;;  %v14956_v13 = vpop.f32.mrb[137].mxu0 }
 0x1ef   :  { %19032 = vst [vmem:[#allocation122_spill] sm:$0xff] %v14956_v13  ;;  %v14963_v14 = vpop.f32.mrb[138].mxu0 }
 0x1f0   :  { %19033 = vst [vmem:[#allocation123_spill] sm:$0xff] %v14963_v14  ;;  %v14970_v60 = vpop.f32.mrb[139].mxu0 }
 0x1f2   :  { %12914 = vmatmul.mubr.msk.bf16.gmra.mrb[244].mxu0 %vm1730_vm0, %v13618_v25  ;;  %v13621_v25 = vld [vmem:[%s18653_s0 + $0x3f0] sm:$0xff]  }
 0x1f3   :  { %12917 = vmatprep.mubr.msk.bf16.mxu0 %vm1730_vm0, %v13619_v43  ;;  %v13622_v43 = vld [vmem:[%s18653_s0 + $0x3f8] sm:$0xff]  }
 0x1f5   :  { %v14976_v55 = vpop.f32.mrb[140].mxu0 }
 0x1f6   :  { %19034 = vst [vmem:[#allocation124_spill] sm:$0xff] %v14976_v55  ;;  %v14980_v13 = vpop.f32.mrb[141].mxu0 }
 0x1f7   :  { %19035 = vst [vmem:[#allocation125_spill] sm:$0xff] %v14980_v13  ;;  %v14987_v20 = vpop.f32.mrb[142].mxu0 }
 0x1f8   :  { %19036 = vst [vmem:[#allocation126_spill] sm:$0xff] %v14987_v20  ;;  %v14994_v2 = vpop.f32.mrb[143].mxu0 }
 0x1f9   :  { %19037 = vst [vmem:[#allocation127_spill] sm:$0xff] %v14994_v2 }
 0x1fa   :  { %12918 = vmatmul.mubr.msk.bf16.gmra.mrb[248].mxu0 %vm1730_vm0, %v13620_v7  ;;  %v13623_v7 = vld [vmem:[%s18653_s0 + $0x400] sm:$0xff]  }
 0x1fb   :  { %12921 = vmatprep.mubr.msk.bf16.mxu0 %vm1730_vm0, %v13621_v25  ;;  %v13624_v25 = vld [vmem:[%s18653_s0 + $0x408] sm:$0xff]  }
 0x1fd   :  { %v15000_v55 = vpop.f32.mrb[144].mxu0 }
 0x1fe   :  { %19038 = vst [vmem:[#allocation128_spill] sm:$0xff] %v15000_v55  ;;  %v15004_v13 = vpop.f32.mrb[145].mxu0 }
 0x1ff   :  { %19039 = vst [vmem:[#allocation129_spill] sm:$0xff] %v15004_v13  ;;  %v15011_v26 = vpop.f32.mrb[146].mxu0 }
 0x200   :  { %19040 = vst [vmem:[#allocation130_spill] sm:$0xff] %v15011_v26  ;;  %v15018_v8 = vpop.f32.mrb[147].mxu0 }
 0x201   :  { %19041 = vst [vmem:[#allocation131_spill] sm:$0xff] %v15018_v8 }
 0x202   :  { %12922 = vmatmul.mubr.msk.bf16.gmra.mrb[252].mxu0 %vm1730_vm0, %v13622_v43  ;;  %v13625_v43 = vld [vmem:[%s18653_s0 + $0x410] sm:$0xff]  }
 0x203   :  { %12925 = vmatprep.mubr.msk.bf16.mxu0 %vm1730_vm0, %v13623_v7  ;;  %v13626_v7 = vld [vmem:[%s18653_s0 + $0x418] sm:$0xff]  }
 0x205   :  { %v15024_v55 = vpop.f32.mrb[148].mxu0 }
 0x206   :  { %19042 = vst [vmem:[#allocation132_spill] sm:$0xff] %v15024_v55  ;;  %v15028_v13 = vpop.f32.mrb[149].mxu0 }
 0x207   :  { %19043 = vst [vmem:[#allocation133_spill] sm:$0xff] %v15028_v13  ;;  %v15035_v32 = vpop.f32.mrb[150].mxu0 }
 0x208   :  { %19044 = vst [vmem:[#allocation134_spill] sm:$0xff] %v15035_v32  ;;  %v15042_v14 = vpop.f32.mrb[151].mxu0 }
 0x209   :  { %19045 = vst [vmem:[#allocation135_spill] sm:$0xff] %v15042_v14  ;;  %v13684_v14 = vld [vmem:[%s18653_s0 + $0x5e8] sm:$0xff]  }
 0x20a   :  { %12926 = vmatmul.mubr.msk.bf16.gmra.mrb[0].mxu0 %vm1730_vm0, %v13624_v25  ;;  %v13627_v25 = vld [vmem:[%s18653_s0 + $0x420] sm:$0xff]  }
 0x20b   :  { %12929 = vmatprep.mubr.msk.bf16.mxu0 %vm1730_vm0, %v13625_v43  ;;  %v13628_v43 = vld [vmem:[%s18653_s0 + $0x428] sm:$0xff]  }
 0x20d   :  { %v15048_v55 = vpop.f32.mrb[152].mxu0 }
 0x20e   :  { %19046 = vst [vmem:[#allocation136_spill] sm:$0xff] %v15048_v55  ;;  %v15052_v13 = vpop.f32.mrb[153].mxu0 }
 0x20f   :  { %19047 = vst [vmem:[#allocation137_spill] sm:$0xff] %v15052_v13  ;;  %v15059_v38 = vpop.f32.mrb[154].mxu0 }
 0x210   :  { %19048 = vst [vmem:[#allocation138_spill] sm:$0xff] %v15059_v38  ;;  %v15066_v20 = vpop.f32.mrb[155].mxu0 }
 0x211   :  { %19049 = vst [vmem:[#allocation139_spill] sm:$0xff] %v15066_v20  ;;  %v13682_v20 = vld [vmem:[%s18653_s0 + $0x5d8] sm:$0xff]  }
 0x212   :  { %12930 = vmatmul.mubr.msk.bf16.gmra.mrb[4].mxu0 %vm1730_vm0, %v13626_v7  ;;  %v13629_v7 = vld [vmem:[%s18653_s0 + $0x430] sm:$0xff]  }
 0x213   :  { %12933 = vmatprep.mubr.msk.bf16.mxu0 %vm1730_vm0, %v13627_v25  ;;  %v13630_v25 = vld [vmem:[%s18653_s0 + $0x438] sm:$0xff]  }
 0x215   :  { %v15072_v55 = vpop.f32.mrb[156].mxu0 }
 0x216   :  { %19050 = vst [vmem:[#allocation140_spill] sm:$0xff] %v15072_v55  ;;  %v15076_v13 = vpop.f32.mrb[157].mxu0 }
 0x217   :  { %19051 = vst [vmem:[#allocation141_spill] sm:$0xff] %v15076_v13  ;;  %v15083_v44 = vpop.f32.mrb[158].mxu0 }
 0x218   :  { %19052 = vst [vmem:[#allocation142_spill] sm:$0xff] %v15083_v44  ;;  %v15090_v26 = vpop.f32.mrb[159].mxu0 }
 0x219   :  { %19053 = vst [vmem:[#allocation143_spill] sm:$0xff] %v15090_v26  ;;  %v13680_v26 = vld [vmem:[%s18653_s0 + $0x5c8] sm:$0xff]  }
 0x21a   :  { %12934 = vmatmul.mubr.msk.bf16.gmra.mrb[8].mxu0 %vm1730_vm0, %v13628_v43  ;;  %v13631_v43 = vld [vmem:[%s18653_s0 + $0x440] sm:$0xff]  }
 0x21b   :  { %12937 = vmatprep.mubr.msk.bf16.mxu0 %vm1730_vm0, %v13629_v7  ;;  %v13632_v7 = vld [vmem:[%s18653_s0 + $0x448] sm:$0xff]  }
 0x21d   :  { %v15096_v55 = vpop.f32.mrb[160].mxu0 }
 0x21e   :  { %19054 = vst [vmem:[#allocation144_spill] sm:$0xff] %v15096_v55  ;;  %v15100_v13 = vpop.f32.mrb[161].mxu0 }
 0x21f   :  { %19055 = vst [vmem:[#allocation145_spill] sm:$0xff] %v15100_v13  ;;  %v15107_v50 = vpop.f32.mrb[162].mxu0 }
 0x220   :  { %19056 = vst [vmem:[#allocation146_spill] sm:$0xff] %v15107_v50  ;;  %v15114_v32 = vpop.f32.mrb[163].mxu0 }
 0x221   :  { %19057 = vst [vmem:[#allocation147_spill] sm:$0xff] %v15114_v32  ;;  %v13678_v32 = vld [vmem:[%s18653_s0 + $0x5b8] sm:$0xff]  }
 0x222   :  { %12938 = vmatmul.mubr.msk.bf16.gmra.mrb[12].mxu0 %vm1730_vm0, %v13630_v25  ;;  %v13633_v25 = vld [vmem:[%s18653_s0 + $0x450] sm:$0xff]  }
 0x223   :  { %12941 = vmatprep.mubr.msk.bf16.mxu0 %vm1730_vm0, %v13631_v43  ;;  %v13634_v43 = vld [vmem:[%s18653_s0 + $0x458] sm:$0xff]  }
 0x225   :  { %v15120_v55 = vpop.f32.mrb[164].mxu0 }
 0x226   :  { %19058 = vst [vmem:[#allocation148_spill] sm:$0xff] %v15120_v55  ;;  %v15124_v13 = vpop.f32.mrb[165].mxu0 }
 0x227   :  { %19059 = vst [vmem:[#allocation149_spill] sm:$0xff] %v15124_v13  ;;  %v15131_v56 = vpop.f32.mrb[166].mxu0 }
 0x228   :  { %19060 = vst [vmem:[#allocation150_spill] sm:$0xff] %v15131_v56  ;;  %v15138_v38 = vpop.f32.mrb[167].mxu0 }
 0x229   :  { %19061 = vst [vmem:[#allocation151_spill] sm:$0xff] %v15138_v38  ;;  %v13676_v38 = vld [vmem:[%s18653_s0 + $0x5a8] sm:$0xff]  }
 0x22a   :  { %12942 = vmatmul.mubr.msk.bf16.gmra.mrb[16].mxu0 %vm1730_vm0, %v13632_v7  ;;  %v13635_v7 = vld [vmem:[%s18653_s0 + $0x460] sm:$0xff]  }
 0x22b   :  { %12945 = vmatprep.mubr.msk.bf16.mxu0 %vm1730_vm0, %v13633_v25  ;;  %v13636_v25 = vld [vmem:[%s18653_s0 + $0x468] sm:$0xff]  }
 0x22d   :  { %v15144_v55 = vpop.f32.mrb[168].mxu0 }
 0x22e   :  { %19062 = vst [vmem:[#allocation152_spill] sm:$0xff] %v15144_v55  ;;  %v15148_v13 = vpop.f32.mrb[169].mxu0 }
 0x22f   :  { %19063 = vst [vmem:[#allocation153_spill] sm:$0xff] %v15148_v13  ;;  %v15155_v9 = vpop.f32.mrb[170].mxu0 }
 0x230   :  { %19064 = vst [vmem:[#allocation154_spill] sm:$0xff] %v15155_v9  ;;  %v15162_v44 = vpop.f32.mrb[171].mxu0 }
 0x231   :  { %19065 = vst [vmem:[#allocation155_spill] sm:$0xff] %v15162_v44 }
 0x232   :  { %12946 = vmatmul.mubr.msk.bf16.gmra.mrb[20].mxu0 %vm1730_vm0, %v13634_v43  ;;  %v13637_v43 = vld [vmem:[%s18653_s0 + $0x470] sm:$0xff]  }
 0x233   :  { %12949 = vmatprep.mubr.msk.bf16.mxu0 %vm1730_vm0, %v13635_v7  ;;  %v13638_v7 = vld [vmem:[%s18653_s0 + $0x478] sm:$0xff]  }
 0x235   :  { %v15168_v55 = vpop.f32.mrb[172].mxu0 }
 0x236   :  { %19066 = vst [vmem:[#allocation156_spill] sm:$0xff] %v15168_v55  ;;  %v15172_v13 = vpop.f32.mrb[173].mxu0  ;;  %v13640_v55 = vld [vmem:[%s18653_s0 + $0x488] sm:$0xff]  }
 0x237   :  { %19067 = vst [vmem:[#allocation157_spill] sm:$0xff] %v15172_v13  ;;  %v15179_v27 = vpop.f32.mrb[174].mxu0 }
 0x238   :  { %19068 = vst [vmem:[#allocation158_spill] sm:$0xff] %v15179_v27  ;;  %v15186_v50 = vpop.f32.mrb[175].mxu0 }
 0x239   :  { %19069 = vst [vmem:[#allocation159_spill] sm:$0xff] %v15186_v50 }
 0x23a   :  { %12950 = vmatmul.mubr.msk.bf16.gmra.mrb[24].mxu0 %vm1730_vm0, %v13636_v25  ;;  %v13639_v25 = vld [vmem:[%s18653_s0 + $0x480] sm:$0xff]  }
 0x23b   :  { %12953 = vmatprep.mubr.msk.bf16.mxu0 %vm1730_vm0, %v13637_v43 }
 0x23d   :  { %v15192_v37 = vpop.f32.mrb[176].mxu0 }
 0x23e   :  { %19071 = vst [vmem:[#allocation160_spill] sm:$0xff] %v15192_v37  ;;  %v15196_v39 = vpop.f32.mrb[177].mxu0  ;;  %v13642_v37 = vld [vmem:[%s18653_s0 + $0x498] sm:$0xff]  }
 0x23f   :  { %19073 = vst [vmem:[#allocation161_spill] sm:$0xff] %v15196_v39  ;;  %v15203_v44 = vpop.f32.mrb[178].mxu0 }
 0x240   :  { %19075 = vst [vmem:[#allocation162_spill] sm:$0xff] %v15203_v44  ;;  %v15210_v50 = vpop.f32.mrb[179].mxu0 }
 0x241   :  { %19077 = vst [vmem:[#allocation163_spill] sm:$0xff] %v15210_v50 }
 0x242   :  { %12954 = vmatmul.mubr.msk.bf16.gmra.mrb[28].mxu0 %vm1730_vm0, %v13638_v7  ;;  %v13641_v7 = vld [vmem:[%s18653_s0 + $0x490] sm:$0xff]  }
 0x243   :  { %12957 = vmatprep.mubr.msk.bf16.mxu0 %vm1730_vm0, %v13639_v25 }
 0x245   :  { %v15216_v9 = vpop.f32.mrb[180].mxu0 }
 0x246   :  { %19079 = vst [vmem:[#allocation164_spill] sm:$0xff] %v15216_v9  ;;  %v15220_v27 = vpop.f32.mrb[181].mxu0  ;;  %v13644_v9 = vld [vmem:[%s18653_s0 + $0x4a8] sm:$0xff]  }
 0x247   :  { %19081 = vst [vmem:[#allocation165_spill] sm:$0xff] %v15220_v27  ;;  %v15227_v56 = vpop.f32.mrb[182].mxu0 }
 0x248   :  { %19083 = vst [vmem:[#allocation166_spill] sm:$0xff] %v15227_v56  ;;  %v15234_v50 = vpop.f32.mrb[183].mxu0 }
 0x249   :  { %19085 = vst [vmem:[#allocation167_spill] sm:$0xff] %v15234_v50 }
 0x24a   :  { %12958 = vmatmul.mubr.msk.bf16.gmra.mrb[32].mxu0 %vm1730_vm0, %v13640_v55  ;;  %v13643_v55 = vld [vmem:[%s18653_s0 + $0x4a0] sm:$0xff]  }
 0x24b   :  { %12961 = vmatprep.mubr.msk.bf16.mxu0 %vm1730_vm0, %v13641_v7 }
 0x24d   :  { %v15240_v45 = vpop.f32.mrb[184].mxu0 }
 0x24e   :  { %19087 = vst [vmem:[#allocation168_spill] sm:$0xff] %v15240_v45  ;;  %v15244_v44 = vpop.f32.mrb[185].mxu0  ;;  %v13646_v45 = vld [vmem:[%s18653_s0 + $0x4b8] sm:$0xff]  }
 0x24f   :  { %19089 = vst [vmem:[#allocation169_spill] sm:$0xff] %v15244_v44  ;;  %v15251_v13 = vpop.f32.mrb[186].mxu0 }
 0x250   :  { %19091 = vst [vmem:[#allocation170_spill] sm:$0xff] %v15251_v13  ;;  %v15258_v50 = vpop.f32.mrb[187].mxu0 }
 0x251   :  { %19093 = vst [vmem:[#allocation171_spill] sm:$0xff] %v15258_v50 }
 0x252   :  { %12962 = vmatmul.mubr.msk.bf16.gmra.mrb[36].mxu0 %vm1730_vm0, %v13642_v37  ;;  %v13645_v37 = vld [vmem:[%s18653_s0 + $0x4b0] sm:$0xff]  }
 0x253   :  { %12965 = vmatprep.mubr.msk.bf16.mxu0 %vm1730_vm0, %v13643_v55 }
 0x255   :  { %v15264_v43 = vpop.f32.mrb[188].mxu0 }
 0x256   :  { %19095 = vst [vmem:[#allocation172_spill] sm:$0xff] %v15264_v43  ;;  %v15268_v56 = vpop.f32.mrb[189].mxu0  ;;  %v13648_v43 = vld [vmem:[%s18653_s0 + $0x4c8] sm:$0xff]  }
 0x257   :  { %19097 = vst [vmem:[#allocation173_spill] sm:$0xff] %v15268_v56  ;;  %v15275_v39 = vpop.f32.mrb[190].mxu0 }
 0x258   :  { %19099 = vst [vmem:[#allocation174_spill] sm:$0xff] %v15275_v39  ;;  %v15282_v50 = vpop.f32.mrb[191].mxu0 }
 0x259   :  { %19101 = vst [vmem:[#allocation175_spill] sm:$0xff] %v15282_v50 }
 0x25a   :  { %12966 = vmatmul.mubr.msk.bf16.gmra.mrb[40].mxu0 %vm1730_vm0, %v13644_v9  ;;  %v13647_v9 = vld [vmem:[%s18653_s0 + $0x4c0] sm:$0xff]  }
 0x25b   :  { %12969 = vmatprep.mubr.msk.bf16.mxu0 %vm1730_vm0, %v13645_v37 }
 0x25d   :  { %v15288_v25 = vpop.f32.mrb[192].mxu0 }
 0x25e   :  { %19103 = vst [vmem:[#allocation176_spill] sm:$0xff] %v15288_v25  ;;  %v15292_v13 = vpop.f32.mrb[193].mxu0  ;;  %v13650_v25 = vld [vmem:[%s18653_s0 + $0x4d8] sm:$0xff]  }
 0x25f   :  { %19105 = vst [vmem:[#allocation177_spill] sm:$0xff] %v15292_v13  ;;  %v15299_v27 = vpop.f32.mrb[194].mxu0 }
 0x260   :  { %19107 = vst [vmem:[#allocation178_spill] sm:$0xff] %v15299_v27  ;;  %v15306_v50 = vpop.f32.mrb[195].mxu0 }
 0x261   :  { %19109 = vst [vmem:[#allocation179_spill] sm:$0xff] %v15306_v50 }
 0x262   :  { %12970 = vmatmul.mubr.msk.bf16.gmra.mrb[44].mxu0 %vm1730_vm0, %v13646_v45  ;;  %v13649_v45 = vld [vmem:[%s18653_s0 + $0x4d0] sm:$0xff]  }
 0x263   :  { %12973 = vmatprep.mubr.msk.bf16.mxu0 %vm1730_vm0, %v13647_v9 }
 0x265   :  { %v15312_v7 = vpop.f32.mrb[196].mxu0 }
 0x266   :  { %19111 = vst [vmem:[#allocation180_spill] sm:$0xff] %v15312_v7  ;;  %v15316_v39 = vpop.f32.mrb[197].mxu0  ;;  %v13652_v7 = vld [vmem:[%s18653_s0 + $0x4e8] sm:$0xff]  }
 0x267   :  { %19113 = vst [vmem:[#allocation181_spill] sm:$0xff] %v15316_v39  ;;  %v15323_v44 = vpop.f32.mrb[198].mxu0 }
 0x268   :  { %19115 = vst [vmem:[#allocation182_spill] sm:$0xff] %v15323_v44  ;;  %v15330_v50 = vpop.f32.mrb[199].mxu0 }
 0x269   :  { %19117 = vst [vmem:[#allocation183_spill] sm:$0xff] %v15330_v50 }
 0x26a   :  { %12974 = vmatmul.mubr.msk.bf16.gmra.mrb[48].mxu0 %vm1730_vm0, %v13648_v43  ;;  %v13651_v43 = vld [vmem:[%s18653_s0 + $0x4e0] sm:$0xff]  }
 0x26b   :  { %12977 = vmatprep.mubr.msk.bf16.mxu0 %vm1730_vm0, %v13649_v45 }
 0x26d   :  { %v15336_v55 = vpop.f32.mrb[200].mxu0 }
 0x26e   :  { %19119 = vst [vmem:[#allocation184_spill] sm:$0xff] %v15336_v55  ;;  %v15340_v27 = vpop.f32.mrb[201].mxu0  ;;  %v13654_v55 = vld [vmem:[%s18653_s0 + $0x4f8] sm:$0xff]  }
 0x26f   :  { %19121 = vst [vmem:[#allocation185_spill] sm:$0xff] %v15340_v27  ;;  %v15347_v56 = vpop.f32.mrb[202].mxu0 }
 0x270   :  { %19123 = vst [vmem:[#allocation186_spill] sm:$0xff] %v15347_v56  ;;  %v15354_v50 = vpop.f32.mrb[203].mxu0 }
 0x271   :  { %19125 = vst [vmem:[#allocation187_spill] sm:$0xff] %v15354_v50 }
 0x272   :  { %12978 = vmatmul.mubr.msk.bf16.gmra.mrb[52].mxu0 %vm1730_vm0, %v13650_v25  ;;  %v13653_v25 = vld [vmem:[%s18653_s0 + $0x4f0] sm:$0xff]  }
 0x273   :  { %12981 = vmatprep.mubr.msk.bf16.mxu0 %vm1730_vm0, %v13651_v43 }
 0x275   :  { %v15360_v37 = vpop.f32.mrb[204].mxu0 }
 0x276   :  { %19127 = vst [vmem:[#allocation188_spill] sm:$0xff] %v15360_v37  ;;  %v15364_v44 = vpop.f32.mrb[205].mxu0  ;;  %v13656_v37 = vld [vmem:[%s18653_s0 + $0x508] sm:$0xff]  }
 0x277   :  { %19129 = vst [vmem:[#allocation189_spill] sm:$0xff] %v15364_v44  ;;  %v15371_v13 = vpop.f32.mrb[206].mxu0 }
 0x278   :  { %19131 = vst [vmem:[#allocation190_spill] sm:$0xff] %v15371_v13  ;;  %v15378_v50 = vpop.f32.mrb[207].mxu0 }
 0x279   :  { %19133 = vst [vmem:[#allocation191_spill] sm:$0xff] %v15378_v50 }
 0x27a   :  { %12982 = vmatmul.mubr.msk.bf16.gmra.mrb[56].mxu0 %vm1730_vm0, %v13652_v7  ;;  %v13655_v7 = vld [vmem:[%s18653_s0 + $0x500] sm:$0xff]  }
 0x27b   :  { %12985 = vmatprep.mubr.msk.bf16.mxu0 %vm1730_vm0, %v13653_v25 }
 0x27d   :  { %v15384_v9 = vpop.f32.mrb[208].mxu0 }
 0x27e   :  { %19135 = vst [vmem:[#allocation192_spill] sm:$0xff] %v15384_v9  ;;  %v15388_v56 = vpop.f32.mrb[209].mxu0  ;;  %v13658_v9 = vld [vmem:[%s18653_s0 + $0x518] sm:$0xff]  }
 0x27f   :  { %19137 = vst [vmem:[#allocation193_spill] sm:$0xff] %v15388_v56  ;;  %v15395_v39 = vpop.f32.mrb[210].mxu0 }
 0x280   :  { %19139 = vst [vmem:[#allocation194_spill] sm:$0xff] %v15395_v39  ;;  %v15402_v50 = vpop.f32.mrb[211].mxu0 }
 0x281   :  { %19141 = vst [vmem:[#allocation195_spill] sm:$0xff] %v15402_v50 }
 0x282   :  { %12986 = vmatmul.mubr.msk.bf16.gmra.mrb[60].mxu0 %vm1730_vm0, %v13654_v55  ;;  %v13657_v55 = vld [vmem:[%s18653_s0 + $0x510] sm:$0xff]  }
 0x283   :  { %12989 = vmatprep.mubr.msk.bf16.mxu0 %vm1730_vm0, %v13655_v7 }
 0x285   :  { %v15408_v45 = vpop.f32.mrb[212].mxu0 }
 0x286   :  { %19143 = vst [vmem:[#allocation196_spill] sm:$0xff] %v15408_v45  ;;  %v15412_v13 = vpop.f32.mrb[213].mxu0  ;;  %v13660_v45 = vld [vmem:[%s18653_s0 + $0x528] sm:$0xff]  }
 0x287   :  { %19145 = vst [vmem:[#allocation197_spill] sm:$0xff] %v15412_v13  ;;  %v15419_v27 = vpop.f32.mrb[214].mxu0 }
 0x288   :  { %19147 = vst [vmem:[#allocation198_spill] sm:$0xff] %v15419_v27  ;;  %v15426_v50 = vpop.f32.mrb[215].mxu0 }
 0x289   :  { %19149 = vst [vmem:[#allocation199_spill] sm:$0xff] %v15426_v50 }
 0x28a   :  { %12990 = vmatmul.mubr.msk.bf16.gmra.mrb[64].mxu0 %vm1730_vm0, %v13656_v37  ;;  %v13659_v37 = vld [vmem:[%s18653_s0 + $0x520] sm:$0xff]  }
 0x28b   :  { %12993 = vmatprep.mubr.msk.bf16.mxu0 %vm1730_vm0, %v13657_v55 }
 0x28d   :  { %v15432_v43 = vpop.f32.mrb[216].mxu0 }
 0x28e   :  { %19151 = vst [vmem:[#allocation200_spill] sm:$0xff] %v15432_v43  ;;  %v15436_v39 = vpop.f32.mrb[217].mxu0  ;;  %v13662_v43 = vld [vmem:[%s18653_s0 + $0x538] sm:$0xff]  }
 0x28f   :  { %19153 = vst [vmem:[#allocation201_spill] sm:$0xff] %v15436_v39  ;;  %v15443_v44 = vpop.f32.mrb[218].mxu0 }
 0x290   :  { %19155 = vst [vmem:[#allocation202_spill] sm:$0xff] %v15443_v44  ;;  %v15450_v50 = vpop.f32.mrb[219].mxu0 }
 0x291   :  { %19157 = vst [vmem:[#allocation203_spill] sm:$0xff] %v15450_v50 }
 0x292   :  { %12994 = vmatmul.mubr.msk.bf16.gmra.mrb[68].mxu0 %vm1730_vm0, %v13658_v9  ;;  %v13661_v9 = vld [vmem:[%s18653_s0 + $0x530] sm:$0xff]  }
 0x293   :  { %12997 = vmatprep.mubr.msk.bf16.mxu0 %vm1730_vm0, %v13659_v37 }
 0x295   :  { %v15456_v25 = vpop.f32.mrb[220].mxu0 }
 0x296   :  { %19159 = vst [vmem:[#allocation204_spill] sm:$0xff] %v15456_v25  ;;  %v15460_v27 = vpop.f32.mrb[221].mxu0  ;;  %v13664_v25 = vld [vmem:[%s18653_s0 + $0x548] sm:$0xff]  }
 0x297   :  { %19161 = vst [vmem:[#allocation205_spill] sm:$0xff] %v15460_v27  ;;  %v15467_v56 = vpop.f32.mrb[222].mxu0 }
 0x298   :  { %19163 = vst [vmem:[#allocation206_spill] sm:$0xff] %v15467_v56  ;;  %v15474_v50 = vpop.f32.mrb[223].mxu0 }
 0x299   :  { %19165 = vst [vmem:[#allocation207_spill] sm:$0xff] %v15474_v50 }
 0x29a   :  { %12998 = vmatmul.mubr.msk.bf16.gmra.mrb[72].mxu0 %vm1730_vm0, %v13660_v45  ;;  %v13663_v45 = vld [vmem:[%s18653_s0 + $0x540] sm:$0xff]  }
 0x29b   :  { %13001 = vmatprep.mubr.msk.bf16.mxu0 %vm1730_vm0, %v13661_v9 }
 0x29d   :  { %v15480_v7 = vpop.f32.mrb[224].mxu0 }
 0x29e   :  { %19167 = vst [vmem:[#allocation208_spill] sm:$0xff] %v15480_v7  ;;  %v15484_v44 = vpop.f32.mrb[225].mxu0  ;;  %v13666_v7 = vld [vmem:[%s18653_s0 + $0x558] sm:$0xff]  }
 0x29f   :  { %19169 = vst [vmem:[#allocation209_spill] sm:$0xff] %v15484_v44  ;;  %v15491_v13 = vpop.f32.mrb[226].mxu0 }
 0x2a0   :  { %19171 = vst [vmem:[#allocation210_spill] sm:$0xff] %v15491_v13  ;;  %v15498_v50 = vpop.f32.mrb[227].mxu0 }
 0x2a1   :  { %19173 = vst [vmem:[#allocation211_spill] sm:$0xff] %v15498_v50 }
 0x2a2   :  { %13002 = vmatmul.mubr.msk.bf16.gmra.mrb[76].mxu0 %vm1730_vm0, %v13662_v43  ;;  %v13665_v43 = vld [vmem:[%s18653_s0 + $0x550] sm:$0xff]  }
 0x2a3   :  { %13005 = vmatprep.mubr.msk.bf16.mxu0 %vm1730_vm0, %v13663_v45 }
 0x2a5   :  { %v15504_v55 = vpop.f32.mrb[228].mxu0 }
 0x2a6   :  { %19175 = vst [vmem:[#allocation212_spill] sm:$0xff] %v15504_v55  ;;  %v15508_v56 = vpop.f32.mrb[229].mxu0  ;;  %v13668_v55 = vld [vmem:[%s18653_s0 + $0x568] sm:$0xff]  }
 0x2a7   :  { %19177 = vst [vmem:[#allocation213_spill] sm:$0xff] %v15508_v56  ;;  %v15515_v39 = vpop.f32.mrb[230].mxu0  ;;  %v13674_v56 = vld [vmem:[%s18653_s0 + $0x598] sm:$0xff]  }
 0x2a8   :  { %19179 = vst [vmem:[#allocation214_spill] sm:$0xff] %v15515_v39  ;;  %v15522_v50 = vpop.f32.mrb[231].mxu0 }
 0x2a9   :  { %19181 = vst [vmem:[#allocation215_spill] sm:$0xff] %v15522_v50 }
 0x2aa   :  { %13006 = vmatmul.mubr.msk.bf16.gmra.mrb[80].mxu0 %vm1730_vm0, %v13664_v25  ;;  %v13667_v25 = vld [vmem:[%s18653_s0 + $0x560] sm:$0xff]  }
 0x2ab   :  { %13009 = vmatprep.mubr.msk.bf16.mxu0 %vm1730_vm0, %v13665_v43 }
 0x2ad   :  { %v15528_v37 = vpop.f32.mrb[232].mxu0 }
 0x2ae   :  { %19183 = vst [vmem:[#allocation216_spill] sm:$0xff] %v15528_v37  ;;  %v15532_v13 = vpop.f32.mrb[233].mxu0  ;;  %v13671_v37 = vld [vmem:[%s18653_s0 + $0x580] sm:$0xff]  }
 0x2af   :  { %19185 = vst [vmem:[#allocation217_spill] sm:$0xff] %v15532_v13  ;;  %v15539_v27 = vpop.f32.mrb[234].mxu0  ;;  %v13673_v13 = vld [vmem:[%s18653_s0 + $0x590] sm:$0xff]  }
 0x2b0   :  { %19187 = vst [vmem:[#allocation218_spill] sm:$0xff] %v15539_v27  ;;  %v15546_v50 = vpop.f32.mrb[235].mxu0 }
 0x2b1   :  { %19189 = vst [vmem:[#allocation219_spill] sm:$0xff] %v15546_v50 }
 0x2b2   :  { %13010 = vmatmul.mubr.msk.bf16.gmra.mrb[84].mxu0 %vm1730_vm0, %v13666_v7  ;;  %v13669_v7 = vld [vmem:[%s18653_s0 + $0x570] sm:$0xff]  }
 0x2b3   :  { %13013 = vmatprep.mubr.msk.bf16.mxu0 %vm1730_vm0, %v13667_v25 }
 0x2b5   :  { %v15552_v9 = vpop.f32.mrb[236].mxu0 }
 0x2b6   :  { %19191 = vst [vmem:[#allocation220_spill] sm:$0xff] %v15552_v9  ;;  %v15556_v39 = vpop.f32.mrb[237].mxu0  ;;  %v13672_v9 = vld [vmem:[%s18653_s0 + $0x588] sm:$0xff]  }
 0x2b7   :  { %19193 = vst [vmem:[#allocation221_spill] sm:$0xff] %v15556_v39  ;;  %v15563_v44 = vpop.f32.mrb[238].mxu0  ;;  %v13670_v39 = vld [vmem:[%s18653_s0 + $0x578] sm:$0xff]  }
 0x2b8   :  { %19195 = vst [vmem:[#allocation222_spill] sm:$0xff] %v15563_v44  ;;  %v15570_v50 = vpop.f32.mrb[239].mxu0 }
 0x2b9   :  { %19197 = vst [vmem:[#allocation223_spill] sm:$0xff] %v15570_v50 }
 0x2ba   :  { %13014 = vmatmul.mubr.msk.bf16.gmra.mrb[88].mxu0 %vm1730_vm0, %v13668_v55 }
 0x2bb   :  { %13017 = vmatprep.mubr.msk.bf16.mxu0 %vm1730_vm0, %v13669_v7 }
 0x2bd   :  { %v15576_v45 = vpop.f32.mrb[240].mxu0 }
 0x2be   :  { %v15578_v43 = vpop.f32.mrb[241].mxu0 }
 0x2bf   :  { %v15583_v27 = vpop.f32.mrb[242].mxu0 }
 0x2c0   :  { %v15588_v44 = vpop.f32.mrb[243].mxu0 }
 0x2c2   :  { %13018 = vmatmul.mubr.msk.bf16.gmra.mrb[92].mxu0 %vm1730_vm0, %v13670_v39 }
 0x2c3   :  { %13021 = vmatprep.mubr.msk.bf16.mxu0 %vm1730_vm0, %v13671_v37 }
 0x2c5   :  { %v15592_v55 = vpop.f32.mrb[244].mxu0 }
 0x2c6   :  { %v15594_v7 = vpop.f32.mrb[245].mxu0 }
 0x2c7   :  { %v15599_v50 = vpop.f32.mrb[246].mxu0 }
 0x2c8   :  { %v15604_v25 = vpop.f32.mrb[247].mxu0 }
 0x2ca   :  { %13022 = vmatmul.mubr.msk.bf16.gmra.mrb[96].mxu0 %vm1730_vm0, %v13672_v9 }
 0x2cb   :  { %13025 = vmatprep.mubr.msk.bf16.mxu0 %vm1730_vm0, %v13673_v13 }
 0x2cd   :  { %v15608_v39 = vpop.f32.mrb[248].mxu0 }
 0x2ce   :  { %v15610_v37 = vpop.f32.mrb[249].mxu0 }
 0x2cf   :  { %v15615_v33 = vpop.f32.mrb[250].mxu0 }
 0x2d0   :  { %v15620_v19 = vpop.f32.mrb[251].mxu0 }
 0x2d2   :  { %13026 = vmatmul.mubr.msk.bf16.gmra.mrb[100].mxu0 %vm1730_vm0, %v13674_v56 }
 0x2d3   :  { %13029 = vmatprep.mubr.msk.bf16.mxu0 %vm1730_vm0, %v13675_v21 }
 0x2d5   :  { %v15624_v13 = vpop.f32.mrb[252].mxu0 }
 0x2d6   :  { %v15626_v9 = vpop.f32.mrb[253].mxu0 }
 0x2d7   :  { %v15631_v15 = vpop.f32.mrb[254].mxu0 }
 0x2d8   :  { %v15636_v1 = vpop.f32.mrb[255].mxu0 }
 0x2da   :  { %13030 = vmatmul.mubr.msk.bf16.gmra.mrb[104].mxu0 %vm1730_vm0, %v13676_v38 }
 0x2db   :  { %13033 = vmatprep.mubr.msk.bf16.mxu0 %vm1730_vm0, %v13677_v3 }
 0x2dd   :  { %v15640_v56 = vpop.f32.mrb[0].mxu0 }
 0x2de   :  { %v15642_v21 = vpop.f32.mrb[1].mxu0 }
 0x2df   :  { %v15647_v61 = vpop.f32.mrb[2].mxu0 }
 0x2e0   :  { %v15652_v53 = vpop.f32.mrb[3].mxu0 }
 0x2e2   :  { %13034 = vmatmul.mubr.msk.bf16.gmra.mrb[108].mxu0 %vm1730_vm0, %v13678_v32 }
 0x2e3   :  { %13037 = vmatprep.mubr.msk.bf16.mxu0 %vm1730_vm0, %v13679_v54 }
 0x2e5   :  { %v15656_v38 = vpop.f32.mrb[4].mxu0 }
 0x2e6   :  { %v15658_v3 = vpop.f32.mrb[5].mxu0 }
 0x2e7   :  { %v15663_v52 = vpop.f32.mrb[6].mxu0 }
 0x2e8   :  { %v15668_v47 = vpop.f32.mrb[7].mxu0 }
 0x2ea   :  { %13038 = vmatmul.mubr.msk.bf16.gmra.mrb[112].mxu0 %vm1730_vm0, %v13680_v26 }
 0x2eb   :  { %13041 = vmatprep.mubr.msk.bf16.mxu0 %vm1730_vm0, %v13681_v48 }
 0x2ed   :  { %v15672_v32 = vpop.f32.mrb[8].mxu0 }
 0x2ee   :  { %19199 = vst [vmem:[#allocation224_spill] sm:$0xff] %v15672_v32  ;;  %v15674_v54 = vpop.f32.mrb[9].mxu0  ;;  %v19300_v32 = vld [vmem:[#allocation111_spill] sm:$0xff] }
 0x2ef   :  { %19200 = vst [vmem:[#allocation225_spill] sm:$0xff] %v15674_v54  ;;  %v15679_v46 = vpop.f32.mrb[10].mxu0 }
 0x2f0   :  { %19201 = vst [vmem:[#allocation226_spill] sm:$0xff] %v15679_v46  ;;  %v15684_v41 = vpop.f32.mrb[11].mxu0  ;;  %v19298_v46 = vmax.f32 %v14378_v58, %v19297_v30 }
 0x2f1   :  { %19202 = vst [vmem:[#allocation227_spill] sm:$0xff] %v15684_v41 }
 0x2f2   :  { %13042 = vmatmul.mubr.msk.bf16.gmra.mrb[116].mxu0 %vm1730_vm0, %v13682_v20 }
 0x2f3   :  { %13045 = vmatprep.mubr.msk.bf16.mxu0 %vm1730_vm0, %v13683_v42 }
 0x2f5   :  { %v15688_v26 = vpop.f32.mrb[12].mxu0 }
 0x2f6   :  { %19203 = vst [vmem:[#allocation228_spill] sm:$0xff] %v15688_v26  ;;  %v15690_v48 = vpop.f32.mrb[13].mxu0 }
 0x2f7   :  { %19204 = vst [vmem:[#allocation229_spill] sm:$0xff] %v15690_v48  ;;  %v15695_v40 = vpop.f32.mrb[14].mxu0  ;;  %v13686_v48 = vld [vmem:[%s18653_s0 + $0x5f8] sm:$0xff]  }
 0x2f8   :  { %19205 = vst [vmem:[#allocation230_spill] sm:$0xff] %v15695_v40  ;;  %v15700_v35 = vpop.f32.mrb[15].mxu0  ;;  %v13687_v40 = vld [vmem:[%s18653_s0 + $0x600] sm:$0xff]  }
 0x2f9   :  { %19206 = vst [vmem:[#allocation231_spill] sm:$0xff] %v15700_v35 }
 0x2fa   :  { %13046 = vmatmul.mubr.msk.bf16.gmra.mrb[120].mxu0 %vm1730_vm0, %v13684_v14 }
 0x2fb   :  { %13049 = vmatprep.mubr.msk.bf16.mxu0 %vm1730_vm0, %v13685_v36 }
 0x2fd   :  { %v15704_v20 = vpop.f32.mrb[16].mxu0 }
 0x2fe   :  { %19207 = vst [vmem:[#allocation232_spill] sm:$0xff] %v15704_v20  ;;  %v15706_v42 = vpop.f32.mrb[17].mxu0 }
 0x2ff   :  { %19208 = vst [vmem:[#allocation233_spill] sm:$0xff] %v15706_v42  ;;  %v15711_v26 = vpop.f32.mrb[18].mxu0  ;;  %v13688_v42 = vld [vmem:[%s18653_s0 + $0x608] sm:$0xff]  }
 0x300   :  { %19209 = vst [vmem:[#allocation234_spill] sm:$0xff] %v15711_v26  ;;  %v15716_v8 = vpop.f32.mrb[19].mxu0  ;;  %v13689_v26 = vld [vmem:[%s18653_s0 + $0x610] sm:$0xff]  }
 0x301   :  { %19210 = vst [vmem:[#allocation235_spill] sm:$0xff] %v15716_v8 }
 0x302   :  { %13050 = vmatmul.mubr.msk.bf16.gmra.mrb[124].mxu0 %vm1730_vm0, %v13686_v48 }
 0x303   :  { %13053 = vmatprep.mubr.msk.bf16.mxu0 %vm1730_vm0, %v13687_v40 }
 0x305   :  { %v15720_v14 = vpop.f32.mrb[20].mxu0 }
 0x306   :  { %19211 = vst [vmem:[#allocation236_spill] sm:$0xff] %v15720_v14  ;;  %v15722_v36 = vpop.f32.mrb[21].mxu0 }
 0x307   :  { %19212 = vst [vmem:[#allocation237_spill] sm:$0xff] %v15722_v36  ;;  %v15727_v20 = vpop.f32.mrb[22].mxu0  ;;  %v13690_v36 = vld [vmem:[%s18653_s0 + $0x618] sm:$0xff]  }
 0x308   :  { %19213 = vst [vmem:[#allocation238_spill] sm:$0xff] %v15727_v20  ;;  %v15732_v35 = vpop.f32.mrb[23].mxu0  ;;  %v13691_v20 = vld [vmem:[%s18653_s0 + $0x620] sm:$0xff]  }
 0x309   :  { %19214 = vst [vmem:[#allocation239_spill] sm:$0xff] %v15732_v35 }
 0x30a   :  { %13054 = vmatmul.mubr.msk.bf16.gmra.mrb[128].mxu0 %vm1730_vm0, %v13688_v42 }
 0x30b   :  { %13057 = vmatprep.mubr.msk.bf16.mxu0 %vm1730_vm0, %v13689_v26 }
 0x30d   :  { %v15736_v40 = vpop.f32.mrb[24].mxu0 }
 0x30e   :  { %19215 = vst [vmem:[#allocation240_spill] sm:$0xff] %v15736_v40  ;;  %v15738_v48 = vpop.f32.mrb[25].mxu0 }
 0x30f   :  { %19216 = vst [vmem:[#allocation241_spill] sm:$0xff] %v15738_v48  ;;  %v15743_v14 = vpop.f32.mrb[26].mxu0  ;;  %v13692_v48 = vld [vmem:[%s18653_s0 + $0x628] sm:$0xff]  }
 0x310   :  { %19217 = vst [vmem:[#allocation242_spill] sm:$0xff] %v15743_v14  ;;  %v15748_v8 = vpop.f32.mrb[27].mxu0  ;;  %v13693_v14 = vld [vmem:[%s18653_s0 + $0x630] sm:$0xff]  }
 0x311   :  { %19218 = vst [vmem:[#allocation243_spill] sm:$0xff] %v15748_v8 }
 0x312   :  { %13058 = vmatmul.mubr.msk.bf16.gmra.mrb[132].mxu0 %vm1730_vm0, %v13690_v36 }
 0x313   :  { %13061 = vmatprep.mubr.msk.bf16.mxu0 %vm1730_vm0, %v13691_v20 }
 0x315   :  { %v15752_v26 = vpop.f32.mrb[28].mxu0 }
 0x316   :  { %19219 = vst [vmem:[#allocation244_spill] sm:$0xff] %v15752_v26  ;;  %v15754_v42 = vpop.f32.mrb[29].mxu0 }
 0x317   :  { %19220 = vst [vmem:[#allocation245_spill] sm:$0xff] %v15754_v42  ;;  %v15759_v40 = vpop.f32.mrb[30].mxu0  ;;  %v13694_v42 = vld [vmem:[%s18653_s0 + $0x638] sm:$0xff]  }
 0x318   :  { %19221 = vst [vmem:[#allocation246_spill] sm:$0xff] %v15759_v40  ;;  %v15764_v35 = vpop.f32.mrb[31].mxu0  ;;  %v13695_v40 = vld [vmem:[%s18653_s0 + $0x640] sm:$0xff]  }
 0x319   :  { %19222 = vst [vmem:[#allocation247_spill] sm:$0xff] %v15764_v35 }
 0x31a   :  { %13062 = vmatmul.mubr.msk.bf16.gmra.mrb[136].mxu0 %vm1730_vm0, %v13692_v48 }
 0x31b   :  { %13065 = vmatprep.mubr.msk.bf16.mxu0 %vm1730_vm0, %v13693_v14 }
 0x31d   :  { %v15768_v20 = vpop.f32.mrb[32].mxu0 }
 0x31e   :  { %19223 = vst [vmem:[#allocation248_spill] sm:$0xff] %v15768_v20  ;;  %v15770_v36 = vpop.f32.mrb[33].mxu0 }
 0x31f   :  { %19224 = vst [vmem:[#allocation249_spill] sm:$0xff] %v15770_v36  ;;  %v15775_v26 = vpop.f32.mrb[34].mxu0  ;;  %v13696_v36 = vld [vmem:[%s18653_s0 + $0x648] sm:$0xff]  }
 0x320   :  { %19225 = vst [vmem:[#allocation250_spill] sm:$0xff] %v15775_v26  ;;  %v15780_v8 = vpop.f32.mrb[35].mxu0  ;;  %v13697_v26 = vld [vmem:[%s18653_s0 + $0x650] sm:$0xff]  }
 0x321   :  { %19226 = vst [vmem:[#allocation251_spill] sm:$0xff] %v15780_v8 }
 0x322   :  { %13066 = vmatmul.mubr.msk.bf16.gmra.mrb[140].mxu0 %vm1730_vm0, %v13694_v42 }
 0x323   :  { %13069 = vmatprep.mubr.msk.bf16.mxu0 %vm1730_vm0, %v13695_v40 }
 0x325   :  { %v15784_v14 = vpop.f32.mrb[36].mxu0 }
 0x326   :  { %19227 = vst [vmem:[#allocation252_spill] sm:$0xff] %v15784_v14  ;;  %v15786_v48 = vpop.f32.mrb[37].mxu0 }
 0x327   :  { %19228 = vst [vmem:[#allocation253_spill] sm:$0xff] %v15786_v48  ;;  %v15791_v20 = vpop.f32.mrb[38].mxu0  ;;  %v13698_v48 = vld [vmem:[%s18653_s0 + $0x658] sm:$0xff]  }
 0x328   :  { %19229 = vst [vmem:[#allocation254_spill] sm:$0xff] %v15791_v20  ;;  %v15796_v35 = vpop.f32.mrb[39].mxu0  ;;  %v13699_v20 = vld [vmem:[%s18653_s0 + $0x660] sm:$0xff]  }
 0x329   :  { %19230 = vst [vmem:[#allocation255_spill] sm:$0xff] %v15796_v35 }
 0x32a   :  { %13070 = vmatmul.mubr.msk.bf16.gmra.mrb[144].mxu0 %vm1730_vm0, %v13696_v36 }
 0x32b   :  { %13073 = vmatprep.mubr.msk.bf16.mxu0 %vm1730_vm0, %v13697_v26 }
 0x32d   :  { %v15800_v40 = vpop.f32.mrb[40].mxu0 }
 0x32e   :  { %19231 = vst [vmem:[#allocation256_spill] sm:$0xff] %v15800_v40  ;;  %v15802_v42 = vpop.f32.mrb[41].mxu0 }
 0x32f   :  { %19232 = vst [vmem:[#allocation257_spill] sm:$0xff] %v15802_v42  ;;  %v15807_v14 = vpop.f32.mrb[42].mxu0  ;;  %v13700_v42 = vld [vmem:[%s18653_s0 + $0x668] sm:$0xff]  }
 0x330   :  { %19233 = vst [vmem:[#allocation258_spill] sm:$0xff] %v15807_v14  ;;  %v15812_v8 = vpop.f32.mrb[43].mxu0  ;;  %v13701_v14 = vld [vmem:[%s18653_s0 + $0x670] sm:$0xff]  }
 0x331   :  { %19234 = vst [vmem:[#allocation259_spill] sm:$0xff] %v15812_v8 }
 0x332   :  { %13074 = vmatmul.mubr.msk.bf16.gmra.mrb[148].mxu0 %vm1730_vm0, %v13698_v48 }
 0x333   :  { %13077 = vmatprep.mubr.msk.bf16.mxu0 %vm1730_vm0, %v13699_v20 }
 0x335   :  { %v15816_v26 = vpop.f32.mrb[44].mxu0 }
 0x336   :  { %19235 = vst [vmem:[#allocation260_spill] sm:$0xff] %v15816_v26  ;;  %v15818_v36 = vpop.f32.mrb[45].mxu0 }
 0x337   :  { %19236 = vst [vmem:[#allocation261_spill] sm:$0xff] %v15818_v36  ;;  %v15823_v40 = vpop.f32.mrb[46].mxu0  ;;  %v13702_v36 = vld [vmem:[%s18653_s0 + $0x678] sm:$0xff]  }
 0x338   :  { %19237 = vst [vmem:[#allocation262_spill] sm:$0xff] %v15823_v40  ;;  %v15828_v35 = vpop.f32.mrb[47].mxu0  ;;  %v13703_v40 = vld [vmem:[%s18653_s0 + $0x680] sm:$0xff]  }
 0x339   :  { %19238 = vst [vmem:[#allocation263_spill] sm:$0xff] %v15828_v35 }
 0x33a   :  { %13078 = vmatmul.mubr.msk.bf16.gmra.mrb[152].mxu0 %vm1730_vm0, %v13700_v42 }
 0x33b   :  { %13081 = vmatprep.mubr.msk.bf16.mxu0 %vm1730_vm0, %v13701_v14 }
 0x33d   :  { %v15832_v20 = vpop.f32.mrb[48].mxu0 }
 0x33e   :  { %19239 = vst [vmem:[#allocation264_spill] sm:$0xff] %v15832_v20  ;;  %v15834_v48 = vpop.f32.mrb[49].mxu0 }
 0x33f   :  { %19240 = vst [vmem:[#allocation265_spill] sm:$0xff] %v15834_v48  ;;  %v15839_v26 = vpop.f32.mrb[50].mxu0  ;;  %v13704_v48 = vld [vmem:[%s18653_s0 + $0x688] sm:$0xff]  }
 0x340   :  { %19241 = vst [vmem:[#allocation266_spill] sm:$0xff] %v15839_v26  ;;  %v15844_v8 = vpop.f32.mrb[51].mxu0  ;;  %v13705_v26 = vld [vmem:[%s18653_s0 + $0x690] sm:$0xff]  }
 0x341   :  { %19242 = vst [vmem:[#allocation267_spill] sm:$0xff] %v15844_v8 }
 0x342   :  { %13082 = vmatmul.mubr.msk.bf16.gmra.mrb[156].mxu0 %vm1730_vm0, %v13702_v36  ;;  %v13736_v36 = vld [vmem:[%s18656_s3 + $0x140] sm:$0xff]  }
 0x343   :  { %13085 = vmatprep.mubr.msk.bf16.mxu0 %vm1730_vm0, %v13703_v40  ;;  %v13735_v40 = vld [vmem:[%s18656_s3 + $0x180] sm:$0xff]  }
 0x344   :  { %11760 = vmatprep.subr.bf16.mxu1 %v13735_v40 }
 0x345   :  { %v15848_v14 = vpop.f32.mrb[52].mxu0  ;;  %11761 = vmatpush3.bf16.msra.mxu1 %v13736_v36  ;;  %v13739_v36 = vld [vmem:[%s18656_s3 + $0x190] sm:$0xff]  }
 0x346   :  { %19243 = vst [vmem:[#allocation268_spill] sm:$0xff] %v15848_v14  ;;  %v15850_v42 = vpop.f32.mrb[53].mxu0  ;;  %v13738_v14 = vld [vmem:[%s18656_s3 + $0x148] sm:$0xff]  }
 0x347   :  { %19244 = vst [vmem:[#allocation269_spill] sm:$0xff] %v15850_v42  ;;  %v15855_v20 = vpop.f32.mrb[54].mxu0 }
 0x348   :  { %19245 = vst [vmem:[#allocation270_spill] sm:$0xff] %v15855_v20  ;;  %v15860_v35 = vpop.f32.mrb[55].mxu0 }
 0x349   :  { %19246 = vst [vmem:[#allocation271_spill] sm:$0xff] %v15860_v35  ;;  %v13737_v35 = vld [vmem:[%s18656_s3 + $0x188] sm:$0xff]  }
 0x34a   :  { %13086 = vmatmul.mubr.msk.bf16.gmra.mrb[160].mxu0 %vm1730_vm0, %v13704_v48  ;;  %v13706_v48 = vld [vmem:[%s18653_s0 + $0x698] sm:$0xff]   ;;  %11762 = vmatprep.subr.bf16.mxu1 %v13737_v35 }
 0x34b   :  { %13089 = vmatprep.mubr.msk.bf16.mxu0 %vm1730_vm0, %v13705_v26  ;;  %v13707_v26 = vld [vmem:[%s18653_s0 + $0x6a0] sm:$0xff]   ;;  %11763 = vmatpush3.bf16.msra.mxu1 %v13738_v14  ;;  %v13741_v35 = vld [vmem:[%s18656_s3 + $0x198] sm:$0xff]  }
 0x34c   :  { %11764 = vmatprep.subr.bf16.mxu1 %v13739_v36  ;;  %v13743_v36 = vld [vmem:[%s18656_s3 + $0x1a0] sm:$0xff]  }
 0x34d   :  { %v15870_v20 = vpop.f32.mrb[56].mxu0 }
 0x34e   :  { %19247 = vst [vmem:[#allocation272_spill] sm:$0xff] %v15870_v20  ;;  %v15875_v42 = vpop.f32.mrb[57].mxu0 }
 0x34f   :  { %19248 = vst [vmem:[#allocation273_spill] sm:$0xff] %v15875_v42  ;;  %v15883_v8 = vpop.f32.mrb[58].mxu0  ;;  %v13740_v42 = vld [vmem:[%s18656_s3 + $0x150] sm:$0xff]  }
 0x350   :  { %19249 = vst [vmem:[#allocation274_spill] sm:$0xff] %v15883_v8  ;;  %v15888_v40 = vpop.f32.mrb[59].mxu0  ;;  %11765 = vmatpush3.bf16.msra.mxu1 %v13740_v42  ;;  %v13709_v42 = vld [vmem:[%s18653_s0 + $0x6b0] sm:$0xff]  }
 0x351   :  { %19250 = vst [vmem:[#allocation275_spill] sm:$0xff] %v15888_v40  ;;  %v13742_v40 = vld [vmem:[%s18656_s3 + $0x158] sm:$0xff]   ;;  %11766 = vmatprep.subr.bf16.mxu1 %v13741_v35 }
 0x352   :  { %13090 = vmatmul.mubr.msk.bf16.gmra.mrb[164].mxu0 %vm1730_vm0, %v13706_v48  ;;  %v13708_v48 = vld [vmem:[%s18653_s0 + $0x6a8] sm:$0xff]  }
 0x353   :  { %13093 = vmatprep.mubr.msk.bf16.mxu0 %vm1730_vm0, %v13707_v26 }
 0x354   :  { %11767 = vmatpush3.bf16.msra.mxu1 %v13742_v40  ;;  %v13745_v40 = vld [vmem:[%s18656_s3 + $0x1a8] sm:$0xff]  }
 0x355   :  { %v15898_v8 = vpop.f32.mrb[60].mxu0  ;;  %11768 = vmatprep.subr.bf16.mxu1 %v13743_v36  ;;  %v13747_v36 = vld [vmem:[%s18656_s3 + $0x1b0] sm:$0xff]  }
 0x356   :  { %19251 = vst [vmem:[#allocation276_spill] sm:$0xff] %v15898_v8  ;;  %v15903_v14 = vpop.f32.mrb[61].mxu0 }
 0x357   :  { %19252 = vst [vmem:[#allocation277_spill] sm:$0xff] %v15903_v14  ;;  %v15911_v20 = vpop.f32.mrb[62].mxu0  ;;  %v13744_v14 = vld [vmem:[%s18656_s3 + $0x160] sm:$0xff]  }
 0x358   :  { %19253 = vst [vmem:[#allocation278_spill] sm:$0xff] %v15911_v20  ;;  %v15916_v26 = vpop.f32.mrb[63].mxu0  ;;  %11769 = vmatpush3.bf16.msra.mxu1 %v13744_v14  ;;  %v13711_v14 = vld [vmem:[%s18653_s0 + $0x6c0] sm:$0xff]  }
 0x359   :  { %19254 = vst [vmem:[#allocation279_spill] sm:$0xff] %v15916_v26  ;;  %v13746_v26 = vld [vmem:[%s18656_s3 + $0x168] sm:$0xff]   ;;  %11770 = vmatprep.subr.bf16.mxu1 %v13745_v40 }
 0x35a   :  { %13094 = vmatmul.mubr.msk.bf16.gmra.mrb[168].mxu0 %vm1730_vm0, %v13708_v48  ;;  %v13710_v48 = vld [vmem:[%s18653_s0 + $0x6b8] sm:$0xff]  }
 0x35b   :  { %13097 = vmatprep.mubr.msk.bf16.mxu0 %vm1730_vm0, %v13709_v42 }
 0x35c   :  { %11771 = vmatpush3.bf16.msra.mxu1 %v13746_v26  ;;  %v13749_v26 = vld [vmem:[%s18656_s3 + $0x1b8] sm:$0xff]  }
 0x35d   :  { %v15926_v20 = vpop.f32.mrb[64].mxu0  ;;  %11772 = vmatprep.subr.bf16.mxu1 %v13747_v36 }
 0x35e   :  { %19255 = vst [vmem:[#allocation280_spill] sm:$0xff] %v15926_v20  ;;  %v15931_v35 = vpop.f32.mrb[65].mxu0 }
 0x35f   :  { %19256 = vst [vmem:[#allocation281_spill] sm:$0xff] %v15931_v35  ;;  %v15939_v8 = vpop.f32.mrb[66].mxu0  ;;  %v13748_v35 = vld [vmem:[%s18656_s3 + $0x170] sm:$0xff]  }
 0x360   :  { %19257 = vst [vmem:[#allocation282_spill] sm:$0xff] %v15939_v8  ;;  %v15944_v42 = vpop.f32.mrb[67].mxu0  ;;  %11773 = vmatpush3.bf16.msra.mxu1 %v13748_v35  ;;  %v13713_v35 = vld [vmem:[%s18653_s0 + $0x6d0] sm:$0xff]  }
 0x361   :  { %19258 = vst [vmem:[#allocation283_spill] sm:$0xff] %v15944_v42  ;;  %v13750_v42 = vld [vmem:[%s18656_s3 + $0x178] sm:$0xff]   ;;  %11774 = vmatprep.subr.bf16.mxu1 %v13749_v26  ;;  %v13715_v26 = vld [vmem:[%s18653_s0 + $0x6e0] sm:$0xff]  }
 0x362   :  { %13098 = vmatmul.mubr.msk.bf16.gmra.mrb[172].mxu0 %vm1730_vm0, %v13710_v48  ;;  %v13712_v48 = vld [vmem:[%s18653_s0 + $0x6c8] sm:$0xff]  }
 0x363   :  { %13101 = vmatprep.mubr.msk.bf16.mxu0 %vm1730_vm0, %v13711_v14 }
 0x364   :  { %11775 = vmatpush3.bf16.msra.mxu1 %v13750_v42 }
 0x365   :  { %v15954_v8 = vpop.f32.mrb[68].mxu0 }
 0x366   :  { %19259 = vst [vmem:[#allocation284_spill] sm:$0xff] %v15954_v8  ;;  %v15959_v40 = vpop.f32.mrb[69].mxu0 }
 0x367   :  { %19260 = vst [vmem:[#allocation285_spill] sm:$0xff] %v15959_v40  ;;  %v15967_v20 = vpop.f32.mrb[70].mxu0 }
 0x368   :  { %19261 = vst [vmem:[#allocation286_spill] sm:$0xff] %v15967_v20  ;;  %v15972_v14 = vpop.f32.mrb[71].mxu0  ;;  %v13714_v20 = vld [vmem:[%s18653_s0 + $0x6d8] sm:$0xff]  }
 0x369   :  { %19262 = vst [vmem:[#allocation287_spill] sm:$0xff] %v15972_v14 }
 0x36a   :  { %13102 = vmatmul.mubr.msk.bf16.gmra.mrb[176].mxu0 %vm1730_vm0, %v13712_v48 }
 0x36b   :  { %13105 = vmatprep.mubr.msk.bf16.mxu0 %vm1730_vm0, %v13713_v35  ;;  %v13716_v35 = vld [vmem:[%s18653_s0 + $0x6e8] sm:$0xff]  }
 0x36d   :  { %v15976_v36 = vpop.f32.mrb[72].mxu0 }
 0x36e   :  { %19263 = vst [vmem:[#allocation288_spill] sm:$0xff] %v15976_v36  ;;  %v15978_v40 = vpop.f32.mrb[73].mxu0 }
 0x36f   :  { %19264 = vst [vmem:[#allocation289_spill] sm:$0xff] %v15978_v40  ;;  %v15983_v8 = vpop.f32.mrb[74].mxu0 }
 0x370   :  { %19265 = vst [vmem:[#allocation290_spill] sm:$0xff] %v15983_v8  ;;  %v15988_v14 = vpop.f32.mrb[75].mxu0  ;;  %v13717_v8 = vld [vmem:[%s18653_s0 + $0x6f0] sm:$0xff]  }
 0x371   :  { %19266 = vst [vmem:[#allocation291_spill] sm:$0xff] %v15988_v14 }
 0x372   :  { %13106 = vmatmul.mubr.msk.bf16.gmra.mrb[180].mxu0 %vm1730_vm0, %v13714_v20 }
 0x373   :  { %13109 = vmatprep.mubr.msk.bf16.mxu0 %vm1730_vm0, %v13715_v26 }
 0x375   :  { %v15992_v42 = vpop.f32.mrb[76].mxu0 }
 0x376   :  { %19267 = vst [vmem:[#allocation292_spill] sm:$0xff] %v15992_v42  ;;  %v15994_v48 = vpop.f32.mrb[77].mxu0 }
 0x377   :  { %19268 = vst [vmem:[#allocation293_spill] sm:$0xff] %v15994_v48  ;;  %v15999_v40 = vpop.f32.mrb[78].mxu0  ;;  %v13718_v48 = vld [vmem:[%s18653_s0 + $0x6f8] sm:$0xff]  }
 0x378   :  { %19269 = vst [vmem:[#allocation294_spill] sm:$0xff] %v15999_v40  ;;  %v16004_v36 = vpop.f32.mrb[79].mxu0  ;;  %v13719_v40 = vld [vmem:[%s18653_s0 + $0x700] sm:$0xff]  }
 0x379   :  { %19270 = vst [vmem:[#allocation295_spill] sm:$0xff] %v16004_v36 }
 0x37a   :  { %13110 = vmatmul.mubr.msk.bf16.gmra.mrb[184].mxu0 %vm1730_vm0, %v13716_v35 }
 0x37b   :  { %13113 = vmatprep.mubr.msk.bf16.mxu0 %vm1730_vm0, %v13717_v8 }
 0x37d   :  { %v16008_v20 = vpop.f32.mrb[80].mxu0 }
 0x37e   :  { %19271 = vst [vmem:[#allocation296_spill] sm:$0xff] %v16008_v20  ;;  %v16010_v26 = vpop.f32.mrb[81].mxu0 }
 0x37f   :  { %19272 = vst [vmem:[#allocation297_spill] sm:$0xff] %v16010_v26  ;;  %v16015_v42 = vpop.f32.mrb[82].mxu0  ;;  %v13720_v26 = vld [vmem:[%s18653_s0 + $0x708] sm:$0xff]  }
 0x380   :  { %19273 = vst [vmem:[#allocation298_spill] sm:$0xff] %v16015_v42  ;;  %v16020_v14 = vpop.f32.mrb[83].mxu0  ;;  %v13721_v42 = vld [vmem:[%s18653_s0 + $0x710] sm:$0xff]  }
 0x381   :  { %19274 = vst [vmem:[#allocation299_spill] sm:$0xff] %v16020_v14  ;;  %v13725_v14 = vld [vmem:[%s18653_s0 + $0x730] sm:$0xff]  }
 0x382   :  { %13114 = vmatmul.mubr.msk.bf16.gmra.mrb[188].mxu0 %vm1730_vm0, %v13718_v48 }
 0x383   :  { %13117 = vmatprep.mubr.msk.bf16.mxu0 %vm1730_vm0, %v13719_v40 }
 0x385   :  { %v16024_v8 = vpop.f32.mrb[84].mxu0 }
 0x386   :  { %19275 = vst [vmem:[#allocation300_spill] sm:$0xff] %v16024_v8  ;;  %v16026_v35 = vpop.f32.mrb[85].mxu0 }
 0x387   :  { %19276 = vst [vmem:[#allocation301_spill] sm:$0xff] %v16026_v35  ;;  %v16031_v20 = vpop.f32.mrb[86].mxu0  ;;  %v13722_v35 = vld [vmem:[%s18653_s0 + $0x718] sm:$0xff]  }
 0x388   :  { %19277 = vst [vmem:[#allocation302_spill] sm:$0xff] %v16031_v20  ;;  %v16036_v36 = vpop.f32.mrb[87].mxu0  ;;  %v13723_v20 = vld [vmem:[%s18653_s0 + $0x720] sm:$0xff]  }
 0x389   :  { %19278 = vst [vmem:[#allocation303_spill] sm:$0xff] %v16036_v36 }
 0x38a   :  { %13118 = vmatmul.mubr.msk.bf16.gmra.mrb[192].mxu0 %vm1730_vm0, %v13720_v26  ;;  %v13751_v26 = vld [vmem:[%s18656_s3 + $0x200] sm:$0xff]  }
 0x38b   :  { %13121 = vmatprep.mubr.msk.bf16.mxu0 %vm1730_vm0, %v13721_v42  ;;  %11824 = vmatprep.subr.bf16.mxu1 %v13751_v26  ;;  %v13726_v26 = vld [vmem:[%s18653_s0 + $0x738] sm:$0xff]  }
 0x38d   :  { %v16040_v40 = vpop.f32.mrb[88].mxu0 }
 0x38e   :  { %19279 = vst [vmem:[#allocation304_spill] sm:$0xff] %v16040_v40  ;;  %v16042_v48 = vpop.f32.mrb[89].mxu0 }
 0x38f   :  { %19280 = vst [vmem:[#allocation305_spill] sm:$0xff] %v16042_v48  ;;  %v16047_v8 = vpop.f32.mrb[90].mxu0 }
 0x390   :  { %19281 = vst [vmem:[#allocation306_spill] sm:$0xff] %v16047_v8  ;;  %v16055_v36 = vpop.f32.mrb[91].mxu0  ;;  %v13724_v8 = vld [vmem:[%s18653_s0 + $0x728] sm:$0xff]  }
 0x391   :  { %19282 = vst [vmem:[#allocation307_spill] sm:$0xff] %v16055_v36 }
 0x392   :  { %13122 = vmatmul.mubr.msk.bf16.gmra.mrb[196].mxu0 %vm1730_vm0, %v13722_v35 }
 0x393   :  { %13125 = vmatprep.mubr.msk.bf16.mxu0 %vm1730_vm0, %v13723_v20 }
 0x395   :  { %v16059_v42 = vpop.f32.mrb[92].mxu0 }
 0x396   :  { %19283 = vst [vmem:[#allocation308_spill] sm:$0xff] %v16059_v42  ;;  %v16061_v48 = vpop.f32.mrb[93].mxu0 }
 0x397   :  { %19284 = vst [vmem:[#allocation309_spill] sm:$0xff] %v16061_v48  ;;  %v16066_v40 = vpop.f32.mrb[94].mxu0 }
 0x398   :  { %19285 = vst [vmem:[#allocation310_spill] sm:$0xff] %v16066_v40  ;;  %v16071_v36 = vpop.f32.mrb[95].mxu0  ;;  %v13727_v40 = vld [vmem:[%s18653_s0 + $0x740] sm:$0xff]  }
 0x399   :  { %19286 = vst [vmem:[#allocation311_spill] sm:$0xff] %v16071_v36 }
 0x39a   :  { %13126 = vmatmul.mubr.msk.bf16.gmra.mrb[200].mxu0 %vm1730_vm0, %v13724_v8 }
 0x39b   :  { %13129 = vmatprep.mubr.msk.bf16.mxu0 %vm1730_vm0, %v13725_v14 }
 0x39d   :  { %v16075_v20 = vpop.f32.mrb[96].mxu0 }
 0x39e   :  { %19287 = vst [vmem:[#allocation312_spill] sm:$0xff] %v16075_v20  ;;  %v16077_v35 = vpop.f32.mrb[97].mxu0 }
 0x39f   :  { %19288 = vst [vmem:[#allocation313_spill] sm:$0xff] %v16077_v35  ;;  %v16082_v48 = vpop.f32.mrb[98].mxu0  ;;  %v13728_v35 = vld [vmem:[%s18653_s0 + $0x748] sm:$0xff]  }
 0x3a0   :  { %19289 = vst [vmem:[#allocation314_spill] sm:$0xff] %v16082_v48  ;;  %v16087_v42 = vpop.f32.mrb[99].mxu0  ;;  %v13729_v48 = vld [vmem:[%s18653_s0 + $0x750] sm:$0xff]  }
 0x3a1   :  { %19290 = vst [vmem:[#allocation315_spill] sm:$0xff] %v16087_v42 }
 0x3a2   :  { %13130 = vmatmul.mubr.msk.bf16.gmra.mrb[204].mxu0 %vm1730_vm0, %v13726_v26 }
 0x3a3   :  { %13133 = vmatprep.mubr.msk.bf16.mxu0 %vm1730_vm0, %v13727_v40 }
 0x3a5   :  { %v16091_v14 = vpop.f32.mrb[100].mxu0 }
 0x3a6   :  { %19291 = vst [vmem:[#allocation316_spill] sm:$0xff] %v16091_v14  ;;  %v16093_v8 = vpop.f32.mrb[101].mxu0  ;;  %v13730_v14 = vld [vmem:[%s18653_s0 + $0x758] sm:$0xff]  }
 0x3a7   :  { %19292 = vst [vmem:[#allocation317_spill] sm:$0xff] %v16093_v8  ;;  %v16098_v20 = vpop.f32.mrb[102].mxu0 }
 0x3a8   :  { %19293 = vst [vmem:[#allocation318_spill] sm:$0xff] %v16098_v20  ;;  %v16103_v36 = vpop.f32.mrb[103].mxu0  ;;  %v16114_v20 = vld [vmem:[%s18655_s2] ss:$0 sm:$0xff] }
 0x3a9   :  { %19294 = vst [vmem:[#allocation319_spill] sm:$0xff] %v16103_v36 }
 0x3aa   :  { %13134 = vmatmul.mubr.msk.bf16.gmra.mrb[208].mxu0 %vm1730_vm0, %v13728_v35  ;;  %v19295_v35 = vld [vmem:[#allocation109_spill] sm:$0xff] }
 0x3ab   :  { %13137 = vmatprep.mubr.msk.bf16.mxu0 %vm1730_vm0, %v13729_v48  ;;  %v13731_v48 = vld [vmem:[%s18653_s0 + $0x760] sm:$0xff]  }
 0x3ad   :  { %v13031_v40 = vpop.f32.mrb[104].mxu0 }
 0x3ae   :  { %v4526_v26 = vmax.f32 %v15576_v45, %v13031_v40  ;;  %v3925_v8 = vpop.f32.mrb[105].mxu0  ;;  %v19296_v45 = vmax.f32 %v14376_v57, %v19295_v35 }
 0x3af   :  { %v4524_v42 = vmax.f32 %v15578_v43, %v3925_v8  ;;  %v13032_v36 = vpop.f32.mrb[106].mxu0  ;;  %v19299_v8 = vld [vmem:[#allocation6_spill] sm:$0xff] }
 0x3b0   :  { %v4646_v40 = vmax.f32 %v19296_v45, %v4526_v26  ;;  %v4527_v34 = vmax.f32 %v15583_v27, %v13032_v36  ;;  %v3928_v41 = vpop.f32.mrb[107].mxu0  ;;  %v19301_v2 = vmax.f32 %v19299_v8, %v19300_v32  ;;  %v19302_v27 = vmax.f32 %v14388_v62, %v14874_v31 }
 0x3b1   :  { %v4644_v29 = vmax.f32 %v19298_v46, %v4524_v42  ;;  %v4525_v54 = vmax.f32 %v15588_v44, %v3928_v41 }
 0x3b2   :  { %v4773_v43 = vadd.f32 %v16114_v20, %v4646_v40  ;;  %v4647_v28 = vmax.f32 %v19301_v2, %v4527_v34  ;;  %13138 = vmatmul.mubr.msk.bf16.gmra.mrb[212].mxu0 %vm1730_vm0, %v13730_v14  ;;  %v19305_v40 = vld [vmem:[#allocation113_spill] sm:$0xff] }
 0x3b3   :  { %v4771_v57 = vadd.f32 %v16114_v20, %v4644_v29  ;;  %v4645_v36 = vmax.f32 %v19302_v27, %v4525_v54  ;;  %13141 = vmatprep.mubr.msk.bf16.mxu0 %vm1730_vm0, %v13731_v48  ;;  %v13732_v29 = vld [vmem:[%s18653_s0 + $0x768] sm:$0xff]   ;;  %v19303_v54 = vld [vmem:[#allocation112_spill] sm:$0xff]  ;;  %v19307_v27 = vld [vmem:[#allocation7_spill] sm:$0xff] }
 0x3b4   :  { %v4774_v58 = vadd.f32 %v16114_v20, %v4647_v28  ;;  %v4893_v44 = vmax.f32 %v4773_v43, 0.0  ;;  %v13733_v28 = vld [vmem:[%s18653_s0 + $0x770] sm:$0xff]   ;;  %v19304_v14 = vmax.f32 %v14392_v63, %v19303_v54  ;;  %v19306_v43 = vmax.f32 %v14394_v0, %v19305_v40 }
 0x3b5   :  { %v4772_v30 = vadd.f32 %v16114_v20, %v4645_v36  ;;  %v13035_v41 = vpop.f32.mrb[108].mxu0  ;;  %v4891_v34 = vmax.f32 %v4771_v57, 0.0  ;;  %v19308_v36 = vld [vmem:[#allocation114_spill] sm:$0xff] }
 0x3b6   :  { %v4894_v46 = vmax.f32 %v4774_v58, 0.0  ;;  %v4530_v32 = vmax.f32 %v15592_v55, %v13035_v41  ;;  %v3941_v2 = vpop.f32.mrb[109].mxu0  ;;  %v19309_v58 = vmax.f32 %v19307_v27, %v19308_v36 }
 0x3b7   :  { %v4892_v42 = vmax.f32 %v4772_v30, 0.0  ;;  %v4528_v62 = vmax.f32 %v15594_v7, %v3941_v2  ;;  %v13036_v31 = vpop.f32.mrb[110].mxu0  ;;  %v19310_v30 = vmax.f32 %v14404_v4, %v14898_v49 }
 0x3b8   :  { %v4650_v26 = vmax.f32 %v19304_v14, %v4530_v32  ;;  %v4531_v55 = vmax.f32 %v15599_v50, %v13036_v31  ;;  %v3944_v48 = vpop.f32.mrb[111].mxu0  ;;  %v16152_v35 = vpack.c.bf16 %v4894_v46, %v4893_v44 }
 0x3b9   :  { %v16154_v45 = vpack.c.bf16 %v4892_v42, %v4891_v34  ;;  %v4648_v7 = vmax.f32 %v19306_v43, %v4528_v62  ;;  %v4529_v8 = vmax.f32 %v15604_v25, %v3944_v48 }
 0x3ba   :  { %v4777_v57 = vadd.f32 %v16114_v20, %v4650_v26  ;;  %v4651_v63 = vmax.f32 %v19309_v58, %v4531_v55  ;;  %13142 = vmatmul.mubr.msk.bf16.gmra.mrb[216].mxu0 %vm1730_vm0, %v13732_v29  ;;  %v13734_v29 = vld [vmem:[%s18653_s0 + $0x778] sm:$0xff]  }
 0x3bb   :  { %v4775_v50 = vadd.f32 %v16114_v20, %v4648_v7  ;;  %v4649_v41 = vmax.f32 %v19310_v30, %v4529_v8  ;;  %13145 = vmatprep.mubr.msk.bf16.mxu0 %vm1730_vm0, %v13733_v28  ;;  %v19311_v28 = vld [vmem:[#allocation115_spill] sm:$0xff]  ;;  %v19315_v8 = vld [vmem:[#allocation8_spill] sm:$0xff] }
 0x3bc   :  { %v4778_v0 = vadd.f32 %v16114_v20, %v4651_v63  ;;  %v4897_v46 = vmax.f32 %v4777_v57, 0.0  ;;  %v19312_v54 = vmax.f32 %v14408_v5, %v19311_v28  ;;  %v19316_v57 = vld [vmem:[#allocation117_spill] sm:$0xff] }
 0x3bd   :  { %v4776_v25 = vadd.f32 %v16114_v20, %v4649_v41  ;;  %v13039_v44 = vpop.f32.mrb[112].mxu0  ;;  %v4895_v42 = vmax.f32 %v4775_v50, 0.0  ;;  %v19317_v27 = vmax.f32 %v19315_v8, %v19316_v57 }
 0x3be   :  { %v4898_v32 = vmax.f32 %v4778_v0, 0.0  ;;  %v4534_v2 = vmax.f32 %v15608_v39, %v13039_v44  ;;  %v3957_v34 = vpop.f32.mrb[113].mxu0  ;;  %v19313_v39 = vld [vmem:[#allocation116_spill] sm:$0xff] }
 0x3bf   :  { %v4896_v62 = vmax.f32 %v4776_v25, 0.0  ;;  %v4532_v4 = vmax.f32 %v15610_v37, %v3957_v34  ;;  %v13040_v49 = vpop.f32.mrb[114].mxu0  ;;  %v19314_v48 = vmax.f32 %v14410_v6, %v19313_v39 }
 0x3c0   :  { %v16177_v31 = vpack.c.bf16 %v4898_v32, %v4897_v46  ;;  %v4654_v14 = vmax.f32 %v19312_v54, %v4534_v2  ;;  %v4535_v26 = vmax.f32 %v15615_v33, %v13040_v49  ;;  %v3960_v55 = vpop.f32.mrb[115].mxu0  ;;  %v19318_v33 = vmax.f32 %v14420_v10, %v14922_v59  ;;  %v19319_v10 = vld [vmem:[#allocation118_spill] sm:$0xff]  ;;  %v19323_v54 = vld [vmem:[#allocation9_spill] sm:$0xff] }
 0x3c1   :  { %v4652_v40 = vmax.f32 %v19314_v48, %v4532_v4  ;;  %v4533_v43 = vmax.f32 %v15620_v19, %v3960_v55  ;;  %v16187_v7 = vpack.c.bf16 %v4896_v62, %v4895_v42  ;;  %v19320_v59 = vmax.f32 %v14424_v11, %v19319_v10  ;;  %v19321_v4 = vld [vmem:[#allocation119_spill] sm:$0xff] }
 0x3c2   :  { %v4781_v37 = vadd.f32 %v16114_v20, %v4654_v14  ;;  %v4655_v36 = vmax.f32 %v19317_v27, %v4535_v26  ;;  %13146 = vmatmul.mubr.msk.bf16.gmra.mrb[220].mxu0 %vm1730_vm0, %v13734_v29  ;;  %v19324_v14 = vld [vmem:[#allocation120_spill] sm:$0xff] }
 0x3c3   :  { %v4779_v5 = vadd.f32 %v16114_v20, %v4652_v40  ;;  %v4653_v58 = vmax.f32 %v19318_v33, %v4533_v43  ;;  %v19325_v26 = vmax.f32 %v19323_v54, %v19324_v14 }
 0x3c4   :  { %v4782_v6 = vadd.f32 %v16114_v20, %v4655_v36  ;;  %v4901_v50 = vmax.f32 %v4781_v37, 0.0 }
 0x3c5   :  { %v4780_v19 = vadd.f32 %v16114_v20, %v4653_v58  ;;  %v13043_v63 = vpop.f32.mrb[116].mxu0  ;;  %v4899_v25 = vmax.f32 %v4779_v5, 0.0 }
 0x3c6   :  { %v4902_v30 = vmax.f32 %v4782_v6, 0.0  ;;  %v4538_v41 = vmax.f32 %v15624_v13, %v13043_v63  ;;  %v3973_v0 = vpop.f32.mrb[117].mxu0  ;;  %v19322_v13 = vmax.f32 %v14426_v12, %v19321_v4 }
 0x3c7   :  { %v4900_v44 = vmax.f32 %v4780_v19, 0.0  ;;  %v4536_v46 = vmax.f32 %v15626_v9, %v3973_v0  ;;  %v13044_v32 = vpop.f32.mrb[118].mxu0  ;;  %v19331_v0 = vld [vmem:[#allocation10_spill] sm:$0xff] }
 0x3c8   :  { %v16202_v2 = vpack.c.bf16 %v4902_v30, %v4901_v50  ;;  %v4658_v34 = vmax.f32 %v19320_v59, %v4538_v41  ;;  %v4539_v29 = vmax.f32 %v15631_v15, %v13044_v32  ;;  %v3976_v42 = vpop.f32.mrb[119].mxu0  ;;  %v19326_v15 = vmax.f32 %v14436_v16, %v14946_v51  ;;  %v19327_v16 = vld [vmem:[#allocation121_spill] sm:$0xff]  ;;  %v19329_v50 = vld [vmem:[#allocation122_spill] sm:$0xff] }
 0x3c9   :  { %v16208_v62 = vpack.c.bf16 %v4900_v44, %v4899_v25  ;;  %v4656_v49 = vmax.f32 %v19322_v13, %v4536_v46  ;;  %v4537_v28 = vmax.f32 %v15636_v1, %v3976_v42  ;;  %v19328_v51 = vmax.f32 %v14440_v17, %v19327_v16  ;;  %v19332_v25 = vld [vmem:[#allocation123_spill] sm:$0xff] }
 0x3ca   :  { %v4785_v9 = vadd.f32 %v16114_v20, %v4658_v34  ;;  %v4659_v55 = vmax.f32 %v19325_v26, %v4539_v29  ;;  %v19333_v44 = vmax.f32 %v19331_v0, %v19332_v25 }
 0x3cb   :  { %v4783_v11 = vadd.f32 %v16114_v20, %v4656_v49  ;;  %v4657_v39 = vmax.f32 %v19326_v15, %v4537_v28 }
 0x3cc   :  { %v4786_v48 = vadd.f32 %v16114_v20, %v4659_v55  ;;  %v4905_v43 = vmax.f32 %v4785_v9, 0.0  ;;  %v19335_v9 = vld [vmem:[#allocation124_spill] sm:$0xff] }
 0x3cd   :  { %v4784_v40 = vadd.f32 %v16114_v20, %v4657_v39  ;;  %v13047_v12 = vpop.f32.mrb[120].mxu0  ;;  %v4903_v57 = vmax.f32 %v4783_v11, 0.0  ;;  %v19336_v54 = vmax.f32 %v14456_v23, %v19335_v9  ;;  %v19339_v11 = vld [vmem:[#allocation125_spill] sm:$0xff]  ;;  %v19362_v9 = vld [vmem:[#allocation16_spill] sm:$0xff] }
 0x3ce   :  { %v4906_v37 = vmax.f32 %v4786_v48, 0.0  ;;  %v4542_v1 = vmax.f32 %v15640_v56, %v13047_v12  ;;  %v3989_v8 = vpop.f32.mrb[121].mxu0  ;;  %v19330_v56 = vmax.f32 %v14442_v18, %v19329_v50  ;;  %v19341_v48 = vld [vmem:[#allocation11_spill] sm:$0xff] }
 0x3cf   :  { %v4904_v27 = vmax.f32 %v4784_v40, 0.0  ;;  %v4540_v36 = vmax.f32 %v15642_v21, %v3989_v8  ;;  %v13048_v5 = vpop.f32.mrb[122].mxu0  ;;  %v19342_v40 = vld [vmem:[#allocation126_spill] sm:$0xff] }
 0x3d0   :  { %v16226_v33 = vpack.c.bf16 %v4906_v37, %v4905_v43  ;;  %v4662_v58 = vmax.f32 %v19328_v51, %v4542_v1  ;;  %v4543_v6 = vmax.f32 %v15647_v61, %v13048_v5  ;;  %v3992_v19 = vpop.f32.mrb[123].mxu0  ;;  %v19334_v61 = vmax.f32 %v14452_v22, %v14970_v60  ;;  %v19345_v37 = vld [vmem:[#allocation127_spill] sm:$0xff] }
 0x3d1   :  { %v16232_v63 = vpack.c.bf16 %v4904_v27, %v4903_v57  ;;  %v4660_v30 = vmax.f32 %v19330_v56, %v4540_v36  ;;  %v4541_v41 = vmax.f32 %v15652_v53, %v3992_v19  ;;  %v19343_v12 = vmax.f32 %v19341_v48, %v19342_v40  ;;  %v19348_v19 = vld [vmem:[#allocation225_spill] sm:$0xff] }
 0x3d2   :  { %v4789_v21 = vadd.f32 %v16114_v20, %v4662_v58  ;;  %v4663_v46 = vmax.f32 %v19333_v44, %v4543_v6  ;;  %v19353_v44 = vld [vmem:[#allocation226_spill] sm:$0xff] }
 0x3d3   :  { %v4787_v17 = vadd.f32 %v16114_v20, %v4660_v30  ;;  %v4661_v32 = vmax.f32 %v19334_v61, %v4541_v41  ;;  %v19350_v41 = vld [vmem:[#allocation13_spill] sm:$0xff]  ;;  %v19354_v61 = vld [vmem:[#allocation14_spill] sm:$0xff] }
 0x3d4   :  { %v4790_v10 = vadd.f32 %v16114_v20, %v4663_v46  ;;  %v4909_v34 = vmax.f32 %v4789_v21, 0.0  ;;  %v19351_v21 = vld [vmem:[#allocation128_spill] sm:$0xff] }
 0x3d5   :  { %v4788_v59 = vadd.f32 %v16114_v20, %v4661_v32  ;;  %v13051_v18 = vpop.f32.mrb[124].mxu0  ;;  %v4907_v4 = vmax.f32 %v4787_v17, 0.0  ;;  %v19352_v0 = vmax.f32 %v19350_v41, %v19351_v21  ;;  %v19355_v32 = vld [vmem:[#allocation129_spill] sm:$0xff] }
 0x3d6   :  { %v4910_v29 = vmax.f32 %v4790_v10, 0.0  ;;  %v4546_v53 = vmax.f32 %v15656_v38, %v13051_v18  ;;  %v4005_v42 = vpop.f32.mrb[125].mxu0  ;;  %v19340_v38 = vmax.f32 %v14458_v24, %v19339_v11  ;;  %v19356_v10 = vmax.f32 %v19354_v61, %v19355_v32  ;;  %v19357_v18 = vld [vmem:[#allocation227_spill] sm:$0xff]  ;;  %v13753_v41 = vld [vmem:[%s18656_s3 + $0x208] sm:$0xff]   ;;  %v19378_v32 = vld [vmem:[#allocation20_spill] sm:$0xff] }
 0x3d7   :  { %v4908_v13 = vmax.f32 %v4788_v59, 0.0  ;;  %v4544_v49 = vmax.f32 %v15658_v3, %v4005_v42  ;;  %v13052_v28 = vpop.f32.mrb[126].mxu0  ;;  %v19360_v42 = vld [vmem:[#allocation130_spill] sm:$0xff] }
 0x3d8   :  { %v4666_v60 = vmax.f32 %v19336_v54, %v4546_v53  ;;  %v4547_v22 = vmax.f32 %v15663_v52, %v13052_v28  ;;  %v4008_v14 = vpop.f32.mrb[127].mxu0  ;;  %v16254_v26 = vpack.c.bf16 %v4910_v29, %v4909_v34  ;;  %v19344_v52 = vld [vmem:[#allocation12_spill] sm:$0xff]  ;;  %v19359_v53 = vld [vmem:[#allocation15_spill] sm:$0xff] }
 0x3d9   :  { %v16256_v55 = vpack.c.bf16 %v4908_v13, %v4907_v4  ;;  %v4664_v15 = vmax.f32 %v19340_v38, %v4544_v49  ;;  %v4545_v39 = vmax.f32 %v15668_v47, %v4008_v14  ;;  %v19346_v1 = vmax.f32 %v19344_v52, %v19345_v37  ;;  %v19347_v47 = vld [vmem:[#allocation224_spill] sm:$0xff]  ;;  %v19363_v54 = vld [vmem:[#allocation131_spill] sm:$0xff] }
 0x3da   :  { %19337 = vst [vmem:[#allocation109_spill] sm:$0xff] %v16254_v26  ;;  %v4793_v3 = vadd.f32 %v16114_v20, %v4666_v60  ;;  %v4667_v23 = vmax.f32 %v19343_v12, %v4547_v22  ;;  %v19361_v4 = vmax.f32 %v19359_v53, %v19360_v42  ;;  %v19364_v60 = vmax.f32 %v19362_v9, %v19363_v54  ;;  %v13754_v53 = vld [vmem:[%s18656_s3 + $0x1c8] sm:$0xff]   ;;  %v19381_v9 = vld [vmem:[#allocation232_spill] sm:$0xff] }
 0x3db   :  { %19338 = vst [vmem:[#allocation110_spill] sm:$0xff] %v16256_v55  ;;  %v4791_v43 = vadd.f32 %v16114_v20, %v4664_v15  ;;  %v4665_v8 = vmax.f32 %v19346_v1, %v4545_v39  ;;  %v19365_v15 = vld [vmem:[#allocation228_spill] sm:$0xff]  ;;  %v19367_v1 = vld [vmem:[#allocation17_spill] sm:$0xff]  ;;  %v19650_v26 = vld [vmem:[#allocation198_spill] sm:$0xff] }
 0x3dc   :  { %v4794_v57 = vadd.f32 %v16114_v20, %v4667_v23  ;;  %v4913_v36 = vmax.f32 %v4793_v3, 0.0 }
 0x3dd   :  { %v4792_v27 = vadd.f32 %v16114_v20, %v4665_v8  ;;  %v13055_v24 = vpop.f32.mrb[128].mxu0  ;;  %v4911_v58 = vmax.f32 %v4791_v43, 0.0  ;;  %v19366_v43 = vld [vmem:[#allocation229_spill] sm:$0xff]  ;;  %v19368_v8 = vld [vmem:[#allocation132_spill] sm:$0xff] }
 0x3de   :  { %v4914_v5 = vmax.f32 %v4794_v57, 0.0  ;;  %v4550_v16 = vmax.f32 %v19347_v47, %v13055_v24  ;;  %v4021_v51 = vpop.f32.mrb[129].mxu0  ;;  %v19369_v57 = vmax.f32 %v19367_v1, %v19368_v8  ;;  %v19370_v24 = vld [vmem:[#allocation230_spill] sm:$0xff]  ;;  %v19388_v1 = vld [vmem:[#allocation137_spill] sm:$0xff] }
 0x3df   :  { %v4912_v6 = vmax.f32 %v4792_v27, 0.0  ;;  %v4548_v50 = vmax.f32 %v19348_v19, %v4021_v51  ;;  %v13056_v56 = vpop.f32.mrb[130].mxu0  ;;  %v19371_v51 = vld [vmem:[#allocation18_spill] sm:$0xff] }
 0x3e0   :  { %v16274_v30 = vpack.c.bf16 %v4914_v5, %v4913_v36  ;;  %v4670_v25 = vmax.f32 %v19352_v0, %v4550_v16  ;;  %v4551_v46 = vmax.f32 %v19353_v44, %v13056_v56  ;;  %v4024_v17 = vpop.f32.mrb[131].mxu0  ;;  %v13752_v16 = vld [vmem:[%s18656_s3 + $0x1c0] sm:$0xff]   ;;  %v19376_v44 = vld [vmem:[#allocation134_spill] sm:$0xff] }
 0x3e1   :  { %v4668_v59 = vmax.f32 %v19356_v10, %v4548_v50  ;;  %v4549_v34 = vmax.f32 %v19357_v18, %v4024_v17  ;;  %v16284_v29 = vpack.c.bf16 %v4912_v6, %v4911_v58  ;;  %v19372_v58 = vld [vmem:[#allocation133_spill] sm:$0xff]  ;;  %v19374_v50 = vld [vmem:[#allocation231_spill] sm:$0xff] }
 0x3e2   :  { %19349 = vst [vmem:[#allocation6_spill] sm:$0xff] %v16274_v30  ;;  %v4671_v13 = vmax.f32 %v19361_v4, %v4551_v46  ;;  %v4797_v49 = vadd.f32 %v16114_v20, %v4670_v25  ;;  %v19373_v6 = vmax.f32 %v19371_v51, %v19372_v58  ;;  %v19375_v25 = vld [vmem:[#allocation19_spill] sm:$0xff]  ;;  %v19392_v58 = vld [vmem:[#allocation138_spill] sm:$0xff] }
 0x3e3   :  { %19358 = vst [vmem:[#allocation111_spill] sm:$0xff] %v16284_v29  ;;  %v4795_v28 = vadd.f32 %v16114_v20, %v4668_v59  ;;  %v4669_v22 = vmax.f32 %v19364_v60, %v4549_v34  ;;  %v19377_v46 = vmax.f32 %v19375_v25, %v19376_v44  ;;  %v19379_v10 = vld [vmem:[#allocation135_spill] sm:$0xff] }
 0x3e4   :  { %v4798_v14 = vadd.f32 %v16114_v20, %v4671_v13  ;;  %v4917_v48 = vmax.f32 %v4797_v49, 0.0  ;;  %v19380_v59 = vmax.f32 %v19378_v32, %v19379_v10  ;;  %v13755_v13 = vld [vmem:[%s18656_s3 + $0x210] sm:$0xff]   ;;  %v13758_v32 = vld [vmem:[%s18656_s3 + $0x1d8] sm:$0xff]  }
 0x3e5   :  { %v4796_v11 = vadd.f32 %v16114_v20, %v4669_v22  ;;  %v13059_v38 = vpop.f32.mrb[132].mxu0  ;;  %v4915_v12 = vmax.f32 %v4795_v28, 0.0  ;;  %v19391_v51 = vld [vmem:[#allocation23_spill] sm:$0xff] }
 0x3e6   :  { %v4554_v39 = vmax.f32 %v19365_v15, %v13059_v38  ;;  %v4037_v3 = vpop.f32.mrb[133].mxu0  ;;  %v4918_v40 = vmax.f32 %v4798_v14, 0.0 }
 0x3e7   :  { %v4916_v23 = vmax.f32 %v4796_v11, 0.0  ;;  %v4552_v52 = vmax.f32 %v19366_v43, %v4037_v3  ;;  %v13060_v37 = vpop.f32.mrb[134].mxu0  ;;  %v19382_v11 = vld [vmem:[#allocation233_spill] sm:$0xff] }
 0x3e8   :  { %v4674_v27 = vmax.f32 %v19369_v57, %v4554_v39  ;;  %v4555_v36 = vmax.f32 %v19370_v24, %v13060_v37  ;;  %v4040_v5 = vpop.f32.mrb[135].mxu0  ;;  %v16302_v47 = vpack.c.bf16 %v4918_v40, %v4917_v48  ;;  %v19383_v3 = vld [vmem:[#allocation21_spill] sm:$0xff]  ;;  %v19384_v48 = vld [vmem:[#allocation136_spill] sm:$0xff]  ;;  %v19387_v37 = vld [vmem:[#allocation22_spill] sm:$0xff] }
 0x3e9   :  { %v4672_v19 = vmax.f32 %v19373_v6, %v4552_v52  ;;  %v4553_v56 = vmax.f32 %v19374_v50, %v4040_v5  ;;  %v16314_v21 = vpack.c.bf16 %v4916_v23, %v4915_v12  ;;  %v19385_v40 = vmax.f32 %v19383_v3, %v19384_v48  ;;  %v19386_v23 = vld [vmem:[#allocation234_spill] sm:$0xff]  ;;  %v13757_v50 = vld [vmem:[%s18656_s3 + $0x218] sm:$0xff]  }
 0x3ea   :  { %v4801_v0 = vadd.f32 %v16114_v20, %v4674_v27  ;;  %v4675_v17 = vmax.f32 %v19377_v46, %v4555_v36  ;;  %5645 = vmatprep.mubr.bf16.mxu1 %v16302_v47  ;;  %v19389_v8 = vmax.f32 %v19387_v37, %v19388_v1  ;;  %v19390_v27 = vld [vmem:[#allocation235_spill] sm:$0xff]  ;;  %v19393_v6 = vmax.f32 %v19391_v51, %v19392_v58  ;;  %v13760_v1 = vld [vmem:[%s18656_s3 + $0x1e0] sm:$0xff]  }
 0x3eb   :  { %v4799_v61 = vadd.f32 %v16114_v20, %v4672_v19  ;;  %v4673_v18 = vmax.f32 %v19380_v59, %v4553_v56  ;;  %5646 = vmatmul.mubr.bf16.vlgmr.msra.gmra.mrb[0].mxu1 %v16152_v35  ;;  %v13756_v5 = vld [vmem:[%s18656_s3 + $0x1d0] sm:$0xff]   ;;  %v19410_v58 = vld [vmem:[#allocation28_spill] sm:$0xff] }
 0x3ec   :  { %v4802_v34 = vadd.f32 %v16114_v20, %v4675_v17  ;;  %11825 = vmatpush3.bf16.msra.mxu1 %v13752_v16  ;;  %v4921_v49 = vmax.f32 %v4801_v0, 0.0  ;;  %v19395_v0 = vld [vmem:[#allocation139_spill] sm:$0xff] }
 0x3ed   :  { %v4800_v42 = vadd.f32 %v16114_v20, %v4673_v18  ;;  %v13063_v4 = vpop.f32.mrb[136].mxu0  ;;  %11826 = vmatprep.subr.bf16.mxu1 %v13753_v41  ;;  %v4919_v22 = vmax.f32 %v4799_v61, 0.0  ;;  %v19394_v41 = vld [vmem:[#allocation24_spill] sm:$0xff] }
 0x3ee   :  { %v4922_v28 = vmax.f32 %v4802_v34, 0.0  ;;  %v4558_v54 = vmax.f32 %v19381_v9, %v13063_v4  ;;  %v4053_v60 = vpop.f32.mrb[137].mxu0  ;;  %v19396_v25 = vmax.f32 %v19394_v41, %v19395_v0  ;;  %v19397_v18 = vld [vmem:[#allocation236_spill] sm:$0xff] }
 0x3ef   :  { %v4920_v14 = vmax.f32 %v4800_v42, 0.0  ;;  %v4556_v38 = vmax.f32 %v19382_v11, %v4053_v60  ;;  %v13064_v15 = vpop.f32.mrb[138].mxu0  ;;  %v13759_v42 = vld [vmem:[%s18656_s3 + $0x220] sm:$0xff]  }
 0x3f0   :  { %v16336_v39 = vpack.c.bf16 %v4922_v28, %v4921_v49  ;;  %v4678_v12 = vmax.f32 %v19385_v40, %v4558_v54  ;;  %v4559_v43 = vmax.f32 %v19386_v23, %v13064_v15  ;;  %v4056_v52 = vpop.f32.mrb[139].mxu0  ;;  %11827 = vmatpush3.bf16.msra.mxu1 %v13754_v53  ;;  %v19398_v49 = vld [vmem:[#allocation237_spill] sm:$0xff]  ;;  %v19403_v40 = vld [vmem:[#allocation26_spill] sm:$0xff] }
 0x3f1   :  { %v4676_v57 = vmax.f32 %v19389_v8, %v4556_v38  ;;  %v4557_v24 = vmax.f32 %v19390_v27, %v4056_v52  ;;  %v16346_v36 = vpack.c.bf16 %v4920_v14, %v4919_v22  ;;  %11828 = vmatprep.subr.bf16.mxu1 %v13755_v13  ;;  %v19399_v60 = vld [vmem:[#allocation25_spill] sm:$0xff]  ;;  %v19400_v22 = vld [vmem:[#allocation140_spill] sm:$0xff]  ;;  %v19402_v38 = vld [vmem:[#allocation238_spill] sm:$0xff] }
 0x3f2   :  { %v4805_v16 = vadd.f32 %v16114_v20, %v4678_v12  ;;  %v4679_v19 = vmax.f32 %v19393_v6, %v4559_v43  ;;  %v19401_v14 = vmax.f32 %v19399_v60, %v19400_v22  ;;  %v19404_v12 = vld [vmem:[#allocation141_spill] sm:$0xff]  ;;  %v19406_v52 = vld [vmem:[#allocation239_spill] sm:$0xff]  ;;  %v19408_v27 = vld [vmem:[#allocation142_spill] sm:$0xff] }
 0x3f3   :  { %v4803_v56 = vadd.f32 %v16114_v20, %v4676_v57  ;;  %v4677_v44 = vmax.f32 %v19396_v25, %v4557_v24  ;;  %5653 = vmatprep.mubr.bf16.mxu1 %v16346_v36  ;;  %v19405_v23 = vmax.f32 %v19403_v40, %v19404_v12  ;;  %v19407_v57 = vld [vmem:[#allocation27_spill] sm:$0xff]  ;;  %v13762_v25 = vld [vmem:[%s18656_s3 + $0x1e8] sm:$0xff]  }
 0x3f4   :  { %v4806_v46 = vadd.f32 %v16114_v20, %v4679_v19  ;;  %5654 = vmatmul.mubr.bf16.gmra.mrb[4].mxu1 %v16187_v7  ;;  %v4925_v10 = vmax.f32 %v4805_v16, 0.0  ;;  %v19409_v24 = vmax.f32 %v19407_v57, %v19408_v27  ;;  %v13761_v16 = vld [vmem:[%s18656_s3 + $0x228] sm:$0xff]   ;;  %v19411_v6 = vld [vmem:[#allocation143_spill] sm:$0xff] }
 0x3f5   :  { %v4804_v17 = vadd.f32 %v16114_v20, %v4677_v44  ;;  %v13067_v61 = vpop.f32.mrb[140].mxu0  ;;  %5661 = vmatprep.mubr.bf16.mxu1 %v16336_v39  ;;  %11829 = vmatpush3.bf16.msra.mxu1 %v13756_v5  ;;  %v4923_v4 = vmax.f32 %v4803_v56, 0.0  ;;  %v19412_v19 = vmax.f32 %v19410_v58, %v19411_v6  ;;  %v19418_v60 = vld [vmem:[#allocation242_spill] sm:$0xff]  ;;  %v19422_v12 = vld [vmem:[#allocation243_spill] sm:$0xff] }
 0x3f6   :  { %v4926_v59 = vmax.f32 %v4806_v46, 0.0  ;;  %v4562_v34 = vmax.f32 %v19397_v18, %v13067_v61  ;;  %v4069_v53 = vpop.f32.mrb[141].mxu0  ;;  %11830 = vmatprep.subr.bf16.mxu1 %v13757_v50  ;;  %v13765_v27 = vld [vmem:[%s18656_s3 + $0x238] sm:$0xff]  }
 0x3f7   :  { %v4924_v13 = vmax.f32 %v4804_v17, 0.0  ;;  %v4560_v28 = vmax.f32 %v19398_v49, %v4069_v53  ;;  %v13068_v9 = vpop.f32.mrb[142].mxu0  ;;  %v19413_v17 = vld [vmem:[#allocation240_spill] sm:$0xff] }
 0x3f8   :  { %v16375_v54 = vpack.c.bf16 %v4926_v59, %v4925_v10  ;;  %v4682_v11 = vmax.f32 %v19401_v14, %v4562_v34  ;;  %v4563_v15 = vmax.f32 %v19402_v38, %v13068_v9  ;;  %v4072_v3 = vpop.f32.mrb[143].mxu0  ;;  %v13763_v10 = vld [vmem:[%s18656_s3 + $0x230] sm:$0xff]   ;;  %v19414_v34 = vld [vmem:[#allocation241_spill] sm:$0xff]  ;;  %v19416_v49 = vld [vmem:[#allocation144_spill] sm:$0xff] }
 0x3f9   :  { %v16381_v48 = vpack.c.bf16 %v4924_v13, %v4923_v4  ;;  %v4680_v43 = vmax.f32 %v19405_v23, %v4560_v28  ;;  %v4561_v37 = vmax.f32 %v19406_v52, %v4072_v3  ;;  %11831 = vmatpush3.bf16.msra.mxu1 %v13758_v32  ;;  %v19415_v13 = vld [vmem:[#allocation29_spill] sm:$0xff]  ;;  %v19419_v38 = vld [vmem:[#allocation30_spill] sm:$0xff] }
 0x3fa   :  { %v4809_v8 = vadd.f32 %v16114_v20, %v4682_v11  ;;  %v4683_v5 = vmax.f32 %v19409_v24, %v4563_v15  ;;  %11832 = vmatprep.subr.bf16.mxu1 %v13759_v42  ;;  %v19417_v28 = vmax.f32 %v19415_v13, %v19416_v49  ;;  %v19420_v15 = vld [vmem:[#allocation145_spill] sm:$0xff]  ;;  %v19434_v49 = vld [vmem:[#allocation246_spill] sm:$0xff] }
 0x3fb   :  { %v4807_v51 = vadd.f32 %v16114_v20, %v4680_v43  ;;  %v4681_v50 = vmax.f32 %v19412_v19, %v4561_v37  ;;  %v19421_v3 = vmax.f32 %v19419_v38, %v19420_v15  ;;  %v13764_v43 = vld [vmem:[%s18656_s3 + $0x1f0] sm:$0xff]   ;;  %v19438_v38 = vld [vmem:[#allocation149_spill] sm:$0xff] }
 0x3fc   :  { %v4810_v56 = vadd.f32 %v16114_v20, %v4683_v5  ;;  %5662 = vmatmul.mubr.bf16.gmra.mrb[8].mxu1 %v16177_v31  ;;  %v4929_v44 = vmax.f32 %v4809_v8, 0.0  ;;  %v19423_v37 = vld [vmem:[#allocation31_spill] sm:$0xff]  ;;  %v19426_v5 = vld [vmem:[#allocation32_spill] sm:$0xff] }
 0x3fd   :  { %v4808_v41 = vadd.f32 %v16114_v20, %v4681_v50  ;;  %v13071_v0 = vpop.f32.mrb[144].mxu0  ;;  %5669 = vmatprep.mubr.bf16.mxu1 %v16381_v48  ;;  %11833 = vmatpush3.bf16.msra.mxu1 %v13760_v1  ;;  %v4927_v59 = vmax.f32 %v4807_v51, 0.0  ;;  %v19424_v1 = vld [vmem:[#allocation146_spill] sm:$0xff] }
 0x3fe   :  { %v4930_v46 = vmax.f32 %v4810_v56, 0.0  ;;  %v4566_v61 = vmax.f32 %v19413_v17, %v13071_v0  ;;  %v4085_v32 = vpop.f32.mrb[145].mxu0  ;;  %11834 = vmatprep.subr.bf16.mxu1 %v13761_v16  ;;  %v19425_v8 = vmax.f32 %v19423_v37, %v19424_v1  ;;  %v19427_v16 = vld [vmem:[#allocation147_spill] sm:$0xff]  ;;  %v16450_v17 = vld [vmem:[%s18656_s3 + $0x240] sm:$0xff]  }
 0x3ff   :  { %v4928_v18 = vmax.f32 %v4808_v41, 0.0  ;;  %v4564_v53 = vmax.f32 %v19414_v34, %v4085_v32  ;;  %v13072_v42 = vpop.f32.mrb[146].mxu0  ;;  %v19428_v51 = vmax.f32 %v19426_v5, %v19427_v16  ;;  %v13766_v56 = vld [vmem:[%s18656_s3 + $0x1f8] sm:$0xff]   ;;  %v19431_v34 = vld [vmem:[#allocation33_spill] sm:$0xff] }
 0x400   :  { %v16413_v4 = vpack.c.bf16 %v4930_v46, %v4929_v44  ;;  %v4686_v9 = vmax.f32 %v19417_v28, %v4566_v61  ;;  %v4567_v22 = vmax.f32 %v19418_v60, %v13072_v42  ;;  %v4088_v14 = vpop.f32.mrb[147].mxu0 }
 0x401   :  { %v16419_v11 = vpack.c.bf16 %v4928_v18, %v4927_v59  ;;  %v4684_v40 = vmax.f32 %v19421_v3, %v4564_v53  ;;  %v4565_v23 = vmax.f32 %v19422_v12, %v4088_v14  ;;  %11835 = vmatpush3.bf16.msra.mxu1 %v13762_v25  ;;  %v19429_v25 = vld [vmem:[#allocation244_spill] sm:$0xff]  ;;  %v19437_v14 = vld [vmem:[#allocation34_spill] sm:$0xff] }
 0x402   :  { %v4813_v52 = vadd.f32 %v16114_v20, %v4686_v9  ;;  %v4687_v57 = vmax.f32 %v19425_v8, %v4567_v22  ;;  %11836 = vmatprep.subr.bf16.mxu1 %v13763_v10  ;;  %v19430_v10 = vld [vmem:[#allocation245_spill] sm:$0xff]  ;;  %v19432_v53 = vld [vmem:[#allocation148_spill] sm:$0xff]  ;;  %v19439_v15 = vmax.f32 %v19437_v14, %v19438_v38  ;;  %v19457_v38 = vld [vmem:[#allocation251_spill] sm:$0xff] }
 0x403   :  { %v4811_v24 = vadd.f32 %v16114_v20, %v4684_v40  ;;  %v4685_v58 = vmax.f32 %v19428_v51, %v4565_v23  ;;  %v19433_v42 = vmax.f32 %v19431_v34, %v19432_v53  ;;  %v19440_v40 = vld [vmem:[#allocation247_spill] sm:$0xff]  ;;  %v19452_v34 = vld [vmem:[#allocation250_spill] sm:$0xff] }
 0x404   :  { %v4814_v6 = vadd.f32 %v16114_v20, %v4687_v57  ;;  %5670 = vmatmul.mubr.bf16.gmra.mrb[12].mxu1 %v16208_v62  ;;  %v4933_v41 = vmax.f32 %v4813_v52, 0.0  ;;  %v19442_v52 = vld [vmem:[#allocation150_spill] sm:$0xff]  ;;  %v19444_v57 = vld [vmem:[#allocation36_spill] sm:$0xff] }
 0x405   :  { %v4812_v19 = vadd.f32 %v16114_v20, %v4685_v58  ;;  %v13075_v50 = vpop.f32.mrb[148].mxu0  ;;  %5677 = vmatprep.mubr.bf16.mxu1 %v16375_v54  ;;  %11837 = vmatpush3.bf16.msra.mxu1 %v13764_v43  ;;  %v4931_v61 = vmax.f32 %v4811_v24, 0.0  ;;  %v19441_v43 = vld [vmem:[#allocation35_spill] sm:$0xff] }
 0x406   :  { %v4934_v0 = vmax.f32 %v4814_v6, 0.0  ;;  %v4570_v44 = vmax.f32 %v19429_v25, %v13075_v50  ;;  %v4101_v46 = vpop.f32.mrb[149].mxu0  ;;  %11838 = vmatprep.subr.bf16.mxu1 %v13765_v27  ;;  %v19443_v37 = vmax.f32 %v19441_v43, %v19442_v52  ;;  %v19445_v27 = vld [vmem:[#allocation151_spill] sm:$0xff]  ;;  %v19447_v50 = vld [vmem:[#allocation248_spill] sm:$0xff] }
 0x407   :  { %v4932_v32 = vmax.f32 %v4812_v19, 0.0  ;;  %v4568_v59 = vmax.f32 %v19430_v10, %v4101_v46  ;;  %v13076_v18 = vpop.f32.mrb[150].mxu0  ;;  %v19446_v24 = vmax.f32 %v19444_v57, %v19445_v27  ;;  %v19450_v10 = vld [vmem:[#allocation152_spill] sm:$0xff] }
 0x408   :  { %v4690_v13 = vmax.f32 %v19433_v42, %v4570_v44  ;;  %v4571_v28 = vmax.f32 %v19434_v49, %v13076_v18  ;;  %v4104_v9 = vpop.f32.mrb[151].mxu0  ;;  %v16457_v60 = vpack.c.bf16 %v4934_v0, %v4933_v41  ;;  %v19448_v44 = vld [vmem:[#allocation249_spill] sm:$0xff]  ;;  %v19454_v49 = vld [vmem:[#allocation38_spill] sm:$0xff] }
 0x409   :  { %v16459_v22 = vpack.c.bf16 %v4932_v32, %v4931_v61  ;;  %v4688_v3 = vmax.f32 %v19439_v15, %v4568_v59  ;;  %v4569_v12 = vmax.f32 %v19440_v40, %v4104_v9  ;;  %11839 = vmatpush3.bf16.msra.mxu1 %v13766_v56  ;;  %v19449_v32 = vld [vmem:[#allocation37_spill] sm:$0xff] }
 0x40a   :  { %19435 = vst [vmem:[#allocation112_spill] sm:$0xff] %v16457_v60  ;;  %v4817_v23 = vadd.f32 %v16114_v20, %v4690_v13  ;;  %v4691_v1 = vmax.f32 %v19443_v37, %v4571_v28  ;;  %13149 = vmatprep.subr.bf16.mxu1 %v16450_v17  ;;  %v19451_v59 = vmax.f32 %v19449_v32, %v19450_v10  ;;  %v19455_v28 = vld [vmem:[#allocation153_spill] sm:$0xff]  ;;  %v19468_v32 = vld [vmem:[#allocation156_spill] sm:$0xff] }
 0x40b   :  { %19436 = vst [vmem:[#allocation113_spill] sm:$0xff] %v16459_v22  ;;  %v4815_v8 = vadd.f32 %v16114_v20, %v4688_v3  ;;  %v4689_v5 = vmax.f32 %v19446_v24, %v4569_v12  ;;  %v19456_v9 = vmax.f32 %v19454_v49, %v19455_v28  ;;  %v19459_v12 = vld [vmem:[#allocation39_spill] sm:$0xff]  ;;  %v19471_v49 = vld [vmem:[#allocation42_spill] sm:$0xff]  ;;  %v19472_v28 = vld [vmem:[#allocation157_spill] sm:$0xff] }
 0x40c   :  { %v4818_v16 = vadd.f32 %v16114_v20, %v4691_v1  ;;  %5678 = vmatmul.mubr.bf16.gmra.mrb[16].mxu1 %v16202_v2  ;;  %v4937_v6 = vmax.f32 %v4817_v23, 0.0  ;;  %v19460_v23 = vld [vmem:[#allocation154_spill] sm:$0xff]  ;;  %v19462_v1 = vld [vmem:[#allocation40_spill] sm:$0xff] }
 0x40d   :  { %v4816_v51 = vadd.f32 %v16114_v20, %v4689_v5  ;;  %v13079_v58 = vpop.f32.mrb[152].mxu0  ;;  %5685 = vmatprep.mubr.bf16.mxu1 %v16419_v11  ;;  %v4935_v0 = vmax.f32 %v4815_v8, 0.0  ;;  %v19461_v43 = vmax.f32 %v19459_v12, %v19460_v23  ;;  %v19463_v8 = vld [vmem:[#allocation155_spill] sm:$0xff]  ;;  %v19476_v23 = vld [vmem:[#allocation158_spill] sm:$0xff] }
 0x40e   :  { %v4938_v19 = vmax.f32 %v4818_v16, 0.0  ;;  %v4574_v56 = vmax.f32 %v19447_v50, %v13079_v58  ;;  %v4117_v41 = vpop.f32.mrb[153].mxu0  ;;  %v19464_v57 = vmax.f32 %v19462_v1, %v19463_v8  ;;  %v19475_v12 = vld [vmem:[#allocation43_spill] sm:$0xff]  ;;  %v19478_v1 = vld [vmem:[#allocation44_spill] sm:$0xff] }
 0x40f   :  { %v4936_v25 = vmax.f32 %v4816_v51, 0.0  ;;  %v4572_v46 = vmax.f32 %v19448_v44, %v4117_v41  ;;  %v13080_v61 = vpop.f32.mrb[154].mxu0  ;;  %v19479_v8 = vld [vmem:[#allocation159_spill] sm:$0xff] }
 0x410   :  { %v4694_v18 = vmax.f32 %v19451_v59, %v4574_v56  ;;  %v4575_v53 = vmax.f32 %v19452_v34, %v13080_v61  ;;  %v4120_v42 = vpop.f32.mrb[155].mxu0  ;;  %v16484_v13 = vpack.c.bf16 %v4938_v19, %v4937_v6  ;;  %v19465_v6 = vld [vmem:[#allocation252_spill] sm:$0xff]  ;;  %v19467_v61 = vld [vmem:[#allocation41_spill] sm:$0xff] }
 0x411   :  { %v4692_v14 = vmax.f32 %v19456_v9, %v4572_v46  ;;  %v4573_v15 = vmax.f32 %v19457_v38, %v4120_v42  ;;  %v16490_v3 = vpack.c.bf16 %v4936_v25, %v4935_v0  ;;  %v19466_v0 = vld [vmem:[#allocation253_spill] sm:$0xff]  ;;  %v19469_v10 = vmax.f32 %v19467_v61, %v19468_v32  ;;  %v19474_v38 = vld [vmem:[#allocation255_spill] sm:$0xff] }
 0x412   :  { %19453 = vst [vmem:[#allocation7_spill] sm:$0xff] %v16484_v13  ;;  %v4821_v40 = vadd.f32 %v16114_v20, %v4694_v18  ;;  %v4695_v52 = vmax.f32 %v19461_v43, %v4575_v53  ;;  %v19470_v18 = vld [vmem:[#allocation254_spill] sm:$0xff]  ;;  %v19473_v9 = vmax.f32 %v19471_v49, %v19472_v28  ;;  %v19477_v43 = vmax.f32 %v19475_v12, %v19476_v23  ;;  %v19483_v32 = vld [vmem:[#allocation45_spill] sm:$0xff] }
 0x413   :  { %19458 = vst [vmem:[#allocation114_spill] sm:$0xff] %v16490_v3  ;;  %v4819_v37 = vadd.f32 %v16114_v20, %v4692_v14  ;;  %v4693_v27 = vmax.f32 %v19464_v57, %v4573_v15  ;;  %v19480_v57 = vmax.f32 %v19478_v1, %v19479_v8  ;;  %v19487_v28 = vld [vmem:[#allocation46_spill] sm:$0xff] }
 0x414   :  { %v4822_v24 = vadd.f32 %v16114_v20, %v4695_v52  ;;  %5686 = vmatmul.mubr.bf16.gmra.mrb[20].mxu1 %v16232_v63  ;;  %v4941_v51 = vmax.f32 %v4821_v40, 0.0 }
 0x415   :  { %v4820_v5 = vadd.f32 %v16114_v20, %v4693_v27  ;;  %v13083_v16 = vpop.f32.mrb[156].mxu0  ;;  %5693 = vmatprep.mubr.bf16.mxu1 %v16413_v4  ;;  %v4939_v56 = vmax.f32 %v4819_v37, 0.0 }
 0x416   :  { %v4942_v58 = vmax.f32 %v4822_v24, 0.0  ;;  %v4578_v19 = vmax.f32 %v19465_v6, %v13083_v16  ;;  %v4133_v50 = vpop.f32.mrb[157].mxu0  ;;  %v19481_v6 = vld [vmem:[#allocation256_spill] sm:$0xff] }
 0x417   :  { %v4940_v41 = vmax.f32 %v4820_v5, 0.0  ;;  %v4576_v25 = vmax.f32 %v19466_v0, %v4133_v50  ;;  %v13084_v44 = vpop.f32.mrb[158].mxu0  ;;  %v19482_v0 = vld [vmem:[#allocation257_spill] sm:$0xff] }
 0x418   :  { %v16506_v46 = vpack.c.bf16 %v4942_v58, %v4941_v51  ;;  %v4698_v59 = vmax.f32 %v19469_v10, %v4578_v19  ;;  %v4579_v34 = vmax.f32 %v19470_v18, %v13084_v44  ;;  %v4136_v53 = vpop.f32.mrb[159].mxu0  ;;  %v19484_v10 = vld [vmem:[#allocation160_spill] sm:$0xff] }
 0x419   :  { %v16512_v42 = vpack.c.bf16 %v4940_v41, %v4939_v56  ;;  %v4696_v14 = vmax.f32 %v19473_v9, %v4576_v25  ;;  %v4577_v15 = vmax.f32 %v19474_v38, %v4136_v53  ;;  %v19488_v9 = vld [vmem:[#allocation161_spill] sm:$0xff] }
 0x41a   :  { %v4825_v40 = vadd.f32 %v16114_v20, %v4698_v59  ;;  %v4699_v52 = vmax.f32 %v19477_v43, %v4579_v34  ;;  %v19485_v59 = vmax.f32 %v19483_v32, %v19484_v10  ;;  %v19486_v34 = vld [vmem:[#allocation258_spill] sm:$0xff]  ;;  %v19491_v43 = vld [vmem:[#allocation47_spill] sm:$0xff] }
 0x41b   :  { %v4823_v37 = vadd.f32 %v16114_v20, %v4696_v14  ;;  %v4697_v27 = vmax.f32 %v19480_v57, %v4577_v15  ;;  %v19489_v14 = vmax.f32 %v19487_v28, %v19488_v9  ;;  %v19490_v15 = vld [vmem:[#allocation259_spill] sm:$0xff]  ;;  %v19494_v57 = vld [vmem:[#allocation48_spill] sm:$0xff]  ;;  %v19503_v28 = vld [vmem:[#allocation262_spill] sm:$0xff] }
 0x41c   :  { %v4826_v24 = vadd.f32 %v16114_v20, %v4699_v52  ;;  %5694 = vmatmul.mubr.bf16.gmra.mrb[24].mxu1 %v16226_v33  ;;  %v4945_v51 = vmax.f32 %v4825_v40, 0.0  ;;  %v19492_v52 = vld [vmem:[#allocation162_spill] sm:$0xff] }
 0x41d   :  { %v4824_v5 = vadd.f32 %v16114_v20, %v4697_v27  ;;  %v13087_v16 = vpop.f32.mrb[160].mxu0  ;;  %5701 = vmatprep.mubr.bf16.mxu1 %v16459_v22  ;;  %v4943_v56 = vmax.f32 %v4823_v37, 0.0  ;;  %v19493_v37 = vmax.f32 %v19491_v43, %v19492_v52  ;;  %v19495_v27 = vld [vmem:[#allocation163_spill] sm:$0xff] }
 0x41e   :  { %v4946_v58 = vmax.f32 %v4826_v24, 0.0  ;;  %v4582_v19 = vmax.f32 %v19481_v6, %v13087_v16  ;;  %v4149_v50 = vpop.f32.mrb[161].mxu0  ;;  %v19496_v24 = vmax.f32 %v19494_v57, %v19495_v27  ;;  %v19508_v52 = vld [vmem:[#allocation263_spill] sm:$0xff]  ;;  %v19510_v57 = vld [vmem:[#allocation166_spill] sm:$0xff] }
 0x41f   :  { %v4944_v41 = vmax.f32 %v4824_v5, 0.0  ;;  %v4580_v25 = vmax.f32 %v19482_v0, %v4149_v50  ;;  %v13088_v44 = vpop.f32.mrb[162].mxu0  ;;  %v19497_v50 = vld [vmem:[#allocation260_spill] sm:$0xff] }
 0x420   :  { %v16532_v61 = vpack.c.bf16 %v4946_v58, %v4945_v51  ;;  %v4702_v18 = vmax.f32 %v19485_v59, %v4582_v19  ;;  %v4583_v53 = vmax.f32 %v19486_v34, %v13088_v44  ;;  %v4152_v49 = vpop.f32.mrb[163].mxu0  ;;  %v19498_v44 = vld [vmem:[#allocation261_spill] sm:$0xff]  ;;  %v19501_v34 = vld [vmem:[#allocation164_spill] sm:$0xff] }
 0x421   :  { %v4700_v38 = vmax.f32 %v19489_v14, %v4580_v25  ;;  %v4581_v40 = vmax.f32 %v19490_v15, %v4152_v49  ;;  %v16542_v12 = vpack.c.bf16 %v4944_v41, %v4943_v56  ;;  %v19505_v15 = vld [vmem:[#allocation50_spill] sm:$0xff] }
 0x422   :  { %v4829_v23 = vadd.f32 %v16114_v20, %v4702_v18  ;;  %v4703_v1 = vmax.f32 %v19493_v37, %v4583_v53  ;;  %v19500_v18 = vld [vmem:[#allocation49_spill] sm:$0xff] }
 0x423   :  { %v4827_v8 = vadd.f32 %v16114_v20, %v4700_v38  ;;  %v4701_v5 = vmax.f32 %v19496_v24, %v4581_v40  ;;  %v19502_v53 = vmax.f32 %v19500_v18, %v19501_v34  ;;  %v19506_v40 = vld [vmem:[#allocation165_spill] sm:$0xff] }
 0x424   :  { %v4830_v16 = vadd.f32 %v16114_v20, %v4703_v1  ;;  %5702 = vmatmul.mubr.bf16.gmra.mrb[28].mxu1 %v16256_v55  ;;  %v4949_v6 = vmax.f32 %v4829_v23, 0.0  ;;  %v19507_v23 = vmax.f32 %v19505_v15, %v19506_v40  ;;  %v19516_v34 = vld [vmem:[#allocation265_spill] sm:$0xff] }
 0x425   :  { %v4828_v51 = vadd.f32 %v16114_v20, %v4701_v5  ;;  %v13091_v58 = vpop.f32.mrb[164].mxu0  ;;  %v4947_v0 = vmax.f32 %v4827_v8, 0.0  ;;  %v19509_v8 = vld [vmem:[#allocation51_spill] sm:$0xff]  ;;  %v19731_v55 = vld [vmem:[#allocation217_spill] sm:$0xff] }
 0x426   :  { %v4950_v19 = vmax.f32 %v4830_v16, 0.0  ;;  %v4586_v56 = vmax.f32 %v19497_v50, %v13091_v58  ;;  %v4165_v41 = vpop.f32.mrb[165].mxu0  ;;  %v19511_v27 = vmax.f32 %v19509_v8, %v19510_v57  ;;  %v19512_v16 = vld [vmem:[#allocation52_spill] sm:$0xff]  ;;  %v19524_v8 = vld [vmem:[#allocation169_spill] sm:$0xff] }
 0x427   :  { %v4948_v25 = vmax.f32 %v4828_v51, 0.0  ;;  %v4584_v32 = vmax.f32 %v19498_v44, %v4165_v41  ;;  %v13092_v10 = vpop.f32.mrb[166].mxu0  ;;  %v19513_v51 = vld [vmem:[#allocation167_spill] sm:$0xff] }
 0x428   :  { %v16557_v59 = vpack.c.bf16 %v4950_v19, %v4949_v6  ;;  %v4706_v49 = vmax.f32 %v19502_v53, %v4586_v56  ;;  %v4587_v9 = vmax.f32 %v19503_v28, %v13092_v10  ;;  %v4168_v14 = vpop.f32.mrb[167].mxu0  ;;  %v19514_v58 = vmax.f32 %v19512_v16, %v19513_v51  ;;  %v19527_v51 = vld [vmem:[#allocation55_spill] sm:$0xff] }
 0x429   :  { %v16563_v38 = vpack.c.bf16 %v4948_v25, %v4947_v0  ;;  %v4704_v43 = vmax.f32 %v19507_v23, %v4584_v32  ;;  %v4585_v37 = vmax.f32 %v19508_v52, %v4168_v14  ;;  %v19515_v25 = vld [vmem:[#allocation264_spill] sm:$0xff]  ;;  %v19521_v23 = vld [vmem:[#allocation266_spill] sm:$0xff] }
 0x42a   :  { %19499 = vst [vmem:[#allocation115_spill] sm:$0xff] %v16557_v59  ;;  %v4833_v1 = vadd.f32 %v16114_v20, %v4706_v49  ;;  %v4707_v24 = vmax.f32 %v19511_v27, %v4587_v9  ;;  %v19518_v9 = vld [vmem:[#allocation53_spill] sm:$0xff]  ;;  %v19519_v14 = vld [vmem:[#allocation168_spill] sm:$0xff] }
 0x42b   :  { %19504 = vst [vmem:[#allocation116_spill] sm:$0xff] %v16563_v38  ;;  %v4831_v5 = vadd.f32 %v16114_v20, %v4704_v43  ;;  %v4705_v6 = vmax.f32 %v19514_v58, %v4585_v37  ;;  %v19520_v15 = vmax.f32 %v19518_v9, %v19519_v14  ;;  %v19528_v58 = vld [vmem:[#allocation170_spill] sm:$0xff] }
 0x42c   :  { %v4834_v19 = vadd.f32 %v16114_v20, %v4707_v24  ;;  %v4953_v41 = vmax.f32 %v4833_v1, 0.0  ;;  %v19523_v1 = vld [vmem:[#allocation54_spill] sm:$0xff]  ;;  %v19526_v24 = vld [vmem:[#allocation267_spill] sm:$0xff] }
 0x42d   :  { %v4832_v50 = vadd.f32 %v16114_v20, %v4705_v6  ;;  %v13095_v56 = vpop.f32.mrb[168].mxu0  ;;  %v4951_v10 = vmax.f32 %v4831_v5, 0.0  ;;  %v19525_v57 = vmax.f32 %v19523_v1, %v19524_v8  ;;  %v19529_v6 = vmax.f32 %v19527_v51, %v19528_v58  ;;  %v19535_v1 = vld [vmem:[#allocation57_spill] sm:$0xff]  ;;  %v19536_v8 = vld [vmem:[#allocation172_spill] sm:$0xff] }
 0x42e   :  { %v4954_v0 = vmax.f32 %v4834_v19, 0.0  ;;  %v4590_v44 = vmax.f32 %v19515_v25, %v13095_v56  ;;  %v4181_v32 = vpop.f32.mrb[169].mxu0  ;;  %v19530_v56 = vld [vmem:[#allocation56_spill] sm:$0xff] }
 0x42f   :  { %v4952_v18 = vmax.f32 %v4832_v50, 0.0  ;;  %v4588_v53 = vmax.f32 %v19516_v34, %v4181_v32  ;;  %v13096_v49 = vpop.f32.mrb[170].mxu0 }
 0x430   :  { %v16581_v28 = vpack.c.bf16 %v4954_v0, %v4953_v41  ;;  %v4710_v40 = vmax.f32 %v19520_v15, %v4590_v44  ;;  %v4591_v43 = vmax.f32 %v19521_v23, %v13096_v49  ;;  %v4184_v52 = vpop.f32.mrb[171].mxu0  ;;  %v19531_v41 = vld [vmem:[#allocation171_spill] sm:$0xff]  ;;  %v19533_v49 = vld [vmem:[#allocation268_spill] sm:$0xff]  ;;  %v19534_v23 = vld [vmem:[#allocation269_spill] sm:$0xff] }
 0x431   :  { %v16587_v37 = vpack.c.bf16 %v4952_v18, %v4951_v10  ;;  %v4708_v27 = vmax.f32 %v19525_v57, %v4588_v53  ;;  %v4589_v5 = vmax.f32 %v19526_v24, %v4184_v52  ;;  %v19532_v0 = vmax.f32 %v19530_v56, %v19531_v41  ;;  %v13796_v18 = vld [vmem:[%s18658_s5 + $0x2c0] sm:$0xff]   ;;  %v19538_v24 = vld [vmem:[#allocation270_spill] sm:$0xff]  ;;  %v19544_v41 = vld [vmem:[#allocation271_spill] sm:$0xff] }
 0x432   :  { %19517 = vst [vmem:[#allocation8_spill] sm:$0xff] %v16581_v28  ;;  %v4837_v16 = vadd.f32 %v16114_v20, %v4710_v40  ;;  %v4711_v19 = vmax.f32 %v19529_v6, %v4591_v43  ;;  %12590 = vmatprep.subr.bf16.mxu0 %v13796_v18  ;;  %v19537_v57 = vmax.f32 %v19535_v1, %v19536_v8  ;;  %v19541_v6 = vld [vmem:[#allocation58_spill] sm:$0xff]  ;;  %v19551_v8 = vld [vmem:[#allocation272_spill] sm:$0xff] }
 0x433   :  { %19522 = vst [vmem:[#allocation117_spill] sm:$0xff] %v16587_v37  ;;  %v4835_v50 = vadd.f32 %v16114_v20, %v4708_v27  ;;  %v4709_v25 = vmax.f32 %v19532_v0, %v4589_v5 }
 0x434   :  { %v4838_v44 = vadd.f32 %v16114_v20, %v4711_v19  ;;  %v4957_v34 = vmax.f32 %v4837_v16, 0.0  ;;  %v19542_v19 = vld [vmem:[#allocation173_spill] sm:$0xff] }
 0x435   :  { %v4836_v32 = vadd.f32 %v16114_v20, %v4709_v25  ;;  %v13099_v10 = vpop.f32.mrb[172].mxu0  ;;  %v4955_v15 = vmax.f32 %v4835_v50, 0.0  ;;  %v19543_v56 = vmax.f32 %v19541_v6, %v19542_v19 }
 0x436   :  { %v4958_v53 = vmax.f32 %v4838_v44, 0.0  ;;  %v4594_v9 = vmax.f32 %v19533_v49, %v13099_v10  ;;  %v4197_v14 = vpop.f32.mrb[173].mxu0  ;;  %v19545_v44 = vld [vmem:[#allocation59_spill] sm:$0xff] }
 0x437   :  { %v4956_v40 = vmax.f32 %v4836_v32, 0.0  ;;  %v4592_v43 = vmax.f32 %v19534_v23, %v4197_v14  ;;  %v13100_v52 = vpop.f32.mrb[174].mxu0  ;;  %v19546_v32 = vld [vmem:[#allocation174_spill] sm:$0xff]  ;;  %v19549_v14 = vld [vmem:[#allocation175_spill] sm:$0xff] }
 0x438   :  { %v4714_v27 = vmax.f32 %v19537_v57, %v4594_v9  ;;  %v4595_v5 = vmax.f32 %v19538_v24, %v13100_v52  ;;  %v4200_v51 = vpop.f32.mrb[175].mxu0  ;;  %v16612_v58 = vpack.c.bf16 %v4958_v53, %v4957_v34  ;;  %v19547_v10 = vmax.f32 %v19545_v44, %v19546_v32  ;;  %v19548_v9 = vld [vmem:[#allocation60_spill] sm:$0xff]  ;;  %v19557_v32 = vld [vmem:[#allocation274_spill] sm:$0xff] }
 0x439   :  { %v16614_v16 = vpack.c.bf16 %v4956_v40, %v4955_v15  ;;  %v4712_v50 = vmax.f32 %v19543_v56, %v4592_v43  ;;  %v4593_v0 = vmax.f32 %v19544_v41, %v4200_v51  ;;  %v19550_v34 = vmax.f32 %v19548_v9, %v19549_v14  ;;  %v13798_v40 = vld [vmem:[%s18658_s5 + $0x280] sm:$0xff]   ;;  %v19559_v9 = vld [vmem:[#allocation62_spill] sm:$0xff] }
 0x43a   :  { %19539 = vst [vmem:[#allocation118_spill] sm:$0xff] %v16612_v58  ;;  %v4841_v25 = vadd.f32 %v16114_v20, %v4714_v27  ;;  %v4715_v18 = vmax.f32 %v19547_v10, %v4595_v5  ;;  %12591 = vmatpush3.bf16.msra.mxu0 %v13798_v40  ;;  %v19552_v51 = vld [vmem:[#allocation273_spill] sm:$0xff]  ;;  %v19555_v41 = vld [vmem:[#allocation176_spill] sm:$0xff] }
 0x43b   :  { %19540 = vst [vmem:[#allocation119_spill] sm:$0xff] %v16614_v16  ;;  %v4839_v49 = vadd.f32 %v16114_v20, %v4712_v50  ;;  %v4713_v53 = vmax.f32 %v19550_v34, %v4593_v0  ;;  %v19554_v50 = vld [vmem:[#allocation61_spill] sm:$0xff] }
 0x43c   :  { %v4842_v15 = vadd.f32 %v16114_v20, %v4715_v18  ;;  %v4961_v52 = vmax.f32 %v4841_v25, 0.0  ;;  %v19556_v0 = vmax.f32 %v19554_v50, %v19555_v41  ;;  %v19560_v14 = vld [vmem:[#allocation177_spill] sm:$0xff] }
 0x43d   :  { %v4840_v23 = vadd.f32 %v16114_v20, %v4713_v53  ;;  %v13103_v43 = vpop.f32.mrb[176].mxu0  ;;  %v4959_v24 = vmax.f32 %v4839_v49, 0.0  ;;  %v19561_v34 = vmax.f32 %v19559_v9, %v19560_v14  ;;  %v19562_v49 = vld [vmem:[#allocation275_spill] sm:$0xff]  ;;  %v19570_v14 = vld [vmem:[#allocation277_spill] sm:$0xff] }
 0x43e   :  { %v4962_v1 = vmax.f32 %v4842_v15, 0.0  ;;  %v4598_v57 = vmax.f32 %v19551_v8, %v13103_v43  ;;  %v4213_v27 = vpop.f32.mrb[177].mxu0  ;;  %v19564_v43 = vld [vmem:[#allocation178_spill] sm:$0xff] }
 0x43f   :  { %v4960_v5 = vmax.f32 %v4840_v23, 0.0  ;;  %v4596_v6 = vmax.f32 %v19552_v51, %v4213_v27  ;;  %v13104_v19 = vpop.f32.mrb[178].mxu0  ;;  %v19563_v23 = vld [vmem:[#allocation63_spill] sm:$0xff] }
 0x440   :  { %v16635_v56 = vpack.c.bf16 %v4962_v1, %v4961_v52  ;;  %v4718_v44 = vmax.f32 %v19556_v0, %v4598_v57  ;;  %v4599_v10 = vmax.f32 %v19557_v32, %v13104_v19  ;;  %v4216_v18 = vpop.f32.mrb[179].mxu0  ;;  %v19565_v52 = vmax.f32 %v19563_v23, %v19564_v43  ;;  %v19566_v57 = vld [vmem:[#allocation64_spill] sm:$0xff]  ;;  %v19567_v27 = vld [vmem:[#allocation179_spill] sm:$0xff] }
 0x441   :  { %v16641_v25 = vpack.c.bf16 %v4960_v5, %v4959_v24  ;;  %v4716_v53 = vmax.f32 %v19561_v34, %v4596_v6  ;;  %v4597_v15 = vmax.f32 %v19562_v49, %v4216_v18  ;;  %v19568_v51 = vmax.f32 %v19566_v57, %v19567_v27  ;;  %v19569_v0 = vld [vmem:[#allocation276_spill] sm:$0xff]  ;;  %v19575_v27 = vld [vmem:[#allocation66_spill] sm:$0xff] }
 0x442   :  { %19553 = vst [vmem:[#allocation9_spill] sm:$0xff] %v16635_v56  ;;  %v4845_v40 = vadd.f32 %v16114_v20, %v4718_v44  ;;  %v4719_v1 = vmax.f32 %v19565_v52, %v4599_v10  ;;  %v19572_v49 = vld [vmem:[#allocation180_spill] sm:$0xff]  ;;  %v19610_v56 = vld [vmem:[#allocation189_spill] sm:$0xff] }
 0x443   :  { %19558 = vst [vmem:[#allocation120_spill] sm:$0xff] %v16641_v25  ;;  %v4843_v8 = vadd.f32 %v16114_v20, %v4716_v53  ;;  %v4717_v19 = vmax.f32 %v19568_v51, %v4597_v15  ;;  %v19571_v53 = vld [vmem:[#allocation65_spill] sm:$0xff]  ;;  %v19574_v15 = vld [vmem:[#allocation278_spill] sm:$0xff] }
 0x444   :  { %v4846_v24 = vadd.f32 %v16114_v20, %v4719_v1  ;;  %v4965_v6 = vmax.f32 %v4845_v40, 0.0  ;;  %v19573_v23 = vmax.f32 %v19571_v53, %v19572_v49  ;;  %v19576_v40 = vld [vmem:[#allocation181_spill] sm:$0xff] }
 0x445   :  { %v4844_v5 = vadd.f32 %v16114_v20, %v4717_v19  ;;  %v13107_v50 = vpop.f32.mrb[180].mxu0  ;;  %v4963_v18 = vmax.f32 %v4843_v8, 0.0  ;;  %v19577_v51 = vmax.f32 %v19575_v27, %v19576_v40  ;;  %v13768_v8 = vld [vmem:[%s18656_s3 + $0x248] sm:$0xff]  }
 0x446   :  { %v4966_v41 = vmax.f32 %v4846_v24, 0.0  ;;  %v4602_v32 = vmax.f32 %v19569_v0, %v13107_v50  ;;  %v4229_v44 = vpop.f32.mrb[181].mxu0  ;;  %v19578_v24 = vld [vmem:[#allocation279_spill] sm:$0xff] }
 0x447   :  { %v4964_v9 = vmax.f32 %v4844_v5, 0.0  ;;  %v4600_v10 = vmax.f32 %v19570_v14, %v4229_v44  ;;  %v13108_v34 = vpop.f32.mrb[182].mxu0  ;;  %v19580_v44 = vld [vmem:[#allocation182_spill] sm:$0xff] }
 0x448   :  { %v4722_v43 = vmax.f32 %v19573_v23, %v4602_v32  ;;  %v4603_v52 = vmax.f32 %v19574_v15, %v13108_v34  ;;  %v4232_v1 = vpop.f32.mrb[183].mxu0  ;;  %v16663_v57 = vpack.c.bf16 %v4966_v41, %v4965_v6  ;;  %v19579_v32 = vld [vmem:[#allocation67_spill] sm:$0xff]  ;;  %v19582_v41 = vld [vmem:[#allocation68_spill] sm:$0xff] }
 0x449   :  { %v4720_v19 = vmax.f32 %v19577_v51, %v4600_v10  ;;  %v4601_v50 = vmax.f32 %v19578_v24, %v4232_v1  ;;  %v16672_v5 = vpack.c.bf16 %v4964_v9, %v4963_v18  ;;  %v19581_v14 = vmax.f32 %v19579_v32, %v19580_v44  ;;  %v19583_v10 = vld [vmem:[#allocation183_spill] sm:$0xff]  ;;  %v19585_v1 = vld [vmem:[#allocation280_spill] sm:$0xff]  ;;  %v19586_v24 = vld [vmem:[#allocation281_spill] sm:$0xff] }
 0x44a   :  { %v4849_v0 = vadd.f32 %v16114_v20, %v4722_v43  ;;  %5742 = vmatprep.mubr.bf16.mxu1 %v16663_v57  ;;  %v19584_v53 = vmax.f32 %v19582_v41, %v19583_v10  ;;  %v13769_v43 = vld [vmem:[%s18656_s3 + $0x250] sm:$0xff]  }
 0x44b   :  { %v4723_v34 = vmax.f32 %v19581_v14, %v4603_v52  ;;  %v4847_v6 = vadd.f32 %v16114_v20, %v4720_v19  ;;  %5743 = vmatmul.mubr.bf16.vlgmr.msra.gmra.mrb[32].mxu1 %v16506_v46  ;;  %v19590_v41 = vld [vmem:[#allocation282_spill] sm:$0xff] }
 0x44c   :  { %v4721_v49 = vmax.f32 %v19584_v53, %v4601_v50  ;;  %13150 = vmatpush3.bf16.msra.mxu1 %v16450_v17  ;;  %v4969_v15 = vmax.f32 %v4849_v0, 0.0  ;;  %v19587_v17 = vld [vmem:[#allocation69_spill] sm:$0xff]  ;;  %v19591_v0 = vld [vmem:[#allocation70_spill] sm:$0xff] }
 0x44d   :  { %v4850_v23 = vadd.f32 %v16114_v20, %v4723_v34  ;;  %v13111_v9 = vpop.f32.mrb[184].mxu0  ;;  %13151 = vmatprep.subr.bf16.mxu1 %v13768_v8  ;;  %v4967_v51 = vmax.f32 %v4847_v6, 0.0 }
 0x44e   :  { %v4848_v18 = vadd.f32 %v16114_v20, %v4721_v49  ;;  %v4606_v27 = vmax.f32 %v19585_v1, %v13111_v9  ;;  %v4245_v40 = vpop.f32.mrb[185].mxu0  ;;  %v19588_v20 = vld [vmem:[#allocation184_spill] sm:$0xff]  ;;  %v19592_v49 = vld [vmem:[#allocation185_spill] sm:$0xff]  ;;  %v19594_v1 = vld [vmem:[#allocation283_spill] sm:$0xff] }
 0x44f   :  { %v4970_v52 = vmax.f32 %v4850_v23, 0.0  ;;  %v4604_v50 = vmax.f32 %v19586_v24, %v4245_v40  ;;  %v13112_v32 = vpop.f32.mrb[186].mxu0  ;;  %v19589_v14 = vmax.f32 %v19587_v17, %v19588_v20  ;;  %v19593_v23 = vmax.f32 %v19591_v0, %v19592_v49  ;;  %v19596_v40 = vld [vmem:[#allocation186_spill] sm:$0xff]  ;;  %v19601_v0 = vld [vmem:[#allocation284_spill] sm:$0xff] }
 0x450   :  { %v4968_v19 = vmax.f32 %v4848_v18, 0.0  ;;  %v4607_v10 = vmax.f32 %v19590_v41, %v13112_v32  ;;  %v4248_v53 = vpop.f32.mrb[187].mxu0  ;;  %13152 = vmatpush3.bf16.msra.mxu1 %v13768_v8 }
 0x451   :  { %v16692_v44 = vpack.c.bf16 %v4970_v52, %v4969_v15  ;;  %v4726_v34 = vmax.f32 %v19589_v14, %v4606_v27  ;;  %v4724_v9 = vmax.f32 %v19593_v23, %v4604_v50  ;;  %v4605_v6 = vmax.f32 %v19594_v1, %v4248_v53  ;;  %13153 = vmatprep.subr.bf16.mxu1 %v13769_v43  ;;  %v16707_v15 = vld [vmem:[%s18655_s2] ss:$0 sm:$0xff]  ;;  %v19595_v27 = vld [vmem:[#allocation71_spill] sm:$0xff] }
 0x452   :  { %v16702_v18 = vpack.c.bf16 %v4968_v19, %v4967_v51  ;;  %v19597_v24 = vmax.f32 %v19595_v27, %v19596_v40  ;;  %v13770_v50 = vld [vmem:[%s18656_s3 + $0x258] sm:$0xff]   ;;  %v19602_v27 = vld [vmem:[#allocation285_spill] sm:$0xff] }
 0x453   :  { %v4853_v52 = vadd.f32 %v16707_v15, %v4726_v34  ;;  %v4851_v32 = vadd.f32 %v16707_v15, %v4724_v9  ;;  %v19598_v51 = vld [vmem:[#allocation72_spill] sm:$0xff]  ;;  %v19599_v19 = vld [vmem:[#allocation187_spill] sm:$0xff] }
 0x454   :  { %v4727_v8 = vmax.f32 %v19597_v24, %v4607_v10  ;;  %v19600_v17 = vmax.f32 %v19598_v51, %v19599_v19  ;;  %5750 = vmatprep.mubr.bf16.mxu1 %v16702_v18  ;;  %13154 = vmatpush3.bf16.msra.mxu1 %v13769_v43  ;;  %v13771_v9 = vld [vmem:[%s18656_s3 + $0x260] sm:$0xff]  }
 0x455   :  { %5751 = vmatmul.mubr.bf16.gmra.mrb[36].mxu1 %v16542_v12  ;;  %v13115_v41 = vpop.f32.mrb[188].mxu0  ;;  %v4973_v10 = vmax.f32 %v4853_v52, 0.0  ;;  %13155 = vmatprep.subr.bf16.mxu1 %v13770_v50  ;;  %v4971_v1 = vmax.f32 %v4851_v32, 0.0  ;;  %v19604_v51 = vld [vmem:[#allocation73_spill] sm:$0xff]  ;;  %v19605_v19 = vld [vmem:[#allocation188_spill] sm:$0xff]  ;;  %v19612_v32 = vld [vmem:[#allocation287_spill] sm:$0xff] }
 0x456   :  { %v4725_v20 = vmax.f32 %v19600_v17, %v4605_v6  ;;  %v4854_v14 = vadd.f32 %v16707_v15, %v4727_v8  ;;  %5758 = vmatprep.mubr.bf16.mxu1 %v16692_v44  ;;  %v4610_v49 = vmax.f32 %v19601_v0, %v13115_v41  ;;  %v4261_v23 = vpop.f32.mrb[189].mxu0  ;;  %v19606_v43 = vmax.f32 %v19604_v51, %v19605_v19  ;;  %v19607_v17 = vld [vmem:[#allocation286_spill] sm:$0xff] }
 0x457   :  { %v4608_v40 = vmax.f32 %v19602_v27, %v4261_v23  ;;  %v13116_v24 = vpop.f32.mrb[190].mxu0  ;;  %v19609_v0 = vld [vmem:[#allocation74_spill] sm:$0xff] }
 0x458   :  { %v4852_v34 = vadd.f32 %v16707_v15, %v4725_v20  ;;  %v4974_v53 = vmax.f32 %v4854_v14, 0.0  ;;  %v4730_v52 = vmax.f32 %v19606_v43, %v4610_v49  ;;  %v4611_v20 = vmax.f32 %v19607_v17, %v13116_v24  ;;  %v4264_v14 = vpop.f32.mrb[191].mxu0  ;;  %13156 = vmatpush3.bf16.msra.mxu1 %v13770_v50  ;;  %v13772_v49 = vld [vmem:[%s18656_s3 + $0x268] sm:$0xff]   ;;  %v19617_v24 = vld [vmem:[#allocation191_spill] sm:$0xff] }
 0x459   :  { %v19611_v30 = vmax.f32 %v19609_v0, %v19610_v56  ;;  %13157 = vmatprep.subr.bf16.mxu1 %v13771_v9  ;;  %v19620_v0 = vld [vmem:[#allocation289_spill] sm:$0xff] }
 0x45a   :  { %v4972_v6 = vmax.f32 %v4852_v34, 0.0  ;;  %v16730_v8 = vpack.c.bf16 %v4974_v53, %v4973_v10  ;;  %v4609_v34 = vmax.f32 %v19612_v32, %v4264_v14  ;;  %v4857_v23 = vadd.f32 %v16707_v15, %v4730_v52  ;;  %v19613_v10 = vld [vmem:[#allocation75_spill] sm:$0xff]  ;;  %v19614_v53 = vld [vmem:[#allocation190_spill] sm:$0xff]  ;;  %v19619_v52 = vld [vmem:[#allocation288_spill] sm:$0xff] }
 0x45b   :  { %v4728_v13 = vmax.f32 %v19611_v30, %v4608_v40  ;;  %v19615_v27 = vmax.f32 %v19613_v10, %v19614_v53  ;;  %v19622_v53 = vld [vmem:[#allocation77_spill] sm:$0xff] }
 0x45c   :  { %19603 = vst [vmem:[#allocation121_spill] sm:$0xff] %v16730_v8  ;;  %v16736_v41 = vpack.c.bf16 %v4972_v6, %v4971_v1  ;;  %v19616_v6 = vld [vmem:[#allocation76_spill] sm:$0xff]  ;;  %13158 = vmatpush3.bf16.msra.mxu1 %v13771_v9  ;;  %v4977_v19 = vmax.f32 %v4857_v23, 0.0 }
 0x45d   :  { %v4731_v25 = vmax.f32 %v19615_v27, %v4611_v20  ;;  %v4855_v1 = vadd.f32 %v16707_v15, %v4728_v13  ;;  %v19618_v56 = vmax.f32 %v19616_v6, %v19617_v24  ;;  %5759 = vmatmul.mubr.bf16.gmra.mrb[40].mxu1 %v16532_v61  ;;  %v13119_v51 = vpop.f32.mrb[192].mxu0  ;;  %13159 = vmatprep.subr.bf16.mxu1 %v13772_v49  ;;  %v13773_v13 = vld [vmem:[%s18656_s3 + $0x270] sm:$0xff]   ;;  %v19623_v27 = vld [vmem:[#allocation192_spill] sm:$0xff] }
 0x45e   :  { %19608 = vst [vmem:[#allocation122_spill] sm:$0xff] %v16736_v41  ;;  %5766 = vmatprep.mubr.bf16.mxu1 %v16736_v41  ;;  %v4614_v17 = vmax.f32 %v19619_v52, %v13119_v51  ;;  %v4277_v20 = vpop.f32.mrb[193].mxu0  ;;  %v19624_v9 = vmax.f32 %v19622_v53, %v19623_v27  ;;  %v19625_v6 = vld [vmem:[#allocation290_spill] sm:$0xff]  ;;  %v19628_v51 = vld [vmem:[#allocation193_spill] sm:$0xff] }
 0x45f   :  { %v4729_v30 = vmax.f32 %v19618_v56, %v4609_v34  ;;  %v4858_v40 = vadd.f32 %v16707_v15, %v4731_v25  ;;  %v4975_v14 = vmax.f32 %v4855_v1, 0.0  ;;  %v4612_v32 = vmax.f32 %v19620_v0, %v4277_v20  ;;  %v13120_v34 = vpop.f32.mrb[194].mxu0  ;;  %v19630_v1 = vld [vmem:[#allocation291_spill] sm:$0xff] }
 0x460   :  { %v4734_v23 = vmax.f32 %v19624_v9, %v4614_v17  ;;  %v4615_v24 = vmax.f32 %v19625_v6, %v13120_v34  ;;  %v4280_v56 = vpop.f32.mrb[195].mxu0  ;;  %13160 = vmatpush3.bf16.msra.mxu1 %v13772_v49  ;;  %v13774_v17 = vld [vmem:[%s18656_s3 + $0x278] sm:$0xff]  }
 0x461   :  { %v4856_v50 = vadd.f32 %v16707_v15, %v4729_v30  ;;  %v4978_v43 = vmax.f32 %v4858_v40, 0.0  ;;  %v19627_v40 = vld [vmem:[#allocation78_spill] sm:$0xff]  ;;  %13161 = vmatprep.subr.bf16.mxu1 %v13773_v13  ;;  %v19635_v34 = vld [vmem:[#allocation195_spill] sm:$0xff] }
 0x462   :  { %v19629_v52 = vmax.f32 %v19627_v40, %v19628_v51  ;;  %v4861_v20 = vadd.f32 %v16707_v15, %v4734_v23 }
 0x463   :  { %v4976_v25 = vmax.f32 %v4856_v50, 0.0  ;;  %v16762_v10 = vpack.c.bf16 %v4978_v43, %v4977_v19  ;;  %v4613_v50 = vmax.f32 %v19630_v1, %v4280_v56  ;;  %v19631_v19 = vld [vmem:[#allocation79_spill] sm:$0xff]  ;;  %v19632_v43 = vld [vmem:[#allocation194_spill] sm:$0xff] }
 0x464   :  { %v4732_v29 = vmax.f32 %v19629_v52, %v4612_v32  ;;  %v19633_v0 = vmax.f32 %v19631_v19, %v19632_v43  ;;  %13162 = vmatpush3.bf16.msra.mxu1 %v13773_v13  ;;  %v4981_v23 = vmax.f32 %v4861_v20, 0.0  ;;  %v19638_v52 = vld [vmem:[#allocation293_spill] sm:$0xff]  ;;  %v19640_v43 = vld [vmem:[#allocation196_spill] sm:$0xff]  ;;  %v19642_v13 = vld [vmem:[#allocation294_spill] sm:$0xff] }
 0x465   :  { %19621 = vst [vmem:[#allocation10_spill] sm:$0xff] %v16762_v10  ;;  %v16768_v30 = vpack.c.bf16 %v4976_v25, %v4975_v14  ;;  %v19634_v25 = vld [vmem:[#allocation80_spill] sm:$0xff]  ;;  %5767 = vmatmul.mubr.bf16.gmra.mrb[44].mxu1 %v16563_v38  ;;  %v13123_v9 = vpop.f32.mrb[196].mxu0  ;;  %13163 = vmatprep.subr.bf16.mxu1 %v13774_v17  ;;  %v19639_v19 = vld [vmem:[#allocation81_spill] sm:$0xff] }
 0x466   :  { %v4735_v3 = vmax.f32 %v19633_v0, %v4615_v24  ;;  %v4859_v14 = vadd.f32 %v16707_v15, %v4732_v29  ;;  %v19636_v53 = vmax.f32 %v19634_v25, %v19635_v34  ;;  %5774 = vmatprep.mubr.bf16.mxu1 %v16730_v8  ;;  %v19637_v24 = vld [vmem:[#allocation292_spill] sm:$0xff]  ;;  %v4293_v40 = vpop.f32.mrb[197].mxu0  ;;  %v19641_v0 = vmax.f32 %v19639_v19, %v19640_v43 }
 0x467   :  { %19626 = vst [vmem:[#allocation123_spill] sm:$0xff] %v16768_v30  ;;  %v4618_v56 = vmax.f32 %v19637_v24, %v13123_v9  ;;  %v13775_v29 = vld [vmem:[%s18656_s3 + $0x40] sm:$0xff]   ;;  %v4616_v1 = vmax.f32 %v19638_v52, %v4293_v40  ;;  %v19649_v52 = vld [vmem:[#allocation83_spill] sm:$0xff] }
 0x468   :  { %v4733_v32 = vmax.f32 %v19636_v53, %v4613_v50  ;;  %v4862_v27 = vadd.f32 %v16707_v15, %v4735_v3  ;;  %v4979_v51 = vmax.f32 %v4859_v14, 0.0  ;;  %v13124_v50 = vpop.f32.mrb[198].mxu0  ;;  %v19646_v9 = vld [vmem:[#allocation197_spill] sm:$0xff]  ;;  %v19648_v14 = vld [vmem:[#allocation295_spill] sm:$0xff]  ;;  %13164 = vmatpush3.bf16.msra.mxu1 %v13774_v17  ;;  %v19651_v19 = vmax.f32 %v19649_v52, %v19650_v26  ;;  %v19655_v26 = vld [vmem:[#allocation296_spill] sm:$0xff] }
 0x469   :  { %v4738_v25 = vmax.f32 %v19641_v0, %v4618_v56  ;;  %v4619_v20 = vmax.f32 %v19642_v13, %v13124_v50  ;;  %v4296_v34 = vpop.f32.mrb[199].mxu0  ;;  %11904 = vmatprep.subr.bf16.mxu1 %v13775_v29 }
 0x46a   :  { %v4860_v49 = vadd.f32 %v16707_v15, %v4733_v32  ;;  %v4982_v6 = vmax.f32 %v4862_v27, 0.0  ;;  %v19645_v27 = vld [vmem:[#allocation82_spill] sm:$0xff] }
 0x46b   :  { %v19647_v24 = vmax.f32 %v19645_v27, %v19646_v9  ;;  %v4865_v40 = vadd.f32 %v16707_v15, %v4738_v25  ;;  %v4739_v56 = vmax.f32 %v19651_v19, %v4619_v20  ;;  %v19660_v19 = vld [vmem:[#allocation298_spill] sm:$0xff] }
 0x46c   :  { %v4980_v3 = vmax.f32 %v4860_v49, 0.0  ;;  %v16798_v53 = vpack.c.bf16 %v4982_v6, %v4981_v23  ;;  %v4617_v49 = vmax.f32 %v19648_v14, %v4296_v34  ;;  %v19652_v23 = vld [vmem:[#allocation84_spill] sm:$0xff]  ;;  %v19653_v6 = vld [vmem:[#allocation199_spill] sm:$0xff]  ;;  %v19656_v34 = vld [vmem:[#allocation297_spill] sm:$0xff] }
 0x46d   :  { %v4736_v58 = vmax.f32 %v19647_v24, %v4616_v1  ;;  %v4866_v43 = vadd.f32 %v16707_v15, %v4739_v56  ;;  %5775 = vmatmul.mubr.bf16.gmra.mrb[48].mxu1 %v16557_v59  ;;  %v13127_v17 = vpop.f32.mrb[200].mxu0  ;;  %v4985_v0 = vmax.f32 %v4865_v40, 0.0  ;;  %v19657_v24 = vld [vmem:[#allocation85_spill] sm:$0xff]  ;;  %v19658_v14 = vld [vmem:[#allocation200_spill] sm:$0xff] }
 0x46e   :  { %19643 = vst [vmem:[#allocation124_spill] sm:$0xff] %v16798_v53  ;;  %v16800_v32 = vpack.c.bf16 %v4980_v3, %v4979_v51  ;;  %v19654_v51 = vmax.f32 %v19652_v23, %v19653_v6  ;;  %5782 = vmatprep.mubr.bf16.mxu1 %v16768_v30  ;;  %v4622_v13 = vmax.f32 %v19655_v26, %v13127_v17  ;;  %v4309_v29 = vpop.f32.mrb[201].mxu0  ;;  %v19663_v40 = vld [vmem:[#allocation201_spill] sm:$0xff]  ;;  %v19665_v17 = vld [vmem:[#allocation299_spill] sm:$0xff] }
 0x46f   :  { %v4863_v50 = vadd.f32 %v16707_v15, %v4736_v58  ;;  %v4986_v25 = vmax.f32 %v4866_v43, 0.0  ;;  %v4620_v27 = vmax.f32 %v19656_v34, %v4309_v29  ;;  %v13128_v9 = vpop.f32.mrb[202].mxu0  ;;  %v19667_v29 = vld [vmem:[#allocation87_spill] sm:$0xff]  ;;  %v19668_v34 = vld [vmem:[#allocation202_spill] sm:$0xff] }
 0x470   :  { %19644 = vst [vmem:[#allocation125_spill] sm:$0xff] %v16800_v32  ;;  %v4737_v3 = vmax.f32 %v19654_v51, %v4617_v49  ;;  %v19659_v49 = vmax.f32 %v19657_v24, %v19658_v14  ;;  %v4623_v56 = vmax.f32 %v19660_v19, %v13128_v9  ;;  %v4312_v23 = vpop.f32.mrb[203].mxu0  ;;  %v19662_v51 = vld [vmem:[#allocation86_spill] sm:$0xff]  ;;  %v19669_v53 = vmax.f32 %v19667_v29, %v19668_v34  ;;  %v19670_v9 = vld [vmem:[#allocation88_spill] sm:$0xff]  ;;  %v19671_v14 = vld [vmem:[#allocation203_spill] sm:$0xff] }
 0x471   :  { %v4983_v20 = vmax.f32 %v4863_v50, 0.0  ;;  %v16824_v6 = vpack.c.bf16 %v4986_v25, %v4985_v0  ;;  %v4621_v26 = vmax.f32 %v19665_v17, %v4312_v23  ;;  %v19672_v0 = vmax.f32 %v19670_v9, %v19671_v14  ;;  %v19673_v19 = vld [vmem:[#allocation300_spill] sm:$0xff]  ;;  %v19675_v17 = vld [vmem:[#allocation89_spill] sm:$0xff] }
 0x472   :  { %v4864_v1 = vadd.f32 %v16707_v15, %v4737_v3  ;;  %v4742_v52 = vmax.f32 %v19659_v49, %v4622_v13  ;;  %v19664_v3 = vmax.f32 %v19662_v51, %v19663_v40  ;;  %v4743_v24 = vmax.f32 %v19669_v53, %v4623_v56  ;;  %v19674_v40 = vld [vmem:[#allocation301_spill] sm:$0xff] }
 0x473   :  { %19661 = vst [vmem:[#allocation11_spill] sm:$0xff] %v16824_v6  ;;  %v4741_v25 = vmax.f32 %v19672_v0, %v4621_v26  ;;  %v19676_v26 = vld [vmem:[#allocation204_spill] sm:$0xff] }
 0x474   :  { %v4984_v58 = vmax.f32 %v4864_v1, 0.0  ;;  %v4740_v43 = vmax.f32 %v19664_v3, %v4620_v27  ;;  %v4869_v1 = vadd.f32 %v16707_v15, %v4742_v52  ;;  %v4870_v49 = vadd.f32 %v16707_v15, %v4743_v24  ;;  %v19678_v24 = vld [vmem:[#allocation302_spill] sm:$0xff] }
 0x475   :  { %5783 = vmatmul.mubr.bf16.gmra.mrb[52].mxu1 %v16587_v37  ;;  %v4868_v27 = vadd.f32 %v16707_v15, %v4741_v25  ;;  %v19677_v29 = vmax.f32 %v19675_v17, %v19676_v26  ;;  %v19679_v25 = vld [vmem:[#allocation90_spill] sm:$0xff]  ;;  %v19687_v26 = vld [vmem:[#allocation207_spill] sm:$0xff] }
 0x476   :  { %v16830_v50 = vpack.c.bf16 %v4984_v58, %v4983_v20  ;;  %v4867_v13 = vadd.f32 %v16707_v15, %v4740_v43  ;;  %v13131_v20 = vpop.f32.mrb[204].mxu0  ;;  %5790 = vmatprep.mubr.bf16.mxu1 %v16762_v10  ;;  %v4989_v58 = vmax.f32 %v4869_v1, 0.0  ;;  %v4990_v52 = vmax.f32 %v4870_v49, 0.0  ;;  %v19680_v1 = vld [vmem:[#allocation205_spill] sm:$0xff] }
 0x477   :  { %v4626_v23 = vmax.f32 %v19673_v19, %v13131_v20  ;;  %v4325_v53 = vpop.f32.mrb[205].mxu0  ;;  %v4988_v51 = vmax.f32 %v4868_v27, 0.0  ;;  %v19681_v49 = vmax.f32 %v19679_v25, %v19680_v1  ;;  %v19682_v20 = vld [vmem:[#allocation303_spill] sm:$0xff]  ;;  %v19690_v25 = vld [vmem:[#allocation305_spill] sm:$0xff] }
 0x478   :  { %19666 = vst [vmem:[#allocation126_spill] sm:$0xff] %v16830_v50  ;;  %v4987_v56 = vmax.f32 %v4867_v13, 0.0  ;;  %v4624_v3 = vmax.f32 %v19674_v40, %v4325_v53  ;;  %v13132_v43 = vpop.f32.mrb[206].mxu0  ;;  %v16850_v0 = vpack.c.bf16 %v4990_v52, %v4989_v58  ;;  %v19683_v53 = vld [vmem:[#allocation91_spill] sm:$0xff]  ;;  %v19684_v40 = vld [vmem:[#allocation206_spill] sm:$0xff] }
 0x479   :  { %v4746_v34 = vmax.f32 %v19677_v29, %v4626_v23  ;;  %v4627_v9 = vmax.f32 %v19678_v24, %v13132_v43  ;;  %v4328_v14 = vpop.f32.mrb[207].mxu0  ;;  %v19685_v50 = vmax.f32 %v19683_v53, %v19684_v40  ;;  %v19686_v43 = vld [vmem:[#allocation92_spill] sm:$0xff] }
 0x47a   :  { %v4744_v6 = vmax.f32 %v19681_v49, %v4624_v3  ;;  %v4625_v19 = vmax.f32 %v19682_v20, %v4328_v14  ;;  %v16856_v13 = vpack.c.bf16 %v4988_v51, %v4987_v56  ;;  %v19688_v58 = vmax.f32 %v19686_v43, %v19687_v26  ;;  %v19689_v24 = vld [vmem:[#allocation304_spill] sm:$0xff]  ;;  %v19695_v43 = vld [vmem:[#allocation306_spill] sm:$0xff] }
 0x47b   :  { %v4873_v27 = vadd.f32 %v16707_v15, %v4746_v34  ;;  %v4747_v17 = vmax.f32 %v19685_v50, %v4627_v9  ;;  %v19693_v53 = vld [vmem:[#allocation208_spill] sm:$0xff] }
 0x47c   :  { %v4871_v23 = vadd.f32 %v16707_v15, %v4744_v6  ;;  %v4745_v52 = vmax.f32 %v19688_v58, %v4625_v19  ;;  %v19692_v19 = vld [vmem:[#allocation93_spill] sm:$0xff] }
 0x47d   :  { %v4874_v29 = vadd.f32 %v16707_v15, %v4747_v17  ;;  %5791 = vmatmul.mubr.bf16.gmra.mrb[56].mxu1 %v16581_v28  ;;  %v13135_v56 = vpop.f32.mrb[208].mxu0  ;;  %v4993_v51 = vmax.f32 %v4873_v27, 0.0  ;;  %v19694_v40 = vmax.f32 %v19692_v19, %v19693_v53  ;;  %v19696_v27 = vld [vmem:[#allocation94_spill] sm:$0xff]  ;;  %v19704_v53 = vld [vmem:[#allocation211_spill] sm:$0xff] }
 0x47e   :  { %v4872_v3 = vadd.f32 %v16707_v15, %v4745_v52  ;;  %5798 = vmatprep.mubr.bf16.mxu1 %v16800_v32  ;;  %v4630_v14 = vmax.f32 %v19689_v24, %v13135_v56  ;;  %v4341_v50 = vpop.f32.mrb[209].mxu0  ;;  %v4991_v9 = vmax.f32 %v4871_v23, 0.0  ;;  %v19699_v23 = vld [vmem:[#allocation307_spill] sm:$0xff] }
 0x47f   :  { %v4994_v34 = vmax.f32 %v4874_v29, 0.0  ;;  %v4628_v1 = vmax.f32 %v19690_v25, %v4341_v50  ;;  %v13136_v49 = vpop.f32.mrb[210].mxu0  ;;  %v19697_v29 = vld [vmem:[#allocation209_spill] sm:$0xff]  ;;  %v19700_v25 = vld [vmem:[#allocation95_spill] sm:$0xff] }
 0x480   :  { %v4992_v6 = vmax.f32 %v4872_v3, 0.0  ;;  %v4750_v17 = vmax.f32 %v19694_v40, %v4630_v14  ;;  %v4631_v26 = vmax.f32 %v19695_v43, %v13136_v49  ;;  %v4344_v58 = vpop.f32.mrb[211].mxu0  ;;  %v19698_v56 = vmax.f32 %v19696_v27, %v19697_v29  ;;  %v19703_v14 = vld [vmem:[#allocation96_spill] sm:$0xff] }
 0x481   :  { %v16872_v20 = vpack.c.bf16 %v4994_v34, %v4993_v51  ;;  %v4629_v3 = vmax.f32 %v19699_v23, %v4344_v58  ;;  %v19701_v51 = vld [vmem:[#allocation210_spill] sm:$0xff]  ;;  %v19705_v49 = vmax.f32 %v19703_v14, %v19704_v53  ;;  %v19706_v58 = vld [vmem:[#allocation308_spill] sm:$0xff] }
 0x482   :  { %v16878_v52 = vpack.c.bf16 %v4992_v6, %v4991_v9  ;;  %v4748_v24 = vmax.f32 %v19698_v56, %v4628_v1  ;;  %v4877_v50 = vadd.f32 %v16707_v15, %v4750_v17  ;;  %v19702_v34 = vmax.f32 %v19700_v25, %v19701_v51  ;;  %v19710_v51 = vld [vmem:[#allocation212_spill] sm:$0xff]  ;;  %v19712_v53 = vld [vmem:[#allocation310_spill] sm:$0xff] }
 0x483   :  { %19691 = vst [vmem:[#allocation12_spill] sm:$0xff] %v16872_v20  ;;  %v4749_v40 = vmax.f32 %v19705_v49, %v4629_v3 }
 0x484   :  { %v4751_v32 = vmax.f32 %v19702_v34, %v4631_v26  ;;  %v4875_v19 = vadd.f32 %v16707_v15, %v4748_v24  ;;  %v4997_v17 = vmax.f32 %v4877_v50, 0.0  ;;  %v19707_v24 = vld [vmem:[#allocation309_spill] sm:$0xff]  ;;  %v19714_v50 = vld [vmem:[#allocation98_spill] sm:$0xff] }
 0x485   :  { %5799 = vmatmul.mubr.bf16.gmra.mrb[60].mxu1 %v16614_v16  ;;  %v4876_v6 = vadd.f32 %v16707_v15, %v4749_v40  ;;  %v13139_v1 = vpop.f32.mrb[212].mxu0 }
 0x486   :  { %v4878_v9 = vadd.f32 %v16707_v15, %v4751_v32  ;;  %13165 = vmatprep.mubr.bf16.mxu1 %v16850_v0  ;;  %v4634_v27 = vmax.f32 %v19706_v58, %v13139_v1  ;;  %v4357_v26 = vpop.f32.mrb[213].mxu0  ;;  %v4995_v29 = vmax.f32 %v4875_v19, 0.0  ;;  %v19709_v32 = vld [vmem:[#allocation97_spill] sm:$0xff]  ;;  %v19717_v19 = vld [vmem:[#allocation311_spill] sm:$0xff] }
 0x487   :  { %v4996_v56 = vmax.f32 %v4876_v6, 0.0  ;;  %v4632_v23 = vmax.f32 %v19707_v24, %v4357_v26  ;;  %v13140_v25 = vpop.f32.mrb[214].mxu0  ;;  %v19711_v34 = vmax.f32 %v19709_v32, %v19710_v51  ;;  %v19718_v26 = vld [vmem:[#allocation99_spill] sm:$0xff]  ;;  %v19719_v24 = vld [vmem:[#allocation214_spill] sm:$0xff] }
 0x488   :  { %v4998_v43 = vmax.f32 %v4878_v9, 0.0  ;;  %v4635_v49 = vmax.f32 %v19712_v53, %v13140_v25  ;;  %v4360_v40 = vpop.f32.mrb[215].mxu0  ;;  %v19715_v9 = vld [vmem:[#allocation213_spill] sm:$0xff]  ;;  %v19721_v25 = vld [vmem:[#allocation100_spill] sm:$0xff] }
 0x489   :  { %v4754_v14 = vmax.f32 %v19711_v34, %v4634_v27  ;;  %v16904_v16 = vpack.c.bf16 %v4996_v56, %v4995_v29  ;;  %v19716_v1 = vmax.f32 %v19714_v50, %v19715_v9  ;;  %v4633_v6 = vmax.f32 %v19717_v19, %v4360_v40  ;;  %v13777_v29 = vld [vmem:[%s18656_s3 + $0x48] sm:$0xff]  }
 0x48a   :  { %v16898_v3 = vpack.c.bf16 %v4998_v43, %v4997_v17  ;;  %v13776_v17 = vld [vmem:[%s18656_s3] sm:$0xff]   ;;  %v19720_v27 = vmax.f32 %v19718_v26, %v19719_v24 }
 0x48b   :  { %19713 = vst [vmem:[#allocation224_spill] sm:$0xff] %v16904_v16  ;;  %v4752_v58 = vmax.f32 %v19716_v1, %v4632_v23  ;;  %v4881_v43 = vadd.f32 %v16707_v15, %v4754_v14  ;;  %v19722_v23 = vld [vmem:[#allocation215_spill] sm:$0xff]  ;;  %v19724_v1 = vld [vmem:[#allocation312_spill] sm:$0xff] }
 0x48c   :  { %19708 = vst [vmem:[#allocation127_spill] sm:$0xff] %v16898_v3  ;;  %v4755_v32 = vmax.f32 %v19720_v27, %v4635_v49  ;;  %v19723_v51 = vmax.f32 %v19721_v25, %v19722_v23  ;;  %v13778_v49 = vld [vmem:[%s18656_s3 + $0x8] sm:$0xff]  }
 0x48d   :  { %v4879_v56 = vadd.f32 %v16707_v15, %v4752_v58  ;;  %13166 = vmatmul.mubr.bf16.vlgmr.msra.gmra.mrb[64].mxu1 %v16878_v52  ;;  %v13143_v40 = vpop.f32.mrb[216].mxu0  ;;  %v5001_v50 = vmax.f32 %v4881_v43, 0.0  ;;  %v19726_v23 = vld [vmem:[#allocation101_spill] sm:$0xff] }
 0x48e   :  { %v4753_v34 = vmax.f32 %v19723_v51, %v4633_v6  ;;  %v4882_v53 = vadd.f32 %v16707_v15, %v4755_v32  ;;  %11905 = vmatpush3.bf16.msra.mxu1 %v13776_v17  ;;  %13169 = vmatprep.mubr.bf16.mxu1 %v16872_v20  ;;  %v4638_v58 = vmax.f32 %v19724_v1, %v13143_v40  ;;  %v4373_v19 = vpop.f32.mrb[217].mxu0  ;;  %v13779_v6 = vld [vmem:[%s18656_s3 + $0x50] sm:$0xff]   ;;  %v19725_v17 = vld [vmem:[#allocation313_spill] sm:$0xff]  ;;  %v19727_v51 = vld [vmem:[#allocation216_spill] sm:$0xff] }
 0x48f   :  { %11906 = vmatprep.subr.bf16.mxu1 %v13777_v29  ;;  %v4999_v26 = vmax.f32 %v4879_v56, 0.0  ;;  %v4636_v27 = vmax.f32 %v19725_v17, %v4373_v19  ;;  %v13144_v32 = vpop.f32.mrb[218].mxu0  ;;  %v19730_v29 = vld [vmem:[#allocation102_spill] sm:$0xff]  ;;  %v19733_v56 = vld [vmem:[#allocation315_spill] sm:$0xff] }
 0x490   :  { %v4880_v14 = vadd.f32 %v16707_v15, %v4753_v34  ;;  %v5002_v9 = vmax.f32 %v4882_v53, 0.0  ;;  %v19728_v34 = vmax.f32 %v19726_v23, %v19727_v51  ;;  %v19729_v53 = vld [vmem:[#allocation314_spill] sm:$0xff]  ;;  %v4376_v40 = vpop.f32.mrb[219].mxu0  ;;  %v19732_v22 = vmax.f32 %v19730_v29, %v19731_v55  ;;  %v19734_v19 = vld [vmem:[#allocation103_spill] sm:$0xff]  ;;  %v13783_v29 = vld [vmem:[%s18656_s3 + $0x60] sm:$0xff]  }
 0x491   :  { %v4639_v60 = vmax.f32 %v19729_v53, %v13144_v32 }
 0x492   :  { %v5000_v24 = vmax.f32 %v4880_v14, 0.0  ;;  %v16936_v25 = vpack.c.bf16 %v5002_v9, %v5001_v50  ;;  %v4758_v43 = vmax.f32 %v19728_v34, %v4638_v58  ;;  %v4756_v20 = vmax.f32 %v19732_v22, %v4636_v27  ;;  %11907 = vmatpush3.bf16.msra.mxu1 %v13778_v49  ;;  %v13780_v50 = vld [vmem:[%s18656_s3 + $0x10] sm:$0xff]   ;;  %v19737_v22 = vld [vmem:[#allocation104_spill] sm:$0xff] }
 0x493   :  { %v4637_v14 = vmax.f32 %v19733_v56, %v4376_v40  ;;  %v19735_v58 = vld [vmem:[#allocation218_spill] sm:$0xff]  ;;  %11908 = vmatprep.subr.bf16.mxu1 %v13779_v6 }
 0x494   :  { %v16942_v1 = vpack.c.bf16 %v5000_v24, %v4999_v26  ;;  %v4885_v9 = vadd.f32 %v16707_v15, %v4758_v43  ;;  %v19736_v17 = vmax.f32 %v19734_v19, %v19735_v58  ;;  %v13781_v26 = vld [vmem:[%s18656_s3 + $0x58] sm:$0xff]   ;;  %v4883_v55 = vadd.f32 %v16707_v15, %v4756_v20 }
 0x495   :  { %v19738_v24 = vld [vmem:[#allocation219_spill] sm:$0xff]  ;;  %13170 = vmatmul.mubr.bf16.gmra.mrb[68].mxu1 %v16904_v16  ;;  %v13147_v34 = vpop.f32.mrb[220].mxu0  ;;  %v19740_v43 = vld [vmem:[#allocation316_spill] sm:$0xff] }
 0x496   :  { %v4759_v32 = vmax.f32 %v19736_v17, %v4639_v60  ;;  %v19739_v49 = vmax.f32 %v19737_v22, %v19738_v24  ;;  %11909 = vmatpush3.bf16.msra.mxu1 %v13780_v50  ;;  %13173 = vmatprep.mubr.bf16.mxu1 %v16898_v3  ;;  %v13782_v60 = vld [vmem:[%s18656_s3 + $0x18] sm:$0xff]   ;;  %v5005_v6 = vmax.f32 %v4885_v9, 0.0  ;;  %v4642_v53 = vmax.f32 %v19740_v43, %v13147_v34  ;;  %v4389_v40 = vpop.f32.mrb[221].mxu0  ;;  %v19741_v50 = vld [vmem:[#allocation317_spill] sm:$0xff] }
 0x497   :  { %11910 = vmatprep.subr.bf16.mxu1 %v13781_v26  ;;  %v5003_v56 = vmax.f32 %v4883_v55, 0.0  ;;  %v4640_v19 = vmax.f32 %v19741_v50, %v4389_v40  ;;  %v13148_v58 = vpop.f32.mrb[222].mxu0  ;;  %v19742_v17 = vld [vmem:[#allocation105_spill] sm:$0xff]  ;;  %v19746_v26 = vld [vmem:[#allocation106_spill] sm:$0xff]  ;;  %v19749_v55 = vld [vmem:[#allocation319_spill] sm:$0xff] }
 0x498   :  { %v4757_v27 = vmax.f32 %v19739_v49, %v4637_v14  ;;  %v4886_v23 = vadd.f32 %v16707_v15, %v4759_v32  ;;  %v19743_v32 = vld [vmem:[#allocation220_spill] sm:$0xff]  ;;  %v19745_v49 = vld [vmem:[#allocation318_spill] sm:$0xff]  ;;  %v19747_v43 = vld [vmem:[#allocation221_spill] sm:$0xff] }
 0x499   :  { %v19744_v22 = vmax.f32 %v19742_v17, %v19743_v32  ;;  %v4643_v9 = vmax.f32 %v19745_v49, %v13148_v58  ;;  %v19748_v3 = vmax.f32 %v19746_v26, %v19747_v43  ;;  %v13784_v40 = vld [vmem:[%s18656_s3 + $0x20] sm:$0xff]   ;;  %v19750_v50 = vld [vmem:[#allocation107_spill] sm:$0xff]  ;;  %v19751_v58 = vld [vmem:[#allocation222_spill] sm:$0xff] }
 0x49a   :  { %v4884_v51 = vadd.f32 %v16707_v15, %v4757_v27  ;;  %v5006_v20 = vmax.f32 %v4886_v23, 0.0  ;;  %v4392_v27 = vpop.f32.mrb[223].mxu0  ;;  %11911 = vmatpush3.bf16.msra.mxu1 %v13782_v60  ;;  %v19752_v17 = vmax.f32 %v19750_v50, %v19751_v58  ;;  %v13793_v50 = vld [vmem:[%s18656_s3 + $0xc8] sm:$0xff]   ;;  %v13795_v58 = vld [vmem:[%s18656_s3 + $0xd0] sm:$0xff]  }
 0x49b   :  { %v4762_v24 = vmax.f32 %v19744_v22, %v4642_v53  ;;  %v4760_v16 = vmax.f32 %v19748_v3, %v4640_v19  ;;  %11912 = vmatprep.subr.bf16.mxu1 %v13783_v29  ;;  %v13786_v29 = vld [vmem:[%s18656_s3 + $0x28] sm:$0xff]  }
 0x49c   :  { %v5004_v14 = vmax.f32 %v4884_v51, 0.0  ;;  %v16978_v23 = vpack.c.bf16 %v5006_v20, %v5005_v6  ;;  %v4641_v51 = vmax.f32 %v19749_v55, %v4392_v27  ;;  %v4763_v6 = vmax.f32 %v19752_v17, %v4643_v9  ;;  %v13785_v20 = vld [vmem:[%s18656_s3 + $0x68] sm:$0xff]   ;;  %v13789_v55 = vld [vmem:[%s18656_s3 + $0x78] sm:$0xff]   ;;  %v13797_v17 = vld [vmem:[%s18656_s3 + $0x90] sm:$0xff]  }
 0x49d   :  { %v4889_v53 = vadd.f32 %v16707_v15, %v4762_v24  ;;  %v4887_v3 = vadd.f32 %v16707_v15, %v4760_v16  ;;  %13174 = vmatmul.mubr.bf16.gmra.mrb[72].mxu1 %v16942_v1  ;;  %v13787_v16 = vld [vmem:[%s18656_s3 + $0x70] sm:$0xff]  }
 0x49e   :  { %v16980_v34 = vpack.c.bf16 %v5004_v14, %v5003_v56  ;;  %v19753_v56 = vld [vmem:[#allocation108_spill] sm:$0xff]  ;;  %v19754_v14 = vld [vmem:[#allocation223_spill] sm:$0xff]  ;;  %v4890_v32 = vadd.f32 %v16707_v15, %v4763_v6  ;;  %11913 = vmatpush3.bf16.msra.mxu1 %v13784_v40  ;;  %13177 = vmatprep.mubr.bf16.mxu1 %v16936_v25  ;;  %v13822_v6 = vld [vmem:[%s18658_s5 + $0x2c8] sm:$0xff]  }
 0x49f   :  { %v19755_v60 = vmax.f32 %v19753_v56, %v19754_v14  ;;  %v5009_v24 = vmax.f32 %v4889_v53, 0.0  ;;  %11914 = vmatprep.subr.bf16.mxu1 %v13785_v20  ;;  %v5007_v9 = vmax.f32 %v4887_v3, 0.0  ;;  %v13791_v40 = vld [vmem:[%s18656_s3 + $0xc0] sm:$0xff]   ;;  %v13824_v20 = vld [vmem:[%s18658_s5 + $0x288] sm:$0xff]   ;;  %12592 = vmatprep.subr.bf16.mxu0 %v13822_v6 }
 0x4a0   :  { %v5010_v49 = vmax.f32 %v4890_v32, 0.0  ;;  %v13792_v53 = vld [vmem:[%s18656_s3 + $0x80] sm:$0xff]   ;;  %12593 = vmatpush3.bf16.msra.mxu0 %v13824_v20  ;;  %v13803_v56 = vld [vmem:[%s18656_s3 + $0xe8] sm:$0xff]  }
 0x4a1   :  { %v4761_v19 = vmax.f32 %v19755_v60, %v4641_v51  ;;  %v13790_v51 = vld [vmem:[%s18656_s3 + $0x38] sm:$0xff]   ;;  %v13802_v3 = vld [vmem:[%s18656_s3 + $0xa0] sm:$0xff]   ;;  %v13804_v14 = vld [vmem:[%s18656_s3 + $0xa8] sm:$0xff]  }
 0x4a2   :  { %v17010_v26 = vpack.c.bf16 %v5010_v49, %v5009_v24  ;;  %11915 = vmatpush3.bf16.msra.mxu1 %v13786_v29  ;;  %v13806_v49 = vld [vmem:[%s18656_s3 + $0xb0] sm:$0xff]  }
 0x4a3   :  { %v4888_v22 = vadd.f32 %v16707_v15, %v4761_v19  ;;  %v13788_v15 = vld [vmem:[%s18656_s3 + $0x30] sm:$0xff]   ;;  %11916 = vmatprep.subr.bf16.mxu1 %v13787_v16 }
 0x4a4   :  { %19756 = vst [vmem:[#allocation225_spill] sm:$0xff] %v17010_v26  ;;  %v13805_v19 = vld [vmem:[%s18656_s3 + $0xf0] sm:$0xff]  }
 0x4a5   :  { %v5008_v27 = vmax.f32 %v4888_v22, 0.0  ;;  %13178 = vmatmul.mubr.bf16.gmra.mrb[76].mxu1 %v16980_v34 }
 0x4a6   :  { %11917 = vmatpush3.bf16.msra.mxu1 %v13788_v15  ;;  %6176 = vmatprep.mubr.bf16.mxu1 %v16314_v21  ;;  %v13794_v21 = vld [vmem:[%s18656_s3 + $0x88] sm:$0xff]   ;;  %v13809_v15 = vld [vmem:[%s18656_s3 + $0x100] sm:$0xff]  }
 0x4a7   :  { %v17015_v43 = vpack.c.bf16 %v5008_v27, %v5007_v9  ;;  %11918 = vmatprep.subr.bf16.mxu1 %v13789_v55  ;;  %v13807_v9 = vld [vmem:[%s18656_s3 + $0xf8] sm:$0xff]  }
 0x4a8   :  { %v13808_v27 = vld [vmem:[%s18656_s3 + $0xb8] sm:$0xff]  }
 0x4a9   :  { %19757 = vst [vmem:[#allocation13_spill] sm:$0xff] %v17015_v43 }
 0x4aa   :  { %11919 = vmatpush3.bf16.msra.mxu1 %v13790_v51 }
 0x4ab   :  { %11968 = vmatprep.subr.bf16.mxu1 %v13791_v40 }
 0x4ad   :  { %6177 = vmatmul.mubr.bf16.vlgmr.msra.gmra.mrb[80].mxu1 %v16154_v45  ;;  %v13799_v45 = vld [vmem:[%s18656_s3 + $0xd8] sm:$0xff]  }
 0x4ae   :  { %11969 = vmatpush3.bf16.msra.mxu1 %v13792_v53  ;;  %6184 = vmatprep.mubr.bf16.mxu1 %v16302_v47  ;;  %v13800_v47 = vld [vmem:[%s18656_s3 + $0x98] sm:$0xff]  }
 0x4af   :  { %11970 = vmatprep.subr.bf16.mxu1 %v13793_v50 }
 0x4b2   :  { %11971 = vmatpush3.bf16.msra.mxu1 %v13794_v21 }
 0x4b3   :  { %11972 = vmatprep.subr.bf16.mxu1 %v13795_v58 }
 0x4b5   :  { %6185 = vmatmul.mubr.bf16.gmra.mrb[84].mxu1 %v16152_v35  ;;  %v13801_v35 = vld [vmem:[%s18656_s3 + $0xe0] sm:$0xff]  }
 0x4b6   :  { %6192 = vmatprep.mubr.bf16.mxu1 %v16346_v36  ;;  %11973 = vmatpush3.bf16.msra.mxu1 %v13797_v17 }
 0x4b7   :  { %11974 = vmatprep.subr.bf16.mxu1 %v13799_v45 }
 0x4ba   :  { %11975 = vmatpush3.bf16.msra.mxu1 %v13800_v47 }
 0x4bb   :  { %11976 = vmatprep.subr.bf16.mxu1 %v13801_v35 }
 0x4bd   :  { %6193 = vmatmul.mubr.bf16.gmra.mrb[88].mxu1 %v16187_v7 }
 0x4be   :  { %6200 = vmatprep.mubr.bf16.mxu1 %v16336_v39  ;;  %11977 = vmatpush3.bf16.msra.mxu1 %v13802_v3  ;;  %v11776_v60 = vpop.f32.mrb[0].mxu1 }
 0x4bf   :  { %11978 = vmatprep.subr.bf16.mxu1 %v13803_v56  ;;  %v11777_v32 = vpop.f32.mrb[1].mxu1 }
 0x4c0   :  { %v17076_v22 = vadd.f32 %v11777_v32, %v11776_v60  ;;  %v11779_v29 = vpop.f32.mrb[2].mxu1 }
 0x4c1   :  { %v11780_v24 = vpop.f32.mrb[3].mxu1 }
 0x4c2   :  { %11979 = vmatpush3.bf16.msra.mxu1 %v13804_v14  ;;  %v17081_v16 = vadd.f32 %v11780_v24, %v11779_v29 }
 0x4c3   :  { %11980 = vmatprep.subr.bf16.mxu1 %v13805_v19 }
 0x4c5   :  { %6201 = vmatmul.mubr.bf16.gmra.mrb[92].mxu1 %v16177_v31 }
 0x4c6   :  { %6208 = vmatprep.mubr.bf16.mxu1 %v16381_v48  ;;  %11981 = vmatpush3.bf16.msra.mxu1 %v13806_v49 }
 0x4c7   :  { %11982 = vmatprep.subr.bf16.mxu1 %v13807_v9  ;;  %v11782_v55 = vpop.f32.mrb[4].mxu1 }
 0x4c8   :  { %v11783_v51 = vpop.f32.mrb[5].mxu1 }
 0x4c9   :  { %v17094_v40 = vadd.f32 %v11783_v51, %v11782_v55  ;;  %v11785_v53 = vpop.f32.mrb[6].mxu1 }
 0x4ca   :  { %11983 = vmatpush3.bf16.msra.mxu1 %v13808_v27  ;;  %v11786_v50 = vpop.f32.mrb[7].mxu1 }
 0x4cb   :  { %13181 = vmatprep.subr.bf16.mxu1 %v13809_v15  ;;  %v17096_v21 = vadd.f32 %v11786_v50, %v11785_v53 }
 0x4cd   :  { %6209 = vmatmul.mubr.bf16.gmra.mrb[96].mxu1 %v16208_v62 }
 0x4ce   :  { %6216 = vmatprep.mubr.bf16.mxu1 %v16375_v54 }
 0x4cf   :  { %v11788_v58 = vpop.f32.mrb[8].mxu1 }
 0x4d0   :  { %v11789_v17 = vpop.f32.mrb[9].mxu1 }
 0x4d1   :  { %v17100_v45 = vadd.f32 %v11789_v17, %v11788_v58  ;;  %v11791_v47 = vpop.f32.mrb[10].mxu1  ;;  %v13810_v17 = vld [vmem:[%s18656_s3 + $0x108] sm:$0xff]  }
 0x4d2   :  { %v11792_v6 = vpop.f32.mrb[11].mxu1 }
 0x4d3   :  { %v17102_v20 = vadd.f32 %v11792_v6, %v11791_v47 }
 0x4d5   :  { %6217 = vmatmul.mubr.bf16.gmra.mrb[100].mxu1 %v16202_v2 }
 0x4d6   :  { %6224 = vmatprep.mubr.bf16.mxu1 %v16419_v11 }
 0x4d7   :  { %v11794_v35 = vpop.f32.mrb[12].mxu1 }
 0x4d8   :  { %v11795_v3 = vpop.f32.mrb[13].mxu1 }
 0x4d9   :  { %v17106_v56 = vadd.f32 %v11795_v3, %v11794_v35  ;;  %v11797_v14 = vpop.f32.mrb[14].mxu1 }
 0x4da   :  { %v11798_v60 = vpop.f32.mrb[15].mxu1 }
 0x4db   :  { %v17108_v19 = vadd.f32 %v11798_v60, %v11797_v14 }
 0x4dd   :  { %6225 = vmatmul.mubr.bf16.gmra.mrb[104].mxu1 %v16232_v63 }
 0x4de   :  { %6232 = vmatprep.mubr.bf16.mxu1 %v16413_v4 }
 0x4df   :  { %v11800_v32 = vpop.f32.mrb[16].mxu1 }
 0x4e0   :  { %v11801_v29 = vpop.f32.mrb[17].mxu1 }
 0x4e1   :  { %v17112_v24 = vadd.f32 %v11801_v29, %v11800_v32  ;;  %v11803_v49 = vpop.f32.mrb[18].mxu1 }
 0x4e2   :  { %v11804_v9 = vpop.f32.mrb[19].mxu1 }
 0x4e3   :  { %v17114_v27 = vadd.f32 %v11804_v9, %v11803_v49 }
 0x4e5   :  { %6233 = vmatmul.mubr.bf16.gmra.mrb[108].mxu1 %v16226_v33 }
 0x4e6   :  { %6273 = vmatprep.mubr.bf16.mxu1 %v16672_v5  ;;  %v13811_v5 = vld [vmem:[%s18656_s3 + $0x110] sm:$0xff]  }
 0x4e7   :  { %v11806_v55 = vpop.f32.mrb[20].mxu1 }
 0x4e8   :  { %v11807_v51 = vpop.f32.mrb[21].mxu1 }
 0x4e9   :  { %v17118_v53 = vadd.f32 %v11807_v51, %v11806_v55  ;;  %v11809_v50 = vpop.f32.mrb[22].mxu1 }
 0x4ea   :  { %v11810_v58 = vpop.f32.mrb[23].mxu1 }
 0x4eb   :  { %v17123_v47 = vadd.f32 %v11810_v58, %v11809_v50  ;;  %v13815_v50 = vld [vmem:[%s18656_s3 + $0x130] sm:$0xff]   ;;  %v13816_v58 = vld [vmem:[%s18656_s3 + $0x138] sm:$0xff]  }
 0x4ed   :  { %6274 = vmatmul.mubr.bf16.vlgmr.msra.gmra.mrb[112].mxu1 %v16512_v42  ;;  %v13812_v42 = vld [vmem:[%s18656_s3 + $0x118] sm:$0xff]  }
 0x4ee   :  { %13182 = vmatpush3.bf16.msra.mxu1 %v13809_v15  ;;  %6281 = vmatprep.mubr.bf16.mxu1 %v16663_v57  ;;  %v13813_v57 = vld [vmem:[%s18656_s3 + $0x120] sm:$0xff]  }
 0x4ef   :  { %13183 = vmatprep.subr.bf16.mxu1 %v13810_v17  ;;  %v11812_v6 = vpop.f32.mrb[24].mxu1 }
 0x4f0   :  { %v11813_v35 = vpop.f32.mrb[25].mxu1 }
 0x4f1   :  { %v17130_v3 = vadd.f32 %v11813_v35, %v11812_v6  ;;  %v11815_v14 = vpop.f32.mrb[26].mxu1 }
 0x4f2   :  { %13184 = vmatpush3.bf16.msra.mxu1 %v13810_v17  ;;  %v11816_v60 = vpop.f32.mrb[27].mxu1  ;;  %v13817_v17 = vld [vmem:[%s18656_s3 + $0x2c0] sm:$0xff]  }
 0x4f3   :  { %13185 = vmatprep.subr.bf16.mxu1 %v13811_v5  ;;  %v17135_v15 = vadd.f32 %v11816_v60, %v11815_v14 }
 0x4f5   :  { %6282 = vmatmul.mubr.bf16.gmra.mrb[116].mxu1 %v16506_v46  ;;  %v13814_v46 = vld [vmem:[%s18656_s3 + $0x128] sm:$0xff]  }
 0x4f6   :  { %6289 = vmatprep.mubr.bf16.mxu1 %v16702_v18  ;;  %13186 = vmatpush3.bf16.msra.mxu1 %v13811_v5 }
 0x4f7   :  { %13187 = vmatprep.subr.bf16.mxu1 %v13812_v42  ;;  %v11818_v32 = vpop.f32.mrb[28].mxu1 }
 0x4f8   :  { %v11819_v29 = vpop.f32.mrb[29].mxu1 }
 0x4f9   :  { %v17142_v49 = vadd.f32 %v11819_v29, %v11818_v32  ;;  %v11821_v9 = vpop.f32.mrb[30].mxu1 }
 0x4fa   :  { %13188 = vmatpush3.bf16.msra.mxu1 %v13812_v42  ;;  %v11822_v55 = vpop.f32.mrb[31].mxu1 }
 0x4fb   :  { %13189 = vmatprep.subr.bf16.mxu1 %v13813_v57  ;;  %v17147_v51 = vadd.f32 %v11822_v55, %v11821_v9 }
 0x4fd   :  { %6290 = vmatmul.mubr.bf16.gmra.mrb[120].mxu1 %v16542_v12 }
 0x4fe   :  { %6297 = vmatprep.mubr.bf16.mxu1 %v16692_v44  ;;  %13190 = vmatpush3.bf16.msra.mxu1 %v13813_v57 }
 0x4ff   :  { %13191 = vmatprep.subr.bf16.mxu1 %v13814_v46 }
 0x502   :  { %13192 = vmatpush3.bf16.msra.mxu1 %v13814_v46 }
 0x503   :  { %13193 = vmatprep.subr.bf16.mxu1 %v13815_v50 }
 0x505   :  { %6298 = vmatmul.mubr.bf16.gmra.mrb[124].mxu1 %v16532_v61 }
 0x506   :  { %6305 = vmatprep.mubr.bf16.mxu1 %v16736_v41  ;;  %13194 = vmatpush3.bf16.msra.mxu1 %v13815_v50  ;;  %v13818_v50 = vld [vmem:[%s18656_s3 + $0x280] sm:$0xff]  }
 0x507   :  { %13195 = vmatprep.subr.bf16.mxu1 %v13816_v58 }
 0x50a   :  { %13196 = vmatpush3.bf16.msra.mxu1 %v13816_v58 }
 0x50b   :  { %12048 = vmatprep.subr.bf16.mxu1 %v13817_v17 }
 0x50d   :  { %6306 = vmatmul.mubr.bf16.gmra.mrb[128].mxu1 %v16563_v38 }
 0x50e   :  { %6313 = vmatprep.mubr.bf16.mxu1 %v16730_v8 }
 0x515   :  { %6314 = vmatmul.mubr.bf16.gmra.mrb[132].mxu1 %v16557_v59 }
 0x516   :  { %6321 = vmatprep.mubr.bf16.mxu1 %v16768_v30 }
 0x51d   :  { %6322 = vmatmul.mubr.bf16.gmra.mrb[136].mxu1 %v16587_v37 }
 0x51e   :  { %6329 = vmatprep.mubr.bf16.mxu1 %v16762_v10  ;;  %v11840_v5 = vpop.f32.mrb[32].mxu1 }
 0x51f   :  { %v11841_v6 = vpop.f32.mrb[33].mxu1 }
 0x520   :  { %v11842_v35 = vadd.f32 %v11841_v6, %v11840_v5  ;;  %v11843_v14 = vpop.f32.mrb[34].mxu1  ;;  %v13857_v5 = vld [vmem:[%s18658_s5 + $0x290] sm:$0xff]  }
 0x521   :  { %v11844_v60 = vpop.f32.mrb[35].mxu1 }
 0x522   :  { %v17169_v42 = vadd.f32 %v11842_v35, %v17076_v22  ;;  %v11845_v57 = vadd.f32 %v11844_v60, %v11843_v14  ;;  %v13819_v22 = vld [vmem:[%s18656_s3 + $0x2c8] sm:$0xff]   ;;  %v13821_v35 = vld [vmem:[%s18656_s3 + $0x2d0] sm:$0xff]  }
 0x524   :  { %v17172_v32 = vadd.f32 %v11845_v57, %v17081_v16  ;;  %v13823_v57 = vld [vmem:[%s18656_s3 + $0x290] sm:$0xff]  }
 0x525   :  { %6330 = vmatmul.mubr.bf16.gmra.mrb[140].mxu1 %v16581_v28 }
 0x526   :  { %13197 = vmatprep.mubr.bf16.mxu1 %v16856_v13  ;;  %v13856_v13 = vld [vmem:[%s18658_s5 + $0x2d0] sm:$0xff]  }
 0x527   :  { %12594 = vmatprep.subr.bf16.mxu0 %v13856_v13  ;;  %v13827_v13 = vld [vmem:[%s18656_s3 + $0x2e0] sm:$0xff]  }
 0x528   :  { %v11846_v29 = vpop.f32.mrb[36].mxu1  ;;  %12595 = vmatpush3.bf16.msra.mxu0 %v13857_v5 }
 0x529   :  { %v11847_v9 = vpop.f32.mrb[37].mxu1 }
 0x52a   :  { %v11848_v55 = vadd.f32 %v11847_v9, %v11846_v29  ;;  %v11849_v46 = vpop.f32.mrb[38].mxu1  ;;  %v13825_v9 = vld [vmem:[%s18656_s3 + $0x2d8] sm:$0xff]  }
 0x52b   :  { %v11850_v58 = vpop.f32.mrb[39].mxu1 }
 0x52c   :  { %v17183_v16 = vadd.f32 %v11848_v55, %v17094_v40  ;;  %v11851_v17 = vadd.f32 %v11850_v58, %v11849_v46  ;;  %v13820_v40 = vld [vmem:[%s18656_s3 + $0x288] sm:$0xff]  }
 0x52d   :  { %13198 = vmatmul.mubr.bf16.vlgmr.msra.gmra.mrb[64].mxu1 %v16850_v0 }
 0x52e   :  { %v17193_v6 = vadd.f32 %v11851_v17, %v17096_v21  ;;  %12049 = vmatpush3.bf16.msra.mxu1 %v13818_v50  ;;  %13201 = vmatprep.mubr.bf16.mxu1 %v16878_v52  ;;  %v19758_v50 = vld [vmem:[#allocation12_spill] sm:$0xff] }
 0x52f   :  { %12050 = vmatprep.subr.bf16.mxu1 %v13819_v22  ;;  %v19759_v22 = vld [vmem:[#allocation224_spill] sm:$0xff] }
 0x530   :  { %v11852_v0 = vpop.f32.mrb[40].mxu1  ;;  %v13826_v17 = vld [vmem:[%s18656_s3 + $0x298] sm:$0xff]  }
 0x531   :  { %v11853_v14 = vpop.f32.mrb[41].mxu1 }
 0x532   :  { %v11854_v60 = vadd.f32 %v11853_v14, %v11852_v0  ;;  %12051 = vmatpush3.bf16.msra.mxu1 %v13820_v40  ;;  %v11855_v21 = vpop.f32.mrb[42].mxu1  ;;  %v13829_v14 = vld [vmem:[%s18656_s3 + $0x2e8] sm:$0xff]  }
 0x533   :  { %v11856_v29 = vpop.f32.mrb[43].mxu1  ;;  %12052 = vmatprep.subr.bf16.mxu1 %v13821_v35 }
 0x534   :  { %v17209_v55 = vadd.f32 %v11854_v60, %v17100_v45  ;;  %v11857_v46 = vadd.f32 %v11856_v29, %v11855_v21 }
 0x535   :  { %13202 = vmatmul.mubr.bf16.gmra.mrb[68].mxu1 %v19758_v50 }
 0x536   :  { %v17213_v58 = vadd.f32 %v11857_v46, %v17102_v20  ;;  %12053 = vmatpush3.bf16.msra.mxu1 %v13823_v57  ;;  %13205 = vmatprep.mubr.bf16.mxu1 %v19759_v22  ;;  %v13828_v20 = vld [vmem:[%s18656_s3 + $0x2a0] sm:$0xff]   ;;  %v19760_v57 = vld [vmem:[#allocation127_spill] sm:$0xff] }
 0x537   :  { %12054 = vmatprep.subr.bf16.mxu1 %v13825_v9  ;;  %v13830_v9 = vld [vmem:[%s18656_s3 + $0x2a8] sm:$0xff]   ;;  %v13831_v46 = vld [vmem:[%s18656_s3 + $0x2f0] sm:$0xff]  }
 0x538   :  { %v11858_v45 = vpop.f32.mrb[44].mxu1 }
 0x539   :  { %v11859_v5 = vpop.f32.mrb[45].mxu1 }
 0x53a   :  { %v11860_v40 = vadd.f32 %v11859_v5, %v11858_v45  ;;  %12055 = vmatpush3.bf16.msra.mxu1 %v13826_v17  ;;  %v11861_v35 = vpop.f32.mrb[46].mxu1 }
 0x53b   :  { %v11862_v0 = vpop.f32.mrb[47].mxu1  ;;  %12056 = vmatprep.subr.bf16.mxu1 %v13827_v13 }
 0x53c   :  { %v17229_v60 = vadd.f32 %v11860_v40, %v17106_v56  ;;  %v11863_v21 = vadd.f32 %v11862_v0, %v11861_v35  ;;  %v13833_v40 = vld [vmem:[%s18656_s3 + $0x2f8] sm:$0xff]  }
 0x53d   :  { %13206 = vmatmul.mubr.bf16.gmra.mrb[72].mxu1 %v19760_v57 }
 0x53e   :  { %v17233_v29 = vadd.f32 %v11863_v21, %v17108_v19  ;;  %12057 = vmatpush3.bf16.msra.mxu1 %v13828_v20  ;;  %13209 = vmatprep.mubr.bf16.mxu1 %v16942_v1  ;;  %v13832_v19 = vld [vmem:[%s18656_s3 + $0x2b0] sm:$0xff]   ;;  %v13835_v21 = vld [vmem:[%s18656_s3 + $0x340] sm:$0xff]  }
 0x53f   :  { %12058 = vmatprep.subr.bf16.mxu1 %v13829_v14  ;;  %v13834_v14 = vld [vmem:[%s18656_s3 + $0x2b8] sm:$0xff]  }
 0x540   :  { %v11864_v56 = vpop.f32.mrb[48].mxu1 }
 0x541   :  { %v11865_v17 = vpop.f32.mrb[49].mxu1 }
 0x542   :  { %v11866_v13 = vadd.f32 %v11865_v17, %v11864_v56  ;;  %12059 = vmatpush3.bf16.msra.mxu1 %v13830_v9  ;;  %v11867_v45 = vpop.f32.mrb[50].mxu1 }
 0x543   :  { %v11868_v5 = vpop.f32.mrb[51].mxu1  ;;  %12060 = vmatprep.subr.bf16.mxu1 %v13831_v46 }
 0x544   :  { %v17249_v35 = vadd.f32 %v11866_v13, %v17112_v24  ;;  %v11869_v20 = vadd.f32 %v11868_v5, %v11867_v45  ;;  %v13838_v5 = vld [vmem:[%s18656_s3 + $0x308] sm:$0xff]  }
 0x545   :  { %13210 = vmatmul.mubr.bf16.gmra.mrb[76].mxu1 %v16936_v25 }
 0x546   :  { %v17253_v0 = vadd.f32 %v11869_v20, %v17114_v27  ;;  %12061 = vmatpush3.bf16.msra.mxu1 %v13832_v19  ;;  %6829 = vmatprep.mubr.bf16.mxu1 %v16346_v36  ;;  %v13836_v27 = vld [vmem:[%s18656_s3 + $0x300] sm:$0xff]   ;;  %v13837_v36 = vld [vmem:[%s18656_s3 + $0x348] sm:$0xff]  }
 0x547   :  { %12062 = vmatprep.subr.bf16.mxu1 %v13833_v40  ;;  %v13839_v40 = vld [vmem:[%s18656_s3 + $0x350] sm:$0xff]  }
 0x548   :  { %v11870_v24 = vpop.f32.mrb[52].mxu1 }
 0x549   :  { %v11871_v9 = vpop.f32.mrb[53].mxu1 }
 0x54a   :  { %v11872_v46 = vadd.f32 %v11871_v9, %v11870_v24  ;;  %12063 = vmatpush3.bf16.msra.mxu1 %v13834_v14  ;;  %v11873_v56 = vpop.f32.mrb[54].mxu1  ;;  %v13841_v24 = vld [vmem:[%s18656_s3 + $0x358] sm:$0xff]  }
 0x54b   :  { %v11874_v17 = vpop.f32.mrb[55].mxu1  ;;  %12112 = vmatprep.subr.bf16.mxu1 %v13835_v21 }
 0x54c   :  { %v17269_v13 = vadd.f32 %v11872_v46, %v17118_v53  ;;  %v11875_v45 = vadd.f32 %v11874_v17, %v11873_v56  ;;  %v13843_v17 = vld [vmem:[%s18656_s3 + $0x360] sm:$0xff]  }
 0x54d   :  { %6830 = vmatmul.mubr.bf16.vlgmr.msra.gmra.mrb[144].mxu1 %v16187_v7  ;;  %v13840_v7 = vld [vmem:[%s18656_s3 + $0x310] sm:$0xff]  }
 0x54e   :  { %v17273_v19 = vadd.f32 %v11875_v45, %v17123_v47  ;;  %12113 = vmatpush3.bf16.msra.mxu1 %v13836_v27  ;;  %6837 = vmatprep.mubr.bf16.mxu1 %v16336_v39  ;;  %v13842_v27 = vld [vmem:[%s18656_s3 + $0x318] sm:$0xff]  }
 0x54f   :  { %12114 = vmatprep.subr.bf16.mxu1 %v13837_v36 }
 0x550   :  { %v11876_v53 = vpop.f32.mrb[56].mxu1 }
 0x551   :  { %v11877_v20 = vpop.f32.mrb[57].mxu1 }
 0x552   :  { %v11878_v14 = vadd.f32 %v11877_v20, %v11876_v53  ;;  %v11879_v21 = vpop.f32.mrb[58].mxu1  ;;  %12115 = vmatpush3.bf16.msra.mxu1 %v13838_v5  ;;  %v13845_v53 = vld [vmem:[%s18656_s3 + $0x368] sm:$0xff]  }
 0x553   :  { %v11880_v47 = vpop.f32.mrb[59].mxu1  ;;  %12116 = vmatprep.subr.bf16.mxu1 %v13839_v40 }
 0x554   :  { %v17289_v9 = vadd.f32 %v11878_v14, %v17130_v3  ;;  %v11881_v46 = vadd.f32 %v11880_v47, %v11879_v21  ;;  %v13847_v47 = vld [vmem:[%s18656_s3 + $0x370] sm:$0xff]  }
 0x555   :  { %6838 = vmatmul.mubr.bf16.gmra.mrb[148].mxu1 %v16177_v31 }
 0x556   :  { %v17293_v56 = vadd.f32 %v11881_v46, %v17135_v15  ;;  %6845 = vmatprep.mubr.bf16.mxu1 %v16381_v48  ;;  %12117 = vmatpush3.bf16.msra.mxu1 %v13840_v7  ;;  %v13844_v15 = vld [vmem:[%s18656_s3 + $0x320] sm:$0xff]   ;;  %v13846_v7 = vld [vmem:[%s18656_s3 + $0x328] sm:$0xff]  }
 0x557   :  { %12118 = vmatprep.subr.bf16.mxu1 %v13841_v24  ;;  %v13850_v24 = vld [vmem:[%s18656_s3 + $0x338] sm:$0xff]   ;;  %v13851_v46 = vld [vmem:[%s18656_s3 + $0x380] sm:$0xff]  }
 0x558   :  { %v11882_v3 = vpop.f32.mrb[60].mxu1 }
 0x559   :  { %v11883_v36 = vpop.f32.mrb[61].mxu1 }
 0x55a   :  { %v11884_v45 = vadd.f32 %v11883_v36, %v11882_v3  ;;  %v11885_v5 = vpop.f32.mrb[62].mxu1  ;;  %12119 = vmatpush3.bf16.msra.mxu1 %v13842_v27  ;;  %v19761_v27 = vld [vmem:[#allocation113_spill] sm:$0xff]  ;;  %v19763_v3 = vld [vmem:[#allocation112_spill] sm:$0xff] }
 0x55b   :  { %v11886_v40 = vpop.f32.mrb[63].mxu1  ;;  %12120 = vmatprep.subr.bf16.mxu1 %v13843_v17  ;;  %v19762_v17 = vld [vmem:[#allocation110_spill] sm:$0xff] }
 0x55c   :  { %v17309_v20 = vadd.f32 %v11884_v45, %v17142_v49  ;;  %v11887_v14 = vadd.f32 %v11886_v40, %v11885_v5  ;;  %v13848_v49 = vld [vmem:[%s18656_s3 + $0x330] sm:$0xff]  }
 0x55d   :  { %6846 = vmatmul.mubr.bf16.gmra.mrb[152].mxu1 %v16208_v62 }
 0x55e   :  { %v17313_v21 = vadd.f32 %v11887_v14, %v17147_v51  ;;  %6853 = vmatprep.mubr.bf16.mxu1 %v16375_v54  ;;  %12121 = vmatpush3.bf16.msra.mxu1 %v13844_v15  ;;  %v13849_v51 = vld [vmem:[%s18656_s3 + $0x378] sm:$0xff]  }
 0x55f   :  { %12122 = vmatprep.subr.bf16.mxu1 %v13845_v53 }
 0x562   :  { %12123 = vmatpush3.bf16.msra.mxu1 %v13846_v7  ;;  %v19764_v7 = vld [vmem:[#allocation109_spill] sm:$0xff] }
 0x563   :  { %12124 = vmatprep.subr.bf16.mxu1 %v13847_v47 }
 0x565   :  { %6854 = vmatmul.mubr.bf16.gmra.mrb[156].mxu1 %v16202_v2 }
 0x566   :  { %6861 = vmatprep.mubr.bf16.mxu1 %v16419_v11  ;;  %12125 = vmatpush3.bf16.msra.mxu1 %v13848_v49 }
 0x567   :  { %12126 = vmatprep.subr.bf16.mxu1 %v13849_v51 }
 0x56a   :  { %12127 = vmatpush3.bf16.msra.mxu1 %v13850_v24 }
 0x56b   :  { %13213 = vmatprep.subr.bf16.mxu1 %v13851_v46 }
 0x56d   :  { %6862 = vmatmul.mubr.bf16.gmra.mrb[160].mxu1 %v16232_v63 }
 0x56e   :  { %6869 = vmatprep.mubr.bf16.mxu1 %v16413_v4 }
 0x575   :  { %6870 = vmatmul.mubr.bf16.gmra.mrb[164].mxu1 %v16226_v33 }
 0x576   :  { %6877 = vmatprep.mubr.bf16.mxu1 %v19761_v27 }
 0x57d   :  { %6878 = vmatmul.mubr.bf16.gmra.mrb[168].mxu1 %v19762_v17 }
 0x57e   :  { %6885 = vmatprep.mubr.bf16.mxu1 %v19763_v3 }
 0x580   :  { %v11920_v36 = vpop.f32.mrb[80].mxu1 }
 0x581   :  { %v11921_v45 = vpop.f32.mrb[81].mxu1 }
 0x582   :  { %v11922_v5 = vadd.f32 %v11921_v45, %v11920_v36  ;;  %v11923_v15 = vpop.f32.mrb[82].mxu1  ;;  %v13852_v36 = vld [vmem:[%s18656_s3 + $0x388] sm:$0xff]  }
 0x583   :  { %v11924_v40 = vpop.f32.mrb[83].mxu1 }
 0x584   :  { %v17343_v53 = vadd.f32 %v11922_v5, %v17169_v42  ;;  %v11925_v14 = vadd.f32 %v11924_v40, %v11923_v15 }
 0x585   :  { %6886 = vmatmul.mubr.bf16.gmra.mrb[172].mxu1 %v19764_v7 }
 0x586   :  { %v17347_v47 = vadd.f32 %v11925_v14, %v17172_v32  ;;  %6926 = vmatprep.mubr.bf16.mxu1 %v16702_v18  ;;  %v13853_v18 = vld [vmem:[%s18656_s3 + $0x390] sm:$0xff]  }
 0x588   :  { %v11926_v49 = vpop.f32.mrb[84].mxu1 }
 0x589   :  { %v11927_v51 = vpop.f32.mrb[85].mxu1 }
 0x58a   :  { %v11928_v24 = vadd.f32 %v11927_v51, %v11926_v49  ;;  %v11929_v26 = vpop.f32.mrb[86].mxu1 }
 0x58b   :  { %v11930_v43 = vpop.f32.mrb[87].mxu1 }
 0x58c   :  { %v17354_v42 = vadd.f32 %v11928_v24, %v17183_v16  ;;  %v11931_v45 = vadd.f32 %v11930_v43, %v11929_v26 }
 0x58d   :  { %6927 = vmatmul.mubr.bf16.vlgmr.msra.gmra.mrb[176].mxu1 %v16542_v12  ;;  %v13854_v12 = vld [vmem:[%s18656_s3 + $0x398] sm:$0xff]  }
 0x58e   :  { %v17358_v32 = vadd.f32 %v11931_v45, %v17193_v6  ;;  %13214 = vmatpush3.bf16.msra.mxu1 %v13851_v46  ;;  %6934 = vmatprep.mubr.bf16.mxu1 %v16692_v44  ;;  %v13855_v46 = vld [vmem:[%s18656_s3 + $0x3a0] sm:$0xff]  }
 0x58f   :  { %13215 = vmatprep.subr.bf16.mxu1 %v13852_v36 }
 0x590   :  { %v11932_v5 = vpop.f32.mrb[88].mxu1 }
 0x591   :  { %v11933_v15 = vpop.f32.mrb[89].mxu1 }
 0x592   :  { %v11934_v40 = vadd.f32 %v11933_v15, %v11932_v5  ;;  %v11935_v14 = vpop.f32.mrb[90].mxu1  ;;  %13216 = vmatpush3.bf16.msra.mxu1 %v13852_v36  ;;  %v13859_v15 = vld [vmem:[%s18656_s3 + $0x3b0] sm:$0xff]  }
 0x593   :  { %v11936_v16 = vpop.f32.mrb[91].mxu1  ;;  %13217 = vmatprep.subr.bf16.mxu1 %v13853_v18 }
 0x594   :  { %v17368_v26 = vadd.f32 %v11934_v40, %v17209_v55  ;;  %v11937_v43 = vadd.f32 %v11936_v16, %v11935_v14 }
 0x595   :  { %6935 = vmatmul.mubr.bf16.gmra.mrb[180].mxu1 %v16532_v61 }
 0x596   :  { %v17372_v6 = vadd.f32 %v11937_v43, %v17213_v58  ;;  %6942 = vmatprep.mubr.bf16.mxu1 %v16736_v41  ;;  %13218 = vmatpush3.bf16.msra.mxu1 %v13853_v18  ;;  %v13858_v58 = vld [vmem:[%s18656_s3 + $0x3a8] sm:$0xff]   ;;  %v13860_v43 = vld [vmem:[%s18656_s3 + $0x3b8] sm:$0xff]  }
 0x597   :  { %13219 = vmatprep.subr.bf16.mxu1 %v13854_v12 }
 0x598   :  { %v11938_v49 = vpop.f32.mrb[92].mxu1 }
 0x599   :  { %v11939_v51 = vpop.f32.mrb[93].mxu1 }
 0x59a   :  { %v11940_v24 = vadd.f32 %v11939_v51, %v11938_v49  ;;  %v11941_v36 = vpop.f32.mrb[94].mxu1  ;;  %13220 = vmatpush3.bf16.msra.mxu1 %v13854_v12  ;;  %v13892_v49 = vld [vmem:[%s18658_s5 + $0x2d8] sm:$0xff]  }
 0x59b   :  { %v11942_v55 = vpop.f32.mrb[95].mxu1  ;;  %13221 = vmatprep.subr.bf16.mxu1 %v13855_v46  ;;  %v13894_v51 = vld [vmem:[%s18658_s5 + $0x298] sm:$0xff]   ;;  %12596 = vmatprep.subr.bf16.mxu0 %v13892_v49 }
 0x59c   :  { %v11943_v45 = vadd.f32 %v11942_v55, %v11941_v36  ;;  %v17382_v5 = vadd.f32 %v11940_v24, %v17229_v60  ;;  %12597 = vmatpush3.bf16.msra.mxu0 %v13894_v51 }
 0x59d   :  { %6943 = vmatmul.mubr.bf16.gmra.mrb[184].mxu1 %v16563_v38 }
 0x59e   :  { %6950 = vmatprep.mubr.bf16.mxu1 %v16730_v8  ;;  %13222 = vmatpush3.bf16.msra.mxu1 %v13855_v46  ;;  %v17387_v18 = vadd.f32 %v11943_v45, %v17233_v29 }
 0x59f   :  { %13223 = vmatprep.subr.bf16.mxu1 %v13858_v58 }
 0x5a0   :  { %v11944_v40 = vpop.f32.mrb[96].mxu1 }
 0x5a1   :  { %v11945_v14 = vpop.f32.mrb[97].mxu1 }
 0x5a2   :  { %v11946_v16 = vadd.f32 %v11945_v14, %v11944_v40  ;;  %v11947_v12 = vpop.f32.mrb[98].mxu1  ;;  %13224 = vmatpush3.bf16.msra.mxu1 %v13858_v58 }
 0x5a3   :  { %v11948_v60 = vpop.f32.mrb[99].mxu1  ;;  %13225 = vmatprep.subr.bf16.mxu1 %v13859_v15 }
 0x5a4   :  { %v11949_v46 = vadd.f32 %v11948_v60, %v11947_v12  ;;  %v17396_v29 = vadd.f32 %v11946_v16, %v17249_v35  ;;  %v13861_v35 = vld [vmem:[%s18656_s3 + $0x400] sm:$0xff]  }
 0x5a5   :  { %6951 = vmatmul.mubr.bf16.gmra.mrb[188].mxu1 %v16557_v59 }
 0x5a6   :  { %6958 = vmatprep.mubr.bf16.mxu1 %v16768_v30  ;;  %13226 = vmatpush3.bf16.msra.mxu1 %v13859_v15  ;;  %v17407_v24 = vadd.f32 %v11949_v46, %v17253_v0 }
 0x5a7   :  { %13227 = vmatprep.subr.bf16.mxu1 %v13860_v43 }
 0x5a8   :  { %v11950_v36 = vpop.f32.mrb[100].mxu1 }
 0x5a9   :  { %v11951_v55 = vpop.f32.mrb[101].mxu1 }
 0x5aa   :  { %v11952_v58 = vadd.f32 %v11951_v55, %v11950_v36  ;;  %v11953_v45 = vpop.f32.mrb[102].mxu1  ;;  %13228 = vmatpush3.bf16.msra.mxu1 %v13860_v43 }
 0x5ab   :  { %v11954_v40 = vpop.f32.mrb[103].mxu1  ;;  %12192 = vmatprep.subr.bf16.mxu1 %v13861_v35 }
 0x5ac   :  { %v11955_v14 = vadd.f32 %v11954_v40, %v11953_v45  ;;  %v17413_v15 = vadd.f32 %v11952_v58, %v17269_v13  ;;  %v19765_v13 = vld [vmem:[#allocation125_spill] sm:$0xff] }
 0x5ad   :  { %6959 = vmatmul.mubr.bf16.gmra.mrb[192].mxu1 %v16587_v37 }
 0x5ae   :  { %6966 = vmatprep.mubr.bf16.mxu1 %v16762_v10  ;;  %v17418_v0 = vadd.f32 %v11955_v14, %v17273_v19 }
 0x5b0   :  { %v11956_v16 = vpop.f32.mrb[104].mxu1 }
 0x5b1   :  { %v11957_v12 = vpop.f32.mrb[105].mxu1 }
 0x5b2   :  { %v11958_v60 = vadd.f32 %v11957_v12, %v11956_v16  ;;  %v11959_v46 = vpop.f32.mrb[106].mxu1  ;;  %v19766_v16 = vld [vmem:[#allocation119_spill] sm:$0xff] }
 0x5b3   :  { %v11960_v49 = vpop.f32.mrb[107].mxu1 }
 0x5b4   :  { %v11961_v51 = vadd.f32 %v11960_v49, %v11959_v46  ;;  %v17421_v43 = vadd.f32 %v11958_v60, %v17289_v9  ;;  %v19767_v9 = vld [vmem:[#allocation124_spill] sm:$0xff] }
 0x5b5   :  { %6967 = vmatmul.mubr.bf16.gmra.mrb[196].mxu1 %v16581_v28 }
 0x5b6   :  { %6974 = vmatprep.mubr.bf16.mxu1 %v19765_v13  ;;  %v17426_v35 = vadd.f32 %v11961_v51, %v17293_v56 }
 0x5b8   :  { %v11962_v36 = vpop.f32.mrb[108].mxu1 }
 0x5b9   :  { %v11963_v55 = vpop.f32.mrb[109].mxu1 }
 0x5ba   :  { %v11964_v19 = vadd.f32 %v11963_v55, %v11962_v36  ;;  %v11965_v58 = vpop.f32.mrb[110].mxu1 }
 0x5bb   :  { %v11966_v45 = vpop.f32.mrb[111].mxu1 }
 0x5bc   :  { %v11967_v40 = vadd.f32 %v11966_v45, %v11965_v58  ;;  %v17429_v14 = vadd.f32 %v11964_v19, %v17309_v20  ;;  %v19768_v58 = vld [vmem:[#allocation118_spill] sm:$0xff] }
 0x5bd   :  { %6975 = vmatmul.mubr.bf16.gmra.mrb[200].mxu1 %v19766_v16 }
 0x5be   :  { %6982 = vmatprep.mubr.bf16.mxu1 %v19767_v9  ;;  %v17434_v12 = vadd.f32 %v11967_v40, %v17313_v21 }
 0x5c0   :  { %v11984_v60 = vpop.f32.mrb[112].mxu1 }
 0x5c1   :  { %v11985_v46 = vpop.f32.mrb[113].mxu1 }
 0x5c2   :  { %v11986_v56 = vadd.f32 %v11985_v46, %v11984_v60  ;;  %v11987_v49 = vpop.f32.mrb[114].mxu1  ;;  %v13862_v60 = vld [vmem:[%s18656_s3 + $0x3c0] sm:$0xff]  }
 0x5c3   :  { %v11988_v51 = vpop.f32.mrb[115].mxu1 }
 0x5c4   :  { %v17437_v36 = vadd.f32 %v17343_v53, %v11986_v56  ;;  %v11989_v55 = vadd.f32 %v11988_v51, %v11987_v49  ;;  %v13863_v53 = vld [vmem:[%s18656_s3 + $0x408] sm:$0xff]   ;;  %v13865_v51 = vld [vmem:[%s18656_s3 + $0x410] sm:$0xff]  }
 0x5c5   :  { %6983 = vmatmul.mubr.bf16.gmra.mrb[204].mxu1 %v19768_v58  ;;  %v13864_v49 = vld [vmem:[%s18656_s3 + $0x3c8] sm:$0xff]  }
 0x5c6   :  { %v17441_v20 = vadd.f32 %v17347_v47, %v11989_v55  ;;  %13229 = vmatprep.mubr.bf16.mxu1 %v16878_v52 }
 0x5c8   :  { %v11990_v19 = vpop.f32.mrb[116].mxu1 }
 0x5c9   :  { %v11991_v45 = vpop.f32.mrb[117].mxu1 }
 0x5ca   :  { %v11992_v21 = vadd.f32 %v11991_v45, %v11990_v19  ;;  %v11993_v40 = vpop.f32.mrb[118].mxu1 }
 0x5cb   :  { %v11994_v46 = vpop.f32.mrb[119].mxu1 }
 0x5cc   :  { %v17451_v56 = vadd.f32 %v17354_v42, %v11992_v21  ;;  %v11995_v47 = vadd.f32 %v11994_v46, %v11993_v40  ;;  %v13867_v40 = vld [vmem:[%s18656_s3 + $0x418] sm:$0xff]  }
 0x5cd   :  { %13230 = vmatmul.mubr.bf16.vlgmr.msra.gmra.mrb[64].mxu1 %v19758_v50 }
 0x5ce   :  { %v17455_v52 = vadd.f32 %v17358_v32, %v11995_v47  ;;  %12193 = vmatpush3.bf16.msra.mxu1 %v13862_v60  ;;  %13233 = vmatprep.mubr.bf16.mxu1 %v19759_v22  ;;  %v13866_v32 = vld [vmem:[%s18656_s3 + $0x3d0] sm:$0xff]   ;;  %v13868_v47 = vld [vmem:[%s18656_s3 + $0x3d8] sm:$0xff]  }
 0x5cf   :  { %12194 = vmatprep.subr.bf16.mxu1 %v13863_v53 }
 0x5d0   :  { %v11996_v42 = vpop.f32.mrb[120].mxu1 }
 0x5d1   :  { %v11997_v55 = vpop.f32.mrb[121].mxu1 }
 0x5d2   :  { %v11998_v19 = vadd.f32 %v11997_v55, %v11996_v42  ;;  %12195 = vmatpush3.bf16.msra.mxu1 %v13864_v49  ;;  %v11999_v45 = vpop.f32.mrb[122].mxu1  ;;  %v13869_v49 = vld [vmem:[%s18656_s3 + $0x420] sm:$0xff]  }
 0x5d3   :  { %v12000_v21 = vpop.f32.mrb[123].mxu1  ;;  %12196 = vmatprep.subr.bf16.mxu1 %v13865_v51 }
 0x5d4   :  { %v17471_v60 = vadd.f32 %v17368_v26, %v11998_v19  ;;  %v12001_v46 = vadd.f32 %v12000_v21, %v11999_v45  ;;  %v13871_v45 = vld [vmem:[%s18656_s3 + $0x428] sm:$0xff]  }
 0x5d5   :  { %13234 = vmatmul.mubr.bf16.gmra.mrb[68].mxu1 %v19760_v57 }
 0x5d6   :  { %v17475_v53 = vadd.f32 %v17372_v6, %v12001_v46  ;;  %12197 = vmatpush3.bf16.msra.mxu1 %v13866_v32  ;;  %13237 = vmatprep.mubr.bf16.mxu1 %v16942_v1  ;;  %v13870_v6 = vld [vmem:[%s18656_s3 + $0x3e0] sm:$0xff]   ;;  %v13872_v46 = vld [vmem:[%s18656_s3 + $0x3e8] sm:$0xff]  }
 0x5d7   :  { %12198 = vmatprep.subr.bf16.mxu1 %v13867_v40 }
 0x5d8   :  { %v12002_v26 = vpop.f32.mrb[124].mxu1 }
 0x5d9   :  { %v12003_v51 = vpop.f32.mrb[125].mxu1 }
 0x5da   :  { %v12004_v42 = vadd.f32 %v12003_v51, %v12002_v26  ;;  %12199 = vmatpush3.bf16.msra.mxu1 %v13868_v47  ;;  %v12005_v55 = vpop.f32.mrb[126].mxu1  ;;  %v13873_v47 = vld [vmem:[%s18656_s3 + $0x430] sm:$0xff]  }
 0x5db   :  { %v12006_v19 = vpop.f32.mrb[127].mxu1  ;;  %12200 = vmatprep.subr.bf16.mxu1 %v13869_v49 }
 0x5dc   :  { %v17491_v32 = vadd.f32 %v17382_v5, %v12004_v42  ;;  %v12007_v21 = vadd.f32 %v12006_v19, %v12005_v55  ;;  %v13875_v55 = vld [vmem:[%s18656_s3 + $0x438] sm:$0xff]  }
 0x5dd   :  { %13238 = vmatmul.mubr.bf16.gmra.mrb[72].mxu1 %v16936_v25 }
 0x5de   :  { %v17495_v40 = vadd.f32 %v17387_v18, %v12007_v21  ;;  %12201 = vmatpush3.bf16.msra.mxu1 %v13870_v6  ;;  %13241 = vmatprep.mubr.bf16.mxu1 %v16980_v34  ;;  %v13874_v18 = vld [vmem:[%s18656_s3 + $0x3f0] sm:$0xff]   ;;  %v13876_v21 = vld [vmem:[%s18656_s3 + $0x3f8] sm:$0xff]  }
 0x5df   :  { %12202 = vmatprep.subr.bf16.mxu1 %v13871_v45 }
 0x5e0   :  { %v12008_v5 = vpop.f32.mrb[128].mxu1 }
 0x5e1   :  { %v12009_v49 = vpop.f32.mrb[129].mxu1 }
 0x5e2   :  { %v12010_v26 = vadd.f32 %v12009_v49, %v12008_v5  ;;  %12203 = vmatpush3.bf16.msra.mxu1 %v13872_v46  ;;  %v12011_v51 = vpop.f32.mrb[130].mxu1  ;;  %v13877_v46 = vld [vmem:[%s18656_s3 + $0x480] sm:$0xff]  }
 0x5e3   :  { %v12012_v42 = vpop.f32.mrb[131].mxu1  ;;  %12204 = vmatprep.subr.bf16.mxu1 %v13873_v47 }
 0x5e4   :  { %v17511_v6 = vadd.f32 %v17396_v29, %v12010_v26  ;;  %v12013_v19 = vadd.f32 %v12012_v42, %v12011_v51 }
 0x5e5   :  { %13242 = vmatmul.mubr.bf16.gmra.mrb[76].mxu1 %v16978_v23 }
 0x5e6   :  { %v17515_v45 = vadd.f32 %v17407_v24, %v12013_v19  ;;  %12205 = vmatpush3.bf16.msra.mxu1 %v13874_v18  ;;  %7498 = vmatprep.mubr.bf16.mxu1 %v16336_v39  ;;  %v13878_v24 = vld [vmem:[%s18656_s3 + $0x440] sm:$0xff]   ;;  %v13879_v39 = vld [vmem:[%s18656_s3 + $0x488] sm:$0xff]   ;;  %v13881_v19 = vld [vmem:[%s18656_s3 + $0x490] sm:$0xff]  }
 0x5e7   :  { %12206 = vmatprep.subr.bf16.mxu1 %v13875_v55  ;;  %v13880_v55 = vld [vmem:[%s18656_s3 + $0x448] sm:$0xff]  }
 0x5e8   :  { %v12014_v29 = vpop.f32.mrb[132].mxu1 }
 0x5e9   :  { %v12015_v47 = vpop.f32.mrb[133].mxu1 }
 0x5ea   :  { %v12016_v5 = vadd.f32 %v12015_v47, %v12014_v29  ;;  %12207 = vmatpush3.bf16.msra.mxu1 %v13876_v21  ;;  %v12017_v49 = vpop.f32.mrb[134].mxu1  ;;  %v13883_v47 = vld [vmem:[%s18656_s3 + $0x498] sm:$0xff]  }
 0x5eb   :  { %v12018_v26 = vpop.f32.mrb[135].mxu1  ;;  %12256 = vmatprep.subr.bf16.mxu1 %v13877_v46 }
 0x5ec   :  { %v17531_v51 = vadd.f32 %v17413_v15, %v12016_v5  ;;  %v12019_v18 = vadd.f32 %v12018_v26, %v12017_v49  ;;  %v13884_v26 = vld [vmem:[%s18656_s3 + $0x458] sm:$0xff]  }
 0x5ed   :  { %7499 = vmatmul.mubr.bf16.vlgmr.msra.gmra.mrb[208].mxu1 %v16177_v31  ;;  %v13882_v31 = vld [vmem:[%s18656_s3 + $0x450] sm:$0xff]  }
 0x5ee   :  { %v17535_v42 = vadd.f32 %v17418_v0, %v12019_v18  ;;  %12257 = vmatpush3.bf16.msra.mxu1 %v13878_v24  ;;  %7506 = vmatprep.mubr.bf16.mxu1 %v16381_v48 }
 0x5ef   :  { %12258 = vmatprep.subr.bf16.mxu1 %v13879_v39  ;;  %v13885_v39 = vld [vmem:[%s18656_s3 + $0x4a0] sm:$0xff]  }
 0x5f0   :  { %v12020_v15 = vpop.f32.mrb[136].mxu1 }
 0x5f1   :  { %v12021_v21 = vpop.f32.mrb[137].mxu1 }
 0x5f2   :  { %v12022_v46 = vadd.f32 %v12021_v21, %v12020_v15  ;;  %v12023_v29 = vpop.f32.mrb[138].mxu1  ;;  %12259 = vmatpush3.bf16.msra.mxu1 %v13880_v55  ;;  %v13887_v21 = vld [vmem:[%s18656_s3 + $0x4a8] sm:$0xff]  }
 0x5f3   :  { %v12024_v0 = vpop.f32.mrb[139].mxu1  ;;  %12260 = vmatprep.subr.bf16.mxu1 %v13881_v19 }
 0x5f4   :  { %v17551_v5 = vadd.f32 %v17421_v43, %v12022_v46  ;;  %v12025_v49 = vadd.f32 %v12024_v0, %v12023_v29  ;;  %v13888_v0 = vld [vmem:[%s18656_s3 + $0x468] sm:$0xff]  }
 0x5f5   :  { %7507 = vmatmul.mubr.bf16.gmra.mrb[212].mxu1 %v16208_v62 }
 0x5f6   :  { %v17555_v24 = vadd.f32 %v17426_v35, %v12025_v49  ;;  %7514 = vmatprep.mubr.bf16.mxu1 %v16375_v54  ;;  %12261 = vmatpush3.bf16.msra.mxu1 %v13882_v31  ;;  %v13886_v35 = vld [vmem:[%s18656_s3 + $0x460] sm:$0xff]   ;;  %v13893_v49 = vld [vmem:[%s18656_s3 + $0x478] sm:$0xff]  }
 0x5f7   :  { %12262 = vmatprep.subr.bf16.mxu1 %v13883_v47  ;;  %v13889_v47 = vld [vmem:[%s18656_s3 + $0x4b0] sm:$0xff]  }
 0x5f8   :  { %v12026_v43 = vpop.f32.mrb[140].mxu1 }
 0x5f9   :  { %v12027_v18 = vpop.f32.mrb[141].mxu1 }
 0x5fa   :  { %v12028_v55 = vadd.f32 %v12027_v18, %v12026_v43  ;;  %v12029_v19 = vpop.f32.mrb[142].mxu1  ;;  %12263 = vmatpush3.bf16.msra.mxu1 %v13884_v26  ;;  %v13895_v26 = vld [vmem:[%s18656_s3 + $0x4c0] sm:$0xff]  }
 0x5fb   :  { %v12030_v15 = vpop.f32.mrb[143].mxu1  ;;  %12264 = vmatprep.subr.bf16.mxu1 %v13885_v39  ;;  %v19769_v39 = vld [vmem:[#allocation114_spill] sm:$0xff]  ;;  %v13924_v18 = vld [vmem:[%s18658_s5 + $0x2e0] sm:$0xff]  }
 0x5fc   :  { %v17571_v46 = vadd.f32 %v17429_v14, %v12028_v55  ;;  %v12031_v29 = vadd.f32 %v12030_v15, %v12029_v19  ;;  %v13890_v14 = vld [vmem:[%s18656_s3 + $0x470] sm:$0xff]   ;;  %v13926_v19 = vld [vmem:[%s18658_s5 + $0x2a0] sm:$0xff]   ;;  %12598 = vmatprep.subr.bf16.mxu0 %v13924_v18 }
 0x5fd   :  { %7515 = vmatmul.mubr.bf16.gmra.mrb[216].mxu1 %v16202_v2  ;;  %12599 = vmatpush3.bf16.msra.mxu0 %v13926_v19 }
 0x5fe   :  { %v17575_v31 = vadd.f32 %v17434_v12, %v12031_v29  ;;  %7522 = vmatprep.mubr.bf16.mxu1 %v16419_v11  ;;  %12265 = vmatpush3.bf16.msra.mxu1 %v13886_v35  ;;  %v13891_v12 = vld [vmem:[%s18656_s3 + $0x4b8] sm:$0xff]  }
 0x5ff   :  { %12266 = vmatprep.subr.bf16.mxu1 %v13887_v21 }
 0x602   :  { %12267 = vmatpush3.bf16.msra.mxu1 %v13888_v0  ;;  %v19770_v0 = vld [vmem:[#allocation111_spill] sm:$0xff] }
 0x603   :  { %12268 = vmatprep.subr.bf16.mxu1 %v13889_v47 }
 0x605   :  { %7523 = vmatmul.mubr.bf16.gmra.mrb[220].mxu1 %v16232_v63 }
 0x606   :  { %7530 = vmatprep.mubr.bf16.mxu1 %v16413_v4  ;;  %12269 = vmatpush3.bf16.msra.mxu1 %v13890_v14 }
 0x607   :  { %12270 = vmatprep.subr.bf16.mxu1 %v13891_v12 }
 0x60a   :  { %12271 = vmatpush3.bf16.msra.mxu1 %v13893_v49 }
 0x60b   :  { %13245 = vmatprep.subr.bf16.mxu1 %v13895_v26 }
 0x60d   :  { %7531 = vmatmul.mubr.bf16.gmra.mrb[224].mxu1 %v16226_v33 }
 0x60e   :  { %7538 = vmatprep.mubr.bf16.mxu1 %v19761_v27 }
 0x615   :  { %7539 = vmatmul.mubr.bf16.gmra.mrb[228].mxu1 %v19762_v17 }
 0x616   :  { %7546 = vmatprep.mubr.bf16.mxu1 %v19763_v3 }
 0x61d   :  { %7547 = vmatmul.mubr.bf16.gmra.mrb[232].mxu1 %v19764_v7  ;;  %v19772_v7 = vld [vmem:[#allocation120_spill] sm:$0xff] }
 0x61e   :  { %7554 = vmatprep.mubr.bf16.mxu1 %v19769_v39 }
 0x620   :  { %v12064_v43 = vpop.f32.mrb[144].mxu1 }
 0x621   :  { %v12065_v55 = vpop.f32.mrb[145].mxu1 }
 0x622   :  { %v17610_v35 = vadd.f32 %v12065_v55, %v12064_v43  ;;  %v12067_v15 = vpop.f32.mrb[146].mxu1  ;;  %v13896_v43 = vld [vmem:[%s18656_s3 + $0x4c8] sm:$0xff]  }
 0x623   :  { %v12068_v21 = vpop.f32.mrb[147].mxu1 }
 0x624   :  { %v17612_v29 = vadd.f32 %v12068_v21, %v12067_v15 }
 0x625   :  { %7555 = vmatmul.mubr.bf16.gmra.mrb[236].mxu1 %v19770_v0 }
 0x626   :  { %7595 = vmatprep.mubr.bf16.mxu1 %v16692_v44  ;;  %v13897_v44 = vld [vmem:[%s18656_s3 + $0x4d0] sm:$0xff]  }
 0x628   :  { %v12070_v47 = vpop.f32.mrb[148].mxu1 }
 0x629   :  { %v12071_v14 = vpop.f32.mrb[149].mxu1 }
 0x62a   :  { %v17616_v12 = vadd.f32 %v12071_v14, %v12070_v47  ;;  %v12073_v49 = vpop.f32.mrb[150].mxu1 }
 0x62b   :  { %v12074_v39 = vpop.f32.mrb[151].mxu1 }
 0x62c   :  { %v17621_v55 = vadd.f32 %v12074_v39, %v12073_v49  ;;  %v13899_v39 = vld [vmem:[%s18656_s3 + $0x4e0] sm:$0xff]  }
 0x62d   :  { %7596 = vmatmul.mubr.bf16.vlgmr.msra.gmra.mrb[240].mxu1 %v16532_v61  ;;  %v13898_v61 = vld [vmem:[%s18656_s3 + $0x4d8] sm:$0xff]  }
 0x62e   :  { %13246 = vmatpush3.bf16.msra.mxu1 %v13895_v26  ;;  %7603 = vmatprep.mubr.bf16.mxu1 %v16736_v41 }
 0x62f   :  { %13247 = vmatprep.subr.bf16.mxu1 %v13896_v43 }
 0x630   :  { %v12076_v18 = vpop.f32.mrb[152].mxu1 }
 0x631   :  { %v12077_v19 = vpop.f32.mrb[153].mxu1 }
 0x632   :  { %v17628_v15 = vadd.f32 %v12077_v19, %v12076_v18  ;;  %v12079_v21 = vpop.f32.mrb[154].mxu1  ;;  %13248 = vmatpush3.bf16.msra.mxu1 %v13896_v43 }
 0x633   :  { %v12080_v47 = vpop.f32.mrb[155].mxu1  ;;  %13249 = vmatprep.subr.bf16.mxu1 %v13897_v44 }
 0x634   :  { %v17633_v26 = vadd.f32 %v12080_v47, %v12079_v21  ;;  %v13900_v21 = vld [vmem:[%s18656_s3 + $0x4e8] sm:$0xff]  }
 0x635   :  { %7604 = vmatmul.mubr.bf16.gmra.mrb[244].mxu1 %v16563_v38 }
 0x636   :  { %7611 = vmatprep.mubr.bf16.mxu1 %v16730_v8  ;;  %13250 = vmatpush3.bf16.msra.mxu1 %v13897_v44  ;;  %v13901_v44 = vld [vmem:[%s18656_s3 + $0x4f0] sm:$0xff]  }
 0x637   :  { %13251 = vmatprep.subr.bf16.mxu1 %v13898_v61 }
 0x638   :  { %v12082_v14 = vpop.f32.mrb[156].mxu1 }
 0x639   :  { %v12083_v49 = vpop.f32.mrb[157].mxu1 }
 0x63a   :  { %v17640_v43 = vadd.f32 %v12083_v49, %v12082_v14  ;;  %v12085_v18 = vpop.f32.mrb[158].mxu1  ;;  %13252 = vmatpush3.bf16.msra.mxu1 %v13898_v61 }
 0x63b   :  { %v12086_v19 = vpop.f32.mrb[159].mxu1  ;;  %13253 = vmatprep.subr.bf16.mxu1 %v13899_v39 }
 0x63c   :  { %v17645_v47 = vadd.f32 %v12086_v19, %v12085_v18  ;;  %v13902_v18 = vld [vmem:[%s18656_s3 + $0x4f8] sm:$0xff]  }
 0x63d   :  { %7612 = vmatmul.mubr.bf16.gmra.mrb[248].mxu1 %v16557_v59 }
 0x63e   :  { %7619 = vmatprep.mubr.bf16.mxu1 %v16768_v30  ;;  %13254 = vmatpush3.bf16.msra.mxu1 %v13899_v39  ;;  %v13903_v39 = vld [vmem:[%s18656_s3 + $0x540] sm:$0xff]  }
 0x63f   :  { %13255 = vmatprep.subr.bf16.mxu1 %v13900_v21 }
 0x640   :  { %v12088_v14 = vpop.f32.mrb[160].mxu1 }
 0x641   :  { %v12089_v61 = vpop.f32.mrb[161].mxu1 }
 0x642   :  { %v17652_v49 = vadd.f32 %v12089_v61, %v12088_v14  ;;  %v12091_v8 = vpop.f32.mrb[162].mxu1  ;;  %13256 = vmatpush3.bf16.msra.mxu1 %v13900_v21 }
 0x643   :  { %v12092_v38 = vpop.f32.mrb[163].mxu1  ;;  %13257 = vmatprep.subr.bf16.mxu1 %v13901_v44 }
 0x644   :  { %v17657_v19 = vadd.f32 %v12092_v38, %v12091_v8 }
 0x645   :  { %7620 = vmatmul.mubr.bf16.gmra.mrb[252].mxu1 %v16587_v37 }
 0x646   :  { %7627 = vmatprep.mubr.bf16.mxu1 %v16762_v10  ;;  %13258 = vmatpush3.bf16.msra.mxu1 %v13901_v44 }
 0x647   :  { %13259 = vmatprep.subr.bf16.mxu1 %v13902_v18 }
 0x648   :  { %v12094_v14 = vpop.f32.mrb[164].mxu1 }
 0x649   :  { %v12095_v21 = vpop.f32.mrb[165].mxu1 }
 0x64a   :  { %v17664_v61 = vadd.f32 %v12095_v21, %v12094_v14  ;;  %v12097_v30 = vpop.f32.mrb[166].mxu1  ;;  %13260 = vmatpush3.bf16.msra.mxu1 %v13902_v18 }
 0x64b   :  { %v12098_v59 = vpop.f32.mrb[167].mxu1  ;;  %12336 = vmatprep.subr.bf16.mxu1 %v13903_v39 }
 0x64c   :  { %v17666_v38 = vadd.f32 %v12098_v59, %v12097_v30 }
 0x64d   :  { %7628 = vmatmul.mubr.bf16.gmra.mrb[0].mxu1 %v16581_v28 }
 0x64e   :  { %7635 = vmatprep.mubr.bf16.mxu1 %v19765_v13 }
 0x650   :  { %v12100_v8 = vpop.f32.mrb[168].mxu1 }
 0x651   :  { %v12101_v44 = vpop.f32.mrb[169].mxu1 }
 0x652   :  { %v17670_v10 = vadd.f32 %v12101_v44, %v12100_v8  ;;  %v12103_v37 = vpop.f32.mrb[170].mxu1  ;;  %v19771_v8 = vld [vmem:[#allocation126_spill] sm:$0xff] }
 0x653   :  { %v12104_v41 = vpop.f32.mrb[171].mxu1 }
 0x654   :  { %v17672_v0 = vadd.f32 %v12104_v41, %v12103_v37 }
 0x655   :  { %7636 = vmatmul.mubr.bf16.gmra.mrb[4].mxu1 %v19766_v16 }
 0x656   :  { %7643 = vmatprep.mubr.bf16.mxu1 %v19767_v9 }
 0x658   :  { %v12106_v18 = vpop.f32.mrb[172].mxu1 }
 0x659   :  { %v12107_v39 = vpop.f32.mrb[173].mxu1 }
 0x65a   :  { %v17676_v59 = vadd.f32 %v12107_v39, %v12106_v18  ;;  %v12109_v30 = vpop.f32.mrb[174].mxu1 }
 0x65b   :  { %v12110_v14 = vpop.f32.mrb[175].mxu1 }
 0x65c   :  { %v17678_v21 = vadd.f32 %v12110_v14, %v12109_v30 }
 0x65d   :  { %7644 = vmatmul.mubr.bf16.gmra.mrb[8].mxu1 %v19768_v58 }
 0x65e   :  { %7651 = vmatprep.mubr.bf16.mxu1 %v19771_v8 }
 0x660   :  { %v12128_v44 = vpop.f32.mrb[176].mxu1 }
 0x661   :  { %v12129_v13 = vpop.f32.mrb[177].mxu1 }
 0x662   :  { %v12130_v37 = vadd.f32 %v12129_v13, %v12128_v44  ;;  %v12131_v41 = vpop.f32.mrb[178].mxu1 }
 0x663   :  { %v12132_v28 = vpop.f32.mrb[179].mxu1 }
 0x664   :  { %v6929_v16 = vadd.f32 %v12130_v37, %v17610_v35  ;;  %v12133_v9 = vadd.f32 %v12132_v28, %v12131_v41  ;;  %v13904_v28 = vld [vmem:[%s18656_s3 + $0x500] sm:$0xff]  }
 0x665   :  { %7652 = vmatmul.mubr.bf16.gmra.mrb[12].mxu1 %v19772_v7 }
 0x666   :  { %v17685_v18 = vadd.f32 %v17437_v36, %v6929_v16  ;;  %v6932_v39 = vadd.f32 %v12133_v9, %v17612_v29  ;;  %13261 = vmatprep.mubr.bf16.mxu1 %v19758_v50  ;;  %v13905_v16 = vld [vmem:[%s18656_s3 + $0x548] sm:$0xff]  }
 0x667   :  { %v13906_v29 = vld [vmem:[%s18656_s3 + $0x508] sm:$0xff]  }
 0x668   :  { %v17690_v30 = vadd.f32 %v17441_v20, %v6932_v39  ;;  %v12134_v14 = vpop.f32.mrb[180].mxu1  ;;  %v13908_v39 = vld [vmem:[%s18656_s3 + $0x510] sm:$0xff]  }
 0x669   :  { %v12135_v8 = vpop.f32.mrb[181].mxu1 }
 0x66a   :  { %v12136_v13 = vadd.f32 %v12135_v8, %v12134_v14  ;;  %v12137_v44 = vpop.f32.mrb[182].mxu1 }
 0x66b   :  { %v12138_v35 = vpop.f32.mrb[183].mxu1 }
 0x66c   :  { %v6937_v9 = vadd.f32 %v12136_v13, %v17616_v12  ;;  %v12139_v36 = vadd.f32 %v12138_v35, %v12137_v44  ;;  %v13907_v12 = vld [vmem:[%s18656_s3 + $0x550] sm:$0xff]   ;;  %v13909_v13 = vld [vmem:[%s18656_s3 + $0x558] sm:$0xff]  }
 0x66d   :  { %13262 = vmatmul.mubr.bf16.vlgmr.msra.gmra.mrb[64].mxu1 %v19759_v22 }
 0x66e   :  { %v17701_v50 = vadd.f32 %v17451_v56, %v6937_v9  ;;  %v6940_v20 = vadd.f32 %v12139_v36, %v17621_v55  ;;  %12337 = vmatpush3.bf16.msra.mxu1 %v13904_v28  ;;  %13265 = vmatprep.mubr.bf16.mxu1 %v19760_v57 }
 0x66f   :  { %12338 = vmatprep.subr.bf16.mxu1 %v13905_v16  ;;  %v13910_v16 = vld [vmem:[%s18656_s3 + $0x518] sm:$0xff]  }
 0x670   :  { %v17712_v8 = vadd.f32 %v17455_v52, %v6940_v20  ;;  %v12140_v37 = vpop.f32.mrb[184].mxu1 }
 0x671   :  { %v12141_v56 = vpop.f32.mrb[185].mxu1 }
 0x672   :  { %v12142_v41 = vadd.f32 %v12141_v56, %v12140_v37  ;;  %12339 = vmatpush3.bf16.msra.mxu1 %v13906_v29  ;;  %v12143_v55 = vpop.f32.mrb[186].mxu1  ;;  %v13912_v29 = vld [vmem:[%s18656_s3 + $0x520] sm:$0xff]   ;;  %v13913_v37 = vld [vmem:[%s18656_s3 + $0x568] sm:$0xff]  }
 0x673   :  { %v12144_v14 = vpop.f32.mrb[187].mxu1  ;;  %12340 = vmatprep.subr.bf16.mxu1 %v13907_v12 }
 0x674   :  { %v6945_v44 = vadd.f32 %v12142_v41, %v17628_v15  ;;  %v12145_v28 = vadd.f32 %v12144_v14, %v12143_v55  ;;  %v13911_v15 = vld [vmem:[%s18656_s3 + $0x560] sm:$0xff]  }
 0x675   :  { %13266 = vmatmul.mubr.bf16.gmra.mrb[68].mxu1 %v16942_v1 }
 0x676   :  { %v17723_v52 = vadd.f32 %v17471_v60, %v6945_v44  ;;  %v6948_v35 = vadd.f32 %v12145_v28, %v17633_v26  ;;  %12341 = vmatpush3.bf16.msra.mxu1 %v13908_v39  ;;  %13269 = vmatprep.mubr.bf16.mxu1 %v16936_v25  ;;  %v13914_v39 = vld [vmem:[%s18656_s3 + $0x528] sm:$0xff]   ;;  %v13916_v28 = vld [vmem:[%s18656_s3 + $0x530] sm:$0xff]  }
 0x677   :  { %12342 = vmatprep.subr.bf16.mxu1 %v13909_v13 }
 0x678   :  { %v17734_v9 = vadd.f32 %v17475_v53, %v6948_v35  ;;  %v12146_v36 = vpop.f32.mrb[188].mxu1 }
 0x679   :  { %v12147_v60 = vpop.f32.mrb[189].mxu1 }
 0x67a   :  { %v12148_v20 = vadd.f32 %v12147_v60, %v12146_v36  ;;  %12343 = vmatpush3.bf16.msra.mxu1 %v13910_v16  ;;  %v12149_v26 = vpop.f32.mrb[190].mxu1  ;;  %v13917_v16 = vld [vmem:[%s18656_s3 + $0x578] sm:$0xff]  }
 0x67b   :  { %v12150_v12 = vpop.f32.mrb[191].mxu1  ;;  %12344 = vmatprep.subr.bf16.mxu1 %v13911_v15 }
 0x67c   :  { %v6953_v56 = vadd.f32 %v12148_v20, %v17640_v43  ;;  %v12151_v41 = vadd.f32 %v12150_v12, %v12149_v26  ;;  %v13915_v43 = vld [vmem:[%s18656_s3 + $0x570] sm:$0xff]   ;;  %v13918_v26 = vld [vmem:[%s18656_s3 + $0x538] sm:$0xff]  }
 0x67d   :  { %13270 = vmatmul.mubr.bf16.gmra.mrb[72].mxu1 %v16980_v34 }
 0x67e   :  { %v17745_v53 = vadd.f32 %v17491_v32, %v6953_v56  ;;  %v6956_v55 = vadd.f32 %v12151_v41, %v17645_v47  ;;  %12345 = vmatpush3.bf16.msra.mxu1 %v13912_v29  ;;  %13273 = vmatprep.mubr.bf16.mxu1 %v16978_v23  ;;  %v13921_v41 = vld [vmem:[%s18656_s3 + $0x5c8] sm:$0xff]  }
 0x67f   :  { %12346 = vmatprep.subr.bf16.mxu1 %v13913_v37 }
 0x680   :  { %v17756_v14 = vadd.f32 %v17495_v40, %v6956_v55  ;;  %v12152_v13 = vpop.f32.mrb[192].mxu1  ;;  %v19773_v40 = vld [vmem:[#allocation13_spill] sm:$0xff] }
 0x681   :  { %v12153_v32 = vpop.f32.mrb[193].mxu1 }
 0x682   :  { %v12154_v44 = vadd.f32 %v12153_v32, %v12152_v13  ;;  %12347 = vmatpush3.bf16.msra.mxu1 %v13914_v39  ;;  %v12155_v47 = vpop.f32.mrb[194].mxu1  ;;  %v13922_v13 = vld [vmem:[%s18656_s3 + $0x588] sm:$0xff]  }
 0x683   :  { %v12156_v35 = vpop.f32.mrb[195].mxu1  ;;  %12348 = vmatprep.subr.bf16.mxu1 %v13915_v43 }
 0x684   :  { %v6961_v15 = vadd.f32 %v12154_v44, %v17652_v49  ;;  %v12157_v36 = vadd.f32 %v12156_v35, %v12155_v47  ;;  %v13919_v49 = vld [vmem:[%s18656_s3 + $0x5c0] sm:$0xff]  }
 0x685   :  { %13274 = vmatmul.mubr.bf16.gmra.mrb[76].mxu1 %v19773_v40 }
 0x686   :  { %v17767_v60 = vadd.f32 %v17511_v6, %v6961_v15  ;;  %v6964_v20 = vadd.f32 %v12157_v36, %v17657_v19  ;;  %12349 = vmatpush3.bf16.msra.mxu1 %v13916_v28  ;;  %8167 = vmatprep.mubr.bf16.mxu1 %v16381_v48  ;;  %v13920_v48 = vld [vmem:[%s18656_s3 + $0x580] sm:$0xff]   ;;  %v13927_v28 = vld [vmem:[%s18656_s3 + $0x5d8] sm:$0xff]  }
 0x687   :  { %12350 = vmatprep.subr.bf16.mxu1 %v13917_v16  ;;  %v13928_v36 = vld [vmem:[%s18656_s3 + $0x598] sm:$0xff]  }
 0x688   :  { %v17778_v29 = vadd.f32 %v17515_v45, %v6964_v20  ;;  %v12158_v12 = vpop.f32.mrb[196].mxu1  ;;  %v13945_v20 = vld [vmem:[%s18658_s5 + $0x2e8] sm:$0xff]  }
 0x689   :  { %v12159_v6 = vpop.f32.mrb[197].mxu1  ;;  %12600 = vmatprep.subr.bf16.mxu0 %v13945_v20  ;;  %v19781_v20 = vld [vmem:[#allocation121_spill] sm:$0xff] }
 0x68a   :  { %v12160_v37 = vadd.f32 %v12159_v6, %v12158_v12  ;;  %12351 = vmatpush3.bf16.msra.mxu1 %v13918_v26  ;;  %v12161_v19 = vpop.f32.mrb[198].mxu1  ;;  %v13930_v12 = vld [vmem:[%s18656_s3 + $0x5a0] sm:$0xff]  }
 0x68b   :  { %v12162_v56 = vpop.f32.mrb[199].mxu1  ;;  %12400 = vmatprep.subr.bf16.mxu1 %v13919_v49 }
 0x68c   :  { %v6969_v55 = vadd.f32 %v12160_v37, %v17664_v61  ;;  %v12163_v39 = vadd.f32 %v12162_v56, %v12161_v19  ;;  %v13923_v61 = vld [vmem:[%s18656_s3 + $0x5d0] sm:$0xff]   ;;  %v13931_v37 = vld [vmem:[%s18656_s3 + $0x5e8] sm:$0xff]  }
 0x68d   :  { %8168 = vmatmul.mubr.bf16.vlgmr.msra.gmra.mrb[16].mxu1 %v16208_v62 }
 0x68e   :  { %v17789_v45 = vadd.f32 %v17531_v51, %v6969_v55  ;;  %v6972_v43 = vadd.f32 %v12163_v39, %v17666_v38  ;;  %12401 = vmatpush3.bf16.msra.mxu1 %v13920_v48  ;;  %8175 = vmatprep.mubr.bf16.mxu1 %v16375_v54  ;;  %v13925_v54 = vld [vmem:[%s18656_s3 + $0x590] sm:$0xff]  }
 0x68f   :  { %12402 = vmatprep.subr.bf16.mxu1 %v13921_v41  ;;  %v13932_v41 = vld [vmem:[%s18656_s3 + $0x5a8] sm:$0xff]   ;;  %v19777_v39 = vld [vmem:[#allocation7_spill] sm:$0xff] }
 0x690   :  { %v17800_v32 = vadd.f32 %v17535_v42, %v6972_v43  ;;  %v12164_v62 = vpop.f32.mrb[200].mxu1 }
 0x691   :  { %v12165_v51 = vpop.f32.mrb[201].mxu1 }
 0x692   :  { %v12166_v44 = vadd.f32 %v12165_v51, %v12164_v62  ;;  %v12167_v47 = vpop.f32.mrb[202].mxu1  ;;  %12403 = vmatpush3.bf16.msra.mxu1 %v13922_v13 }
 0x693   :  { %v12168_v38 = vpop.f32.mrb[203].mxu1  ;;  %12404 = vmatprep.subr.bf16.mxu1 %v13923_v61 }
 0x694   :  { %v6977_v35 = vadd.f32 %v12166_v44, %v17670_v10  ;;  %v12169_v16 = vadd.f32 %v12168_v38, %v12167_v47  ;;  %v13929_v10 = vld [vmem:[%s18656_s3 + $0x5e0] sm:$0xff]   ;;  %v19778_v47 = vld [vmem:[#allocation6_spill] sm:$0xff] }
 0x695   :  { %8176 = vmatmul.mubr.bf16.gmra.mrb[20].mxu1 %v16202_v2  ;;  %v13946_v2 = vld [vmem:[%s18658_s5 + $0x2a8] sm:$0xff]  }
 0x696   :  { %v17811_v42 = vadd.f32 %v17551_v5, %v6977_v35  ;;  %v6980_v15 = vadd.f32 %v12169_v16, %v17672_v0  ;;  %8183 = vmatprep.mubr.bf16.mxu1 %v16419_v11  ;;  %12405 = vmatpush3.bf16.msra.mxu1 %v13925_v54  ;;  %v13938_v16 = vld [vmem:[%s18656_s3 + $0x608] sm:$0xff]  }
 0x697   :  { %12406 = vmatprep.subr.bf16.mxu1 %v13927_v28  ;;  %12601 = vmatpush3.bf16.msra.mxu0 %v13946_v2  ;;  %v13939_v2 = vld [vmem:[%s18656_s3 + $0x610] sm:$0xff]  }
 0x698   :  { %v17828_v11 = vadd.f32 %v17555_v24, %v6980_v15  ;;  %v12170_v5 = vpop.f32.mrb[204].mxu1 }
 0x699   :  { %v12171_v0 = vpop.f32.mrb[205].mxu1 }
 0x69a   :  { %v12172_v26 = vadd.f32 %v12171_v0, %v12170_v5  ;;  %v12173_v49 = vpop.f32.mrb[206].mxu1  ;;  %12407 = vmatpush3.bf16.msra.mxu1 %v13928_v36  ;;  %v19780_v36 = vld [vmem:[#allocation116_spill] sm:$0xff] }
 0x69b   :  { %v12174_v6 = vpop.f32.mrb[207].mxu1  ;;  %12408 = vmatprep.subr.bf16.mxu1 %v13929_v10 }
 0x69c   :  { %v6985_v24 = vadd.f32 %v12172_v26, %v17676_v59  ;;  %v12175_v19 = vadd.f32 %v12174_v6, %v12173_v49  ;;  %v13933_v59 = vld [vmem:[%s18656_s3 + $0x5f0] sm:$0xff]  }
 0x69d   :  { %8184 = vmatmul.mubr.bf16.gmra.mrb[24].mxu1 %v16232_v63  ;;  %v13934_v63 = vld [vmem:[%s18656_s3 + $0x5b0] sm:$0xff]  }
 0x69e   :  { %v17839_v48 = vadd.f32 %v17571_v46, %v6985_v24  ;;  %v6988_v56 = vadd.f32 %v12175_v19, %v17678_v21  ;;  %8191 = vmatprep.mubr.bf16.mxu1 %v16413_v4  ;;  %12409 = vmatpush3.bf16.msra.mxu1 %v13930_v12  ;;  %v13935_v4 = vld [vmem:[%s18656_s3 + $0x5f8] sm:$0xff]   ;;  %v19774_v21 = vld [vmem:[#allocation109_spill] sm:$0xff] }
 0x69f   :  { %12410 = vmatprep.subr.bf16.mxu1 %v13931_v37  ;;  %v13936_v46 = vld [vmem:[%s18656_s3 + $0x5b8] sm:$0xff]   ;;  %v13941_v19 = vld [vmem:[%s18656_s3 + $0x620] sm:$0xff]  }
 0x6a0   :  { %v17850_v55 = vadd.f32 %v17575_v31, %v6988_v56  ;;  %v13937_v31 = vld [vmem:[%s18656_s3 + $0x600] sm:$0xff]   ;;  %v13940_v12 = vld [vmem:[%s18656_s3 + $0x618] sm:$0xff]  }
 0x6a1   :  { %v19782_v37 = vld [vmem:[#allocation115_spill] sm:$0xff] }
 0x6a2   :  { %12411 = vmatpush3.bf16.msra.mxu1 %v13932_v41  ;;  %v19783_v24 = vld [vmem:[#allocation123_spill] sm:$0xff] }
 0x6a3   :  { %12412 = vmatprep.subr.bf16.mxu1 %v13933_v59 }
 0x6a5   :  { %8192 = vmatmul.mubr.bf16.gmra.mrb[28].mxu1 %v16226_v33  ;;  %v19775_v33 = vld [vmem:[#allocation114_spill] sm:$0xff] }
 0x6a6   :  { %8199 = vmatprep.mubr.bf16.mxu1 %v19761_v27  ;;  %12413 = vmatpush3.bf16.msra.mxu1 %v13934_v63  ;;  %v19776_v27 = vld [vmem:[#allocation111_spill] sm:$0xff] }
 0x6a7   :  { %12414 = vmatprep.subr.bf16.mxu1 %v13935_v4 }
 0x6aa   :  { %12415 = vmatpush3.bf16.msra.mxu1 %v13936_v46  ;;  %v13942_v46 = vld [vmem:[%s18656_s3 + $0x628] sm:$0xff]  }
 0x6ab   :  { %13277 = vmatprep.subr.bf16.mxu1 %v13937_v31 }
 0x6ad   :  { %8200 = vmatmul.mubr.bf16.gmra.mrb[32].mxu1 %v19762_v17  ;;  %v19779_v17 = vld [vmem:[#allocation122_spill] sm:$0xff] }
 0x6ae   :  { %8207 = vmatprep.mubr.bf16.mxu1 %v19763_v3 }
 0x6b5   :  { %8208 = vmatmul.mubr.bf16.gmra.mrb[36].mxu1 %v19774_v21  ;;  %v19784_v21 = vld [vmem:[#allocation117_spill] sm:$0xff] }
 0x6b6   :  { %8215 = vmatprep.mubr.bf16.mxu1 %v19775_v33  ;;  %v19785_v33 = vld [vmem:[#allocation10_spill] sm:$0xff] }
 0x6bd   :  { %8216 = vmatmul.mubr.bf16.gmra.mrb[40].mxu1 %v19776_v27  ;;  %v13943_v27 = vld [vmem:[%s18656_s3 + $0x630] sm:$0xff]  }
 0x6be   :  { %8223 = vmatprep.mubr.bf16.mxu1 %v19777_v39 }
 0x6c0   :  { %v12208_v43 = vpop.f32.mrb[208].mxu1 }
 0x6c1   :  { %v12209_v13 = vpop.f32.mrb[209].mxu1 }
 0x6c2   :  { %v17872_v61 = vadd.f32 %v12209_v13, %v12208_v43  ;;  %v12211_v62 = vpop.f32.mrb[210].mxu1 }
 0x6c3   :  { %v12212_v51 = vpop.f32.mrb[211].mxu1 }
 0x6c4   :  { %v17874_v44 = vadd.f32 %v12212_v51, %v12211_v62 }
 0x6c5   :  { %8224 = vmatmul.mubr.bf16.gmra.mrb[44].mxu1 %v19778_v47  ;;  %v13944_v47 = vld [vmem:[%s18656_s3 + $0x638] sm:$0xff]  }
 0x6c6   :  { %8264 = vmatprep.mubr.bf16.mxu1 %v19779_v17 }
 0x6c8   :  { %v12214_v3 = vpop.f32.mrb[212].mxu1 }
 0x6c9   :  { %v12215_v54 = vpop.f32.mrb[213].mxu1 }
 0x6ca   :  { %v17878_v38 = vadd.f32 %v12215_v54, %v12214_v3  ;;  %v12217_v28 = vpop.f32.mrb[214].mxu1  ;;  %v19786_v3 = vld [vmem:[#allocation8_spill] sm:$0xff]  ;;  %v19787_v54 = vld [vmem:[#allocation125_spill] sm:$0xff] }
 0x6cb   :  { %v12218_v35 = vpop.f32.mrb[215].mxu1 }
 0x6cc   :  { %v17883_v15 = vadd.f32 %v12218_v35, %v12217_v28 }
 0x6cd   :  { %8265 = vmatmul.mubr.bf16.vlgmr.msra.gmra.mrb[48].mxu1 %v19780_v36 }
 0x6ce   :  { %13278 = vmatpush3.bf16.msra.mxu1 %v13937_v31  ;;  %8272 = vmatprep.mubr.bf16.mxu1 %v19781_v20 }
 0x6cf   :  { %13279 = vmatprep.subr.bf16.mxu1 %v13938_v16 }
 0x6d0   :  { %v12220_v10 = vpop.f32.mrb[216].mxu1 }
 0x6d1   :  { %v12221_v5 = vpop.f32.mrb[217].mxu1 }
 0x6d2   :  { %v17890_v0 = vadd.f32 %v12221_v5, %v12220_v10  ;;  %v12223_v26 = vpop.f32.mrb[218].mxu1  ;;  %13280 = vmatpush3.bf16.msra.mxu1 %v13938_v16  ;;  %v19788_v10 = vld [vmem:[#allocation119_spill] sm:$0xff]  ;;  %v19789_v5 = vld [vmem:[#allocation124_spill] sm:$0xff] }
 0x6d3   :  { %v12224_v49 = vpop.f32.mrb[219].mxu1  ;;  %13281 = vmatprep.subr.bf16.mxu1 %v13939_v2 }
 0x6d4   :  { %v17895_v6 = vadd.f32 %v12224_v49, %v12223_v26 }
 0x6d5   :  { %8273 = vmatmul.mubr.bf16.gmra.mrb[52].mxu1 %v19782_v37 }
 0x6d6   :  { %8280 = vmatprep.mubr.bf16.mxu1 %v19783_v24  ;;  %13282 = vmatpush3.bf16.msra.mxu1 %v13939_v2 }
 0x6d7   :  { %13283 = vmatprep.subr.bf16.mxu1 %v13940_v12 }
 0x6d8   :  { %v12226_v56 = vpop.f32.mrb[220].mxu1 }
 0x6d9   :  { %v12227_v41 = vpop.f32.mrb[221].mxu1 }
 0x6da   :  { %v17902_v59 = vadd.f32 %v12227_v41, %v12226_v56  ;;  %v12229_v63 = vpop.f32.mrb[222].mxu1  ;;  %13284 = vmatpush3.bf16.msra.mxu1 %v13940_v12  ;;  %v19790_v56 = vld [vmem:[#allocation126_spill] sm:$0xff] }
 0x6db   :  { %v12230_v4 = vpop.f32.mrb[223].mxu1  ;;  %13285 = vmatprep.subr.bf16.mxu1 %v13941_v19 }
 0x6dc   :  { %v17907_v31 = vadd.f32 %v12230_v4, %v12229_v63 }
 0x6dd   :  { %8281 = vmatmul.mubr.bf16.gmra.mrb[56].mxu1 %v19784_v21 }
 0x6de   :  { %8288 = vmatprep.mubr.bf16.mxu1 %v19785_v33  ;;  %13286 = vmatpush3.bf16.msra.mxu1 %v13941_v19 }
 0x6df   :  { %13287 = vmatprep.subr.bf16.mxu1 %v13942_v46 }
 0x6e0   :  { %v12232_v39 = vpop.f32.mrb[224].mxu1 }
 0x6e1   :  { %v12233_v43 = vpop.f32.mrb[225].mxu1 }
 0x6e2   :  { %v17914_v13 = vadd.f32 %v12233_v43, %v12232_v39  ;;  %v12235_v62 = vpop.f32.mrb[226].mxu1  ;;  %13288 = vmatpush3.bf16.msra.mxu1 %v13942_v46 }
 0x6e3   :  { %v12236_v51 = vpop.f32.mrb[227].mxu1  ;;  %13289 = vmatprep.subr.bf16.mxu1 %v13943_v27 }
 0x6e4   :  { %v17919_v17 = vadd.f32 %v12236_v51, %v12235_v62 }
 0x6e5   :  { %8289 = vmatmul.mubr.bf16.gmra.mrb[60].mxu1 %v19786_v3 }
 0x6e6   :  { %8296 = vmatprep.mubr.bf16.mxu1 %v19787_v54  ;;  %13290 = vmatpush3.bf16.msra.mxu1 %v13943_v27  ;;  %v19791_v27 = vld [vmem:[#allocation11_spill] sm:$0xff]  ;;  %v19792_v54 = vld [vmem:[#allocation9_spill] sm:$0xff] }
 0x6e7   :  { %13291 = vmatprep.subr.bf16.mxu1 %v13944_v47 }
 0x6e8   :  { %v12238_v28 = vpop.f32.mrb[228].mxu1 }
 0x6e9   :  { %v12239_v35 = vpop.f32.mrb[229].mxu1 }
 0x6ea   :  { %v17923_v16 = vadd.f32 %v12239_v35, %v12238_v28  ;;  %v12241_v36 = vpop.f32.mrb[230].mxu1  ;;  %13292 = vmatpush3.bf16.msra.mxu1 %v13944_v47 }
 0x6eb   :  { %v12242_v20 = vpop.f32.mrb[231].mxu1 }
 0x6ec   :  { %v17925_v2 = vadd.f32 %v12242_v20, %v12241_v36 }
 0x6ed   :  { %8297 = vmatmul.mubr.bf16.gmra.mrb[80].mxu1 %v19788_v10 }
 0x6ee   :  { %8304 = vmatprep.mubr.bf16.mxu1 %v19789_v5 }
 0x6f0   :  { %v12244_v26 = vpop.f32.mrb[232].mxu1 }
 0x6f1   :  { %v12245_v49 = vpop.f32.mrb[233].mxu1 }
 0x6f2   :  { %v17929_v12 = vadd.f32 %v12245_v49, %v12244_v26  ;;  %v12247_v37 = vpop.f32.mrb[234].mxu1 }
 0x6f3   :  { %v12248_v24 = vpop.f32.mrb[235].mxu1 }
 0x6f4   :  { %v17931_v19 = vadd.f32 %v12248_v24, %v12247_v37 }
 0x6f5   :  { %8305 = vmatmul.mubr.bf16.gmra.mrb[84].mxu1 %v19768_v58 }
 0x6f6   :  { %8312 = vmatprep.mubr.bf16.mxu1 %v19790_v56 }
 0x6f8   :  { %v12250_v41 = vpop.f32.mrb[236].mxu1 }
 0x6f9   :  { %v12251_v63 = vpop.f32.mrb[237].mxu1 }
 0x6fa   :  { %v17935_v4 = vadd.f32 %v12251_v63, %v12250_v41  ;;  %v12253_v46 = vpop.f32.mrb[238].mxu1 }
 0x6fb   :  { %v12254_v21 = vpop.f32.mrb[239].mxu1 }
 0x6fc   :  { %v17937_v33 = vadd.f32 %v12254_v21, %v12253_v46 }
 0x6fd   :  { %8313 = vmatmul.mubr.bf16.gmra.mrb[88].mxu1 %v19772_v7 }
 0x6fe   :  { %8320 = vmatprep.mubr.bf16.mxu1 %v19791_v27 }
 0x700   :  { %v12272_v39 = vpop.f32.mrb[240].mxu1 }
 0x701   :  { %v12273_v43 = vpop.f32.mrb[241].mxu1 }
 0x702   :  { %v12274_v62 = vadd.f32 %v12273_v43, %v12272_v39  ;;  %v12275_v51 = vpop.f32.mrb[242].mxu1 }
 0x703   :  { %v12276_v47 = vpop.f32.mrb[243].mxu1 }
 0x704   :  { %v7598_v58 = vadd.f32 %v12274_v62, %v17872_v61  ;;  %v12277_v3 = vadd.f32 %v12276_v47, %v12275_v51 }
 0x705   :  { %8321 = vmatmul.mubr.bf16.gmra.mrb[92].mxu1 %v19792_v54  ;;  %v19793_v54 = vld [vmem:[#allocation225_spill] sm:$0xff] }
 0x706   :  { %v7601_v28 = vadd.f32 %v12277_v3, %v17874_v44  ;;  %13293 = vmatprep.mubr.bf16.mxu1 %v19759_v22  ;;  %v17946_v35 = vadd.f32 %v17685_v18, %v7598_v58  ;;  %v13947_v44 = vld [vmem:[%s18658_s5 + $0x2f0] sm:$0xff]  }
 0x707   :  { %v13948_v22 = vld [vmem:[%s18658_s5 + $0x2b0] sm:$0xff]   ;;  %12602 = vmatprep.subr.bf16.mxu0 %v13947_v44 }
 0x708   :  { %v12278_v7 = vpop.f32.mrb[244].mxu1  ;;  %v17949_v36 = vadd.f32 %v17690_v30, %v7601_v28  ;;  %12603 = vmatpush3.bf16.msra.mxu0 %v13948_v22 }
 0x709   :  { %v12279_v20 = vpop.f32.mrb[245].mxu1 }
 0x70a   :  { %v12280_v10 = vadd.f32 %v12279_v20, %v12278_v7  ;;  %v12281_v5 = vpop.f32.mrb[246].mxu1 }
 0x70b   :  { %v12282_v26 = vpop.f32.mrb[247].mxu1 }
 0x70c   :  { %v7606_v61 = vadd.f32 %v12280_v10, %v17878_v38  ;;  %v12283_v49 = vadd.f32 %v12282_v26, %v12281_v5 }
 0x70d   :  { %13294 = vmatmul.mubr.bf16.vlgmr.msra.gmra.mrb[64].mxu1 %v19760_v57 }
 0x70e   :  { %v7609_v18 = vadd.f32 %v12283_v49, %v17883_v15  ;;  %13297 = vmatprep.mubr.bf16.mxu1 %v16942_v1  ;;  %v17962_v30 = vadd.f32 %v17701_v50, %v7606_v61 }
 0x710   :  { %v12284_v38 = vpop.f32.mrb[248].mxu1  ;;  %v17965_v37 = vadd.f32 %v17712_v8, %v7609_v18 }
 0x711   :  { %v12285_v24 = vpop.f32.mrb[249].mxu1 }
 0x712   :  { %v12286_v56 = vadd.f32 %v12285_v24, %v12284_v38  ;;  %v12287_v41 = vpop.f32.mrb[250].mxu1 }
 0x713   :  { %v12288_v63 = vpop.f32.mrb[251].mxu1 }
 0x714   :  { %v7614_v46 = vadd.f32 %v12286_v56, %v17890_v0  ;;  %v12289_v57 = vadd.f32 %v12288_v63, %v12287_v41 }
 0x715   :  { %13298 = vmatmul.mubr.bf16.gmra.mrb[68].mxu1 %v16936_v25 }
 0x716   :  { %v7617_v1 = vadd.f32 %v12289_v57, %v17895_v6  ;;  %13301 = vmatprep.mubr.bf16.mxu1 %v16980_v34  ;;  %v17972_v50 = vadd.f32 %v17723_v52, %v7614_v46 }
 0x718   :  { %v12290_v15 = vpop.f32.mrb[252].mxu1  ;;  %v17975_v8 = vadd.f32 %v17734_v9, %v7617_v1 }
 0x719   :  { %v12291_v21 = vpop.f32.mrb[253].mxu1 }
 0x71a   :  { %v12292_v27 = vadd.f32 %v12291_v21, %v12290_v15  ;;  %v12293_v39 = vpop.f32.mrb[254].mxu1 }
 0x71b   :  { %v12294_v43 = vpop.f32.mrb[255].mxu1 }
 0x71c   :  { %v7622_v0 = vadd.f32 %v12292_v27, %v17902_v59  ;;  %v12295_v62 = vadd.f32 %v12294_v43, %v12293_v39  ;;  %v13954_v27 = vld [vmem:[%s18658_s5 + $0x10] sm:$0xff]  }
 0x71d   :  { %13302 = vmatmul.mubr.bf16.gmra.mrb[72].mxu1 %v16978_v23 }
 0x71e   :  { %v7625_v25 = vadd.f32 %v12295_v62, %v17907_v31  ;;  %13305 = vmatprep.mubr.bf16.mxu1 %v19773_v40  ;;  %v17982_v34 = vadd.f32 %v17745_v53, %v7622_v0  ;;  %v13955_v0 = vld [vmem:[%s18658_s5 + $0x58] sm:$0xff]  }
 0x71f   :  { %v13956_v62 = vld [vmem:[%s18658_s5 + $0x18] sm:$0xff]  }
 0x720   :  { %v12296_v52 = vpop.f32.mrb[0].mxu1  ;;  %v17985_v9 = vadd.f32 %v17756_v14, %v7625_v25 }
 0x721   :  { %v12297_v6 = vpop.f32.mrb[1].mxu1 }
 0x722   :  { %v12298_v51 = vadd.f32 %v12297_v6, %v12296_v52  ;;  %v12299_v47 = vpop.f32.mrb[2].mxu1 }
 0x723   :  { %v12300_v58 = vpop.f32.mrb[3].mxu1 }
 0x724   :  { %v7630_v59 = vadd.f32 %v12298_v51, %v17914_v13  ;;  %v12301_v3 = vadd.f32 %v12300_v58, %v12299_v47 }
 0x725   :  { %13306 = vmatmul.mubr.bf16.gmra.mrb[76].mxu1 %v19793_v54  ;;  %v13958_v54 = vld [vmem:[%s18658_s5 + $0x20] sm:$0xff]  }
 0x726   :  { %v7633_v23 = vadd.f32 %v12301_v3, %v17919_v17  ;;  %v17991_v40 = vadd.f32 %v17767_v60, %v7630_v59  ;;  %v13957_v59 = vld [vmem:[%s18658_s5 + $0x60] sm:$0xff]  }
 0x728   :  { %v12302_v53 = vpop.f32.mrb[4].mxu1  ;;  %v17994_v31 = vadd.f32 %v17778_v29, %v7633_v23 }
 0x729   :  { %v12303_v14 = vpop.f32.mrb[5].mxu1 }
 0x72a   :  { %v12304_v28 = vadd.f32 %v12303_v14, %v12302_v53  ;;  %v12305_v7 = vpop.f32.mrb[6].mxu1 }
 0x72b   :  { %v12306_v20 = vpop.f32.mrb[7].mxu1 }
 0x72c   :  { %v7638_v10 = vadd.f32 %v12304_v28, %v17923_v16  ;;  %v12307_v5 = vadd.f32 %v12306_v20, %v12305_v7  ;;  %v13959_v7 = vld [vmem:[%s18658_s5 + $0x68] sm:$0xff]  }
 0x72e   :  { %v7641_v13 = vadd.f32 %v12307_v5, %v17925_v2  ;;  %v17999_v26 = vadd.f32 %v17789_v45, %v7638_v10  ;;  %v13960_v10 = vld [vmem:[%s18658_s5 + $0x28] sm:$0xff]   ;;  %v13961_v5 = vld [vmem:[%s18658_s5 + $0x70] sm:$0xff]  }
 0x730   :  { %v12308_v17 = vpop.f32.mrb[8].mxu1  ;;  %v18002_v60 = vadd.f32 %v17800_v32, %v7641_v13 }
 0x731   :  { %v12309_v61 = vpop.f32.mrb[9].mxu1 }
 0x732   :  { %v12310_v49 = vadd.f32 %v12309_v61, %v12308_v17  ;;  %v12311_v29 = vpop.f32.mrb[10].mxu1  ;;  %v13962_v17 = vld [vmem:[%s18658_s5 + $0x30] sm:$0xff]  }
 0x733   :  { %v12312_v44 = vpop.f32.mrb[11].mxu1 }
 0x734   :  { %v7646_v22 = vadd.f32 %v12310_v49, %v17929_v12  ;;  %v12313_v18 = vadd.f32 %v12312_v44, %v12311_v29 }
 0x736   :  { %v7649_v38 = vadd.f32 %v12313_v18, %v17931_v19  ;;  %v18007_v16 = vadd.f32 %v17811_v42, %v7646_v22  ;;  %v13949_v42 = vld [vmem:[%s18658_s5 + $0x40] sm:$0xff]   ;;  %v13963_v22 = vld [vmem:[%s18658_s5 + $0x78] sm:$0xff]  }
 0x737   :  { %12480 = vmatprep.subr.bf16.mxu1 %v13949_v42 }
 0x738   :  { %v12314_v2 = vpop.f32.mrb[12].mxu1  ;;  %v18010_v45 = vadd.f32 %v17828_v11, %v7649_v38  ;;  %v13950_v11 = vld [vmem:[%s18658_s5] sm:$0xff]   ;;  %v13964_v38 = vld [vmem:[%s18658_s5 + $0x38] sm:$0xff]  }
 0x739   :  { %v12315_v24 = vpop.f32.mrb[13].mxu1  ;;  %12481 = vmatpush3.bf16.msra.mxu1 %v13950_v11 }
 0x73a   :  { %v12316_v56 = vadd.f32 %v12315_v24, %v12314_v2  ;;  %v12317_v32 = vpop.f32.mrb[14].mxu1 }
 0x73b   :  { %v12318_v41 = vpop.f32.mrb[15].mxu1 }
 0x73c   :  { %v7654_v63 = vadd.f32 %v12316_v56, %v17935_v4  ;;  %v12319_v46 = vadd.f32 %v12318_v41, %v12317_v32  ;;  %v13951_v4 = vld [vmem:[%s18658_s5 + $0x48] sm:$0xff]  }
 0x73d   :  { %12482 = vmatprep.subr.bf16.mxu1 %v13951_v4 }
 0x73e   :  { %v7657_v57 = vadd.f32 %v12319_v46, %v17937_v33  ;;  %v18015_v12 = vadd.f32 %v17839_v48, %v7654_v63  ;;  %v13952_v48 = vld [vmem:[%s18658_s5 + $0x8] sm:$0xff]   ;;  %v13953_v33 = vld [vmem:[%s18658_s5 + $0x50] sm:$0xff]  }
 0x73f   :  { %12483 = vmatpush3.bf16.msra.mxu1 %v13952_v48  ;;  %v13965_v48 = vld [vmem:[%s18658_s5 + $0xc0] sm:$0xff]  }
 0x740   :  { %v18018_v19 = vadd.f32 %v17850_v55, %v7657_v57  ;;  %12484 = vmatprep.subr.bf16.mxu1 %v13953_v33 }
 0x743   :  { %12485 = vmatpush3.bf16.msra.mxu1 %v13954_v27 }
 0x744   :  { %12486 = vmatprep.subr.bf16.mxu1 %v13955_v0 }
 0x747   :  { %12487 = vmatpush3.bf16.msra.mxu1 %v13956_v62  ;;  %v13971_v62 = vld [vmem:[%s18658_s5 + $0x2f8] sm:$0xff]  }
 0x748   :  { %12488 = vmatprep.subr.bf16.mxu1 %v13957_v59  ;;  %12604 = vmatprep.subr.bf16.mxu0 %v13971_v62 }
 0x74b   :  { %12489 = vmatpush3.bf16.msra.mxu1 %v13958_v54 }
 0x74c   :  { %12490 = vmatprep.subr.bf16.mxu1 %v13959_v7 }
 0x74f   :  { %12491 = vmatpush3.bf16.msra.mxu1 %v13960_v10 }
 0x750   :  { %12492 = vmatprep.subr.bf16.mxu1 %v13961_v5 }
 0x753   :  { %12493 = vmatpush3.bf16.msra.mxu1 %v13962_v17 }
 0x754   :  { %12494 = vmatprep.subr.bf16.mxu1 %v13963_v22 }
 0x757   :  { %12495 = vmatpush3.bf16.msra.mxu1 %v13964_v38 }
 0x758   :  { %12502 = vmatprep.subr.bf16.mxu1 %v13965_v48 }
 0x760   :  { %v12352_v55 = vpop.f32.mrb[16].mxu1 }
 0x761   :  { %v12353_v1 = vpop.f32.mrb[17].mxu1 }
 0x762   :  { %v18035_v15 = vadd.f32 %v12353_v1, %v12352_v55  ;;  %v12355_v21 = vpop.f32.mrb[18].mxu1 }
 0x763   :  { %v12356_v39 = vpop.f32.mrb[19].mxu1 }
 0x764   :  { %v18040_v43 = vadd.f32 %v12356_v39, %v12355_v21 }
 0x768   :  { %v12358_v25 = vpop.f32.mrb[20].mxu1 }
 0x769   :  { %v12359_v52 = vpop.f32.mrb[21].mxu1 }
 0x76a   :  { %v18048_v6 = vadd.f32 %v12359_v52, %v12358_v25  ;;  %v12361_v51 = vpop.f32.mrb[22].mxu1  ;;  %v13972_v25 = vld [vmem:[%s18658_s5 + $0x2b8] sm:$0xff]  }
 0x76b   :  { %v12362_v47 = vpop.f32.mrb[23].mxu1  ;;  %12605 = vmatpush3.bf16.msra.mxu0 %v13972_v25 }
 0x76c   :  { %v18050_v58 = vadd.f32 %v12362_v47, %v12361_v51 }
 0x770   :  { %v12364_v3 = vpop.f32.mrb[24].mxu1 }
 0x771   :  { %v12365_v23 = vpop.f32.mrb[25].mxu1 }
 0x772   :  { %v18058_v53 = vadd.f32 %v12365_v23, %v12364_v3  ;;  %v12367_v14 = vpop.f32.mrb[26].mxu1  ;;  %v13977_v23 = vld [vmem:[%s18658_s5 + $0x3c0] sm:$0xff]  }
 0x773   :  { %v12368_v28 = vpop.f32.mrb[27].mxu1  ;;  %12634 = vmatprep.subr.bf16.mxu0 %v13977_v23 }
 0x774   :  { %v18063_v20 = vadd.f32 %v12368_v28, %v12367_v14 }
 0x778   :  { %v12370_v13 = vpop.f32.mrb[28].mxu1 }
 0x779   :  { %v12371_v61 = vpop.f32.mrb[29].mxu1 }
 0x77a   :  { %v18074_v49 = vadd.f32 %v12371_v61, %v12370_v13  ;;  %v12373_v29 = vpop.f32.mrb[30].mxu1 }
 0x77b   :  { %v12374_v44 = vpop.f32.mrb[31].mxu1 }
 0x77c   :  { %v18079_v18 = vadd.f32 %v12374_v44, %v12373_v29 }
 0x780   :  { %v12376_v2 = vpop.f32.mrb[32].mxu1 }
 0x781   :  { %v12377_v24 = vpop.f32.mrb[33].mxu1 }
 0x782   :  { %v18084_v56 = vadd.f32 %v12377_v24, %v12376_v2  ;;  %v12379_v32 = vpop.f32.mrb[34].mxu1 }
 0x783   :  { %v12380_v41 = vpop.f32.mrb[35].mxu1 }
 0x784   :  { %v18086_v63 = vadd.f32 %v12380_v41, %v12379_v32 }
 0x788   :  { %v12382_v46 = vpop.f32.mrb[36].mxu1 }
 0x789   :  { %v12383_v57 = vpop.f32.mrb[37].mxu1 }
 0x78a   :  { %v18088_v42 = vadd.f32 %v12383_v57, %v12382_v46  ;;  %v12385_v11 = vpop.f32.mrb[38].mxu1 }
 0x78b   :  { %v12386_v4 = vpop.f32.mrb[39].mxu1 }
 0x78c   :  { %v18093_v55 = vadd.f32 %v12386_v4, %v12385_v11 }
 0x790   :  { %v12388_v33 = vpop.f32.mrb[40].mxu1 }
 0x791   :  { %v12389_v1 = vpop.f32.mrb[41].mxu1 }
 0x792   :  { %v18095_v21 = vadd.f32 %v12389_v1, %v12388_v33  ;;  %v12391_v27 = vpop.f32.mrb[42].mxu1 }
 0x793   :  { %v12392_v39 = vpop.f32.mrb[43].mxu1 }
 0x794   :  { %v18097_v0 = vadd.f32 %v12392_v39, %v12391_v27 }
 0x798   :  { %v12394_v52 = vpop.f32.mrb[44].mxu1 }
 0x799   :  { %v12395_v51 = vpop.f32.mrb[45].mxu1 }
 0x79a   :  { %v18105_v47 = vadd.f32 %v12395_v51, %v12394_v52  ;;  %v12397_v59 = vpop.f32.mrb[46].mxu1 }
 0x79b   :  { %v12398_v3 = vpop.f32.mrb[47].mxu1 }
 0x79c   :  { %v18107_v54 = vadd.f32 %v12398_v3, %v12397_v59 }
 0x7a0   :  { %v12416_v14 = vpop.f32.mrb[48].mxu1 }
 0x7a1   :  { %v12417_v28 = vpop.f32.mrb[49].mxu1 }
 0x7a2   :  { %v12418_v7 = vadd.f32 %v12417_v28, %v12416_v14  ;;  %v12419_v10 = vpop.f32.mrb[50].mxu1 }
 0x7a3   :  { %v12420_v5 = vpop.f32.mrb[51].mxu1 }
 0x7a4   :  { %v8267_v13 = vadd.f32 %v12418_v7, %v18035_v15  ;;  %v12421_v17 = vadd.f32 %v12420_v5, %v12419_v10 }
 0x7a6   :  { %v8270_v61 = vadd.f32 %v12421_v17, %v18040_v43  ;;  %v18115_v29 = vadd.f32 %v17946_v35, %v8267_v13 }
 0x7a8   :  { %v12422_v44 = vpop.f32.mrb[52].mxu1  ;;  %v18118_v22 = vadd.f32 %v17949_v36, %v8270_v61 }
 0x7a9   :  { %v12423_v38 = vpop.f32.mrb[53].mxu1 }
 0x7aa   :  { %v12424_v2 = vadd.f32 %v12423_v38, %v12422_v44  ;;  %v12425_v24 = vpop.f32.mrb[54].mxu1 }
 0x7ab   :  { %v12426_v32 = vpop.f32.mrb[55].mxu1 }
 0x7ac   :  { %v8275_v41 = vadd.f32 %v12424_v2, %v18048_v6  ;;  %v12427_v46 = vadd.f32 %v12426_v32, %v12425_v24 }
 0x7ae   :  { %v8278_v57 = vadd.f32 %v12427_v46, %v18050_v58  ;;  %v18123_v15 = vadd.f32 %v17962_v30, %v8275_v41 }
 0x7b0   :  { %v12428_v43 = vpop.f32.mrb[56].mxu1  ;;  %v18126_v35 = vadd.f32 %v17965_v37, %v8278_v57 }
 0x7b1   :  { %v12429_v11 = vpop.f32.mrb[57].mxu1 }
 0x7b2   :  { %v12430_v4 = vadd.f32 %v12429_v11, %v12428_v43  ;;  %v12431_v36 = vpop.f32.mrb[58].mxu1  ;;  %v14096_v11 = vmov 1983009808  }
 0x7b3   :  { %v12432_v48 = vpop.f32.mrb[59].mxu1 }
 0x7b4   :  { %v8283_v33 = vadd.f32 %v12430_v4, %v18058_v53  ;;  %v12433_v1 = vadd.f32 %v12432_v48, %v12431_v36  ;;  %v8485_v4 = vlaneseq }
 0x7b6   :  { %v8286_v27 = vadd.f32 %v12433_v1, %v18063_v20  ;;  %v18131_v6 = vadd.f32 %v17972_v50, %v8283_v33 }
 0x7b8   :  { %v12434_v58 = vpop.f32.mrb[60].mxu1  ;;  %v18134_v30 = vadd.f32 %v17975_v8, %v8286_v27 }
 0x7b9   :  { %v12435_v39 = vpop.f32.mrb[61].mxu1 }
 0x7ba   :  { %v12436_v62 = vadd.f32 %v12435_v39, %v12434_v58  ;;  %v12437_v37 = vpop.f32.mrb[62].mxu1  ;;  %v8486_v58 = vshrl.u32 %v8485_v4, 7 }
 0x7bb   :  { %v12438_v25 = vpop.f32.mrb[63].mxu1 }
 0x7bc   :  { %v8291_v52 = vadd.f32 %v12436_v62, %v18074_v49  ;;  %v12439_v51 = vadd.f32 %v12438_v25, %v12437_v37 }
 0x7be   :  { %v8294_v59 = vadd.f32 %v12439_v51, %v18079_v18  ;;  %v18139_v53 = vadd.f32 %v17982_v34, %v8291_v52 }
 0x7c0   :  { %v12440_v20 = vpop.f32.mrb[80].mxu1  ;;  %v18142_v50 = vadd.f32 %v17985_v9, %v8294_v59 }
 0x7c1   :  { %v12441_v3 = vpop.f32.mrb[81].mxu1 }
 0x7c2   :  { %v12442_v23 = vadd.f32 %v12441_v3, %v12440_v20  ;;  %v12443_v8 = vpop.f32.mrb[82].mxu1 }
 0x7c3   :  { %v12444_v14 = vpop.f32.mrb[83].mxu1 }
 0x7c4   :  { %v8299_v28 = vadd.f32 %v12442_v23, %v18084_v56  ;;  %v12445_v7 = vadd.f32 %v12444_v14, %v12443_v8 }
 0x7c6   :  { %v8302_v10 = vadd.f32 %v12445_v7, %v18086_v63  ;;  %v18147_v49 = vadd.f32 %v17991_v40, %v8299_v28 }
 0x7c8   :  { %v12446_v18 = vpop.f32.mrb[84].mxu1  ;;  %v18150_v34 = vadd.f32 %v17994_v31, %v8302_v10 }
 0x7c9   :  { %v12447_v5 = vpop.f32.mrb[85].mxu1 }
 0x7ca   :  { %v12448_v13 = vadd.f32 %v12447_v5, %v12446_v18  ;;  %v12449_v9 = vpop.f32.mrb[86].mxu1 }
 0x7cb   :  { %v12450_v17 = vpop.f32.mrb[87].mxu1 }
 0x7cc   :  { %v8307_v61 = vadd.f32 %v12448_v13, %v18088_v42  ;;  %v12451_v44 = vadd.f32 %v12450_v17, %v12449_v9 }
 0x7ce   :  { %v8310_v38 = vadd.f32 %v12451_v44, %v18093_v55  ;;  %v18155_v56 = vadd.f32 %v17999_v26, %v8307_v61 }
 0x7d0   :  { %v12452_v63 = vpop.f32.mrb[88].mxu1  ;;  %v18158_v40 = vadd.f32 %v18002_v60, %v8310_v38  ;;  %v8483_v60 = vunpack.c.l.s4 %v14096_v11 }
 0x7d1   :  { %v12453_v2 = vpop.f32.mrb[89].mxu1 }
 0x7d2   :  { %v12454_v24 = vadd.f32 %v12453_v2, %v12452_v63  ;;  %v12455_v31 = vpop.f32.mrb[90].mxu1  ;;  %v8484_v27 = vunpack.c.0.s8 %v8483_v60 }
 0x7d3   :  { %v12456_v32 = vpop.f32.mrb[91].mxu1 }
 0x7d4   :  { %v8315_v41 = vadd.f32 %v12454_v24, %v18095_v21  ;;  %v12457_v46 = vadd.f32 %v12456_v32, %v12455_v31 }
 0x7d6   :  { %v8318_v57 = vadd.f32 %v12457_v46, %v18097_v0  ;;  %v18163_v42 = vadd.f32 %v18007_v16, %v8315_v41 }
 0x7d8   :  { %v12458_v55 = vpop.f32.mrb[92].mxu1  ;;  %v18166_v26 = vadd.f32 %v18010_v45, %v8318_v57  ;;  %v18176_v45 = vld [vmem:[%s18657_s4] ss:$0 sm:$0xff] }
 0x7d9   :  { %v12459_v43 = vpop.f32.mrb[93].mxu1 }
 0x7da   :  { %v12460_v36 = vadd.f32 %v12459_v43, %v12458_v55  ;;  %v12461_v48 = vpop.f32.mrb[94].mxu1 }
 0x7db   :  { %v12462_v33 = vpop.f32.mrb[95].mxu1 }
 0x7dc   :  { %v8323_v1 = vadd.f32 %v12460_v36, %v18105_v47  ;;  %v12463_v21 = vadd.f32 %v12462_v33, %v12461_v48  ;;  %v18182_v47 = vsub.s32 %v8484_v27, %v8486_v58 }
 0x7de   :  { %v8326_v0 = vadd.f32 %v12463_v21, %v18107_v54  ;;  %v18171_v16 = vadd.f32 %v18015_v12, %v8323_v1 }
 0x7e0   :  { %v13295_v39 = vpop.f32.mrb[64].mxu1  ;;  %v18179_v62 = vadd.f32 %v18018_v19, %v8326_v0 }
 0x7e1   :  { %v13334_v37 = vadd.f32 %v18123_v15, %v13295_v39  ;;  %v8363_v25 = vpop.f32.mrb[65].mxu1 }
 0x7e2   :  { %v13340_v52 = vadd.f32 %v18115_v29, %v8363_v25  ;;  %v13296_v54 = vpop.f32.mrb[66].mxu1 }
 0x7e3   :  { %v8451_v12 = vadd.f32 %v13334_v37, %v18176_v45  ;;  %v13346_v51 = vadd.f32 %v18126_v35, %v13296_v54  ;;  %v8366_v59 = vpop.f32.mrb[67].mxu1 }
 0x7e4   :  { %v8449_v20 = vadd.f32 %v13340_v52, %v18176_v45  ;;  %v13352_v3 = vadd.f32 %v18118_v22, %v8366_v59 }
 0x7e5   :  { %v8515_v23 = vcombine.high %v8451_v12, %v8451_v12  ;;  %v8522_v19 = vrot.slane %v8451_v12, %v18182_v47  ;;  %v8452_v15 = vadd.f32 %v13346_v51, %v18176_v45 }
 0x7e6   :  { %v8481_v8 = vcombine.high %v8449_v20, %v8449_v20  ;;  %v8488_v14 = vrot.slane %v8449_v20, %v18182_v47  ;;  %v8450_v29 = vadd.f32 %v13352_v3, %v18176_v45 }
 0x7e7   :  { %v8529_v28 = vrot.slane %v8515_v23, %v18182_v47  ;;  %v8530_v7 = vcombine.high %v8522_v19, %v8522_v19  ;;  %v8532_v10 = vcombine.high %v8452_v15, %v8452_v15  ;;  %v8539_v35 = vrot.slane %v8452_v15, %v18182_v47 }
 0x7e8   :  { %v8495_v18 = vrot.slane %v8481_v8, %v18182_v47  ;;  %v8496_v5 = vcombine.high %v8488_v14, %v8488_v14  ;;  %v8817_v22 = vmax.f32 %v8488_v14, %v8522_v19  ;;  %v8498_v13 = vcombine.high %v8450_v29, %v8450_v29  ;;  %v13299_v9 = vpop.f32.mrb[68].mxu1 }
 0x7e9   :  { %v8531_v17 = vcombine.high %v8529_v28, %v8529_v28  ;;  %v8546_v61 = vrot.slane %v8532_v10, %v18182_v47  ;;  %v8547_v44 = vcombine.high %v8539_v35, %v8539_v35  ;;  %v8505_v38 = vrot.slane %v8450_v29, %v18182_v47  ;;  %v8379_v63 = vpop.f32.mrb[69].mxu1 }
 0x7ea   :  { %v8497_v2 = vcombine.high %v8495_v18, %v8495_v18  ;;  %v8818_v24 = vmax.f32 %v8496_v5, %v8530_v7  ;;  %v8819_v31 = vmax.f32 %v8495_v18, %v8529_v28  ;;  %v8512_v32 = vrot.slane %v8498_v13, %v18182_v47  ;;  %v13300_v41 = vpop.f32.mrb[70].mxu1 }
 0x7eb   :  { %v8548_v46 = vcombine.high %v8546_v61, %v8546_v61  ;;  %v8513_v57 = vcombine.high %v8505_v38, %v8505_v38  ;;  %v8821_v55 = vmax.f32 %v8505_v38, %v8539_v35  ;;  %v13358_v43 = vadd.f32 %v18139_v53, %v13299_v9  ;;  %v8382_v11 = vpop.f32.mrb[71].mxu1 }
 0x7ec   :  { %v8820_v60 = vmax.f32 %v8497_v2, %v8531_v17  ;;  %v18200_v4 = vmax.f32 %v8817_v22, %v8818_v24  ;;  %v8514_v36 = vcombine.high %v8512_v32, %v8512_v32  ;;  %v8823_v48 = vmax.f32 %v8512_v32, %v8546_v61 }
 0x7ed   :  { %v8822_v33 = vmax.f32 %v8513_v57, %v8547_v44  ;;  %v8455_v1 = vadd.f32 %v13358_v43, %v18176_v45  ;;  %v13364_v21 = vadd.f32 %v18131_v6, %v8379_v63  ;;  %v13370_v27 = vadd.f32 %v18142_v50, %v13300_v41 }
 0x7ee   :  { %v18205_v58 = vmax.f32 %v8819_v31, %v8820_v60  ;;  %v8824_v0 = vmax.f32 %v8514_v36, %v8548_v46  ;;  %v13376_v39 = vadd.f32 %v18134_v30, %v8382_v11  ;;  %v8865_v57 = vmax.f32 %v18200_v4, 0.0 }
 0x7ef   :  { %v18208_v37 = vmax.f32 %v8821_v55, %v8822_v33  ;;  %v8583_v53 = vcombine.high %v8455_v1, %v8455_v1  ;;  %v18211_v25 = vrot.slane %v8455_v1, %v18182_v47  ;;  %v8453_v52 = vadd.f32 %v13364_v21, %v18176_v45 }
 0x7f0   :  { %v18214_v54 = vmax.f32 %v8823_v48, %v8824_v0  ;;  %v8456_v12 = vadd.f32 %v13370_v27, %v18176_v45  ;;  %v13303_v6 = vpop.f32.mrb[72].mxu1  ;;  %v8454_v7 = vadd.f32 %v13376_v39, %v18176_v45 }
 0x7f1   :  { %v8549_v51 = vcombine.high %v8453_v52, %v8453_v52  ;;  %v8395_v50 = vpop.f32.mrb[73].mxu1  ;;  %v18218_v59 = vrot.slane %v8453_v52, %v18182_v47  ;;  %v18221_v3 = vrot.slane %v8583_v53, %v18182_v47  ;;  %v8598_v23 = vcombine.high %v18211_v25, %v18211_v25 }
 0x7f2   :  { %v8600_v20 = vcombine.high %v8456_v12, %v8456_v12  ;;  %v13304_v30 = vpop.f32.mrb[74].mxu1  ;;  %v18226_v19 = vrot.slane %v8456_v12, %v18182_v47  ;;  %v13382_v10 = vadd.f32 %v18155_v56, %v13303_v6  ;;  %v13388_v35 = vadd.f32 %v18147_v49, %v8395_v50 }
 0x7f3   :  { %v8398_v15 = vpop.f32.mrb[75].mxu1  ;;  %v18229_v8 = vrot.slane %v8549_v51, %v18182_v47  ;;  %v8564_v14 = vcombine.high %v18218_v59, %v18218_v59  ;;  %v8825_v29 = vmax.f32 %v18218_v59, %v18211_v25  ;;  %v13394_v18 = vadd.f32 %v18158_v40, %v13304_v30 }
 0x7f4   :  { %v18236_v28 = vrot.slane %v8600_v20, %v18182_v47  ;;  %v13400_v5 = vadd.f32 %v18150_v34, %v8398_v15  ;;  %v8566_v22 = vcombine.high %v8454_v7, %v8454_v7  ;;  %v18244_v13 = vrot.slane %v8454_v7, %v18182_v47 }
 0x7f5   :  { %v8459_v9 = vadd.f32 %v13382_v10, %v18176_v45  ;;  %v8826_v17 = vmax.f32 %v8564_v14, %v8598_v23  ;;  %v8457_v61 = vadd.f32 %v13388_v35, %v18176_v45  ;;  %v8460_v44 = vadd.f32 %v13394_v18, %v18176_v45 }
 0x7f6   :  { %v8458_v38 = vadd.f32 %v13400_v5, %v18176_v45  ;;  %v8827_v49 = vmax.f32 %v18229_v8, %v18221_v3  ;;  %v18253_v40 = vrot.slane %v8566_v22, %v18182_v47  ;;  %v8829_v34 = vmax.f32 %v18244_v13, %v18226_v19 }
 0x7f7   :  { %v8651_v63 = vcombine.high %v8459_v9, %v8459_v9  ;;  %v8658_v24 = vrot.slane %v8459_v9, %v18182_v47  ;;  %v8617_v31 = vcombine.high %v8457_v61, %v8457_v61  ;;  %v8624_v32 = vrot.slane %v8457_v61, %v18182_v47 }
 0x7f8   :  { %v13307_v56 = vpop.f32.mrb[76].mxu1  ;;  %v8668_v41 = vcombine.high %v8460_v44, %v8460_v44  ;;  %v8675_v43 = vrot.slane %v8460_v44, %v18182_v47  ;;  %v8634_v11 = vcombine.high %v8458_v38, %v8458_v38  ;;  %v8641_v39 = vrot.slane %v8458_v38, %v18182_v47 }
 0x7f9   :  { %v8411_v2 = vpop.f32.mrb[77].mxu1  ;;  %v8665_v55 = vrot.slane %v8651_v63, %v18182_v47  ;;  %v8666_v36 = vcombine.high %v8658_v24, %v8658_v24  ;;  %v8631_v48 = vrot.slane %v8617_v31, %v18182_v47  ;;  %v8632_v33 = vcombine.high %v8624_v32, %v8624_v32 }
 0x7fa   :  { %v13308_v46 = vpop.f32.mrb[78].mxu1  ;;  %v8833_v1 = vmax.f32 %v8624_v32, %v8658_v24  ;;  %v8682_v27 = vrot.slane %v8668_v41, %v18182_v47  ;;  %v8683_v0 = vcombine.high %v8675_v43, %v8675_v43  ;;  %v8648_v52 = vrot.slane %v8634_v11, %v18182_v47 }
 0x7fb   :  { %v8414_v60 = vpop.f32.mrb[79].mxu1  ;;  %v8667_v21 = vcombine.high %v8665_v55, %v8665_v55  ;;  %v8633_v53 = vcombine.high %v8631_v48, %v8631_v48  ;;  %v8834_v25 = vmax.f32 %v8632_v33, %v8666_v36  ;;  %v8835_v4 = vmax.f32 %v8631_v48, %v8665_v55 }
 0x7fc   :  { %v8684_v12 = vcombine.high %v8682_v27, %v8682_v27  ;;  %v8649_v6 = vcombine.high %v8641_v39, %v8641_v39  ;;  %v8837_v51 = vmax.f32 %v8641_v39, %v8675_v43  ;;  %v13406_v50 = vadd.f32 %v18171_v16, %v13307_v56 }
 0x7fd   :  { %v8836_v59 = vmax.f32 %v8633_v53, %v8667_v21  ;;  %v18267_v20 = vmax.f32 %v8833_v1, %v8834_v25  ;;  %v8650_v30 = vcombine.high %v8648_v52, %v8648_v52  ;;  %v8839_v23 = vmax.f32 %v8648_v52, %v8682_v27  ;;  %v13966_v52 = vld [vmem:[%s18658_s5 + $0x80] sm:$0xff]  }
 0x7fe   :  { %v8838_v15 = vmax.f32 %v8649_v6, %v8683_v0  ;;  %v8463_v14 = vadd.f32 %v13406_v50, %v18176_v45  ;;  %v13412_v7 = vadd.f32 %v18163_v42, %v8411_v2  ;;  %v13418_v10 = vadd.f32 %v18179_v62, %v13308_v46 }
 0x7ff   :  { %v18272_v35 = vmax.f32 %v8835_v4, %v8836_v59  ;;  %v8840_v18 = vmax.f32 %v8650_v30, %v8684_v12  ;;  %v8853_v5 = vmax.f32 %v8825_v29, %v8826_v17  ;;  %v8881_v44 = vpack.c.bf16 %v8865_v57, %v8865_v57 }
 0x800   :  { %v18274_v22 = vmax.f32 %v8837_v51, %v8838_v15  ;;  %v8719_v9 = vcombine.high %v8463_v14, %v8463_v14  ;;  %v8726_v16 = vrot.slane %v8463_v14, %v18182_v47  ;;  %v8461_v61 = vadd.f32 %v13412_v7, %v18176_v45  ;;  %v13967_v51 = vld [vmem:[%s18658_s5 + $0xc8] sm:$0xff]  }
 0x801   :  { %v18278_v38 = vmax.f32 %v8839_v23, %v8840_v18  ;;  %v8464_v56 = vadd.f32 %v13418_v10, %v18176_v45  ;;  %v8599_v42 = vcombine.high %v18221_v3, %v18221_v3  ;;  %v8565_v62 = vcombine.high %v18229_v8, %v18229_v8  ;;  %v13968_v7 = vld [vmem:[%s18658_s5 + $0x88] sm:$0xff]  }
 0x802   :  { %v8733_v29 = vrot.slane %v8719_v9, %v18182_v47  ;;  %v8685_v17 = vcombine.high %v8461_v61, %v8461_v61  ;;  %v8615_v63 = vcombine.high %v18226_v19, %v18226_v19  ;;  %v8734_v2 = vcombine.high %v8726_v16, %v8726_v16  ;;  %v13969_v19 = vld [vmem:[%s18658_s5 + $0xd0] sm:$0xff]  }
 0x803   :  { %v8692_v24 = vrot.slane %v8461_v61, %v18182_v47  ;;  %v8736_v31 = vcombine.high %v8464_v56, %v8464_v56  ;;  %v8581_v32 = vcombine.high %v18244_v13, %v18244_v13  ;;  %v8743_v57 = vrot.slane %v8464_v56, %v18182_v47  ;;  %v13973_v61 = vld [vmem:[%s18658_s5 + $0xd8] sm:$0xff]  }
 0x804   :  { %v8735_v41 = vcombine.high %v8733_v29, %v8733_v29  ;;  %v8699_v46 = vrot.slane %v8685_v17, %v18182_v47  ;;  %v8616_v55 = vcombine.high %v18236_v28, %v18236_v28  ;;  %v8582_v43 = vcombine.high %v18253_v40, %v18253_v40 }
 0x805   :  { %v8700_v11 = vcombine.high %v8692_v24, %v8692_v24  ;;  %v8841_v36 = vmax.f32 %v8692_v24, %v8726_v16  ;;  %v8750_v33 = vrot.slane %v8736_v31, %v18182_v47  ;;  %v8869_v1 = vmax.f32 %v8853_v5, 0.0  ;;  %v13981_v24 = vld [vmem:[%s18658_s5 + $0x3c8] sm:$0xff]   ;;  %v13976_v31 = vld [vmem:[%s18658_s5 + $0xa0] sm:$0xff]  }
 0x806   :  { %v8701_v48 = vcombine.high %v8699_v46, %v8699_v46  ;;  %v13424_v21 = vadd.f32 %v18166_v26, %v8414_v60  ;;  %v8751_v27 = vcombine.high %v8743_v57, %v8743_v57  ;;  %v8828_v39 = vmax.f32 %v8565_v62, %v8599_v42  ;;  %v13974_v42 = vld [vmem:[%s18658_s5 + $0x98] sm:$0xff]  }
 0x807   :  { %v8842_v0 = vmax.f32 %v8700_v11, %v8734_v2  ;;  %v8843_v53 = vmax.f32 %v8699_v46, %v8733_v29  ;;  %v8882_v25 = vpack.c.bf16 %v8869_v1, %v8869_v1  ;;  %v8830_v6 = vmax.f32 %v8581_v32, %v8615_v63  ;;  %v13978_v29 = vld [vmem:[%s18658_s5 + $0x380] sm:$0xff]   ;;  %v13982_v32 = vld [vmem:[%s18658_s5 + $0x388] sm:$0xff]   ;;  %v13985_v46 = vld [vmem:[%s18658_s5 + $0x3d0] sm:$0xff]  }
 0x808   :  { %v8462_v4 = vadd.f32 %v13424_v21, %v18176_v45  ;;  %v8844_v12 = vmax.f32 %v8701_v48, %v8735_v41  ;;  %v18309_v26 = vmax.f32 %v8827_v49, %v8828_v39  ;;  %v8831_v60 = vmax.f32 %v18253_v40, %v18236_v28  ;;  %v13979_v41 = vld [vmem:[%s18658_s5 + $0xe8] sm:$0xff]   ;;  %v13989_v11 = vld [vmem:[%s18658_s5 + $0x3d8] sm:$0xff]   ;;  %v13993_v1 = vld [vmem:[%s18658_s5 + $0x3e0] sm:$0xff]  }
 0x809   :  { %v8861_v50 = vmax.f32 %v8841_v36, %v8842_v0  ;;  %v8832_v45 = vmax.f32 %v8582_v43, %v8616_v55  ;;  %9960 = vmatprep.mubr.bf16.mxu1 %v8882_v25  ;;  %v18319_v15 = vmax.f32 %v8829_v34, %v8830_v6  ;;  %v8752_v8 = vcombine.high %v8750_v33, %v8750_v33  ;;  %v13986_v55 = vld [vmem:[%s18658_s5 + $0x390] sm:$0xff]   ;;  %v13990_v48 = vld [vmem:[%s18658_s5 + $0x398] sm:$0xff]   ;;  %v13991_v39 = vld [vmem:[%s18658_s5 + $0x140] sm:$0xff]  }
 0x80a   :  { %v8702_v59 = vcombine.high %v8462_v4, %v8462_v4  ;;  %v8709_v30 = vrot.slane %v8462_v4, %v18182_v47  ;;  %v18314_v23 = vmax.f32 %v8843_v53, %v8844_v12  ;;  %9961 = vmatmul.mubr.bf16.vlgmr.msra.gmra.mrb[96].mxu1 %v8881_v44  ;;  %v8875_v16 = vmax.f32 %v18274_v22, 0.0  ;;  %v13975_v22 = vld [vmem:[%s18658_s5 + $0xe0] sm:$0xff]   ;;  %v13983_v43 = vld [vmem:[%s18658_s5 + $0xf0] sm:$0xff]   ;;  %v13988_v21 = vld [vmem:[%s18658_s5 + $0xb8] sm:$0xff]  }
 0x80b   :  { %v8877_v14 = vmax.f32 %v8861_v50, 0.0  ;;  %v18321_v3 = vmax.f32 %v8831_v60, %v8832_v45  ;;  %12503 = vmatpush3.bf16.msra.mxu1 %v13966_v52  ;;  %v13984_v36 = vld [vmem:[%s18658_s5 + $0xb0] sm:$0xff]   ;;  %v8873_v0 = vmax.f32 %v18267_v20, 0.0  ;;  %v13997_v53 = vld [vmem:[%s18658_s5 + $0x3e8] sm:$0xff]   ;;  %v8870_v25 = vmax.f32 %v18309_v26, 0.0  ;;  %v13992_v4 = vld [vmem:[%s18658_s5 + $0x100] sm:$0xff]  }
 0x80c   :  { %v8716_v49 = vrot.slane %v8702_v59, %v18182_v47  ;;  %v8717_v28 = vcombine.high %v8709_v30, %v8709_v30  ;;  %v8845_v40 = vmax.f32 %v8709_v30, %v8743_v57  ;;  %12504 = vmatprep.subr.bf16.mxu1 %v13967_v51  ;;  %v13970_v47 = vld [vmem:[%s18658_s5 + $0x90] sm:$0xff]   ;;  %v8891_v63 = vpack.c.bf16 %v8875_v16, %v8875_v16  ;;  %v13980_v57 = vld [vmem:[%s18658_s5 + $0xa8] sm:$0xff]   ;;  %v14005_v45 = vld [vmem:[%s18658_s5 + $0x3f8] sm:$0xff]  }
 0x80d   :  { %v8884_v13 = vpack.c.bf16 %v8877_v14, %v8877_v14  ;;  %v8883_v52 = vpack.c.bf16 %v8873_v0, %v8873_v0  ;;  %v13995_v20 = vld [vmem:[%s18658_s5 + $0x148] sm:$0xff]   ;;  %v8886_v6 = vpack.c.bf16 %v8870_v25, %v8870_v25  ;;  %v14001_v51 = vld [vmem:[%s18658_s5 + $0x3f0] sm:$0xff]   ;;  %v14003_v30 = vld [vmem:[%s18658_s5 + $0x158] sm:$0xff]  }
 0x80e   :  { %v8718_v34 = vcombine.high %v8716_v49, %v8716_v49  ;;  %v8846_v10 = vmax.f32 %v8717_v28, %v8751_v27  ;;  %v8847_v18 = vmax.f32 %v8716_v49, %v8750_v33  ;;  %v13987_v33 = vld [vmem:[%s18658_s5 + $0xf8] sm:$0xff]   ;;  %v13994_v27 = vld [vmem:[%s18658_s5 + $0x3a0] sm:$0xff]   ;;  %v13998_v12 = vld [vmem:[%s18658_s5 + $0x3a8] sm:$0xff]  }
 0x80f   :  { %10000 = vmatprep.mubr.bf16.mxu1 %v8884_v13  ;;  %12505 = vmatpush3.bf16.msra.mxu1 %v13968_v7  ;;  %v13996_v50 = vld [vmem:[%s18658_s5 + $0x108] sm:$0xff]   ;;  %v13999_v26 = vld [vmem:[%s18658_s5 + $0x150] sm:$0xff]   ;;  %v14006_v14 = vld [vmem:[%s18658_s5 + $0x3b8] sm:$0xff]  }
 0x810   :  { %v8863_v5 = vmax.f32 %v8845_v40, %v8846_v10  ;;  %v8848_v9 = vmax.f32 %v8718_v34, %v8752_v8  ;;  %12506 = vmatprep.subr.bf16.mxu1 %v13969_v19  ;;  %v14002_v60 = vld [vmem:[%s18658_s5 + $0x3b0] sm:$0xff]   ;;  %v8876_v8 = vmax.f32 %v18278_v38, 0.0  ;;  %v14004_v49 = vld [vmem:[%s18658_s5 + $0x118] sm:$0xff]   ;;  %v14007_v28 = vld [vmem:[%s18658_s5 + $0x160] sm:$0xff]  }
 0x811   :  { %v14000_v59 = vld [vmem:[%s18658_s5 + $0x110] sm:$0xff]   ;;  %v14008_v7 = vld [vmem:[%s18658_s5 + $0x120] sm:$0xff]   ;;  %v14009_v38 = vld [vmem:[%s18658_s5 + $0x168] sm:$0xff]  }
 0x812   :  { %v8879_v44 = vmax.f32 %v8863_v5, 0.0  ;;  %v8864_v56 = vmax.f32 %v8847_v18, %v8848_v9  ;;  %v8895_v40 = vpack.c.bf16 %v8876_v8, %v8876_v8  ;;  %v14010_v19 = vld [vmem:[%s18658_s5 + $0x128] sm:$0xff]   ;;  %v14011_v13 = vld [vmem:[%s18658_s5 + $0x170] sm:$0xff]   ;;  %v14013_v10 = vld [vmem:[%s18658_s5 + $0x178] sm:$0xff]   ;;  %v8878_v9 = vmax.f32 %v18314_v23, 0.0 }
 0x813   :  { %12507 = vmatpush3.bf16.msra.mxu1 %v13970_v47  ;;  %v14012_v34 = vld [vmem:[%s18658_s5 + $0x130] sm:$0xff]   ;;  %v14014_v18 = vld [vmem:[%s18658_s5 + $0x138] sm:$0xff]   ;;  %v8866_v47 = vmax.f32 %v18205_v58, 0.0  ;;  %v14015_v5 = vld [vmem:[%s18658_s5 + $0x1c0] sm:$0xff]  }
 0x814   :  { %v8892_v62 = vpack.c.bf16 %v8879_v44, %v8879_v44  ;;  %v8880_v17 = vmax.f32 %v8864_v56, 0.0  ;;  %12508 = vmatprep.subr.bf16.mxu1 %v13973_v61  ;;  %v14016_v16 = vld [vmem:[%s18658_s5 + $0x180] sm:$0xff]   ;;  %v14017_v44 = vld [vmem:[%s18658_s5 + $0x1c8] sm:$0xff]   ;;  %v8888_v56 = vpack.c.bf16 %v8878_v9, %v8878_v9  ;;  %v14019_v23 = vld [vmem:[%s18658_s5 + $0x1d0] sm:$0xff]  }
 0x815   :  { %v8885_v61 = vpack.c.bf16 %v8866_v47, %v8866_v47  ;;  %v14018_v58 = vld [vmem:[%s18658_s5 + $0x188] sm:$0xff]   ;;  %v14040_v0 = vld [vmem:[%s18658_s5 + $0x220] sm:$0xff]   ;;  %v14043_v25 = vld [vmem:[%s18658_s5 + $0x270] sm:$0xff]  }
 0x816   :  { %10160 = vmatprep.mubr.bf16.mxu0 %v8892_v62  ;;  %v8896_v2 = vpack.c.bf16 %v8880_v17, %v8880_v17  ;;  %v14021_v62 = vld [vmem:[%s18658_s5 + $0x1d8] sm:$0xff]   ;;  %v14023_v17 = vld [vmem:[%s18658_s5 + $0x1e0] sm:$0xff]  }
 0x817   :  { %10161 = vmatmul.mubr.bf16.vlgmr.msra.gmra.mrb[224].mxu0 %v8891_v63  ;;  %12509 = vmatpush3.bf16.msra.mxu1 %v13974_v42  ;;  %v14020_v42 = vld [vmem:[%s18658_s5 + $0x190] sm:$0xff]   ;;  %v14024_v63 = vld [vmem:[%s18658_s5 + $0x1a0] sm:$0xff]  }
 0x818   :  { %12635 = vmatpush3.bf16.msra.mxu0 %v13978_v29  ;;  %12510 = vmatprep.subr.bf16.mxu1 %v13975_v22  ;;  %v14022_v29 = vld [vmem:[%s18658_s5 + $0x198] sm:$0xff]   ;;  %v14025_v22 = vld [vmem:[%s18658_s5 + $0x1e8] sm:$0xff]   ;;  %v14055_v8 = vld [vmem:[%s18658_s5 + $0x360] sm:$0xff]  }
 0x819   :  { %10240 = vmatprep.mubr.bf16.mxu0 %v8896_v2  ;;  %12636 = vmatprep.subr.bf16.mxu0 %v13981_v24  ;;  %v14026_v2 = vld [vmem:[%s18658_s5 + $0x1a8] sm:$0xff]   ;;  %v14027_v24 = vld [vmem:[%s18658_s5 + $0x1f0] sm:$0xff]  }
 0x81b   :  { %12511 = vmatpush3.bf16.msra.mxu1 %v13976_v31  ;;  %v14028_v31 = vld [vmem:[%s18658_s5 + $0x1b0] sm:$0xff]  }
 0x81c   :  { %12637 = vmatpush3.bf16.msra.mxu0 %v13982_v32  ;;  %12512 = vmatprep.subr.bf16.mxu1 %v13979_v41  ;;  %v14029_v32 = vld [vmem:[%s18658_s5 + $0x1f8] sm:$0xff]  }
 0x81d   :  { %12638 = vmatprep.subr.bf16.mxu0 %v13985_v46  ;;  %v14030_v41 = vld [vmem:[%s18658_s5 + $0x1b8] sm:$0xff]   ;;  %v8874_v46 = vmax.f32 %v18272_v35, 0.0  ;;  %v14034_v35 = vld [vmem:[%s18658_s5 + $0x208] sm:$0xff]  }
 0x81f   :  { %12513 = vmatpush3.bf16.msra.mxu1 %v13980_v57  ;;  %v14031_v57 = vld [vmem:[%s18658_s5 + $0x240] sm:$0xff]  }
 0x820   :  { %12639 = vmatpush3.bf16.msra.mxu0 %v13986_v55  ;;  %12514 = vmatprep.subr.bf16.mxu1 %v13983_v43  ;;  %v8871_v55 = vmax.f32 %v18319_v15, 0.0  ;;  %v14032_v43 = vld [vmem:[%s18658_s5 + $0x200] sm:$0xff]   ;;  %v14035_v15 = vld [vmem:[%s18658_s5 + $0x250] sm:$0xff]  }
 0x821   :  { %12640 = vmatprep.subr.bf16.mxu0 %v13989_v11  ;;  %v8887_v11 = vpack.c.bf16 %v8874_v46, %v8874_v46 }
 0x823   :  { %12515 = vmatpush3.bf16.msra.mxu1 %v13984_v36  ;;  %v14033_v36 = vld [vmem:[%s18658_s5 + $0x248] sm:$0xff]  }
 0x824   :  { %12641 = vmatpush3.bf16.msra.mxu0 %v13990_v48  ;;  %12516 = vmatprep.subr.bf16.mxu1 %v13987_v33  ;;  %v8890_v48 = vpack.c.bf16 %v8871_v55, %v8871_v55  ;;  %v14036_v33 = vld [vmem:[%s18658_s5 + $0x210] sm:$0xff]  }
 0x825   :  { %12642 = vmatprep.subr.bf16.mxu0 %v13993_v1  ;;  %v14037_v1 = vld [vmem:[%s18658_s5 + $0x258] sm:$0xff]  }
 0x827   :  { %12517 = vmatpush3.bf16.msra.mxu1 %v13988_v21  ;;  %v14038_v21 = vld [vmem:[%s18658_s5 + $0x218] sm:$0xff]  }
 0x828   :  { %12643 = vmatpush3.bf16.msra.mxu0 %v13994_v27  ;;  %12524 = vmatprep.subr.bf16.mxu1 %v13991_v39  ;;  %v14039_v27 = vld [vmem:[%s18658_s5 + $0x260] sm:$0xff]   ;;  %v14041_v39 = vld [vmem:[%s18658_s5 + $0x268] sm:$0xff]  }
 0x829   :  { %12644 = vmatprep.subr.bf16.mxu0 %v13997_v53  ;;  %v14042_v53 = vld [vmem:[%s18658_s5 + $0x228] sm:$0xff]  }
 0x82a   :  { %10001 = vmatmul.mubr.bf16.vlgmr.msra.gmra.mrb[100].mxu1 %v8883_v52  ;;  %v14045_v52 = vld [vmem:[%s18658_s5 + $0x278] sm:$0xff]  }
 0x82b   :  { %12525 = vmatpush3.bf16.msra.mxu1 %v13992_v4  ;;  %10040 = vmatprep.mubr.bf16.mxu1 %v8886_v6  ;;  %v14044_v4 = vld [vmem:[%s18658_s5 + $0x230] sm:$0xff]   ;;  %v14047_v6 = vld [vmem:[%s18658_s5 + $0x340] sm:$0xff]  }
 0x82c   :  { %12526 = vmatprep.subr.bf16.mxu1 %v13995_v20  ;;  %12645 = vmatpush3.bf16.msra.mxu0 %v13998_v12  ;;  %v14046_v20 = vld [vmem:[%s18658_s5 + $0x238] sm:$0xff]   ;;  %v8867_v12 = vmax.f32 %v18208_v37, 0.0  ;;  %v14050_v37 = vld [vmem:[%s18658_s5 + $0x308] sm:$0xff]  }
 0x82d   :  { %12646 = vmatprep.subr.bf16.mxu0 %v14001_v51  ;;  %v8872_v51 = vmax.f32 %v18321_v3, 0.0  ;;  %v14051_v3 = vld [vmem:[%s18658_s5 + $0x350] sm:$0xff]  }
 0x82f   :  { %12527 = vmatpush3.bf16.msra.mxu1 %v13996_v50  ;;  %v14048_v50 = vld [vmem:[%s18658_s5 + $0x300] sm:$0xff]  }
 0x830   :  { %12528 = vmatprep.subr.bf16.mxu1 %v13999_v26  ;;  %12647 = vmatpush3.bf16.msra.mxu0 %v14002_v60  ;;  %v8889_v26 = vpack.c.bf16 %v8867_v12, %v8867_v12  ;;  %v14049_v60 = vld [vmem:[%s18658_s5 + $0x348] sm:$0xff]  }
 0x831   :  { %12648 = vmatprep.subr.bf16.mxu0 %v14005_v45  ;;  %v8894_v45 = vpack.c.bf16 %v8872_v51, %v8872_v51 }
 0x833   :  { %12529 = vmatpush3.bf16.msra.mxu1 %v14000_v59  ;;  %v14052_v59 = vld [vmem:[%s18658_s5 + $0x310] sm:$0xff]  }
 0x834   :  { %12530 = vmatprep.subr.bf16.mxu1 %v14003_v30  ;;  %12649 = vmatpush3.bf16.msra.mxu0 %v14006_v14  ;;  %v14053_v30 = vld [vmem:[%s18658_s5 + $0x358] sm:$0xff]  }
 0x835   :  { %v14054_v14 = vld [vmem:[%s18658_s5 + $0x318] sm:$0xff]  }
 0x837   :  { %12531 = vmatpush3.bf16.msra.mxu1 %v14004_v49  ;;  %10241 = vmatmul.mubr.bf16.vlgmr.msra.gmra.mrb[228].mxu0 %v8895_v40  ;;  %v14056_v49 = vld [vmem:[%s18658_s5 + $0x320] sm:$0xff]   ;;  %v14058_v40 = vld [vmem:[%s18658_s5 + $0x328] sm:$0xff]  }
 0x838   :  { %12532 = vmatprep.subr.bf16.mxu1 %v14007_v28  ;;  %v14057_v28 = vld [vmem:[%s18658_s5 + $0x368] sm:$0xff]  }
 0x83b   :  { %12533 = vmatpush3.bf16.msra.mxu1 %v14008_v7  ;;  %v14059_v7 = vld [vmem:[%s18658_s5 + $0x370] sm:$0xff]  }
 0x83c   :  { %12534 = vmatprep.subr.bf16.mxu1 %v14009_v38  ;;  %v14060_v38 = vld [vmem:[%s18658_s5 + $0x330] sm:$0xff]  }
 0x83f   :  { %12535 = vmatpush3.bf16.msra.mxu1 %v14010_v19  ;;  %v14061_v19 = vld [vmem:[%s18658_s5 + $0x378] sm:$0xff]  }
 0x840   :  { %12536 = vmatprep.subr.bf16.mxu1 %v14011_v13  ;;  %v14062_v13 = vld [vmem:[%s18658_s5 + $0x338] sm:$0xff]  }
 0x843   :  { %12537 = vmatpush3.bf16.msra.mxu1 %v14012_v34  ;;  %v8868_v34 = vmax.f32 %v18214_v54, 0.0  ;;  %v14064_v54 = vld [vmem:[%s18660_s7 + $0x8] sm:$0xff]  }
 0x844   :  { %12538 = vmatprep.subr.bf16.mxu1 %v14013_v10 }
 0x845   :  { %v8893_v10 = vpack.c.bf16 %v8868_v34, %v8868_v34 }
 0x847   :  { %12539 = vmatpush3.bf16.msra.mxu1 %v14014_v18 }
 0x848   :  { %12546 = vmatprep.subr.bf16.mxu1 %v14015_v5 }
 0x84a   :  { %10041 = vmatmul.mubr.bf16.vlgmr.msra.gmra.mrb[104].mxu1 %v8885_v61  ;;  %v14063_v61 = vld [vmem:[%s18660_s7] sm:$0xff]  }
 0x84b   :  { %12547 = vmatpush3.bf16.msra.mxu1 %v14016_v16  ;;  %10080 = vmatprep.mubr.bf16.mxu1 %v8888_v56  ;;  %v14065_v56 = vld [vmem:[%s18660_s7 + $0x10] sm:$0xff]  }
 0x84c   :  { %12548 = vmatprep.subr.bf16.mxu1 %v14017_v44  ;;  %v14097_v44 = vmov 0.0  }
 0x84f   :  { %12549 = vmatpush3.bf16.msra.mxu1 %v14018_v58 }
 0x850   :  { %12550 = vmatprep.subr.bf16.mxu1 %v14019_v23 }
 0x853   :  { %12551 = vmatpush3.bf16.msra.mxu1 %v14020_v42 }
 0x854   :  { %12552 = vmatprep.subr.bf16.mxu1 %v14021_v62 }
 0x857   :  { %12553 = vmatpush3.bf16.msra.mxu1 %v14022_v29  ;;  %v14066_v29 = vld [vmem:[%s18660_s7 + $0x18] sm:$0xff]  }
 0x858   :  { %12554 = vmatprep.subr.bf16.mxu1 %v14023_v17 }
 0x85b   :  { %12555 = vmatpush3.bf16.msra.mxu1 %v14024_v63  ;;  %v14067_v63 = vld [vmem:[%s18660_s7 + $0x20] sm:$0xff]  }
 0x85c   :  { %12556 = vmatprep.subr.bf16.mxu1 %v14025_v22  ;;  %v11380_v22 = vld [vmem:[%s18659_s6] ss:$0 sm:$0xff] }
 0x85f   :  { %12557 = vmatpush3.bf16.msra.mxu1 %v14026_v2 }
 0x860   :  { %12558 = vmatprep.subr.bf16.mxu1 %v14027_v24 }
 0x863   :  { %12559 = vmatpush3.bf16.msra.mxu1 %v14028_v31 }
 0x864   :  { %12560 = vmatprep.subr.bf16.mxu1 %v14029_v32 }
 0x867   :  { %12561 = vmatpush3.bf16.msra.mxu1 %v14030_v41 }
 0x868   :  { %12568 = vmatprep.subr.bf16.mxu1 %v14031_v57  ;;  %v14068_v57 = vld [vmem:[%s18660_s7 + $0x28] sm:$0xff]  }
 0x86a   :  { %10081 = vmatmul.mubr.bf16.vlgmr.msra.gmra.mrb[108].mxu1 %v8887_v11  ;;  %v14070_v11 = vld [vmem:[%s18660_s7 + $0x38] sm:$0xff]  }
 0x86b   :  { %12569 = vmatpush3.bf16.msra.mxu1 %v14032_v43  ;;  %10120 = vmatprep.mubr.bf16.mxu1 %v8890_v48  ;;  %v14069_v43 = vld [vmem:[%s18660_s7 + $0x30] sm:$0xff]  }
 0x86c   :  { %12570 = vmatprep.subr.bf16.mxu1 %v14033_v36 }
 0x86f   :  { %12571 = vmatpush3.bf16.msra.mxu1 %v14034_v35 }
 0x870   :  { %12572 = vmatprep.subr.bf16.mxu1 %v14035_v15 }
 0x873   :  { %12573 = vmatpush3.bf16.msra.mxu1 %v14036_v33 }
 0x874   :  { %12574 = vmatprep.subr.bf16.mxu1 %v14037_v1 }
 0x877   :  { %12575 = vmatpush3.bf16.msra.mxu1 %v14038_v21 }
 0x878   :  { %12576 = vmatprep.subr.bf16.mxu1 %v14039_v27 }
 0x87b   :  { %12577 = vmatpush3.bf16.msra.mxu1 %v14040_v0 }
 0x87c   :  { %12578 = vmatprep.subr.bf16.mxu1 %v14041_v39 }
 0x87f   :  { %12579 = vmatpush3.bf16.msra.mxu1 %v14042_v53 }
 0x880   :  { %12580 = vmatprep.subr.bf16.mxu1 %v14043_v25 }
 0x883   :  { %12581 = vmatpush3.bf16.msra.mxu1 %v14044_v4 }
 0x884   :  { %12582 = vmatprep.subr.bf16.mxu1 %v14045_v52 }
 0x887   :  { %12583 = vmatpush3.bf16.msra.mxu1 %v14046_v20 }
 0x888   :  { %12612 = vmatprep.subr.bf16.mxu1 %v14047_v6 }
 0x88a   :  { %10121 = vmatmul.mubr.bf16.vlgmr.msra.gmra.mrb[112].mxu1 %v8889_v26 }
 0x88b   :  { %12613 = vmatpush3.bf16.msra.mxu1 %v14048_v50  ;;  %10200 = vmatprep.mubr.bf16.mxu1 %v8894_v45 }
 0x88c   :  { %12614 = vmatprep.subr.bf16.mxu1 %v14049_v60 }
 0x88f   :  { %12615 = vmatpush3.bf16.msra.mxu1 %v14050_v37 }
 0x890   :  { %12616 = vmatprep.subr.bf16.mxu1 %v14051_v3 }
 0x893   :  { %12617 = vmatpush3.bf16.msra.mxu1 %v14052_v59 }
 0x894   :  { %12618 = vmatprep.subr.bf16.mxu1 %v14053_v30 }
 0x897   :  { %12619 = vmatpush3.bf16.msra.mxu1 %v14054_v14 }
 0x898   :  { %12620 = vmatprep.subr.bf16.mxu1 %v14055_v8 }
 0x89b   :  { %12621 = vmatpush3.bf16.msra.mxu1 %v14056_v49 }
 0x89c   :  { %12622 = vmatprep.subr.bf16.mxu1 %v14057_v28 }
 0x89f   :  { %12623 = vmatpush3.bf16.msra.mxu1 %v14058_v40 }
 0x8a0   :  { %12624 = vmatprep.subr.bf16.mxu1 %v14059_v7 }
 0x8a3   :  { %12625 = vmatpush3.bf16.msra.mxu1 %v14060_v38 }
 0x8a4   :  { %12626 = vmatprep.subr.bf16.mxu1 %v14061_v19  ;;  %v11509_v19 = vld [vmem:[%s18661_s8] ss:$0 sm:$0xff] }
 0x8a7   :  { %12627 = vmatpush3.bf16.msra.mxu1 %v14062_v13 }
 0x8a8   :  { %13309 = vmatprep.subr.bf16.mxu1 %v14097_v44 }
 0x8aa   :  { %10201 = vmatmul.mubr.bf16.vlgmr.msra.gmra.mrb[116].mxu1 %v8893_v10 }
 0x8ab   :  { %13310 = vmatpush3.bf16.msra.mxu1 %v14063_v61  ;;  %13325 = vmatprep.mubr.msk.bf16.mxu1 %vm14098_vm1, %v14097_v44 }
 0x8ac   :  { %13311 = vmatprep.subr.bf16.mxu1 %v14097_v44 }
 0x8af   :  { %13312 = vmatpush3.bf16.msra.mxu1 %v14064_v54 }
 0x8b0   :  { %13313 = vmatprep.subr.bf16.mxu1 %v14097_v44 }
 0x8b3   :  { %13314 = vmatpush3.bf16.msra.mxu1 %v14065_v56 }
 0x8b4   :  { %13315 = vmatprep.subr.bf16.mxu1 %v14097_v44 }
 0x8b7   :  { %13316 = vmatpush3.bf16.msra.mxu1 %v14066_v29 }
 0x8b8   :  { %13317 = vmatprep.subr.bf16.mxu1 %v14097_v44 }
 0x8bb   :  { %13318 = vmatpush3.bf16.msra.mxu1 %v14067_v63 }
 0x8bc   :  { %13319 = vmatprep.subr.bf16.mxu1 %v14097_v44 }
 0x8bf   :  { %13320 = vmatpush3.bf16.msra.mxu1 %v14068_v57 }
 0x8c0   :  { %13321 = vmatprep.subr.bf16.mxu1 %v14097_v44 }
 0x8c3   :  { %13322 = vmatpush3.bf16.msra.mxu1 %v14069_v43 }
 0x8c4   :  { %13323 = vmatprep.subr.bf16.mxu1 %v14097_v44 }
 0x8c7   :  { %13324 = vmatpush3.bf16.msra.mxu1 %v14070_v11 }
 0x8dd   :  { %v12496_v18 = vpop.f32.mrb[96].mxu1 }
 0x8de   :  { %v12497_v47 = vpop.f32.mrb[97].mxu1 }
 0x8df   :  { %v12498_v5 = vadd.f32 %v12497_v47, %v12496_v18  ;;  %v12499_v9 = vpop.f32.mrb[98].mxu1 }
 0x8e0   :  { %v12500_v16 = vpop.f32.mrb[99].mxu1 }
 0x8e1   :  { %v9963_v31 = vadd.f32 %v12498_v5, %v11380_v22 }
 0x8ea   :  { %v12606_v58 = vpop.f32.mrb[224].mxu0 }
 0x8eb   :  { %v12607_v23 = vpop.f32.mrb[225].mxu0 }
 0x8ec   :  { %v12608_v42 = vadd.f32 %v12607_v23, %v12606_v58  ;;  %v12609_v62 = vpop.f32.mrb[226].mxu0 }
 0x8ed   :  { %v12610_v17 = vpop.f32.mrb[227].mxu0 }
 0x8fd   :  { %v12518_v2 = vpop.f32.mrb[100].mxu1 }
 0x8fe   :  { %v12519_v24 = vpop.f32.mrb[101].mxu1 }
 0x8ff   :  { %v12520_v32 = vadd.f32 %v12519_v24, %v12518_v2  ;;  %v12521_v41 = vpop.f32.mrb[102].mxu1 }
 0x900   :  { %v12522_v46 = vpop.f32.mrb[103].mxu1 }
 0x901   :  { %v10003_v55 = vadd.f32 %v12520_v32, %v9963_v31 }
 0x90a   :  { %v12650_v36 = vpop.f32.mrb[228].mxu0 }
 0x90b   :  { %v12651_v48 = vpop.f32.mrb[229].mxu0 }
 0x90c   :  { %v12652_v35 = vadd.f32 %v12651_v48, %v12650_v36  ;;  %v12653_v15 = vpop.f32.mrb[230].mxu0 }
 0x90d   :  { %v12654_v33 = vpop.f32.mrb[231].mxu0 }
 0x91d   :  { %v12540_v1 = vpop.f32.mrb[104].mxu1 }
 0x91e   :  { %v12541_v21 = vpop.f32.mrb[105].mxu1 }
 0x91f   :  { %v12542_v27 = vadd.f32 %v12541_v21, %v12540_v1  ;;  %v12543_v0 = vpop.f32.mrb[106].mxu1 }
 0x920   :  { %v12544_v39 = vpop.f32.mrb[107].mxu1 }
 0x921   :  { %v10043_v53 = vadd.f32 %v12542_v27, %v10003_v55 }
 0x93d   :  { %v12562_v25 = vpop.f32.mrb[108].mxu1 }
 0x93e   :  { %v12563_v4 = vpop.f32.mrb[109].mxu1 }
 0x93f   :  { %v12564_v52 = vadd.f32 %v12563_v4, %v12562_v25  ;;  %v12565_v20 = vpop.f32.mrb[110].mxu1 }
 0x940   :  { %v12566_v12 = vpop.f32.mrb[111].mxu1 }
 0x941   :  { %v10083_v6 = vadd.f32 %v12564_v52, %v10043_v53 }
 0x95d   :  { %v12584_v51 = vpop.f32.mrb[112].mxu1 }
 0x95e   :  { %v12585_v50 = vpop.f32.mrb[113].mxu1 }
 0x95f   :  { %v12586_v26 = vadd.f32 %v12585_v50, %v12584_v51  ;;  %v12587_v60 = vpop.f32.mrb[114].mxu1 }
 0x960   :  { %v12588_v45 = vpop.f32.mrb[115].mxu1 }
 0x961   :  { %v10123_v37 = vadd.f32 %v12586_v26, %v10083_v6 }
 0x963   :  { %v10163_v3 = vadd.f32 %v12608_v42, %v10123_v37 }
 0x97d   :  { %v12628_v59 = vpop.f32.mrb[116].mxu1 }
 0x97e   :  { %v12629_v30 = vpop.f32.mrb[117].mxu1 }
 0x97f   :  { %v12630_v14 = vadd.f32 %v12629_v30, %v12628_v59  ;;  %v12631_v8 = vpop.f32.mrb[118].mxu1 }
 0x980   :  { %v12632_v49 = vpop.f32.mrb[119].mxu1 }
 0x981   :  { %v10203_v28 = vadd.f32 %v12630_v14, %v10163_v3 }
 0x983   :  { %v10243_v40 = vadd.f32 %v12652_v35, %v10203_v28 }
 0x985   :  { %v10248_v7 = vmax.f32 %v10243_v40, 0.0 }
 0x987   :  { %v10249_v38 = vpack.c.bf16 %v10248_v7, %v10248_v7 }
 0x989   :  { %13326 = vmatmul.mubr.bf16.vlgmr.msra.gmra.mrb[120].mxu1 %v10249_v38 }
 0xa5c   :  { %v10355_v13 = vpop.f32.mrb[120].mxu1 }
 0xa5d   :  { %v10356_v34 = vadd.f32 %v11509_v19, %v10355_v13  ;;  %v13327_v10 = vpop.f32.mrb[121].mxu1 }
 0xa5e   :  { %v10358_v18 = vpop.f32.mrb[122].mxu1 }
 0xa5f   :  { %10361 = vst [vmem:[#allocation3] sm:$0x3] %v10356_v34  ;;  %v13328_v47 = vpop.f32.mrb[123].mxu1 }
 0xa60   :  { %14083 = shalt.err (!%p14080_p4)
}
 0xa61   :  { %s14084_s8 = scalar_lea.hbm %s18662_s9, 32 }
 0xa62   :  { %p14085_p5 = scmp.ne.s32.totalorder %s18662_s9, %s14084_s8  ;;  %p14088_p6 = scmp.lt.u32.totalorder %s14084_s8, %s18662_s9 }
 0xa64   :  { %p14090_p7 = pnand %p14088_p6, %p14085_p5 }
 0xa66   :  { %14093 = shalt.err (!%p14090_p7)
}
 0xa67   :  { %10371 = dma.vmem_to_hbm [thread:$0]  %s10369_s24, 32, %s18662_s9, [#allocation4]  }
 0xa68   :  { %14094 = dma.done.wait [#allocation4], 32  }
 0xa69   :  { %14095 = vsyncadd [#allocation4], 4294967264 }
 0xa6a   :  { %10375 = vsyncpa [#allocation4], 1 }

</bundles_post_ra>
